<compile_context>
chip_gen: v6e
topology: v6e:2x2x1
jax: 0.10.0
libtpu: 0.0.40
codegen_flags: <defaults>
</compile_context>

<pallas_src>
import functools
import math

import jax
import jax.numpy as jnp
from jax import lax
from jax.experimental import pallas as pl
from jax.experimental.pallas import tpu as pltpu
import numpy as np


# ----------------------------- Pallas kernels ------------------------------

def _bn_mm_bn_kernel(x_ref, s_in_ref, b_in_ref, w_ref, s_out_ref, b_out_ref,
                     o_ref):
    """o = relu(bn_out(relu(bn_in(x)) @ w));  conv1 with bn1/bn2 fused."""
    a = jnp.maximum(x_ref[...] * s_in_ref[...] + b_in_ref[...], 0.0)
    h = jnp.dot(a.astype(w_ref.dtype), w_ref[...],
                preferred_element_type=jnp.float32)
    o_ref[...] = jnp.maximum(h * s_out_ref[...] + b_out_ref[...],
                             0.0).astype(o_ref.dtype)


def _bn_mm_kernel(x_ref, s_in_ref, b_in_ref, w_ref, o_ref):
    """o = relu(bn_in(x)) @ w   (used for the strided 1x1 shortcut conv)."""
    a = jnp.maximum(x_ref[...] * s_in_ref[...] + b_in_ref[...], 0.0)
    o_ref[...] = jnp.dot(a.astype(w_ref.dtype), w_ref[...],
                         preferred_element_type=jnp.float32).astype(o_ref.dtype)


def _conv2_bn_conv3_add_kernel(x_ref, w2_ref, s3_ref, b3_ref, w3_ref, r_ref,
                               o_ref, pad_ref, *, Ho, Wo, stride):
    """Per batch item:
         3x3 / pad=1 / stride conv (9 accumulated whole-image MXU matmuls)
         -> fused bn3 + relu -> 1x1 conv3 matmul -> residual add.
    x_ref: (1, H, W, C) bf16 pre2; pad_ref: (H+2, W+2, C) VMEM scratch;
    r_ref/o_ref: (1, Ho*Wo, P)."""
    _, H, W, C = x_ref.shape
    F = w2_ref.shape[-1]

    # Zero-pad pre2 into VMEM scratch.  Re-zeroed every step: the grid axis is
    # "parallel" and scratch is per-core, so a core may never run step 0.
    pad_ref[...] = jnp.zeros_like(pad_ref)
    pad_ref[1:H + 1, 1:W + 1, :] = x_ref[0]

    acc = jnp.zeros((Ho * Wo, F), jnp.float32)
    for kh in range(3):
        for kw in range(3):
            if stride == 1:
                tap = pad_ref[kh:kh + Ho, kw:kw + Wo, :]
            else:
                tap = pad_ref[pl.ds(kh, Ho, stride), pl.ds(kw, Wo, stride), :]
            acc = acc + jnp.dot(tap.reshape(Ho * Wo, C), w2_ref[kh, kw, :, :],
                                preferred_element_type=jnp.float32)

    pre3 = jnp.maximum(acc * s3_ref[...] + b3_ref[...], 0.0)      # bn3 + relu
    h3 = jnp.dot(pre3.astype(w3_ref.dtype), w3_ref[...],          # conv3 (1x1)
                 preferred_element_type=jnp.float32)
    o_ref[0] = (h3 + r_ref[0]).astype(o_ref.dtype)                # + shortcut


# ------------------------------ wrappers ------------------------------------

def _choose_tm(M, row_bytes, resident_bytes, budget=24 << 20):
    """Largest divisor-of-M tile whose double-buffered rows plus resident
    weights fit a conservative VMEM budget (stays under the default scoped
    limit on v5e/v6e and well under v7x's 64 MiB physical VMEM)."""
    for t in (2048, 1024, 512, 256, 128, 64, 32, 16, 8):
        if M % t == 0 and 2 * t * row_bytes + resident_bytes <= budget:
            return t
    return M


_PARALLEL1 = pltpu.CompilerParams(dimension_semantics=("parallel",))


def bn_mm_bn(x2d, s_in, b_in, w_bf, s_out, b_out):
    M, K = x2d.shape
    Nf = w_bf.shape[1]
    tm = _choose_tm(M, 4 * K + 2 * Nf, 2 * K * Nf + 8 * (K + Nf))
    return pl.pallas_call(
        _bn_mm_bn_kernel,
        out_shape=jax.ShapeDtypeStruct((M, Nf), jnp.bfloat16),
        grid=(M // tm,),
        in_specs=[
            pl.BlockSpec((tm, K), lambda i: (i, 0)),
            pl.BlockSpec((1, K), lambda i: (0, 0)),
            pl.BlockSpec((1, K), lambda i: (0, 0)),
            pl.BlockSpec((K, Nf), lambda i: (0, 0)),
            pl.BlockSpec((1, Nf), lambda i: (0, 0)),
            pl.BlockSpec((1, Nf), lambda i: (0, 0)),
        ],
        out_specs=pl.BlockSpec((tm, Nf), lambda i: (i, 0)),
        compiler_params=_PARALLEL1,
    )(x2d, s_in.reshape(1, K), b_in.reshape(1, K), w_bf,
      s_out.reshape(1, Nf), b_out.reshape(1, Nf))


def bn_mm(x2d, s_in, b_in, w_bf):
    M, K = x2d.shape
    Nf = w_bf.shape[1]
    tm = _choose_tm(M, 4 * K + 4 * Nf, 2 * K * Nf + 8 * K)
    return pl.pallas_call(
        _bn_mm_kernel,
        out_shape=jax.ShapeDtypeStruct((M, Nf), jnp.float32),
        grid=(M // tm,),
        in_specs=[
            pl.BlockSpec((tm, K), lambda i: (i, 0)),
            pl.BlockSpec((1, K), lambda i: (0, 0)),
            pl.BlockSpec((1, K), lambda i: (0, 0)),
            pl.BlockSpec((K, Nf), lambda i: (0, 0)),
        ],
        out_specs=pl.BlockSpec((tm, Nf), lambda i: (i, 0)),
        compiler_params=_PARALLEL1,
    )(x2d, s_in.reshape(1, K), b_in.reshape(1, K), w_bf)


def conv2_bn_conv3_add(pre2_nhwc, w2_bf, s3, b3, w3_bf, residual, stride,
                       Ho, Wo):
    """Fused conv2(3x3) + bn3 + relu + conv3(1x1) + residual-add.
    pre2_nhwc: (N, H, W, planes) bf16; residual: (N, Ho*Wo, P) f32."""
    N, H, W, C = pre2_nhwc.shape
    F = w2_bf.shape[-1]
    P = w3_bf.shape[-1]
    kernel = functools.partial(_conv2_bn_conv3_add_kernel, Ho=Ho, Wo=Wo,
                               stride=stride)
    return pl.pallas_call(
        kernel,
        out_shape=jax.ShapeDtypeStruct((N, Ho * Wo, P), jnp.float32),
        grid=(N,),
        in_specs=[
            pl.BlockSpec((1, H, W, C), lambda n: (n, 0, 0, 0)),
            pl.BlockSpec((3, 3, C, F), lambda n: (0, 0, 0, 0)),
            pl.BlockSpec((1, F), lambda n: (0, 0)),
            pl.BlockSpec((1, F), lambda n: (0, 0)),
            pl.BlockSpec((F, P), lambda n: (0, 0)),
            pl.BlockSpec((1, Ho * Wo, P), lambda n: (n, 0, 0)),
        ],
        out_specs=pl.BlockSpec((1, Ho * Wo, P), lambda n: (n, 0, 0)),
        scratch_shapes=[pltpu.VMEM((H + 2, W + 2, C), pre2_nhwc.dtype)],
        compiler_params=_PARALLEL1,
    )(pre2_nhwc, w2_bf, s3.reshape(1, F), b3.reshape(1, F), w3_bf, residual)


# ------------------------------ forward --------------------------------------

@functools.partial(jax.jit, static_argnums=(2,))
def preact_bottleneck_forward(x_nchw, params, stride):
    """Pallas implementation of PreActBottleneck.forward (inference-mode BN)."""
    N, Cin, H, W = x_nchw.shape
    planes = params["w1"].shape[1]
    out_planes = params["w3"].shape[1]
    has_shortcut_conv = (stride != 1) or (Cin != out_planes)

    x = jnp.transpose(x_nchw, (0, 2, 3, 1)).astype(jnp.float32)   # NHWC
    M = N * H * W
    Ho = (H + 2 - 3) // stride + 1
    Wo = (W + 2 - 3) // stride + 1
    Mo = N * Ho * Wo

    bf16 = jnp.bfloat16

    # conv1: fused [bn1+relu prologue] -> 1x1 matmul -> [bn2+relu epilogue]
    pre2 = bn_mm_bn(x.reshape(M, Cin), params["s1"], params["b1"],
                    params["w1"].astype(bf16), params["s2"], params["b2"])

    # shortcut: identity, or fused [bn1+relu] -> strided 1x1 matmul
    if has_shortcut_conv:
        if stride == 1:
            xs2d = x.reshape(M, Cin)
        else:
            # TODO(synk): fold the stride-2 spatial subsample into the shortcut
            # kernel's BlockSpec index_map; here it is a small XLA slice of the
            # raw input (pre1 is never materialized either way).
            xs2d = x[:, ::stride, ::stride, :].reshape(Mo, Cin)
        shortcut = bn_mm(xs2d, params["s1"], params["b1"],
                         params["w_sc"].astype(bf16))              # (Mo, 4p) f32
    else:
        shortcut = x.reshape(M, Cin)                               # raw input
    residual = shortcut.reshape(N, Ho * Wo, out_planes)

    # conv2 (3x3, pad=1, stride) + bn3 + relu + conv3 (1x1) + residual add:
    # one fused pallas_call, no padded image or pre3 ever hits HBM.
    out = conv2_bn_conv3_add(pre2.reshape(N, H, W, planes),
                             params["w2"].astype(bf16),
                             params["s3"], params["b3"],
                             params["w3"].astype(bf16),
                             residual, stride, Ho, Wo)

    return jnp.transpose(out.reshape(N, Ho, Wo, out_planes), (0, 3, 1, 2))


# ------------------------------ reference (lax.conv) --------------------------

def ref_forward(x_nchw, params, stride):
    """Pure-JAX reference using the same bf16-matmul / f32-accumulate math."""
    bf16 = jnp.bfloat16
    dn = ("NHWC", "HWIO", "NHWC")
    x = jnp.transpose(x_nchw, (0, 2, 3, 1)).astype(jnp.float32)
    Cin = x.shape[-1]
    planes = params["w1"].shape[1]
    outp = params["w3"].shape[1]

    def bnr(v, s, b):
        return jnp.maximum(v * s + b, 0.0)

    a1 = bnr(x, params["s1"], params["b1"]).astype(bf16)
    if stride != 1 or Cin != outp:
        sc = lax.conv_general_dilated(
            a1, params["w_sc"].astype(bf16).reshape(1, 1, Cin, outp),
            (stride, stride), "VALID", dimension_numbers=dn,
            preferred_element_type=jnp.float32)
    else:
        sc = x
    h1 = lax.conv_general_dilated(
        a1, params["w1"].astype(bf16).reshape(1, 1, Cin, planes),
        (1, 1), "VALID", dimension_numbers=dn,
        preferred_element_type=jnp.float32)
    p2 = bnr(h1, params["s2"], params["b2"]).astype(bf16)
    h2 = lax.conv_general_dilated(
        p2, params["w2"].astype(bf16), (stride, stride), ((1, 1), (1, 1)),
        dimension_numbers=dn, preferred_element_type=jnp.float32)
    p3 = bnr(h2, params["s3"], params["b3"]).astype(bf16)
    h3 = lax.conv_general_dilated(
        p3, params["w3"].astype(bf16).reshape(1, 1, planes, outp),
        (1, 1), "VALID", dimension_numbers=dn,
        preferred_element_type=jnp.float32)
    return jnp.transpose(h3 + sc, (0, 3, 1, 2))


# ------------------------------ parameter init --------------------------------

def make_params(key, in_planes, planes, expansion=4, eps=1e-5):
    keys = jax.random.split(key, 16)
    out_planes = expansion * planes

    def bn_affine(kg, kb, km, kv, c):
        gamma = jax.random.uniform(kg, (c,), minval=0.5, maxval=1.5)
        beta = 0.1 * jax.random.normal(kb, (c,))
        mean = 0.1 * jax.random.normal(km, (c,))
        var = jax.random.uniform(kv, (c,), minval=0.5, maxval=1.5)
        scale = gamma / jnp.sqrt(var + eps)
        bias = beta - mean * scale
        return scale.astype(jnp.float32), bias.astype(jnp.float32)

    s1, b1 = bn_affine(keys[0], keys[1], keys[2], keys[3], in_planes)
    s2, b2 = bn_affine(keys[4], keys[5], keys[6], keys[7], planes)
    s3, b3 = bn_affine(keys[8], keys[9], keys[10], keys[11], planes)

    # Conv weights: 1x1 as (Cin, Cout); 3x3 as HWIO (3, 3, Cin, Cout).
    w1 = (jax.random.normal(keys[12], (in_planes, planes)) /
          math.sqrt(in_planes)).astype(jnp.float32)
    w2 = (jax.random.normal(keys[13], (3, 3, planes, planes)) /
          math.sqrt(9 * planes)).astype(jnp.float32)
    w3 = (jax.random.normal(keys[14], (planes, out_planes)) /
          math.sqrt(planes)).astype(jnp.float32)
    w_sc = (jax.random.normal(keys[15], (in_planes, out_planes)) /
            math.sqrt(in_planes)).astype(jnp.float32)

    return dict(s1=s1, b1=b1, s2=s2, b2=b2, s3=s3, b3=b3,
                w1=w1, w2=w2, w3=w3, w_sc=w_sc)


# ------------------------------ main -----------------------------------------

if __name__ == "__main__":
    key = jax.random.PRNGKey(0)
    kx, kp = jax.random.split(key)

    N, in_planes, H, W = 2, 4, 16, 16
    planes, stride = 4, 1          # expansion*planes=16 != in_planes -> conv shortcut path

    x = jax.random.normal(kx, (N, in_planes, H, W), dtype=jnp.float32)
    params = make_params(kp, in_planes, planes)

    out = jax.block_until_ready(preact_bottleneck_forward(x, params, stride))
    ref = jax.block_until_ready(ref_forward(x, params, stride))

    assert out.shape == (N, 4 * planes, H // stride, W // stride), out.shape
    # Tolerance reflects bf16 MXU inputs (reference uses the same quantization).
    np.testing.assert_allclose(np.asarray(out, dtype=np.float32),
                               np.asarray(ref, dtype=np.float32),
                               rtol=1e-2, atol=1e-2)

    print("KERNEL_OK")
</pallas_src>

<mosaic_0001>
module attributes {stable_mosaic.version = 11 : i64} {
  func.func @_bn_mm_kernel(%arg0: i32, %arg1: memref<512x4xf32, #tpu.memory_space<vmem>>, %arg2: memref<1x4xf32, #tpu.memory_space<vmem>>, %arg3: memref<1x4xf32, #tpu.memory_space<vmem>>, %arg4: memref<4x16xbf16, #tpu.memory_space<vmem>>, %arg5: memref<512x16xf32, #tpu.memory_space<vmem>>) attributes {dimension_semantics = [#tpu.dimension_semantics<parallel>], iteration_bounds = array<i64: 1>, scalar_prefetch = 0 : i64, scratch_operands = 0 : i64, tpu.core_type = #tpu.core_type<tc>, window_params = [{transform_indices = @transform_0, window_bounds = array<i64: 512, 4>}, {pipeline_mode = #tpu.pipeline_mode<synchronous>, transform_indices = @transform_1, window_bounds = array<i64: 1, 4>}, {pipeline_mode = #tpu.pipeline_mode<synchronous>, transform_indices = @transform_2, window_bounds = array<i64: 1, 4>}, {pipeline_mode = #tpu.pipeline_mode<synchronous>, transform_indices = @transform_3, window_bounds = array<i64: 4, 16>}, {transform_indices = @transform_4, window_bounds = array<i64: 512, 16>}]} {
    %c0 = arith.constant 0 : index
    %c0_0 = arith.constant 0 : index
    %0 = vector.load %arg1[%c0, %c0_0] : memref<512x4xf32, #tpu.memory_space<vmem>>, vector<512x4xf32>
    %c0_1 = arith.constant 0 : index
    %c0_2 = arith.constant 0 : index
    %1 = vector.load %arg2[%c0_1, %c0_2] : memref<1x4xf32, #tpu.memory_space<vmem>>, vector<1x4xf32>
    %2 = vector.broadcast %1 : vector<1x4xf32> to vector<512x4xf32>
    %3 = arith.mulf %0, %2 : vector<512x4xf32>
    %c0_3 = arith.constant 0 : index
    %c0_4 = arith.constant 0 : index
    %4 = vector.load %arg3[%c0_3, %c0_4] : memref<1x4xf32, #tpu.memory_space<vmem>>, vector<1x4xf32>
    %5 = vector.broadcast %4 : vector<1x4xf32> to vector<512x4xf32>
    %6 = arith.addf %3, %5 : vector<512x4xf32>
    %cst = arith.constant 0.000000e+00 : f32
    %7 = vector.broadcast %cst : f32 to vector<512x4xf32>
    %8 = arith.maximumf %6, %7 : vector<512x4xf32>
    %9 = arith.truncf %8 : vector<512x4xf32> to vector<512x4xbf16>
    %c0_5 = arith.constant 0 : index
    %c0_6 = arith.constant 0 : index
    %10 = vector.load %arg4[%c0_5, %c0_6] : memref<4x16xbf16, #tpu.memory_space<vmem>>, vector<4x16xbf16>
    %cst_7 = arith.constant dense<0.000000e+00> : vector<512x16xf32>
    %11 = tpu.matmul %9, %10, %cst_7 {dimension_numbers = #tpu.dot_dimension_numbers<[1], [0], [0], [1], [0, 0, 1, 1], [], []>} : vector<512x4xbf16>, vector<4x16xbf16>, vector<512x16xf32> -> vector<512x16xf32>
    %c0_8 = arith.constant 0 : index
    %c0_9 = arith.constant 0 : index
    %12 = vector.load %arg5[%c0_8, %c0_9] : memref<512x16xf32, #tpu.memory_space<vmem>>, vector<512x16xf32>
    tpu.vector_store %arg5[%c0_8, %c0_9], %11 {strides = array<i32>} : memref<512x16xf32, #tpu.memory_space<vmem>>, vector<512x16xf32>,
    return
  }
  func.func @transform_0(%arg0: i32) -> (i32, i32) {
    %c0_i32 = arith.constant 0 : i32
    %c0_i32_0 = arith.constant 0 : i32
    return %arg0, %c0_i32 : i32, i32
  }
  func.func @transform_1(%arg0: i32) -> (i32, i32) {
    %c0_i32 = arith.constant 0 : i32
    %c0_i32_0 = arith.constant 0 : i32
    %c0_i32_1 = arith.constant 0 : i32
    return %c0_i32, %c0_i32_0 : i32, i32
  }
  func.func @transform_2(%arg0: i32) -> (i32, i32) {
    %c0_i32 = arith.constant 0 : i32
    %c0_i32_0 = arith.constant 0 : i32
    %c0_i32_1 = arith.constant 0 : i32
    return %c0_i32, %c0_i32_0 : i32, i32
  }
  func.func @transform_3(%arg0: i32) -> (i32, i32) {
    %c0_i32 = arith.constant 0 : i32
    %c0_i32_0 = arith.constant 0 : i32
    %c0_i32_1 = arith.constant 0 : i32
    return %c0_i32, %c0_i32_0 : i32, i32
  }
  func.func @transform_4(%arg0: i32) -> (i32, i32) {
    %c0_i32 = arith.constant 0 : i32
    %c0_i32_0 = arith.constant 0 : i32
    return %arg0, %c0_i32 : i32, i32
  }
}

module attributes {stable_mosaic.version = 11 : i64} {
  func.func @_bn_mm_bn_kernel(%arg0: i32, %arg1: memref<512x4xf32, #tpu.memory_space<vmem>>, %arg2: memref<1x4xf32, #tpu.memory_space<vmem>>, %arg3: memref<1x4xf32, #tpu.memory_space<vmem>>, %arg4: memref<4x4xbf16, #tpu.memory_space<vmem>>, %arg5: memref<1x4xf32, #tpu.memory_space<vmem>>, %arg6: memref<1x4xf32, #tpu.memory_space<vmem>>, %arg7: memref<512x4xbf16, #tpu.memory_space<vmem>>) attributes {dimension_semantics = [#tpu.dimension_semantics<parallel>], iteration_bounds = array<i64: 1>, scalar_prefetch = 0 : i64, scratch_operands = 0 : i64, tpu.core_type = #tpu.core_type<tc>, window_params = [{transform_indices = @transform_0, window_bounds = array<i64: 512, 4>}, {pipeline_mode = #tpu.pipeline_mode<synchronous>, transform_indices = @transform_1, window_bounds = array<i64: 1, 4>}, {pipeline_mode = #tpu.pipeline_mode<synchronous>, transform_indices = @transform_2, window_bounds = array<i64: 1, 4>}, {pipeline_mode = #tpu.pipeline_mode<synchronous>, transform_indices = @transform_3, window_bounds = array<i64: 4, 4>}, {pipeline_mode = #tpu.pipeline_mode<synchronous>, transform_indices = @transform_4, window_bounds = array<i64: 1, 4>}, {pipeline_mode = #tpu.pipeline_mode<synchronous>, transform_indices = @transform_5, window_bounds = array<i64: 1, 4>}, {transform_indices = @transform_6, window_bounds = array<i64: 512, 4>}]} {
    %c0 = arith.constant 0 : index
    %c0_0 = arith.constant 0 : index
    %0 = vector.load %arg1[%c0, %c0_0] : memref<512x4xf32, #tpu.memory_space<vmem>>, vector<512x4xf32>
    %c0_1 = arith.constant 0 : index
    %c0_2 = arith.constant 0 : index
    %1 = vector.load %arg2[%c0_1, %c0_2] : memref<1x4xf32, #tpu.memory_space<vmem>>, vector<1x4xf32>
    %2 = vector.broadcast %1 : vector<1x4xf32> to vector<512x4xf32>
    %3 = arith.mulf %0, %2 : vector<512x4xf32>
    %c0_3 = arith.constant 0 : index
    %c0_4 = arith.constant 0 : index
    %4 = vector.load %arg3[%c0_3, %c0_4] : memref<1x4xf32, #tpu.memory_space<vmem>>, vector<1x4xf32>
    %5 = vector.broadcast %4 : vector<1x4xf32> to vector<512x4xf32>
    %6 = arith.addf %3, %5 : vector<512x4xf32>
    %cst = arith.constant 0.000000e+00 : f32
    %7 = vector.broadcast %cst : f32 to vector<512x4xf32>
    %8 = arith.maximumf %6, %7 : vector<512x4xf32>
    %9 = arith.truncf %8 : vector<512x4xf32> to vector<512x4xbf16>
    %c0_5 = arith.constant 0 : index
    %c0_6 = arith.constant 0 : index
    %10 = vector.load %arg4[%c0_5, %c0_6] : memref<4x4xbf16, #tpu.memory_space<vmem>>, vector<4x4xbf16>
    %cst_7 = arith.constant dense<0.000000e+00> : vector<512x4xf32>
    %11 = tpu.matmul %9, %10, %cst_7 {dimension_numbers = #tpu.dot_dimension_numbers<[1], [0], [0], [1], [0, 0, 1, 1], [], []>} : vector<512x4xbf16>, vector<4x4xbf16>, vector<512x4xf32> -> vector<512x4xf32>
    %c0_8 = arith.constant 0 : index
    %c0_9 = arith.constant 0 : index
    %12 = vector.load %arg5[%c0_8, %c0_9] : memref<1x4xf32, #tpu.memory_space<vmem>>, vector<1x4xf32>
    %13 = vector.broadcast %12 : vector<1x4xf32> to vector<512x4xf32>
    %14 = arith.mulf %11, %13 : vector<512x4xf32>
    %c0_10 = arith.constant 0 : index
    %c0_11 = arith.constant 0 : index
    %15 = vector.load %arg6[%c0_10, %c0_11] : memref<1x4xf32, #tpu.memory_space<vmem>>, vector<1x4xf32>
    %16 = vector.broadcast %15 : vector<1x4xf32> to vector<512x4xf32>
    %17 = arith.addf %14, %16 : vector<512x4xf32>
    %cst_12 = arith.constant 0.000000e+00 : f32
    %18 = vector.broadcast %cst_12 : f32 to vector<512x4xf32>
    %19 = arith.maximumf %17, %18 : vector<512x4xf32>
    %20 = arith.truncf %19 : vector<512x4xf32> to vector<512x4xbf16>
    %c0_13 = arith.constant 0 : index
    %c0_14 = arith.constant 0 : index
    %21 = vector.load %arg7[%c0_13, %c0_14] : memref<512x4xbf16, #tpu.memory_space<vmem>>, vector<512x4xbf16>
    tpu.vector_store %arg7[%c0_13, %c0_14], %20 {strides = array<i32>} : memref<512x4xbf16, #tpu.memory_space<vmem>>, vector<512x4xbf16>,
    return
  }
  func.func @transform_0(%arg0: i32) -> (i32, i32) {
    %c0_i32 = arith.constant 0 : i32
    %c0_i32_0 = arith.constant 0 : i32
    return %arg0, %c0_i32 : i32, i32
  }
  func.func @transform_1(%arg0: i32) -> (i32, i32) {
    %c0_i32 = arith.constant 0 : i32
    %c0_i32_0 = arith.constant 0 : i32
    %c0_i32_1 = arith.constant 0 : i32
    return %c0_i32, %c0_i32_0 : i32, i32
  }
  func.func @transform_2(%arg0: i32) -> (i32, i32) {
    %c0_i32 = arith.constant 0 : i32
    %c0_i32_0 = arith.constant 0 : i32
    %c0_i32_1 = arith.constant 0 : i32
    return %c0_i32, %c0_i32_0 : i32, i32
  }
  func.func @transform_3(%arg0: i32) -> (i32, i32) {
    %c0_i32 = arith.constant 0 : i32
    %c0_i32_0 = arith.constant 0 : i32
    %c0_i32_1 = arith.constant 0 : i32
    return %c0_i32, %c0_i32_0 : i32, i32
  }
  func.func @transform_4(%arg0: i32) -> (i32, i32) {
    %c0_i32 = arith.constant 0 : i32
    %c0_i32_0 = arith.constant 0 : i32
    %c0_i32_1 = arith.constant 0 : i32
    return %c0_i32, %c0_i32_0 : i32, i32
  }
  func.func @transform_5(%arg0: i32) -> (i32, i32) {
    %c0_i32 = arith.constant 0 : i32
    %c0_i32_0 = arith.constant 0 : i32
    %c0_i32_1 = arith.constant 0 : i32
    return %c0_i32, %c0_i32_0 : i32, i32
  }
  func.func @transform_6(%arg0: i32) -> (i32, i32) {
    %c0_i32 = arith.constant 0 : i32
    %c0_i32_0 = arith.constant 0 : i32
    return %arg0, %c0_i32 : i32, i32
  }
}

module attributes {stable_mosaic.version = 11 : i64} {
  func.func @_conv2_bn_conv3_add_kernel(%arg0: i32, %arg1: memref<1x16x16x4xbf16, #tpu.memory_space<vmem>>, %arg2: memref<3x3x4x4xbf16, #tpu.memory_space<vmem>>, %arg3: memref<1x4xf32, #tpu.memory_space<vmem>>, %arg4: memref<1x4xf32, #tpu.memory_space<vmem>>, %arg5: memref<4x16xbf16, #tpu.memory_space<vmem>>, %arg6: memref<1x256x16xf32, #tpu.memory_space<vmem>>, %arg7: memref<1x256x16xf32, #tpu.memory_space<vmem>>, %arg8: memref<18x18x4xbf16, #tpu.memory_space<vmem>>) attributes {dimension_semantics = [#tpu.dimension_semantics<parallel>], iteration_bounds = array<i64: 2>, scalar_prefetch = 0 : i64, scratch_operands = 1 : i64, tpu.core_type = #tpu.core_type<tc>, window_params = [{transform_indices = @transform_0, window_bounds = array<i64: 1, 16, 16, 4>}, {pipeline_mode = #tpu.pipeline_mode<synchronous>, transform_indices = @transform_1, window_bounds = array<i64: 3, 3, 4, 4>}, {pipeline_mode = #tpu.pipeline_mode<synchronous>, transform_indices = @transform_2, window_bounds = array<i64: 1, 4>}, {pipeline_mode = #tpu.pipeline_mode<synchronous>, transform_indices = @transform_3, window_bounds = array<i64: 1, 4>}, {pipeline_mode = #tpu.pipeline_mode<synchronous>, transform_indices = @transform_4, window_bounds = array<i64: 4, 16>}, {transform_indices = @transform_5, window_bounds = array<i64: 1, 256, 16>}, {transform_indices = @transform_6, window_bounds = array<i64: 1, 256, 16>}]} {
    %cst = arith.constant 0.000000e+00 : bf16
    %0 = vector.broadcast %cst : bf16 to vector<18x18x4xbf16>
    %c0 = arith.constant 0 : index
    %c0_0 = arith.constant 0 : index
    %c0_1 = arith.constant 0 : index
    %1 = vector.load %arg8[%c0, %c0_0, %c0_1] : memref<18x18x4xbf16, #tpu.memory_space<vmem>>, vector<18x18x4xbf16>
    tpu.vector_store %arg8[%c0, %c0_0, %c0_1], %0 {strides = array<i32>} : memref<18x18x4xbf16, #tpu.memory_space<vmem>>, vector<18x18x4xbf16>,
    %c0_2 = arith.constant 0 : index
    %c0_3 = arith.constant 0 : index
    %c0_4 = arith.constant 0 : index
    %c0_5 = arith.constant 0 : index
    %2 = vector.load %arg1[%c0_2, %c0_3, %c0_4, %c0_5] : memref<1x16x16x4xbf16, #tpu.memory_space<vmem>>, vector<1x16x16x4xbf16>
    %3 = vector.shape_cast %2 : vector<1x16x16x4xbf16> to vector<16x16x4xbf16>
    %c1 = arith.constant 1 : index
    %c1_6 = arith.constant 1 : index
    %c0_7 = arith.constant 0 : index
    %4 = vector.load %arg8[%c1, %c1_6, %c0_7] : memref<18x18x4xbf16, #tpu.memory_space<vmem>>, vector<16x16x4xbf16>
    tpu.vector_store %arg8[%c1, %c1_6, %c0_7], %3 {strides = array<i32>} : memref<18x18x4xbf16, #tpu.memory_space<vmem>>, vector<16x16x4xbf16>,
    %cst_8 = arith.constant 0.000000e+00 : f32
    %5 = vector.broadcast %cst_8 : f32 to vector<256x4xf32>
    %c0_9 = arith.constant 0 : index
    %c0_10 = arith.constant 0 : index
    %c0_11 = arith.constant 0 : index
    %6 = vector.load %arg8[%c0_9, %c0_10, %c0_11] : memref<18x18x4xbf16, #tpu.memory_space<vmem>>, vector<16x16x4xbf16>
    %7 = vector.shape_cast %6 : vector<16x16x4xbf16> to vector<256x4xbf16>
    %c0_12 = arith.constant 0 : index
    %c0_13 = arith.constant 0 : index
    %c0_14 = arith.constant 0 : index
    %c0_15 = arith.constant 0 : index
    %8 = vector.load %arg2[%c0_12, %c0_13, %c0_14, %c0_15] : memref<3x3x4x4xbf16, #tpu.memory_space<vmem>>, vector<1x1x4x4xbf16>
    %9 = vector.shape_cast %8 : vector<1x1x4x4xbf16> to vector<4x4xbf16>
    %cst_16 = arith.constant dense<0.000000e+00> : vector<256x4xf32>
    %10 = tpu.matmul %7, %9, %cst_16 {dimension_numbers = #tpu.dot_dimension_numbers<[1], [0], [0], [1], [0, 0, 1, 1], [], []>} : vector<256x4xbf16>, vector<4x4xbf16>, vector<256x4xf32> -> vector<256x4xf32>
    %11 = arith.addf %5, %10 : vector<256x4xf32>
    %c0_17 = arith.constant 0 : index
    %c1_18 = arith.constant 1 : index
    %c0_19 = arith.constant 0 : index
    %12 = vector.load %arg8[%c0_17, %c1_18, %c0_19] : memref<18x18x4xbf16, #tpu.memory_space<vmem>>, vector<16x16x4xbf16>
    %13 = vector.shape_cast %12 : vector<16x16x4xbf16> to vector<256x4xbf16>
    %c0_20 = arith.constant 0 : index
    %c1_21 = arith.constant 1 : index
    %c0_22 = arith.constant 0 : index
    %c0_23 = arith.constant 0 : index
    %14 = vector.load %arg2[%c0_20, %c1_21, %c0_22, %c0_23] : memref<3x3x4x4xbf16, #tpu.memory_space<vmem>>, vector<1x1x4x4xbf16>
    %15 = vector.shape_cast %14 : vector<1x1x4x4xbf16> to vector<4x4xbf16>
    %cst_24 = arith.constant dense<0.000000e+00> : vector<256x4xf32>
    %16 = tpu.matmul %13, %15, %cst_24 {dimension_numbers = #tpu.dot_dimension_numbers<[1], [0], [0], [1], [0, 0, 1, 1], [], []>} : vector<256x4xbf16>, vector<4x4xbf16>, vector<256x4xf32> -> vector<256x4xf32>
    %17 = arith.addf %11, %16 : vector<256x4xf32>
    %c0_25 = arith.constant 0 : index
    %c2 = arith.constant 2 : index
    %c0_26 = arith.constant 0 : index
    %18 = vector.load %arg8[%c0_25, %c2, %c0_26] : memref<18x18x4xbf16, #tpu.memory_space<vmem>>, vector<16x16x4xbf16>
    %19 = vector.shape_cast %18 : vector<16x16x4xbf16> to vector<256x4xbf16>
    %c0_27 = arith.constant 0 : index
    %c2_28 = arith.constant 2 : index
    %c0_29 = arith.constant 0 : index
    %c0_30 = arith.constant 0 : index
    %20 = vector.load %arg2[%c0_27, %c2_28, %c0_29, %c0_30] : memref<3x3x4x4xbf16, #tpu.memory_space<vmem>>, vector<1x1x4x4xbf16>
    %21 = vector.shape_cast %20 : vector<1x1x4x4xbf16> to vector<4x4xbf16>
    %cst_31 = arith.constant dense<0.000000e+00> : vector<256x4xf32>
    %22 = tpu.matmul %19, %21, %cst_31 {dimension_numbers = #tpu.dot_dimension_numbers<[1], [0], [0], [1], [0, 0, 1, 1], [], []>} : vector<256x4xbf16>, vector<4x4xbf16>, vector<256x4xf32> -> vector<256x4xf32>
    %23 = arith.addf %17, %22 : vector<256x4xf32>
    %c1_32 = arith.constant 1 : index
    %c0_33 = arith.constant 0 : index
    %c0_34 = arith.constant 0 : index
    %24 = vector.load %arg8[%c1_32, %c0_33, %c0_34] : memref<18x18x4xbf16, #tpu.memory_space<vmem>>, vector<16x16x4xbf16>
    %25 = vector.shape_cast %24 : vector<16x16x4xbf16> to vector<256x4xbf16>
    %c1_35 = arith.constant 1 : index
    %c0_36 = arith.constant 0 : index
    %c0_37 = arith.constant 0 : index
    %c0_38 = arith.constant 0 : index
    %26 = vector.load %arg2[%c1_35, %c0_36, %c0_37, %c0_38] : memref<3x3x4x4xbf16, #tpu.memory_space<vmem>>, vector<1x1x4x4xbf16>
    %27 = vector.shape_cast %26 : vector<1x1x4x4xbf16> to vector<4x4xbf16>
    %cst_39 = arith.constant dense<0.000000e+00> : vector<256x4xf32>
    %28 = tpu.matmul %25, %27, %cst_39 {dimension_numbers = #tpu.dot_dimension_numbers<[1], [0], [0], [1], [0, 0, 1, 1], [], []>} : vector<256x4xbf16>, vector<4x4xbf16>, vector<256x4xf32> -> vector<256x4xf32>
    %29 = arith.addf %23, %28 : vector<256x4xf32>
    %c1_40 = arith.constant 1 : index
    %c1_41 = arith.constant 1 : index
    %c0_42 = arith.constant 0 : index
    %30 = vector.load %arg8[%c1_40, %c1_41, %c0_42] : memref<18x18x4xbf16, #tpu.memory_space<vmem>>, vector<16x16x4xbf16>
    %31 = vector.shape_cast %30 : vector<16x16x4xbf16> to vector<256x4xbf16>
    %c1_43 = arith.constant 1 : index
    %c1_44 = arith.constant 1 : index
    %c0_45 = arith.constant 0 : index
    %c0_46 = arith.constant 0 : index
    %32 = vector.load %arg2[%c1_43, %c1_44, %c0_45, %c0_46] : memref<3x3x4x4xbf16, #tpu.memory_space<vmem>>, vector<1x1x4x4xbf16>
    %33 = vector.shape_cast %32 : vector<1x1x4x4xbf16> to vector<4x4xbf16>
    %cst_47 = arith.constant dense<0.000000e+00> : vector<256x4xf32>
    %34 = tpu.matmul %31, %33, %cst_47 {dimension_numbers = #tpu.dot_dimension_numbers<[1], [0], [0], [1], [0, 0, 1, 1], [], []>} : vector<256x4xbf16>, vector<4x4xbf16>, vector<256x4xf32> -> vector<256x4xf32>
    %35 = arith.addf %29, %34 : vector<256x4xf32>
    %c1_48 = arith.constant 1 : index
    %c2_49 = arith.constant 2 : index
    %c0_50 = arith.constant 0 : index
    %36 = vector.load %arg8[%c1_48, %c2_49, %c0_50] : memref<18x18x4xbf16, #tpu.memory_space<vmem>>, vector<16x16x4xbf16>
    %37 = vector.shape_cast %36 : vector<16x16x4xbf16> to vector<256x4xbf16>
    %c1_51 = arith.constant 1 : index
    %c2_52 = arith.constant 2 : index
    %c0_53 = arith.constant 0 : index
    %c0_54 = arith.constant 0 : index
    %38 = vector.load %arg2[%c1_51, %c2_52, %c0_53, %c0_54] : memref<3x3x4x4xbf16, #tpu.memory_space<vmem>>, vector<1x1x4x4xbf16>
    %39 = vector.shape_cast %38 : vector<1x1x4x4xbf16> to vector<4x4xbf16>
    %cst_55 = arith.constant dense<0.000000e+00> : vector<256x4xf32>
    %40 = tpu.matmul %37, %39, %cst_55 {dimension_numbers = #tpu.dot_dimension_numbers<[1], [0], [0], [1], [0, 0, 1, 1], [], []>} : vector<256x4xbf16>, vector<4x4xbf16>, vector<256x4xf32> -> vector<256x4xf32>
    %41 = arith.addf %35, %40 : vector<256x4xf32>
    %c2_56 = arith.constant 2 : index
    %c0_57 = arith.constant 0 : index
    %c0_58 = arith.constant 0 : index
    %42 = vector.load %arg8[%c2_56, %c0_57, %c0_58] : memref<18x18x4xbf16, #tpu.memory_space<vmem>>, vector<16x16x4xbf16>
    %43 = vector.shape_cast %42 : vector<16x16x4xbf16> to vector<256x4xbf16>
    %c2_59 = arith.constant 2 : index
    %c0_60 = arith.constant 0 : index
    %c0_61 = arith.constant 0 : index
    %c0_62 = arith.constant 0 : index
    %44 = vector.load %arg2[%c2_59, %c0_60, %c0_61, %c0_62] : memref<3x3x4x4xbf16, #tpu.memory_space<vmem>>, vector<1x1x4x4xbf16>
    %45 = vector.shape_cast %44 : vector<1x1x4x4xbf16> to vector<4x4xbf16>
    %cst_63 = arith.constant dense<0.000000e+00> : vector<256x4xf32>
    %46 = tpu.matmul %43, %45, %cst_63 {dimension_numbers = #tpu.dot_dimension_numbers<[1], [0], [0], [1], [0, 0, 1, 1], [], []>} : vector<256x4xbf16>, vector<4x4xbf16>, vector<256x4xf32> -> vector<256x4xf32>
    %47 = arith.addf %41, %46 : vector<256x4xf32>
    %c2_64 = arith.constant 2 : index
    %c1_65 = arith.constant 1 : index
    %c0_66 = arith.constant 0 : index
    %48 = vector.load %arg8[%c2_64, %c1_65, %c0_66] : memref<18x18x4xbf16, #tpu.memory_space<vmem>>, vector<16x16x4xbf16>
    %49 = vector.shape_cast %48 : vector<16x16x4xbf16> to vector<256x4xbf16>
    %c2_67 = arith.constant 2 : index
    %c1_68 = arith.constant 1 : index
    %c0_69 = arith.constant 0 : index
    %c0_70 = arith.constant 0 : index
    %50 = vector.load %arg2[%c2_67, %c1_68, %c0_69, %c0_70] : memref<3x3x4x4xbf16, #tpu.memory_space<vmem>>, vector<1x1x4x4xbf16>
    %51 = vector.shape_cast %50 : vector<1x1x4x4xbf16> to vector<4x4xbf16>
    %cst_71 = arith.constant dense<0.000000e+00> : vector<256x4xf32>
    %52 = tpu.matmul %49, %51, %cst_71 {dimension_numbers = #tpu.dot_dimension_numbers<[1], [0], [0], [1], [0, 0, 1, 1], [], []>} : vector<256x4xbf16>, vector<4x4xbf16>, vector<256x4xf32> -> vector<256x4xf32>
    %53 = arith.addf %47, %52 : vector<256x4xf32>
    %c2_72 = arith.constant 2 : index
    %c2_73 = arith.constant 2 : index
    %c0_74 = arith.constant 0 : index
    %54 = vector.load %arg8[%c2_72, %c2_73, %c0_74] : memref<18x18x4xbf16, #tpu.memory_space<vmem>>, vector<16x16x4xbf16>
    %55 = vector.shape_cast %54 : vector<16x16x4xbf16> to vector<256x4xbf16>
    %c2_75 = arith.constant 2 : index
    %c2_76 = arith.constant 2 : index
    %c0_77 = arith.constant 0 : index
    %c0_78 = arith.constant 0 : index
    %56 = vector.load %arg2[%c2_75, %c2_76, %c0_77, %c0_78] : memref<3x3x4x4xbf16, #tpu.memory_space<vmem>>, vector<1x1x4x4xbf16>
    %57 = vector.shape_cast %56 : vector<1x1x4x4xbf16> to vector<4x4xbf16>
    %cst_79 = arith.constant dense<0.000000e+00> : vector<256x4xf32>
    %58 = tpu.matmul %55, %57, %cst_79 {dimension_numbers = #tpu.dot_dimension_numbers<[1], [0], [0], [1], [0, 0, 1, 1], [], []>} : vector<256x4xbf16>, vector<4x4xbf16>, vector<256x4xf32> -> vector<256x4xf32>
    %59 = arith.addf %53, %58 : vector<256x4xf32>
    %c0_80 = arith.constant 0 : index
    %c0_81 = arith.constant 0 : index
    %60 = vector.load %arg3[%c0_80, %c0_81] : memref<1x4xf32, #tpu.memory_space<vmem>>, vector<1x4xf32>
    %61 = vector.broadcast %60 : vector<1x4xf32> to vector<256x4xf32>
    %62 = arith.mulf %59, %61 : vector<256x4xf32>
    %c0_82 = arith.constant 0 : index
    %c0_83 = arith.constant 0 : index
    %63 = vector.load %arg4[%c0_82, %c0_83] : memref<1x4xf32, #tpu.memory_space<vmem>>, vector<1x4xf32>
    %64 = vector.broadcast %63 : vector<1x4xf32> to vector<256x4xf32>
    %65 = arith.addf %62, %64 : vector<256x4xf32>
    %cst_84 = arith.constant 0.000000e+00 : f32
    %66 = vector.broadcast %cst_84 : f32 to vector<256x4xf32>
    %67 = arith.maximumf %65, %66 : vector<256x4xf32>
    %68 = arith.truncf %67 : vector<256x4xf32> to vector<256x4xbf16>
    %c0_85 = arith.constant 0 : index
    %c0_86 = arith.constant 0 : index
    %69 = vector.load %arg5[%c0_85, %c0_86] : memref<4x16xbf16, #tpu.memory_space<vmem>>, vector<4x16xbf16>
    %cst_87 = arith.constant dense<0.000000e+00> : vector<256x16xf32>
    %70 = tpu.matmul %68, %69, %cst_87 {dimension_numbers = #tpu.dot_dimension_numbers<[1], [0], [0], [1], [0, 0, 1, 1], [], []>} : vector<256x4xbf16>, vector<4x16xbf16>, vector<256x16xf32> -> vector<256x16xf32>
    %c0_88 = arith.constant 0 : index
    %c0_89 = arith.constant 0 : index
    %c0_90 = arith.constant 0 : index
    %71 = vector.load %arg6[%c0_88, %c0_89, %c0_90] : memref<1x256x16xf32, #tpu.memory_space<vmem>>, vector<1x256x16xf32>
    %72 = vector.shape_cast %71 : vector<1x256x16xf32> to vector<256x16xf32>
    %73 = arith.addf %70, %72 : vector<256x16xf32>
    %c0_91 = arith.constant 0 : index
    %c0_92 = arith.constant 0 : index
    %c0_93 = arith.constant 0 : index
    %74 = vector.load %arg7[%c0_91, %c0_92, %c0_93] : memref<1x256x16xf32, #tpu.memory_space<vmem>>, vector<1x256x16xf32>
    %75 = vector.shape_cast %74 : vector<1x256x16xf32> to vector<256x16xf32>
    %76 = vector.shape_cast %73 : vector<256x16xf32> to vector<1x256x16xf32>
    tpu.vector_store %arg7[%c0_91, %c0_92, %c0_93], %76 {strides = array<i32>} : memref<1x256x16xf32, #tpu.memory_space<vmem>>, vector<1x256x16xf32>,
    return
  }
  func.func @transform_0(%arg0: i32) -> (i32, i32, i32, i32) {
    %c0_i32 = arith.constant 0 : i32
    %c0_i32_0 = arith.constant 0 : i32
    %c0_i32_1 = arith.constant 0 : i32
    %c0_i32_2 = arith.constant 0 : i32
    return %arg0, %c0_i32, %c0_i32_0, %c0_i32_1 : i32, i32, i32, i32
  }
  func.func @transform_1(%arg0: i32) -> (i32, i32, i32, i32) {
    %c0_i32 = arith.constant 0 : i32
    %c0_i32_0 = arith.constant 0 : i32
    %c0_i32_1 = arith.constant 0 : i32
    %c0_i32_2 = arith.constant 0 : i32
    %c0_i32_3 = arith.constant 0 : i32
    return %c0_i32, %c0_i32_0, %c0_i32_1, %c0_i32_2 : i32, i32, i32, i32
  }
  func.func @transform_2(%arg0: i32) -> (i32, i32) {
    %c0_i32 = arith.constant 0 : i32
    %c0_i32_0 = arith.constant 0 : i32
    %c0_i32_1 = arith.constant 0 : i32
    return %c0_i32, %c0_i32_0 : i32, i32
  }
  func.func @transform_3(%arg0: i32) -> (i32, i32) {
    %c0_i32 = arith.constant 0 : i32
    %c0_i32_0 = arith.constant 0 : i32
    %c0_i32_1 = arith.constant 0 : i32
    return %c0_i32, %c0_i32_0 : i32, i32
  }
  func.func @transform_4(%arg0: i32) -> (i32, i32) {
    %c0_i32 = arith.constant 0 : i32
    %c0_i32_0 = arith.constant 0 : i32
    %c0_i32_1 = arith.constant 0 : i32
    return %c0_i32, %c0_i32_0 : i32, i32
  }
  func.func @transform_5(%arg0: i32) -> (i32, i32, i32) {
    %c0_i32 = arith.constant 0 : i32
    %c0_i32_0 = arith.constant 0 : i32
    %c0_i32_1 = arith.constant 0 : i32
    return %arg0, %c0_i32, %c0_i32_0 : i32, i32, i32
  }
  func.func @transform_6(%arg0: i32) -> (i32, i32, i32) {
    %c0_i32 = arith.constant 0 : i32
    %c0_i32_0 = arith.constant 0 : i32
    %c0_i32_1 = arith.constant 0 : i32
    return %arg0, %c0_i32, %c0_i32_0 : i32, i32, i32
  }
}

</mosaic_0001>

<bundles_post_ra>
// kernel: preact_bottleneck_forward.4
= control target key start
LH: loop header
LB: loop body
LE: loop exit
PB: predicated region body
PF: predicated region fallthrough
CT: control target
= control target key end

     0   :  { %vm418_vm0 = vcmask 1041408   ;;  %vm321_vm1 = vcmask 31744   ;;  %vm711_vm2 = vcmask 130048   ;;  %s1563_s3 = inlined_call_operand.vmem [shape: bf16[4,16], index: 3, kind: input, shape index: {}]   ;;  %s1564_s0 = inlined_call_operand.vmem [shape: f32[512,4], index: 0, kind: input, shape index: {}]   ;;  %s1565_s1 = inlined_call_operand.vmem [shape: f32[1,4], index: 1, kind: input, shape index: {}]   ;;  %s1566_s2 = inlined_call_operand.vmem [shape: f32[1,4], index: 2, kind: input, shape index: {}]   ;;  %s1567_s4 = inlined_call_operand.vmem [shape: f32[512,16], index: 4, kind: output, shape index: {}]  }
   0x1   :  { %v320_v0 = vld [vmem:[%s1563_s3] sm:$0x3]  ;;  %v19_v2 = vld [vmem:[%s1564_s0 + $0x8] sm:$0xff]  ;;  %v20_v11 = vld [vmem:[%s1564_s0 + $0x10] sm:$0xff] }
   0x2   :  { %v18_v1 = vld [vmem:[%s1564_s0] sm:$0xff]  ;;  %915 = vmatprep.subr.msk.bf16.mxu0 %vm418_vm0, %v320_v0  ;;  %916 = vmatprep.subr.msk.bf16.mxu1 %vm418_vm0, %v320_v0  ;;  %v420_v3 = vsel %vm418_vm0, %v320_v0, 0  ;;  %v51_v9 = vld [vmem:[%s1564_s0 + $0x108] sm:$0xff]  ;;  %v21_v12 = vld [vmem:[%s1564_s0 + $0x18] sm:$0xff] }
   0x3   :  { %v954_v4 = vld [vmem:[%s1565_s1] ss:$0 sm:$0xff]  ;;  %848 = vmatpush3.bf16.msra.mxu0 %v420_v3  ;;  %914 = vmatpush3.bf16.msra.mxu1 %v420_v3  ;;  %v52_v16 = vld [vmem:[%s1564_s0 + $0x110] sm:$0xff]  ;;  %v53_v17 = vld [vmem:[%s1564_s0 + $0x118] sm:$0xff] }
   0x4   :  { %v959_v5 = vld [vmem:[%s1566_s2] ss:$0 sm:$0xff]  ;;  %v89_v7 = vmul.f32 %v954_v4, %v18_v1  ;;  %v90_v8 = vmul.f32 %v954_v4, %v19_v2  ;;  %v122_v13 = vmul.f32 %v954_v4, %v51_v9  ;;  %v91_v14 = vmul.f32 %v954_v4, %v20_v11  ;;  %v23_v27 = vld [vmem:[%s1564_s0 + $0x28] sm:$0xff]  ;;  %v24_v38 = vld [vmem:[%s1564_s0 + $0x30] sm:$0xff] }
   0x5   :  { %v50_v6 = vld [vmem:[%s1564_s0 + $0x100] sm:$0xff]  ;;  %v92_v15 = vmul.f32 %v954_v4, %v21_v12  ;;  %v123_v21 = vmul.f32 %v954_v4, %v52_v16  ;;  %v124_v25 = vmul.f32 %v954_v4, %v53_v17  ;;  %v55_v37 = vld [vmem:[%s1564_s0 + $0x128] sm:$0xff]  ;;  %v94_v42 = vmul.f32 %v954_v4, %v23_v27  ;;  %v25_v43 = vld [vmem:[%s1564_s0 + $0x38] sm:$0xff] }
   0x6   :  { %v121_v10 = vmul.f32 %v954_v4, %v50_v6  ;;  %v160_v18 = vadd.f32 %v959_v5, %v89_v7  ;;  %v161_v19 = vadd.f32 %v959_v5, %v90_v8  ;;  %v193_v22 = vadd.f32 %v959_v5, %v122_v13  ;;  %v22_v26 = vld [vmem:[%s1564_s0 + $0x20] sm:$0xff]  ;;  %v56_v52 = vld [vmem:[%s1564_s0 + $0x130] sm:$0xff]  ;;  %v57_v53 = vld [vmem:[%s1564_s0 + $0x138] sm:$0xff] }
   0x7   :  { %v162_v23 = vadd.f32 %v959_v5, %v91_v14  ;;  %v163_v24 = vadd.f32 %v959_v5, %v92_v15  ;;  %v194_v31 = vadd.f32 %v959_v5, %v123_v21  ;;  %v54_v32 = vld [vmem:[%s1564_s0 + $0x120] sm:$0xff]  ;;  %v195_v36 = vadd.f32 %v959_v5, %v124_v25  ;;  %v27_v62 = vld [vmem:[%s1564_s0 + $0x48] sm:$0xff]  ;;  %v28_v15 = vld [vmem:[%s1564_s0 + $0x50] sm:$0xff] }
   0x8   :  { %v192_v20 = vadd.f32 %v959_v5, %v121_v10  ;;  %v224_v28 = vmax.f32 %v160_v18, 0.0  ;;  %v225_v29 = vmax.f32 %v161_v19, 0.0  ;;  %v257_v33 = vmax.f32 %v193_v22, 0.0  ;;  %v26_v57 = vld [vmem:[%s1564_s0 + $0x40] sm:$0xff]  ;;  %v59_v6 = vld [vmem:[%s1564_s0 + $0x148] sm:$0xff]  ;;  %v60_v21 = vld [vmem:[%s1564_s0 + $0x150] sm:$0xff] }
   0x9   :  { %v226_v34 = vmax.f32 %v162_v23, 0.0  ;;  %v227_v35 = vmax.f32 %v163_v24, 0.0  ;;  %v258_v40 = vmax.f32 %v194_v31, 0.0  ;;  %v93_v41 = vmul.f32 %v954_v4, %v22_v26  ;;  %v58_v3 = vld [vmem:[%s1564_s0 + $0x140] sm:$0xff]  ;;  %v61_v26 = vld [vmem:[%s1564_s0 + $0x158] sm:$0xff] }
   0xa   :  { %v256_v30 = vmax.f32 %v192_v20, 0.0  ;;  %v288_v39 = vpack.c.bf16 %v225_v29, %v224_v28  ;;  %v259_v46 = vmax.f32 %v195_v36, 0.0  ;;  %v125_v47 = vmul.f32 %v954_v4, %v54_v32  ;;  %v29_v20 = vld [vmem:[%s1564_s0 + $0x58] sm:$0xff]  ;;  %v30_v31 = vld [vmem:[%s1564_s0 + $0x60] sm:$0xff]  ;;  %v31_v36 = vld [vmem:[%s1564_s0 + $0x68] sm:$0xff] }
   0xb   :  { %v289_v45 = vpack.c.bf16 %v227_v35, %v226_v34  ;;  %v164_v48 = vadd.f32 %v959_v5, %v93_v41  ;;  %v165_v49 = vadd.f32 %v959_v5, %v94_v42  ;;  %v126_v50 = vmul.f32 %v954_v4, %v55_v37  ;;  %v62_v41 = vld [vmem:[%s1564_s0 + $0x160] sm:$0xff] }
   0xc   :  { %v304_v44 = vpack.c.bf16 %v257_v33, %v256_v30  ;;  %849 = vmatprep.mubr.msk.bf16.mxu0 %vm321_vm1, %v288_v39  ;;  %v95_v51 = vmul.f32 %v954_v4, %v24_v38  ;;  %v305_v54 = vpack.c.bf16 %v259_v46, %v258_v40  ;;  %v196_v55 = vadd.f32 %v959_v5, %v125_v47  ;;  %v63_v46 = vld [vmem:[%s1564_s0 + $0x168] sm:$0xff]  ;;  %v32_v47 = vld [vmem:[%s1564_s0 + $0x70] sm:$0xff] }
   0xd   :  { %850 = vmatmul.mubr.msk.bf16.vlgmr.msra.gmra.mxu0 %vm321_vm1, %v289_v45  ;;  %v96_v56 = vmul.f32 %v954_v4, %v25_v43  ;;  %v228_v58 = vmax.f32 %v164_v48, 0.0  ;;  %v229_v59 = vmax.f32 %v165_v49, 0.0  ;;  %v197_v60 = vadd.f32 %v959_v5, %v126_v50 }
   0xe   :  { %881 = vmatprep.mubr.msk.bf16.mxu1 %vm321_vm1, %v304_v44  ;;  %v166_v61 = vadd.f32 %v959_v5, %v95_v51  ;;  %v260_v63 = vmax.f32 %v196_v55, 0.0  ;;  %v127_v1 = vmul.f32 %v954_v4, %v56_v52  ;;  %v128_v2 = vmul.f32 %v954_v4, %v57_v53  ;;  %v33_v52 = vld [vmem:[%s1564_s0 + $0x78] sm:$0xff] }
   0xf   :  { %882 = vmatmul.mubr.msk.bf16.vlgmr.msra.gmra.mxu1 %vm321_vm1, %v305_v54  ;;  %v167_v0 = vadd.f32 %v959_v5, %v96_v56  ;;  %v290_v7 = vpack.c.bf16 %v229_v59, %v228_v58  ;;  %v261_v8 = vmax.f32 %v197_v60, 0.0  ;;  %v97_v10 = vmul.f32 %v954_v4, %v26_v57 }
  0x10   :  { %v230_v9 = vmax.f32 %v166_v61, 0.0  ;;  %v198_v12 = vadd.f32 %v959_v5, %v127_v1  ;;  %v199_v13 = vadd.f32 %v959_v5, %v128_v2  ;;  %v98_v14 = vmul.f32 %v954_v4, %v27_v62  ;;  %v64_v61 = vld [vmem:[%s1564_s0 + $0x170] sm:$0xff]  ;;  %v65_v62 = vld [vmem:[%s1564_s0 + $0x178] sm:$0xff] }
  0x11   :  { %v231_v11 = vmax.f32 %v167_v0, 0.0  ;;  %853 = vmatprep.mubr.msk.bf16.mxu0 %vm321_vm1, %v290_v7  ;;  %v306_v16 = vpack.c.bf16 %v261_v8, %v260_v63  ;;  %v168_v17 = vadd.f32 %v959_v5, %v97_v10  ;;  %v129_v18 = vmul.f32 %v954_v4, %v58_v3  ;;  %v34_v3 = vld [vmem:[%s1564_s0 + $0x80] sm:$0xff]  ;;  %v35_v10 = vld [vmem:[%s1564_s0 + $0x88] sm:$0xff] }
  0x12   :  { %v130_v19 = vmul.f32 %v954_v4, %v59_v6  ;;  %v262_v23 = vmax.f32 %v198_v12, 0.0  ;;  %v263_v24 = vmax.f32 %v199_v13, 0.0  ;;  %v169_v25 = vadd.f32 %v959_v5, %v98_v14 }
  0x13   :  { %v291_v22 = vpack.c.bf16 %v231_v11, %v230_v9  ;;  %885 = vmatprep.mubr.msk.bf16.mxu1 %vm321_vm1, %v306_v16  ;;  %v232_v27 = vmax.f32 %v168_v17, 0.0  ;;  %v200_v28 = vadd.f32 %v959_v5, %v129_v18  ;;  %v99_v30 = vmul.f32 %v954_v4, %v28_v15  ;;  %v66_v15 = vld [vmem:[%s1564_s0 + $0x180] sm:$0xff]  ;;  %v67_v16 = vld [vmem:[%s1564_s0 + $0x188] sm:$0xff] }
  0x14   :  { %v201_v29 = vadd.f32 %v959_v5, %v130_v19  ;;  %v307_v32 = vpack.c.bf16 %v263_v24, %v262_v23  ;;  %v233_v33 = vmax.f32 %v169_v25, 0.0  ;;  %v100_v34 = vmul.f32 %v954_v4, %v29_v20  ;;  %v36_v25 = vld [vmem:[%s1564_s0 + $0x90] sm:$0xff] }
  0x15   :  { %854 = vmatmul.mubr.msk.bf16.gmra.mxu0 %vm321_vm1, %v291_v22  ;;  %v131_v35 = vmul.f32 %v954_v4, %v60_v21  ;;  %v264_v37 = vmax.f32 %v200_v28, 0.0  ;;  %v170_v39 = vadd.f32 %v959_v5, %v99_v30  ;;  %v132_v40 = vmul.f32 %v954_v4, %v61_v26  ;;  %v37_v30 = vld [vmem:[%s1564_s0 + $0x98] sm:$0xff] }
  0x16   :  { %v265_v38 = vmax.f32 %v201_v29, 0.0  ;;  %v292_v42 = vpack.c.bf16 %v233_v33, %v232_v27  ;;  %v171_v43 = vadd.f32 %v959_v5, %v100_v34  ;;  %v101_v45 = vmul.f32 %v954_v4, %v30_v31  ;;  %v68_v31 = vld [vmem:[%s1564_s0 + $0x190] sm:$0xff] }
  0x17   :  { %886 = vmatmul.mubr.msk.bf16.gmra.mxu1 %vm321_vm1, %v307_v32  ;;  %v202_v44 = vadd.f32 %v959_v5, %v131_v35  ;;  %v234_v49 = vmax.f32 %v170_v39, 0.0  ;;  %v203_v50 = vadd.f32 %v959_v5, %v132_v40  ;;  %v102_v51 = vmul.f32 %v954_v4, %v31_v36  ;;  %v69_v36 = vld [vmem:[%s1564_s0 + $0x198] sm:$0xff] }
  0x18   :  { %v308_v48 = vpack.c.bf16 %v265_v38, %v264_v37  ;;  %857 = vmatprep.mubr.msk.bf16.mxu0 %vm321_vm1, %v292_v42  ;;  %v235_v53 = vmax.f32 %v171_v43, 0.0  ;;  %v172_v55 = vadd.f32 %v959_v5, %v101_v45  ;;  %v133_v56 = vmul.f32 %v954_v4, %v62_v41  ;;  %v38_v41 = vld [vmem:[%s1564_s0 + $0xa0] sm:$0xff] }
  0x19   :  { %v266_v54 = vmax.f32 %v202_v44, 0.0  ;;  %v267_v57 = vmax.f32 %v203_v50, 0.0  ;;  %v173_v58 = vadd.f32 %v959_v5, %v102_v51  ;;  %v134_v59 = vmul.f32 %v954_v4, %v63_v46  ;;  %v39_v46 = vld [vmem:[%s1564_s0 + $0xa8] sm:$0xff]  ;;  %v70_v51 = vld [vmem:[%s1564_s0 + $0x1a0] sm:$0xff] }
  0x1a   :  { %889 = vmatprep.mubr.msk.bf16.mxu1 %vm321_vm1, %v308_v48  ;;  %v103_v60 = vmul.f32 %v954_v4, %v32_v47  ;;  %v293_v63 = vpack.c.bf16 %v235_v53, %v234_v49  ;;  %v236_v0 = vmax.f32 %v172_v55, 0.0  ;;  %v204_v1 = vadd.f32 %v959_v5, %v133_v56  ;;  %v71_v56 = vld [vmem:[%s1564_s0 + $0x1a8] sm:$0xff] }
  0x1b   :  { %v104_v2 = vmul.f32 %v954_v4, %v33_v52  ;;  %v309_v6 = vpack.c.bf16 %v267_v57, %v266_v54  ;;  %v237_v7 = vmax.f32 %v173_v58, 0.0  ;;  %v205_v8 = vadd.f32 %v959_v5, %v134_v59  ;;  %v40_v57 = vld [vmem:[%s1564_s0 + $0xb0] sm:$0xff] }
  0x1c   :  { %v174_v9 = vadd.f32 %v959_v5, %v103_v60  ;;  %v268_v11 = vmax.f32 %v204_v1, 0.0  ;;  %v135_v13 = vmul.f32 %v954_v4, %v64_v61  ;;  %v136_v14 = vmul.f32 %v954_v4, %v65_v62  ;;  %v41_v62 = vld [vmem:[%s1564_s0 + $0xb8] sm:$0xff] }
  0x1d   :  { %858 = vmatmul.mubr.msk.bf16.gmra.mxu0 %vm321_vm1, %v293_v63  ;;  %v175_v12 = vadd.f32 %v959_v5, %v104_v2  ;;  %v294_v17 = vpack.c.bf16 %v237_v7, %v236_v0  ;;  %v269_v18 = vmax.f32 %v205_v8, 0.0  ;;  %v105_v20 = vmul.f32 %v954_v4, %v34_v3 }
  0x1e   :  { %v238_v19 = vmax.f32 %v174_v9, 0.0  ;;  %v206_v22 = vadd.f32 %v959_v5, %v135_v13  ;;  %v207_v23 = vadd.f32 %v959_v5, %v136_v14  ;;  %v106_v24 = vmul.f32 %v954_v4, %v35_v10  ;;  %v72_v9 = vld [vmem:[%s1564_s0 + $0x1b0] sm:$0xff]  ;;  %v73_v10 = vld [vmem:[%s1564_s0 + $0x1b8] sm:$0xff] }
  0x1f   :  { %890 = vmatmul.mubr.msk.bf16.gmra.mxu1 %vm321_vm1, %v309_v6  ;;  %v239_v21 = vmax.f32 %v175_v12, 0.0  ;;  %861 = vmatprep.mubr.msk.bf16.mxu0 %vm321_vm1, %v294_v17  ;;  %v310_v26 = vpack.c.bf16 %v269_v18, %v268_v11  ;;  %v176_v27 = vadd.f32 %v959_v5, %v105_v20  ;;  %v137_v28 = vmul.f32 %v954_v4, %v66_v15  ;;  %v42_v15 = vld [vmem:[%s1564_s0 + $0xc0] sm:$0xff]  ;;  %v43_v20 = vld [vmem:[%s1564_s0 + $0xc8] sm:$0xff] }
  0x20   :  { %v138_v29 = vmul.f32 %v954_v4, %v67_v16  ;;  %v270_v33 = vmax.f32 %v206_v22, 0.0  ;;  %v271_v34 = vmax.f32 %v207_v23, 0.0  ;;  %v177_v35 = vadd.f32 %v959_v5, %v106_v24 }
  0x21   :  { %v295_v32 = vpack.c.bf16 %v239_v21, %v238_v19  ;;  %893 = vmatprep.mubr.msk.bf16.mxu1 %vm321_vm1, %v310_v26  ;;  %v240_v37 = vmax.f32 %v176_v27, 0.0  ;;  %v208_v38 = vadd.f32 %v959_v5, %v137_v28  ;;  %v107_v40 = vmul.f32 %v954_v4, %v36_v25  ;;  %v74_v25 = vld [vmem:[%s1564_s0 + $0x1c0] sm:$0xff]  ;;  %v75_v26 = vld [vmem:[%s1564_s0 + $0x1c8] sm:$0xff] }
  0x22   :  { %v209_v39 = vadd.f32 %v959_v5, %v138_v29  ;;  %v311_v42 = vpack.c.bf16 %v271_v34, %v270_v33  ;;  %v241_v43 = vmax.f32 %v177_v35, 0.0  ;;  %v108_v44 = vmul.f32 %v954_v4, %v37_v30  ;;  %v44_v35 = vld [vmem:[%s1564_s0 + $0xd0] sm:$0xff] }
  0x23   :  { %v139_v45 = vmul.f32 %v954_v4, %v68_v31  ;;  %v272_v47 = vmax.f32 %v208_v38, 0.0  ;;  %v178_v49 = vadd.f32 %v959_v5, %v107_v40  ;;  %v140_v50 = vmul.f32 %v954_v4, %v69_v36  ;;  %v45_v40 = vld [vmem:[%s1564_s0 + $0xd8] sm:$0xff] }
  0x24   :  { %v273_v48 = vmax.f32 %v209_v39, 0.0  ;;  %v296_v52 = vpack.c.bf16 %v241_v43, %v240_v37  ;;  %v179_v53 = vadd.f32 %v959_v5, %v108_v44  ;;  %v109_v55 = vmul.f32 %v954_v4, %v38_v41  ;;  %v76_v41 = vld [vmem:[%s1564_s0 + $0x1d0] sm:$0xff] }
  0x25   :  { %862 = vmatmul.mubr.msk.bf16.gmra.mxu0 %vm321_vm1, %v295_v32  ;;  %v210_v54 = vadd.f32 %v959_v5, %v139_v45  ;;  %v242_v59 = vmax.f32 %v178_v49, 0.0  ;;  %v211_v60 = vadd.f32 %v959_v5, %v140_v50  ;;  %v110_v61 = vmul.f32 %v954_v4, %v39_v46  ;;  %v77_v46 = vld [vmem:[%s1564_s0 + $0x1d8] sm:$0xff] }
  0x26   :  { %v312_v58 = vpack.c.bf16 %v273_v48, %v272_v47  ;;  %865 = vmatprep.mubr.msk.bf16.mxu0 %vm321_vm1, %v296_v52  ;;  %v243_v63 = vmax.f32 %v179_v53, 0.0  ;;  %v180_v1 = vadd.f32 %v959_v5, %v109_v55  ;;  %v141_v2 = vmul.f32 %v954_v4, %v70_v51  ;;  %v46_v51 = vld [vmem:[%s1564_s0 + $0xe0] sm:$0xff] }
  0x27   :  { %894 = vmatmul.mubr.msk.bf16.gmra.mxu1 %vm321_vm1, %v311_v42  ;;  %v274_v0 = vmax.f32 %v210_v54, 0.0  ;;  %v275_v3 = vmax.f32 %v211_v60, 0.0  ;;  %v181_v6 = vadd.f32 %v959_v5, %v110_v61  ;;  %v142_v7 = vmul.f32 %v954_v4, %v71_v56  ;;  %v47_v56 = vld [vmem:[%s1564_s0 + $0xe8] sm:$0xff]  ;;  %v78_v61 = vld [vmem:[%s1564_s0 + $0x1e0] sm:$0xff] }
  0x28   :  { %897 = vmatprep.mubr.msk.bf16.mxu1 %vm321_vm1, %v312_v58  ;;  %v111_v8 = vmul.f32 %v954_v4, %v40_v57  ;;  %v297_v11 = vpack.c.bf16 %v243_v63, %v242_v59  ;;  %v244_v12 = vmax.f32 %v180_v1, 0.0  ;;  %v212_v13 = vadd.f32 %v959_v5, %v141_v2  ;;  %v79_v2 = vld [vmem:[%s1564_s0 + $0x1e8] sm:$0xff] }
  0x29   :  { %v112_v14 = vmul.f32 %v954_v4, %v41_v62  ;;  %v313_v16 = vpack.c.bf16 %v275_v3, %v274_v0  ;;  %v245_v17 = vmax.f32 %v181_v6, 0.0  ;;  %v213_v18 = vadd.f32 %v959_v5, %v142_v7  ;;  %v48_v3 = vld [vmem:[%s1564_s0 + $0xf0] sm:$0xff] }
  0x2a   :  { %v182_v19 = vadd.f32 %v959_v5, %v111_v8  ;;  %v276_v21 = vmax.f32 %v212_v13, 0.0  ;;  %v143_v23 = vmul.f32 %v954_v4, %v72_v9  ;;  %v144_v24 = vmul.f32 %v954_v4, %v73_v10  ;;  %v49_v10 = vld [vmem:[%s1564_s0 + $0xf8] sm:$0xff] }
  0x2b   :  { %v183_v22 = vadd.f32 %v959_v5, %v112_v14  ;;  %v298_v27 = vpack.c.bf16 %v245_v17, %v244_v12  ;;  %v277_v28 = vmax.f32 %v213_v18, 0.0  ;;  %v113_v30 = vmul.f32 %v954_v4, %v42_v15  ;;  %v80_v18 = vld [vmem:[%s1564_s0 + $0x1f0] sm:$0xff] }
  0x2c   :  { %v246_v29 = vmax.f32 %v182_v19, 0.0  ;;  %v214_v32 = vadd.f32 %v959_v5, %v143_v23  ;;  %v215_v33 = vadd.f32 %v959_v5, %v144_v24  ;;  %v114_v34 = vmul.f32 %v954_v4, %v43_v20  ;;  %v81_v19 = vld [vmem:[%s1564_s0 + $0x1f8] sm:$0xff] }
  0x2d   :  { %866 = vmatmul.mubr.msk.bf16.gmra.mxu0 %vm321_vm1, %v297_v11  ;;  %v247_v31 = vmax.f32 %v183_v22, 0.0  ;;  %v314_v36 = vpack.c.bf16 %v277_v28, %v276_v21  ;;  %v184_v37 = vadd.f32 %v959_v5, %v113_v30  ;;  %v145_v38 = vmul.f32 %v954_v4, %v74_v25 }
  0x2e   :  { %869 = vmatprep.mubr.msk.bf16.mxu0 %vm321_vm1, %v298_v27  ;;  %v146_v39 = vmul.f32 %v954_v4, %v75_v26  ;;  %v278_v43 = vmax.f32 %v214_v32, 0.0  ;;  %v279_v44 = vmax.f32 %v215_v33, 0.0  ;;  %v185_v45 = vadd.f32 %v959_v5, %v114_v34 }
  0x2f   :  { %898 = vmatmul.mubr.msk.bf16.gmra.mxu1 %vm321_vm1, %v313_v16  ;;  %v299_v42 = vpack.c.bf16 %v247_v31, %v246_v29  ;;  %v248_v47 = vmax.f32 %v184_v37, 0.0  ;;  %v216_v48 = vadd.f32 %v959_v5, %v145_v38  ;;  %v115_v50 = vmul.f32 %v954_v4, %v44_v35 }
  0x30   :  { %901 = vmatprep.mubr.msk.bf16.mxu1 %vm321_vm1, %v314_v36  ;;  %v217_v49 = vadd.f32 %v959_v5, %v146_v39  ;;  %v315_v52 = vpack.c.bf16 %v279_v44, %v278_v43  ;;  %v249_v53 = vmax.f32 %v185_v45, 0.0  ;;  %v116_v54 = vmul.f32 %v954_v4, %v45_v40 }
  0x31   :  { %v147_v55 = vmul.f32 %v954_v4, %v76_v41  ;;  %v280_v57 = vmax.f32 %v216_v48, 0.0  ;;  %v186_v59 = vadd.f32 %v959_v5, %v115_v50  ;;  %v148_v60 = vmul.f32 %v954_v4, %v77_v46 }
  0x32   :  { %v281_v58 = vmax.f32 %v217_v49, 0.0  ;;  %v300_v62 = vpack.c.bf16 %v249_v53, %v248_v47  ;;  %v187_v63 = vadd.f32 %v959_v5, %v116_v54  ;;  %v117_v1 = vmul.f32 %v954_v4, %v46_v51 }
  0x33   :  { %v218_v0 = vadd.f32 %v959_v5, %v147_v55  ;;  %v250_v7 = vmax.f32 %v186_v59, 0.0  ;;  %v219_v8 = vadd.f32 %v959_v5, %v148_v60  ;;  %v118_v9 = vmul.f32 %v954_v4, %v47_v56 }
  0x34   :  { %v316_v6 = vpack.c.bf16 %v281_v58, %v280_v57  ;;  %v251_v11 = vmax.f32 %v187_v63, 0.0  ;;  %v188_v12 = vadd.f32 %v959_v5, %v117_v1  ;;  %v149_v13 = vmul.f32 %v954_v4, %v78_v61 }
  0x35   :  { %870 = vmatmul.mubr.msk.bf16.gmra.mxu0 %vm321_vm1, %v299_v42  ;;  %v282_v14 = vmax.f32 %v218_v0, 0.0  ;;  %v189_v15 = vadd.f32 %v959_v5, %v118_v9  ;;  %v150_v16 = vmul.f32 %v954_v4, %v79_v2  ;;  %v119_v17 = vmul.f32 %v954_v4, %v48_v3 }
  0x36   :  { %873 = vmatprep.mubr.msk.bf16.mxu0 %vm321_vm1, %v300_v62  ;;  %v283_v20 = vmax.f32 %v219_v8, 0.0  ;;  %v252_v21 = vmax.f32 %v188_v12, 0.0  ;;  %v220_v22 = vadd.f32 %v959_v5, %v149_v13  ;;  %v120_v23 = vmul.f32 %v954_v4, %v49_v10 }
  0x37   :  { %902 = vmatmul.mubr.msk.bf16.gmra.mxu1 %vm321_vm1, %v315_v52  ;;  %v301_v24 = vpack.c.bf16 %v251_v11, %v250_v7  ;;  %v253_v25 = vmax.f32 %v189_v15, 0.0  ;;  %v221_v26 = vadd.f32 %v959_v5, %v150_v16  ;;  %v190_v27 = vadd.f32 %v959_v5, %v119_v17 }
  0x38   :  { %905 = vmatprep.mubr.msk.bf16.mxu1 %vm321_vm1, %v316_v6  ;;  %v284_v28 = vmax.f32 %v220_v22, 0.0  ;;  %v191_v29 = vadd.f32 %v959_v5, %v120_v23  ;;  %v151_v30 = vmul.f32 %v954_v4, %v80_v18  ;;  %v152_v31 = vmul.f32 %v954_v4, %v81_v19 }
  0x39   :  { %v302_v32 = vpack.c.bf16 %v253_v25, %v252_v21  ;;  %v285_v33 = vmax.f32 %v221_v26, 0.0  ;;  %v317_v34 = vpack.c.bf16 %v283_v20, %v282_v14  ;;  %v254_v38 = vmax.f32 %v190_v27, 0.0 }
  0x3a   :  { %v222_v35 = vadd.f32 %v959_v5, %v151_v30  ;;  %v223_v36 = vadd.f32 %v959_v5, %v152_v31  ;;  %v255_v39 = vmax.f32 %v191_v29, 0.0 }
  0x3b   :  { %v318_v37 = vpack.c.bf16 %v285_v33, %v284_v28 }
  0x3c   :  { %v286_v40 = vmax.f32 %v222_v35, 0.0  ;;  %v287_v41 = vmax.f32 %v223_v36, 0.0  ;;  %v303_v4 = vpack.c.bf16 %v255_v39, %v254_v38 }
  0x3d   :  { %874 = vmatmul.mubr.msk.bf16.gmra.mxu0 %vm321_vm1, %v301_v24 }
  0x3e   :  { %877 = vmatprep.mubr.msk.bf16.mxu0 %vm321_vm1, %v302_v32  ;;  %v319_v42 = vpack.c.bf16 %v287_v41, %v286_v40 }
  0x3f   :  { %906 = vmatmul.mubr.msk.bf16.gmra.mxu1 %vm321_vm1, %v317_v34 }
  0x40   :  { %909 = vmatprep.mubr.msk.bf16.mxu1 %vm321_vm1, %v318_v37 }
  0x45   :  { %878 = vmatmul.mubr.msk.bf16.gmra.mxu0 %vm321_vm1, %v303_v4 }
  0x47   :  { %910 = vmatmul.mubr.msk.bf16.gmra.mxu1 %vm321_vm1, %v319_v42 }
  0xcd   :  { %v851_v5 = vpop.f32.mrf.mxu0 }
  0xce   :  { %714 = vst.msk [vmem:[%s1567_s4 + $0x10] sm:$0xff] %vm711_vm2, %v851_v5 }
  0xcf   :  { %v883_v43 = vpop.f32.mrf.mxu1  ;;  %v456_v44 = vpop.f32.mrf.mxu0 }
  0xd0   :  { %746 = vst.msk [vmem:[%s1567_s4 + $0x110] sm:$0xff] %vm711_vm2, %v883_v43  ;;  %712 = vst.msk [vmem:[%s1567_s4] sm:$0xff] %vm711_vm2, %v456_v44 }
  0xd1   :  { %v584_v45 = vpop.f32.mrf.mxu1  ;;  %v852_v46 = vpop.f32.mrf.mxu0 }
  0xd2   :  { %744 = vst.msk [vmem:[%s1567_s4 + $0x100] sm:$0xff] %vm711_vm2, %v584_v45  ;;  %715 = vst.msk [vmem:[%s1567_s4 + $0x18] sm:$0xff] %vm711_vm2, %v852_v46 }
  0xd3   :  { %v884_v47 = vpop.f32.mrf.mxu1  ;;  %v459_v48 = vpop.f32.mrf.mxu0 }
  0xd4   :  { %747 = vst.msk [vmem:[%s1567_s4 + $0x118] sm:$0xff] %vm711_vm2, %v884_v47  ;;  %713 = vst.msk [vmem:[%s1567_s4 + $0x8] sm:$0xff] %vm711_vm2, %v459_v48 }
  0xd5   :  { %v587_v49 = vpop.f32.mrf.mxu1  ;;  %v855_v50 = vpop.f32.mrf.mxu0 }
  0xd6   :  { %745 = vst.msk [vmem:[%s1567_s4 + $0x108] sm:$0xff] %vm711_vm2, %v587_v49  ;;  %718 = vst.msk [vmem:[%s1567_s4 + $0x30] sm:$0xff] %vm711_vm2, %v855_v50 }
  0xd7   :  { %v887_v51 = vpop.f32.mrf.mxu1  ;;  %v472_v52 = vpop.f32.mrf.mxu0 }
  0xd8   :  { %750 = vst.msk [vmem:[%s1567_s4 + $0x130] sm:$0xff] %vm711_vm2, %v887_v51  ;;  %716 = vst.msk [vmem:[%s1567_s4 + $0x20] sm:$0xff] %vm711_vm2, %v472_v52 }
  0xd9   :  { %v600_v53 = vpop.f32.mrf.mxu1  ;;  %v856_v54 = vpop.f32.mrf.mxu0 }
  0xda   :  { %748 = vst.msk [vmem:[%s1567_s4 + $0x120] sm:$0xff] %vm711_vm2, %v600_v53  ;;  %719 = vst.msk [vmem:[%s1567_s4 + $0x38] sm:$0xff] %vm711_vm2, %v856_v54 }
  0xdb   :  { %v888_v55 = vpop.f32.mrf.mxu1  ;;  %v475_v56 = vpop.f32.mrf.mxu0 }
  0xdc   :  { %751 = vst.msk [vmem:[%s1567_s4 + $0x138] sm:$0xff] %vm711_vm2, %v888_v55  ;;  %717 = vst.msk [vmem:[%s1567_s4 + $0x28] sm:$0xff] %vm711_vm2, %v475_v56 }
  0xdd   :  { %v603_v57 = vpop.f32.mrf.mxu1  ;;  %v859_v58 = vpop.f32.mrf.mxu0 }
  0xde   :  { %749 = vst.msk [vmem:[%s1567_s4 + $0x128] sm:$0xff] %vm711_vm2, %v603_v57  ;;  %722 = vst.msk [vmem:[%s1567_s4 + $0x50] sm:$0xff] %vm711_vm2, %v859_v58 }
  0xdf   :  { %v891_v59 = vpop.f32.mrf.mxu1  ;;  %v488_v60 = vpop.f32.mrf.mxu0 }
  0xe0   :  { %754 = vst.msk [vmem:[%s1567_s4 + $0x150] sm:$0xff] %vm711_vm2, %v891_v59  ;;  %720 = vst.msk [vmem:[%s1567_s4 + $0x40] sm:$0xff] %vm711_vm2, %v488_v60 }
  0xe1   :  { %v616_v61 = vpop.f32.mrf.mxu1  ;;  %v860_v62 = vpop.f32.mrf.mxu0 }
  0xe2   :  { %752 = vst.msk [vmem:[%s1567_s4 + $0x140] sm:$0xff] %vm711_vm2, %v616_v61  ;;  %723 = vst.msk [vmem:[%s1567_s4 + $0x58] sm:$0xff] %vm711_vm2, %v860_v62 }
  0xe3   :  { %v892_v63 = vpop.f32.mrf.mxu1  ;;  %v491_v0 = vpop.f32.mrf.mxu0 }
  0xe4   :  { %755 = vst.msk [vmem:[%s1567_s4 + $0x158] sm:$0xff] %vm711_vm2, %v892_v63  ;;  %721 = vst.msk [vmem:[%s1567_s4 + $0x48] sm:$0xff] %vm711_vm2, %v491_v0 }
  0xe5   :  { %v619_v1 = vpop.f32.mrf.mxu1  ;;  %v863_v2 = vpop.f32.mrf.mxu0 }
  0xe6   :  { %753 = vst.msk [vmem:[%s1567_s4 + $0x148] sm:$0xff] %vm711_vm2, %v619_v1  ;;  %726 = vst.msk [vmem:[%s1567_s4 + $0x70] sm:$0xff] %vm711_vm2, %v863_v2 }
  0xe7   :  { %v895_v3 = vpop.f32.mrf.mxu1  ;;  %v504_v6 = vpop.f32.mrf.mxu0 }
  0xe8   :  { %758 = vst.msk [vmem:[%s1567_s4 + $0x170] sm:$0xff] %vm711_vm2, %v895_v3  ;;  %724 = vst.msk [vmem:[%s1567_s4 + $0x60] sm:$0xff] %vm711_vm2, %v504_v6 }
  0xe9   :  { %v632_v7 = vpop.f32.mrf.mxu1  ;;  %v864_v8 = vpop.f32.mrf.mxu0 }
  0xea   :  { %756 = vst.msk [vmem:[%s1567_s4 + $0x160] sm:$0xff] %vm711_vm2, %v632_v7  ;;  %727 = vst.msk [vmem:[%s1567_s4 + $0x78] sm:$0xff] %vm711_vm2, %v864_v8 }
  0xeb   :  { %v896_v9 = vpop.f32.mrf.mxu1  ;;  %v507_v10 = vpop.f32.mrf.mxu0 }
  0xec   :  { %759 = vst.msk [vmem:[%s1567_s4 + $0x178] sm:$0xff] %vm711_vm2, %v896_v9  ;;  %725 = vst.msk [vmem:[%s1567_s4 + $0x68] sm:$0xff] %vm711_vm2, %v507_v10 }
  0xed   :  { %v635_v11 = vpop.f32.mrf.mxu1  ;;  %v867_v12 = vpop.f32.mrf.mxu0 }
  0xee   :  { %757 = vst.msk [vmem:[%s1567_s4 + $0x168] sm:$0xff] %vm711_vm2, %v635_v11  ;;  %730 = vst.msk [vmem:[%s1567_s4 + $0x90] sm:$0xff] %vm711_vm2, %v867_v12 }
  0xef   :  { %v899_v13 = vpop.f32.mrf.mxu1  ;;  %v520_v14 = vpop.f32.mrf.mxu0 }
  0xf0   :  { %762 = vst.msk [vmem:[%s1567_s4 + $0x190] sm:$0xff] %vm711_vm2, %v899_v13  ;;  %728 = vst.msk [vmem:[%s1567_s4 + $0x80] sm:$0xff] %vm711_vm2, %v520_v14 }
  0xf1   :  { %v648_v15 = vpop.f32.mrf.mxu1  ;;  %v868_v16 = vpop.f32.mrf.mxu0 }
  0xf2   :  { %760 = vst.msk [vmem:[%s1567_s4 + $0x180] sm:$0xff] %vm711_vm2, %v648_v15  ;;  %731 = vst.msk [vmem:[%s1567_s4 + $0x98] sm:$0xff] %vm711_vm2, %v868_v16 }
  0xf3   :  { %v900_v17 = vpop.f32.mrf.mxu1  ;;  %v523_v18 = vpop.f32.mrf.mxu0 }
  0xf4   :  { %763 = vst.msk [vmem:[%s1567_s4 + $0x198] sm:$0xff] %vm711_vm2, %v900_v17  ;;  %729 = vst.msk [vmem:[%s1567_s4 + $0x88] sm:$0xff] %vm711_vm2, %v523_v18 }
  0xf5   :  { %v651_v19 = vpop.f32.mrf.mxu1  ;;  %v871_v20 = vpop.f32.mrf.mxu0 }
  0xf6   :  { %761 = vst.msk [vmem:[%s1567_s4 + $0x188] sm:$0xff] %vm711_vm2, %v651_v19  ;;  %734 = vst.msk [vmem:[%s1567_s4 + $0xb0] sm:$0xff] %vm711_vm2, %v871_v20 }
  0xf7   :  { %v903_v21 = vpop.f32.mrf.mxu1  ;;  %v536_v22 = vpop.f32.mrf.mxu0 }
  0xf8   :  { %766 = vst.msk [vmem:[%s1567_s4 + $0x1b0] sm:$0xff] %vm711_vm2, %v903_v21  ;;  %732 = vst.msk [vmem:[%s1567_s4 + $0xa0] sm:$0xff] %vm711_vm2, %v536_v22 }
  0xf9   :  { %v664_v23 = vpop.f32.mrf.mxu1  ;;  %v872_v24 = vpop.f32.mrf.mxu0 }
  0xfa   :  { %764 = vst.msk [vmem:[%s1567_s4 + $0x1a0] sm:$0xff] %vm711_vm2, %v664_v23  ;;  %735 = vst.msk [vmem:[%s1567_s4 + $0xb8] sm:$0xff] %vm711_vm2, %v872_v24 }
  0xfb   :  { %v904_v25 = vpop.f32.mrf.mxu1  ;;  %v539_v26 = vpop.f32.mrf.mxu0 }
  0xfc   :  { %767 = vst.msk [vmem:[%s1567_s4 + $0x1b8] sm:$0xff] %vm711_vm2, %v904_v25  ;;  %733 = vst.msk [vmem:[%s1567_s4 + $0xa8] sm:$0xff] %vm711_vm2, %v539_v26 }
  0xfd   :  { %v667_v27 = vpop.f32.mrf.mxu1  ;;  %v875_v28 = vpop.f32.mrf.mxu0 }
  0xfe   :  { %765 = vst.msk [vmem:[%s1567_s4 + $0x1a8] sm:$0xff] %vm711_vm2, %v667_v27  ;;  %738 = vst.msk [vmem:[%s1567_s4 + $0xd0] sm:$0xff] %vm711_vm2, %v875_v28 }
  0xff   :  { %v907_v29 = vpop.f32.mrf.mxu1  ;;  %v552_v30 = vpop.f32.mrf.mxu0 }
 0x100   :  { %770 = vst.msk [vmem:[%s1567_s4 + $0x1d0] sm:$0xff] %vm711_vm2, %v907_v29  ;;  %736 = vst.msk [vmem:[%s1567_s4 + $0xc0] sm:$0xff] %vm711_vm2, %v552_v30 }
 0x101   :  { %v680_v31 = vpop.f32.mrf.mxu1  ;;  %v876_v32 = vpop.f32.mrf.mxu0 }
 0x102   :  { %768 = vst.msk [vmem:[%s1567_s4 + $0x1c0] sm:$0xff] %vm711_vm2, %v680_v31  ;;  %739 = vst.msk [vmem:[%s1567_s4 + $0xd8] sm:$0xff] %vm711_vm2, %v876_v32 }
 0x103   :  { %v908_v33 = vpop.f32.mrf.mxu1  ;;  %v555_v34 = vpop.f32.mrf.mxu0 }
 0x104   :  { %771 = vst.msk [vmem:[%s1567_s4 + $0x1d8] sm:$0xff] %vm711_vm2, %v908_v33  ;;  %737 = vst.msk [vmem:[%s1567_s4 + $0xc8] sm:$0xff] %vm711_vm2, %v555_v34 }
 0x105   :  { %v683_v35 = vpop.f32.mrf.mxu1  ;;  %v879_v36 = vpop.f32.mrf.mxu0 }
 0x106   :  { %769 = vst.msk [vmem:[%s1567_s4 + $0x1c8] sm:$0xff] %vm711_vm2, %v683_v35  ;;  %742 = vst.msk [vmem:[%s1567_s4 + $0xf0] sm:$0xff] %vm711_vm2, %v879_v36 }
 0x107   :  { %v911_v37 = vpop.f32.mrf.mxu1  ;;  %v568_v38 = vpop.f32.mrf.mxu0 }
 0x108   :  { %774 = vst.msk [vmem:[%s1567_s4 + $0x1f0] sm:$0xff] %vm711_vm2, %v911_v37  ;;  %740 = vst.msk [vmem:[%s1567_s4 + $0xe0] sm:$0xff] %vm711_vm2, %v568_v38 }
 0x109   :  { %v696_v39 = vpop.f32.mrf.mxu1  ;;  %v880_v40 = vpop.f32.mrf.mxu0 }
 0x10a   :  { %772 = vst.msk [vmem:[%s1567_s4 + $0x1e0] sm:$0xff] %vm711_vm2, %v696_v39  ;;  %743 = vst.msk [vmem:[%s1567_s4 + $0xf8] sm:$0xff] %vm711_vm2, %v880_v40 }
 0x10b   :  { %v912_v41 = vpop.f32.mrf.mxu1  ;;  %v571_v4 = vpop.f32.mrf.mxu0 }
 0x10c   :  { %775 = vst.msk [vmem:[%s1567_s4 + $0x1f8] sm:$0xff] %vm711_vm2, %v912_v41  ;;  %741 = vst.msk [vmem:[%s1567_s4 + $0xe8] sm:$0xff] %vm711_vm2, %v571_v4 }
 0x10d   :  { %v699_v42 = vpop.f32.mrf.mxu1 }
 0x10e   :  { %773 = vst.msk [vmem:[%s1567_s4 + $0x1e8] sm:$0xff] %vm711_vm2, %v699_v42 }

// kernel: preact_bottleneck_forward.3
= control target key start
LH: loop header
LB: loop body
LE: loop exit
PB: predicated region body
PF: predicated region fallthrough
CT: control target
= control target key end

     0   :  { %vm424_vm0 = vcmask 1041408   ;;  %vm327_vm1 = vcmask 31744   ;;  %vm1179_vm2 = vcmask 27648   ;;  %s2309_s3 = inlined_call_operand.vmem [shape: bf16[4,4], index: 3, kind: input, shape index: {}]   ;;  %s2310_s0 = inlined_call_operand.vmem [shape: f32[512,4], index: 0, kind: input, shape index: {}]   ;;  %s2311_s1 = inlined_call_operand.vmem [shape: f32[1,4], index: 1, kind: input, shape index: {}]   ;;  %s2312_s2 = inlined_call_operand.vmem [shape: f32[1,4], index: 2, kind: input, shape index: {}]   ;;  %s2313_s4 = inlined_call_operand.vmem [shape: f32[1,4], index: 4, kind: input, shape index: {}]   ;;  %s2314_s5 = inlined_call_operand.vmem [shape: f32[1,4], index: 5, kind: input, shape index: {}]   ;;  %s2315_s6 = inlined_call_operand.vmem [shape: bf16[512,4], index: 6, kind: output, shape index: {}]  }
   0x1   :  { %v326_v0 = vld [vmem:[%s2309_s3] sm:$0x3]  ;;  %v25_v2 = vld [vmem:[%s2310_s0 + $0x8] sm:$0xff]  ;;  %v26_v11 = vld [vmem:[%s2310_s0 + $0x10] sm:$0xff] }
   0x2   :  { %v24_v1 = vld [vmem:[%s2310_s0] sm:$0xff]  ;;  %1513 = vmatprep.subr.msk.bf16.mxu0 %vm424_vm0, %v326_v0  ;;  %1514 = vmatprep.subr.msk.bf16.mxu1 %vm424_vm0, %v326_v0  ;;  %v426_v3 = vsel %vm424_vm0, %v326_v0, 0  ;;  %v57_v9 = vld [vmem:[%s2310_s0 + $0x108] sm:$0xff]  ;;  %v27_v12 = vld [vmem:[%s2310_s0 + $0x18] sm:$0xff] }
   0x3   :  { %v1562_v4 = vld [vmem:[%s2311_s1] ss:$0 sm:$0xff]  ;;  %1446 = vmatpush3.bf16.msra.mxu0 %v426_v3  ;;  %1512 = vmatpush3.bf16.msra.mxu1 %v426_v3  ;;  %v58_v16 = vld [vmem:[%s2310_s0 + $0x110] sm:$0xff]  ;;  %v59_v17 = vld [vmem:[%s2310_s0 + $0x118] sm:$0xff] }
   0x4   :  { %v1567_v5 = vld [vmem:[%s2312_s2] ss:$0 sm:$0xff]  ;;  %v95_v7 = vmul.f32 %v1562_v4, %v24_v1  ;;  %v96_v8 = vmul.f32 %v1562_v4, %v25_v2  ;;  %v128_v13 = vmul.f32 %v1562_v4, %v57_v9  ;;  %v97_v14 = vmul.f32 %v1562_v4, %v26_v11  ;;  %v29_v27 = vld [vmem:[%s2310_s0 + $0x28] sm:$0xff]  ;;  %v30_v38 = vld [vmem:[%s2310_s0 + $0x30] sm:$0xff] }
   0x5   :  { %v56_v6 = vld [vmem:[%s2310_s0 + $0x100] sm:$0xff]  ;;  %v98_v15 = vmul.f32 %v1562_v4, %v27_v12  ;;  %v129_v21 = vmul.f32 %v1562_v4, %v58_v16  ;;  %v130_v25 = vmul.f32 %v1562_v4, %v59_v17  ;;  %v61_v37 = vld [vmem:[%s2310_s0 + $0x128] sm:$0xff]  ;;  %v100_v42 = vmul.f32 %v1562_v4, %v29_v27  ;;  %v31_v43 = vld [vmem:[%s2310_s0 + $0x38] sm:$0xff] }
   0x6   :  { %v127_v10 = vmul.f32 %v1562_v4, %v56_v6  ;;  %v166_v18 = vadd.f32 %v1567_v5, %v95_v7  ;;  %v167_v19 = vadd.f32 %v1567_v5, %v96_v8  ;;  %v199_v22 = vadd.f32 %v1567_v5, %v128_v13  ;;  %v28_v26 = vld [vmem:[%s2310_s0 + $0x20] sm:$0xff]  ;;  %v62_v52 = vld [vmem:[%s2310_s0 + $0x130] sm:$0xff]  ;;  %v63_v53 = vld [vmem:[%s2310_s0 + $0x138] sm:$0xff] }
   0x7   :  { %v168_v23 = vadd.f32 %v1567_v5, %v97_v14  ;;  %v169_v24 = vadd.f32 %v1567_v5, %v98_v15  ;;  %v200_v31 = vadd.f32 %v1567_v5, %v129_v21  ;;  %v60_v32 = vld [vmem:[%s2310_s0 + $0x120] sm:$0xff]  ;;  %v201_v36 = vadd.f32 %v1567_v5, %v130_v25  ;;  %v33_v62 = vld [vmem:[%s2310_s0 + $0x48] sm:$0xff]  ;;  %v34_v15 = vld [vmem:[%s2310_s0 + $0x50] sm:$0xff] }
   0x8   :  { %v198_v20 = vadd.f32 %v1567_v5, %v127_v10  ;;  %v230_v28 = vmax.f32 %v166_v18, 0.0  ;;  %v231_v29 = vmax.f32 %v167_v19, 0.0  ;;  %v263_v33 = vmax.f32 %v199_v22, 0.0  ;;  %v32_v57 = vld [vmem:[%s2310_s0 + $0x40] sm:$0xff]  ;;  %v65_v6 = vld [vmem:[%s2310_s0 + $0x148] sm:$0xff]  ;;  %v66_v21 = vld [vmem:[%s2310_s0 + $0x150] sm:$0xff] }
   0x9   :  { %v232_v34 = vmax.f32 %v168_v23, 0.0  ;;  %v233_v35 = vmax.f32 %v169_v24, 0.0  ;;  %v264_v40 = vmax.f32 %v200_v31, 0.0  ;;  %v99_v41 = vmul.f32 %v1562_v4, %v28_v26  ;;  %v64_v3 = vld [vmem:[%s2310_s0 + $0x140] sm:$0xff]  ;;  %v67_v26 = vld [vmem:[%s2310_s0 + $0x158] sm:$0xff] }
   0xa   :  { %v262_v30 = vmax.f32 %v198_v20, 0.0  ;;  %v294_v39 = vpack.c.bf16 %v231_v29, %v230_v28  ;;  %v265_v46 = vmax.f32 %v201_v36, 0.0  ;;  %v131_v47 = vmul.f32 %v1562_v4, %v60_v32  ;;  %v35_v20 = vld [vmem:[%s2310_s0 + $0x58] sm:$0xff]  ;;  %v36_v31 = vld [vmem:[%s2310_s0 + $0x60] sm:$0xff]  ;;  %v37_v36 = vld [vmem:[%s2310_s0 + $0x68] sm:$0xff] }
   0xb   :  { %v295_v45 = vpack.c.bf16 %v233_v35, %v232_v34  ;;  %v170_v48 = vadd.f32 %v1567_v5, %v99_v41  ;;  %v171_v49 = vadd.f32 %v1567_v5, %v100_v42  ;;  %v132_v50 = vmul.f32 %v1562_v4, %v61_v37  ;;  %v68_v41 = vld [vmem:[%s2310_s0 + $0x160] sm:$0xff] }
   0xc   :  { %v310_v44 = vpack.c.bf16 %v263_v33, %v262_v30  ;;  %1447 = vmatprep.mubr.msk.bf16.mxu0 %vm327_vm1, %v294_v39  ;;  %v101_v51 = vmul.f32 %v1562_v4, %v30_v38  ;;  %v311_v54 = vpack.c.bf16 %v265_v46, %v264_v40  ;;  %v202_v55 = vadd.f32 %v1567_v5, %v131_v47  ;;  %v69_v46 = vld [vmem:[%s2310_s0 + $0x168] sm:$0xff]  ;;  %v38_v47 = vld [vmem:[%s2310_s0 + $0x70] sm:$0xff] }
   0xd   :  { %1448 = vmatmul.mubr.msk.bf16.vlgmr.msra.gmra.mxu0 %vm327_vm1, %v295_v45  ;;  %v102_v56 = vmul.f32 %v1562_v4, %v31_v43  ;;  %v234_v58 = vmax.f32 %v170_v48, 0.0  ;;  %v235_v59 = vmax.f32 %v171_v49, 0.0  ;;  %v203_v60 = vadd.f32 %v1567_v5, %v132_v50 }
   0xe   :  { %1479 = vmatprep.mubr.msk.bf16.mxu1 %vm327_vm1, %v310_v44  ;;  %v172_v61 = vadd.f32 %v1567_v5, %v101_v51  ;;  %v266_v63 = vmax.f32 %v202_v55, 0.0  ;;  %v133_v1 = vmul.f32 %v1562_v4, %v62_v52  ;;  %v134_v2 = vmul.f32 %v1562_v4, %v63_v53  ;;  %v39_v52 = vld [vmem:[%s2310_s0 + $0x78] sm:$0xff] }
   0xf   :  { %1480 = vmatmul.mubr.msk.bf16.vlgmr.msra.gmra.mxu1 %vm327_vm1, %v311_v54  ;;  %v173_v0 = vadd.f32 %v1567_v5, %v102_v56  ;;  %v296_v7 = vpack.c.bf16 %v235_v59, %v234_v58  ;;  %v267_v8 = vmax.f32 %v203_v60, 0.0  ;;  %v103_v10 = vmul.f32 %v1562_v4, %v32_v57 }
  0x10   :  { %v236_v9 = vmax.f32 %v172_v61, 0.0  ;;  %v204_v12 = vadd.f32 %v1567_v5, %v133_v1  ;;  %v205_v13 = vadd.f32 %v1567_v5, %v134_v2  ;;  %v104_v14 = vmul.f32 %v1562_v4, %v33_v62  ;;  %v70_v61 = vld [vmem:[%s2310_s0 + $0x170] sm:$0xff]  ;;  %v71_v62 = vld [vmem:[%s2310_s0 + $0x178] sm:$0xff] }
  0x11   :  { %v237_v11 = vmax.f32 %v173_v0, 0.0  ;;  %1451 = vmatprep.mubr.msk.bf16.mxu0 %vm327_vm1, %v296_v7  ;;  %v312_v16 = vpack.c.bf16 %v267_v8, %v266_v63  ;;  %v174_v17 = vadd.f32 %v1567_v5, %v103_v10  ;;  %v135_v18 = vmul.f32 %v1562_v4, %v64_v3  ;;  %v40_v3 = vld [vmem:[%s2310_s0 + $0x80] sm:$0xff]  ;;  %v41_v10 = vld [vmem:[%s2310_s0 + $0x88] sm:$0xff] }
  0x12   :  { %v136_v19 = vmul.f32 %v1562_v4, %v65_v6  ;;  %v268_v23 = vmax.f32 %v204_v12, 0.0  ;;  %v269_v24 = vmax.f32 %v205_v13, 0.0  ;;  %v175_v25 = vadd.f32 %v1567_v5, %v104_v14 }
  0x13   :  { %v297_v22 = vpack.c.bf16 %v237_v11, %v236_v9  ;;  %1483 = vmatprep.mubr.msk.bf16.mxu1 %vm327_vm1, %v312_v16  ;;  %v238_v27 = vmax.f32 %v174_v17, 0.0  ;;  %v206_v28 = vadd.f32 %v1567_v5, %v135_v18  ;;  %v105_v30 = vmul.f32 %v1562_v4, %v34_v15  ;;  %v72_v15 = vld [vmem:[%s2310_s0 + $0x180] sm:$0xff]  ;;  %v73_v16 = vld [vmem:[%s2310_s0 + $0x188] sm:$0xff] }
  0x14   :  { %v207_v29 = vadd.f32 %v1567_v5, %v136_v19  ;;  %v313_v32 = vpack.c.bf16 %v269_v24, %v268_v23  ;;  %v239_v33 = vmax.f32 %v175_v25, 0.0  ;;  %v106_v34 = vmul.f32 %v1562_v4, %v35_v20  ;;  %v42_v25 = vld [vmem:[%s2310_s0 + $0x90] sm:$0xff] }
  0x15   :  { %1452 = vmatmul.mubr.msk.bf16.gmra.mxu0 %vm327_vm1, %v297_v22  ;;  %v137_v35 = vmul.f32 %v1562_v4, %v66_v21  ;;  %v270_v37 = vmax.f32 %v206_v28, 0.0  ;;  %v176_v39 = vadd.f32 %v1567_v5, %v105_v30  ;;  %v138_v40 = vmul.f32 %v1562_v4, %v67_v26  ;;  %v43_v30 = vld [vmem:[%s2310_s0 + $0x98] sm:$0xff] }
  0x16   :  { %v271_v38 = vmax.f32 %v207_v29, 0.0  ;;  %v298_v42 = vpack.c.bf16 %v239_v33, %v238_v27  ;;  %v177_v43 = vadd.f32 %v1567_v5, %v106_v34  ;;  %v107_v45 = vmul.f32 %v1562_v4, %v36_v31  ;;  %v74_v31 = vld [vmem:[%s2310_s0 + $0x190] sm:$0xff] }
  0x17   :  { %1484 = vmatmul.mubr.msk.bf16.gmra.mxu1 %vm327_vm1, %v313_v32  ;;  %v208_v44 = vadd.f32 %v1567_v5, %v137_v35  ;;  %v240_v49 = vmax.f32 %v176_v39, 0.0  ;;  %v209_v50 = vadd.f32 %v1567_v5, %v138_v40  ;;  %v108_v51 = vmul.f32 %v1562_v4, %v37_v36  ;;  %v75_v36 = vld [vmem:[%s2310_s0 + $0x198] sm:$0xff] }
  0x18   :  { %v314_v48 = vpack.c.bf16 %v271_v38, %v270_v37  ;;  %1455 = vmatprep.mubr.msk.bf16.mxu0 %vm327_vm1, %v298_v42  ;;  %v241_v53 = vmax.f32 %v177_v43, 0.0  ;;  %v178_v55 = vadd.f32 %v1567_v5, %v107_v45  ;;  %v139_v56 = vmul.f32 %v1562_v4, %v68_v41  ;;  %v44_v41 = vld [vmem:[%s2310_s0 + $0xa0] sm:$0xff] }
  0x19   :  { %v272_v54 = vmax.f32 %v208_v44, 0.0  ;;  %v273_v57 = vmax.f32 %v209_v50, 0.0  ;;  %v179_v58 = vadd.f32 %v1567_v5, %v108_v51  ;;  %v140_v59 = vmul.f32 %v1562_v4, %v69_v46  ;;  %v45_v46 = vld [vmem:[%s2310_s0 + $0xa8] sm:$0xff]  ;;  %v76_v51 = vld [vmem:[%s2310_s0 + $0x1a0] sm:$0xff] }
  0x1a   :  { %1487 = vmatprep.mubr.msk.bf16.mxu1 %vm327_vm1, %v314_v48  ;;  %v109_v60 = vmul.f32 %v1562_v4, %v38_v47  ;;  %v299_v63 = vpack.c.bf16 %v241_v53, %v240_v49  ;;  %v242_v0 = vmax.f32 %v178_v55, 0.0  ;;  %v210_v1 = vadd.f32 %v1567_v5, %v139_v56  ;;  %v77_v56 = vld [vmem:[%s2310_s0 + $0x1a8] sm:$0xff] }
  0x1b   :  { %v110_v2 = vmul.f32 %v1562_v4, %v39_v52  ;;  %v315_v6 = vpack.c.bf16 %v273_v57, %v272_v54  ;;  %v243_v7 = vmax.f32 %v179_v58, 0.0  ;;  %v211_v8 = vadd.f32 %v1567_v5, %v140_v59  ;;  %v46_v57 = vld [vmem:[%s2310_s0 + $0xb0] sm:$0xff] }
  0x1c   :  { %v180_v9 = vadd.f32 %v1567_v5, %v109_v60  ;;  %v274_v11 = vmax.f32 %v210_v1, 0.0  ;;  %v141_v13 = vmul.f32 %v1562_v4, %v70_v61  ;;  %v142_v14 = vmul.f32 %v1562_v4, %v71_v62  ;;  %v47_v62 = vld [vmem:[%s2310_s0 + $0xb8] sm:$0xff] }
  0x1d   :  { %1456 = vmatmul.mubr.msk.bf16.gmra.mxu0 %vm327_vm1, %v299_v63  ;;  %v181_v12 = vadd.f32 %v1567_v5, %v110_v2  ;;  %v300_v17 = vpack.c.bf16 %v243_v7, %v242_v0  ;;  %v275_v18 = vmax.f32 %v211_v8, 0.0  ;;  %v111_v20 = vmul.f32 %v1562_v4, %v40_v3 }
  0x1e   :  { %v244_v19 = vmax.f32 %v180_v9, 0.0  ;;  %v212_v22 = vadd.f32 %v1567_v5, %v141_v13  ;;  %v213_v23 = vadd.f32 %v1567_v5, %v142_v14  ;;  %v112_v24 = vmul.f32 %v1562_v4, %v41_v10  ;;  %v78_v9 = vld [vmem:[%s2310_s0 + $0x1b0] sm:$0xff]  ;;  %v79_v10 = vld [vmem:[%s2310_s0 + $0x1b8] sm:$0xff] }
  0x1f   :  { %1488 = vmatmul.mubr.msk.bf16.gmra.mxu1 %vm327_vm1, %v315_v6  ;;  %v245_v21 = vmax.f32 %v181_v12, 0.0  ;;  %1459 = vmatprep.mubr.msk.bf16.mxu0 %vm327_vm1, %v300_v17  ;;  %v316_v26 = vpack.c.bf16 %v275_v18, %v274_v11  ;;  %v182_v27 = vadd.f32 %v1567_v5, %v111_v20  ;;  %v143_v28 = vmul.f32 %v1562_v4, %v72_v15  ;;  %v48_v15 = vld [vmem:[%s2310_s0 + $0xc0] sm:$0xff]  ;;  %v49_v20 = vld [vmem:[%s2310_s0 + $0xc8] sm:$0xff] }
  0x20   :  { %v144_v29 = vmul.f32 %v1562_v4, %v73_v16  ;;  %v276_v33 = vmax.f32 %v212_v22, 0.0  ;;  %v277_v34 = vmax.f32 %v213_v23, 0.0  ;;  %v183_v35 = vadd.f32 %v1567_v5, %v112_v24 }
  0x21   :  { %v301_v32 = vpack.c.bf16 %v245_v21, %v244_v19  ;;  %1491 = vmatprep.mubr.msk.bf16.mxu1 %vm327_vm1, %v316_v26  ;;  %v246_v37 = vmax.f32 %v182_v27, 0.0  ;;  %v214_v38 = vadd.f32 %v1567_v5, %v143_v28  ;;  %v113_v40 = vmul.f32 %v1562_v4, %v42_v25  ;;  %v80_v25 = vld [vmem:[%s2310_s0 + $0x1c0] sm:$0xff]  ;;  %v81_v26 = vld [vmem:[%s2310_s0 + $0x1c8] sm:$0xff] }
  0x22   :  { %v215_v39 = vadd.f32 %v1567_v5, %v144_v29  ;;  %v317_v42 = vpack.c.bf16 %v277_v34, %v276_v33  ;;  %v247_v43 = vmax.f32 %v183_v35, 0.0  ;;  %v114_v44 = vmul.f32 %v1562_v4, %v43_v30  ;;  %v50_v35 = vld [vmem:[%s2310_s0 + $0xd0] sm:$0xff] }
  0x23   :  { %v145_v45 = vmul.f32 %v1562_v4, %v74_v31  ;;  %v278_v47 = vmax.f32 %v214_v38, 0.0  ;;  %v184_v49 = vadd.f32 %v1567_v5, %v113_v40  ;;  %v146_v50 = vmul.f32 %v1562_v4, %v75_v36  ;;  %v51_v40 = vld [vmem:[%s2310_s0 + $0xd8] sm:$0xff] }
  0x24   :  { %v279_v48 = vmax.f32 %v215_v39, 0.0  ;;  %v302_v52 = vpack.c.bf16 %v247_v43, %v246_v37  ;;  %v185_v53 = vadd.f32 %v1567_v5, %v114_v44  ;;  %v115_v55 = vmul.f32 %v1562_v4, %v44_v41  ;;  %v82_v41 = vld [vmem:[%s2310_s0 + $0x1d0] sm:$0xff] }
  0x25   :  { %1460 = vmatmul.mubr.msk.bf16.gmra.mxu0 %vm327_vm1, %v301_v32  ;;  %v216_v54 = vadd.f32 %v1567_v5, %v145_v45  ;;  %v248_v59 = vmax.f32 %v184_v49, 0.0  ;;  %v217_v60 = vadd.f32 %v1567_v5, %v146_v50  ;;  %v116_v61 = vmul.f32 %v1562_v4, %v45_v46  ;;  %v83_v46 = vld [vmem:[%s2310_s0 + $0x1d8] sm:$0xff] }
  0x26   :  { %v318_v58 = vpack.c.bf16 %v279_v48, %v278_v47  ;;  %1463 = vmatprep.mubr.msk.bf16.mxu0 %vm327_vm1, %v302_v52  ;;  %v249_v63 = vmax.f32 %v185_v53, 0.0  ;;  %v186_v1 = vadd.f32 %v1567_v5, %v115_v55  ;;  %v147_v2 = vmul.f32 %v1562_v4, %v76_v51  ;;  %v52_v51 = vld [vmem:[%s2310_s0 + $0xe0] sm:$0xff] }
  0x27   :  { %1492 = vmatmul.mubr.msk.bf16.gmra.mxu1 %vm327_vm1, %v317_v42  ;;  %v280_v0 = vmax.f32 %v216_v54, 0.0  ;;  %v281_v3 = vmax.f32 %v217_v60, 0.0  ;;  %v187_v6 = vadd.f32 %v1567_v5, %v116_v61  ;;  %v148_v7 = vmul.f32 %v1562_v4, %v77_v56  ;;  %v53_v56 = vld [vmem:[%s2310_s0 + $0xe8] sm:$0xff]  ;;  %v84_v61 = vld [vmem:[%s2310_s0 + $0x1e0] sm:$0xff] }
  0x28   :  { %1495 = vmatprep.mubr.msk.bf16.mxu1 %vm327_vm1, %v318_v58  ;;  %v117_v8 = vmul.f32 %v1562_v4, %v46_v57  ;;  %v303_v11 = vpack.c.bf16 %v249_v63, %v248_v59  ;;  %v250_v12 = vmax.f32 %v186_v1, 0.0  ;;  %v218_v13 = vadd.f32 %v1567_v5, %v147_v2  ;;  %v85_v2 = vld [vmem:[%s2310_s0 + $0x1e8] sm:$0xff] }
  0x29   :  { %v118_v14 = vmul.f32 %v1562_v4, %v47_v62  ;;  %v319_v16 = vpack.c.bf16 %v281_v3, %v280_v0  ;;  %v251_v17 = vmax.f32 %v187_v6, 0.0  ;;  %v219_v18 = vadd.f32 %v1567_v5, %v148_v7  ;;  %v54_v3 = vld [vmem:[%s2310_s0 + $0xf0] sm:$0xff] }
  0x2a   :  { %v188_v19 = vadd.f32 %v1567_v5, %v117_v8  ;;  %v282_v21 = vmax.f32 %v218_v13, 0.0  ;;  %v149_v23 = vmul.f32 %v1562_v4, %v78_v9  ;;  %v150_v24 = vmul.f32 %v1562_v4, %v79_v10  ;;  %v55_v10 = vld [vmem:[%s2310_s0 + $0xf8] sm:$0xff] }
  0x2b   :  { %v189_v22 = vadd.f32 %v1567_v5, %v118_v14  ;;  %v304_v27 = vpack.c.bf16 %v251_v17, %v250_v12  ;;  %v283_v28 = vmax.f32 %v219_v18, 0.0  ;;  %v119_v30 = vmul.f32 %v1562_v4, %v48_v15  ;;  %v86_v18 = vld [vmem:[%s2310_s0 + $0x1f0] sm:$0xff] }
  0x2c   :  { %v252_v29 = vmax.f32 %v188_v19, 0.0  ;;  %v220_v32 = vadd.f32 %v1567_v5, %v149_v23  ;;  %v221_v33 = vadd.f32 %v1567_v5, %v150_v24  ;;  %v120_v34 = vmul.f32 %v1562_v4, %v49_v20  ;;  %v87_v19 = vld [vmem:[%s2310_s0 + $0x1f8] sm:$0xff] }
  0x2d   :  { %1464 = vmatmul.mubr.msk.bf16.gmra.mxu0 %vm327_vm1, %v303_v11  ;;  %v253_v31 = vmax.f32 %v189_v22, 0.0  ;;  %v320_v36 = vpack.c.bf16 %v283_v28, %v282_v21  ;;  %v190_v37 = vadd.f32 %v1567_v5, %v119_v30  ;;  %v151_v38 = vmul.f32 %v1562_v4, %v80_v25 }
  0x2e   :  { %1467 = vmatprep.mubr.msk.bf16.mxu0 %vm327_vm1, %v304_v27  ;;  %v152_v39 = vmul.f32 %v1562_v4, %v81_v26  ;;  %v284_v43 = vmax.f32 %v220_v32, 0.0  ;;  %v285_v44 = vmax.f32 %v221_v33, 0.0  ;;  %v191_v45 = vadd.f32 %v1567_v5, %v120_v34 }
  0x2f   :  { %1496 = vmatmul.mubr.msk.bf16.gmra.mxu1 %vm327_vm1, %v319_v16  ;;  %v305_v42 = vpack.c.bf16 %v253_v31, %v252_v29  ;;  %v254_v47 = vmax.f32 %v190_v37, 0.0  ;;  %v222_v48 = vadd.f32 %v1567_v5, %v151_v38  ;;  %v121_v50 = vmul.f32 %v1562_v4, %v50_v35 }
  0x30   :  { %1499 = vmatprep.mubr.msk.bf16.mxu1 %vm327_vm1, %v320_v36  ;;  %v223_v49 = vadd.f32 %v1567_v5, %v152_v39  ;;  %v321_v52 = vpack.c.bf16 %v285_v44, %v284_v43  ;;  %v255_v53 = vmax.f32 %v191_v45, 0.0  ;;  %v122_v54 = vmul.f32 %v1562_v4, %v51_v40  ;;  %v1923_v44 = vld [vmem:[%s2314_s5] ss:$0 sm:$0xff] }
  0x31   :  { %v153_v55 = vmul.f32 %v1562_v4, %v82_v41  ;;  %v286_v57 = vmax.f32 %v222_v48, 0.0  ;;  %v192_v59 = vadd.f32 %v1567_v5, %v121_v50  ;;  %v154_v60 = vmul.f32 %v1562_v4, %v83_v46 }
  0x32   :  { %v287_v58 = vmax.f32 %v223_v49, 0.0  ;;  %v306_v62 = vpack.c.bf16 %v255_v53, %v254_v47  ;;  %v193_v63 = vadd.f32 %v1567_v5, %v122_v54  ;;  %v123_v1 = vmul.f32 %v1562_v4, %v52_v51 }
  0x33   :  { %v224_v0 = vadd.f32 %v1567_v5, %v153_v55  ;;  %v256_v7 = vmax.f32 %v192_v59, 0.0  ;;  %v225_v8 = vadd.f32 %v1567_v5, %v154_v60  ;;  %v124_v9 = vmul.f32 %v1562_v4, %v53_v56 }
  0x34   :  { %v322_v6 = vpack.c.bf16 %v287_v58, %v286_v57  ;;  %v257_v11 = vmax.f32 %v193_v63, 0.0  ;;  %v194_v12 = vadd.f32 %v1567_v5, %v123_v1  ;;  %v155_v13 = vmul.f32 %v1562_v4, %v84_v61 }
  0x35   :  { %1468 = vmatmul.mubr.msk.bf16.gmra.mxu0 %vm327_vm1, %v305_v42  ;;  %v288_v14 = vmax.f32 %v224_v0, 0.0  ;;  %v195_v15 = vadd.f32 %v1567_v5, %v124_v9  ;;  %v156_v16 = vmul.f32 %v1562_v4, %v85_v2  ;;  %v125_v17 = vmul.f32 %v1562_v4, %v54_v3 }
  0x36   :  { %1471 = vmatprep.mubr.msk.bf16.mxu0 %vm327_vm1, %v306_v62  ;;  %v289_v20 = vmax.f32 %v225_v8, 0.0  ;;  %v258_v21 = vmax.f32 %v194_v12, 0.0  ;;  %v226_v22 = vadd.f32 %v1567_v5, %v155_v13  ;;  %v126_v23 = vmul.f32 %v1562_v4, %v55_v10 }
  0x37   :  { %1500 = vmatmul.mubr.msk.bf16.gmra.mxu1 %vm327_vm1, %v321_v52  ;;  %v307_v24 = vpack.c.bf16 %v257_v11, %v256_v7  ;;  %v259_v25 = vmax.f32 %v195_v15, 0.0  ;;  %v227_v26 = vadd.f32 %v1567_v5, %v156_v16  ;;  %v196_v27 = vadd.f32 %v1567_v5, %v125_v17 }
  0x38   :  { %1503 = vmatprep.mubr.msk.bf16.mxu1 %vm327_vm1, %v322_v6  ;;  %v290_v28 = vmax.f32 %v226_v22, 0.0  ;;  %v197_v29 = vadd.f32 %v1567_v5, %v126_v23  ;;  %v157_v30 = vmul.f32 %v1562_v4, %v86_v18  ;;  %v158_v31 = vmul.f32 %v1562_v4, %v87_v19 }
  0x39   :  { %v308_v32 = vpack.c.bf16 %v259_v25, %v258_v21  ;;  %v291_v33 = vmax.f32 %v227_v26, 0.0  ;;  %v323_v34 = vpack.c.bf16 %v289_v20, %v288_v14  ;;  %v260_v38 = vmax.f32 %v196_v27, 0.0 }
  0x3a   :  { %v228_v35 = vadd.f32 %v1567_v5, %v157_v30  ;;  %v229_v36 = vadd.f32 %v1567_v5, %v158_v31  ;;  %v261_v39 = vmax.f32 %v197_v29, 0.0  ;;  %v1918_v5 = vld [vmem:[%s2313_s4] ss:$0 sm:$0xff] }
  0x3b   :  { %v324_v37 = vpack.c.bf16 %v291_v33, %v290_v28 }
  0x3c   :  { %v292_v40 = vmax.f32 %v228_v35, 0.0  ;;  %v293_v41 = vmax.f32 %v229_v36, 0.0  ;;  %v309_v4 = vpack.c.bf16 %v261_v39, %v260_v38 }
  0x3d   :  { %1472 = vmatmul.mubr.msk.bf16.gmra.mxu0 %vm327_vm1, %v307_v24 }
  0x3e   :  { %1475 = vmatprep.mubr.msk.bf16.mxu0 %vm327_vm1, %v308_v32  ;;  %v325_v42 = vpack.c.bf16 %v293_v41, %v292_v40 }
  0x3f   :  { %1504 = vmatmul.mubr.msk.bf16.gmra.mxu1 %vm327_vm1, %v323_v34 }
  0x40   :  { %1507 = vmatprep.mubr.msk.bf16.mxu1 %vm327_vm1, %v324_v37 }
  0x45   :  { %1476 = vmatmul.mubr.msk.bf16.gmra.mxu0 %vm327_vm1, %v309_v4 }
  0x47   :  { %1508 = vmatmul.mubr.msk.bf16.gmra.mxu1 %vm327_vm1, %v325_v42 }
  0xcd   :  { %v1449_v43 = vpop.f32.mrf.mxu0 }
  0xce   :  { %v726_v45 = vmul.f32 %v1449_v43, %v1918_v5 }
  0xcf   :  { %v1481_v46 = vpop.f32.mrf.mxu1  ;;  %v462_v47 = vpop.f32.mrf.mxu0 }
  0xd0   :  { %v797_v48 = vadd.f32 %v1923_v44, %v726_v45  ;;  %v758_v49 = vmul.f32 %v1481_v46, %v1918_v5  ;;  %v724_v50 = vmul.f32 %v1918_v5, %v462_v47 }
  0xd1   :  { %v590_v51 = vpop.f32.mrf.mxu1  ;;  %v1450_v52 = vpop.f32.mrf.mxu0 }
  0xd2   :  { %v861_v53 = vmax.f32 %v797_v48, 0.0  ;;  %v829_v54 = vadd.f32 %v1923_v44, %v758_v49  ;;  %v795_v55 = vadd.f32 %v1923_v44, %v724_v50  ;;  %v756_v56 = vmul.f32 %v1918_v5, %v590_v51 }
  0xd3   :  { %v727_v57 = vmul.f32 %v1450_v52, %v1918_v5  ;;  %v1482_v58 = vpop.f32.mrf.mxu1  ;;  %v465_v59 = vpop.f32.mrf.mxu0 }
  0xd4   :  { %v1350_v60 = vpack.c.bf16 %v861_v53, %v861_v53  ;;  %v893_v61 = vmax.f32 %v829_v54, 0.0  ;;  %v859_v62 = vmax.f32 %v795_v55, 0.0  ;;  %v827_v63 = vadd.f32 %v1923_v44, %v756_v56 }
  0xd5   :  { %v798_v0 = vadd.f32 %v1923_v44, %v727_v57  ;;  %v759_v1 = vmul.f32 %v1482_v58, %v1918_v5  ;;  %v725_v2 = vmul.f32 %v1918_v5, %v465_v59  ;;  %v593_v3 = vpop.f32.mrf.mxu1  ;;  %v1453_v6 = vpop.f32.mrf.mxu0 }
  0xd6   :  { %1182 = vst.msk [vmem:[%s2315_s6 + $0x8] sm:$0xf] %vm1179_vm2, %v1350_v60  ;;  %v1382_v7 = vpack.c.bf16 %v893_v61, %v893_v61  ;;  %v1348_v8 = vpack.c.bf16 %v859_v62, %v859_v62  ;;  %v891_v9 = vmax.f32 %v827_v63, 0.0  ;;  %v757_v10 = vmul.f32 %v1918_v5, %v593_v3 }
  0xd7   :  { %v862_v11 = vmax.f32 %v798_v0, 0.0  ;;  %v830_v12 = vadd.f32 %v1923_v44, %v759_v1  ;;  %v796_v13 = vadd.f32 %v1923_v44, %v725_v2  ;;  %v730_v14 = vmul.f32 %v1453_v6, %v1918_v5  ;;  %v1485_v15 = vpop.f32.mrf.mxu1  ;;  %v478_v16 = vpop.f32.mrf.mxu0 }
  0xd8   :  { %1214 = vst.msk [vmem:[%s2315_s6 + $0x88] sm:$0xf] %vm1179_vm2, %v1382_v7  ;;  %1180 = vst.msk [vmem:[%s2315_s6] sm:$0xf] %vm1179_vm2, %v1348_v8  ;;  %v1380_v17 = vpack.c.bf16 %v891_v9, %v891_v9  ;;  %v828_v18 = vadd.f32 %v1923_v44, %v757_v10  ;;  %v762_v19 = vmul.f32 %v1485_v15, %v1918_v5 }
  0xd9   :  { %v728_v20 = vmul.f32 %v1918_v5, %v478_v16  ;;  %v1351_v21 = vpack.c.bf16 %v862_v11, %v862_v11  ;;  %v894_v22 = vmax.f32 %v830_v12, 0.0  ;;  %v860_v23 = vmax.f32 %v796_v13, 0.0  ;;  %v606_v25 = vpop.f32.mrf.mxu1  ;;  %v1454_v26 = vpop.f32.mrf.mxu0 }
  0xda   :  { %v801_v24 = vadd.f32 %v1923_v44, %v730_v14  ;;  %1212 = vst.msk [vmem:[%s2315_s6 + $0x80] sm:$0xf] %vm1179_vm2, %v1380_v17  ;;  %v892_v27 = vmax.f32 %v828_v18, 0.0  ;;  %v833_v28 = vadd.f32 %v1923_v44, %v762_v19  ;;  %v760_v30 = vmul.f32 %v1918_v5, %v606_v25 }
  0xdb   :  { %v799_v29 = vadd.f32 %v1923_v44, %v728_v20  ;;  %1183 = vst.msk [vmem:[%s2315_s6 + $0xc] sm:$0xf] %vm1179_vm2, %v1351_v21  ;;  %v1383_v31 = vpack.c.bf16 %v894_v22, %v894_v22  ;;  %v1349_v32 = vpack.c.bf16 %v860_v23, %v860_v23  ;;  %v731_v34 = vmul.f32 %v1454_v26, %v1918_v5  ;;  %v1486_v35 = vpop.f32.mrf.mxu1  ;;  %v481_v36 = vpop.f32.mrf.mxu0 }
  0xdc   :  { %v865_v33 = vmax.f32 %v801_v24, 0.0  ;;  %v1381_v37 = vpack.c.bf16 %v892_v27, %v892_v27  ;;  %v897_v38 = vmax.f32 %v833_v28, 0.0  ;;  %v831_v40 = vadd.f32 %v1923_v44, %v760_v30 }
  0xdd   :  { %v863_v39 = vmax.f32 %v799_v29, 0.0  ;;  %1215 = vst.msk [vmem:[%s2315_s6 + $0x8c] sm:$0xf] %vm1179_vm2, %v1383_v31  ;;  %1181 = vst.msk [vmem:[%s2315_s6 + $0x4] sm:$0xf] %vm1179_vm2, %v1349_v32  ;;  %v802_v4 = vadd.f32 %v1923_v44, %v731_v34  ;;  %v763_v42 = vmul.f32 %v1486_v35, %v1918_v5  ;;  %v729_v43 = vmul.f32 %v1918_v5, %v481_v36  ;;  %v609_v45 = vpop.f32.mrf.mxu1  ;;  %v1457_v46 = vpop.f32.mrf.mxu0 }
  0xde   :  { %v1354_v41 = vpack.c.bf16 %v865_v33, %v865_v33  ;;  %1213 = vst.msk [vmem:[%s2315_s6 + $0x84] sm:$0xf] %vm1179_vm2, %v1381_v37  ;;  %v1386_v47 = vpack.c.bf16 %v897_v38, %v897_v38  ;;  %v895_v49 = vmax.f32 %v831_v40, 0.0  ;;  %v761_v50 = vmul.f32 %v1918_v5, %v609_v45 }
  0xdf   :  { %v1352_v48 = vpack.c.bf16 %v863_v39, %v863_v39  ;;  %v866_v51 = vmax.f32 %v802_v4, 0.0  ;;  %v834_v52 = vadd.f32 %v1923_v44, %v763_v42  ;;  %v800_v53 = vadd.f32 %v1923_v44, %v729_v43  ;;  %v1489_v55 = vpop.f32.mrf.mxu1  ;;  %v494_v56 = vpop.f32.mrf.mxu0 }
  0xe0   :  { %1186 = vst.msk [vmem:[%s2315_s6 + $0x18] sm:$0xf] %vm1179_vm2, %v1354_v41  ;;  %v734_v54 = vmul.f32 %v1457_v46, %v1918_v5  ;;  %1218 = vst.msk [vmem:[%s2315_s6 + $0x98] sm:$0xf] %vm1179_vm2, %v1386_v47  ;;  %v1384_v57 = vpack.c.bf16 %v895_v49, %v895_v49  ;;  %v832_v58 = vadd.f32 %v1923_v44, %v761_v50 }
  0xe1   :  { %1184 = vst.msk [vmem:[%s2315_s6 + $0x10] sm:$0xf] %vm1179_vm2, %v1352_v48  ;;  %v766_v59 = vmul.f32 %v1489_v55, %v1918_v5  ;;  %v732_v60 = vmul.f32 %v1918_v5, %v494_v56  ;;  %v1355_v61 = vpack.c.bf16 %v866_v51, %v866_v51  ;;  %v898_v62 = vmax.f32 %v834_v52, 0.0  ;;  %v622_v1 = vpop.f32.mrf.mxu1  ;;  %v1458_v2 = vpop.f32.mrf.mxu0 }
  0xe2   :  { %v864_v63 = vmax.f32 %v800_v53, 0.0  ;;  %v805_v0 = vadd.f32 %v1923_v44, %v734_v54  ;;  %1216 = vst.msk [vmem:[%s2315_s6 + $0x90] sm:$0xf] %vm1179_vm2, %v1384_v57  ;;  %v896_v3 = vmax.f32 %v832_v58, 0.0  ;;  %v764_v8 = vmul.f32 %v1918_v5, %v622_v1 }
  0xe3   :  { %v837_v6 = vadd.f32 %v1923_v44, %v766_v59  ;;  %v803_v7 = vadd.f32 %v1923_v44, %v732_v60  ;;  %1187 = vst.msk [vmem:[%s2315_s6 + $0x1c] sm:$0xf] %vm1179_vm2, %v1355_v61  ;;  %v1387_v9 = vpack.c.bf16 %v898_v62, %v898_v62  ;;  %v735_v12 = vmul.f32 %v1458_v2, %v1918_v5  ;;  %v1490_v13 = vpop.f32.mrf.mxu1  ;;  %v497_v14 = vpop.f32.mrf.mxu0 }
  0xe4   :  { %v1353_v10 = vpack.c.bf16 %v864_v63, %v864_v63  ;;  %v869_v11 = vmax.f32 %v805_v0, 0.0  ;;  %v1385_v15 = vpack.c.bf16 %v896_v3, %v896_v3  ;;  %v835_v18 = vadd.f32 %v1923_v44, %v764_v8 }
  0xe5   :  { %v901_v16 = vmax.f32 %v837_v6, 0.0  ;;  %v867_v17 = vmax.f32 %v803_v7, 0.0  ;;  %1219 = vst.msk [vmem:[%s2315_s6 + $0x9c] sm:$0xf] %vm1179_vm2, %v1387_v9  ;;  %v806_v20 = vadd.f32 %v1923_v44, %v735_v12  ;;  %v767_v21 = vmul.f32 %v1490_v13, %v1918_v5  ;;  %v625_v23 = vpop.f32.mrf.mxu1  ;;  %v1461_v24 = vpop.f32.mrf.mxu0 }
  0xe6   :  { %1185 = vst.msk [vmem:[%s2315_s6 + $0x14] sm:$0xf] %vm1179_vm2, %v1353_v10  ;;  %v1358_v19 = vpack.c.bf16 %v869_v11, %v869_v11  ;;  %v733_v22 = vmul.f32 %v1918_v5, %v497_v14  ;;  %1217 = vst.msk [vmem:[%s2315_s6 + $0x94] sm:$0xf] %vm1179_vm2, %v1385_v15  ;;  %v899_v27 = vmax.f32 %v835_v18, 0.0  ;;  %v765_v28 = vmul.f32 %v1918_v5, %v625_v23 }
  0xe7   :  { %v1390_v25 = vpack.c.bf16 %v901_v16, %v901_v16  ;;  %v1356_v26 = vpack.c.bf16 %v867_v17, %v867_v17  ;;  %v870_v29 = vmax.f32 %v806_v20, 0.0  ;;  %v838_v30 = vadd.f32 %v1923_v44, %v767_v21  ;;  %v1493_v33 = vpop.f32.mrf.mxu1  ;;  %v510_v34 = vpop.f32.mrf.mxu0 }
  0xe8   :  { %1190 = vst.msk [vmem:[%s2315_s6 + $0x28] sm:$0xf] %vm1179_vm2, %v1358_v19  ;;  %v804_v31 = vadd.f32 %v1923_v44, %v733_v22  ;;  %v738_v32 = vmul.f32 %v1461_v24, %v1918_v5  ;;  %v1388_v35 = vpack.c.bf16 %v899_v27, %v899_v27  ;;  %v836_v36 = vadd.f32 %v1923_v44, %v765_v28 }
  0xe9   :  { %1222 = vst.msk [vmem:[%s2315_s6 + $0xa8] sm:$0xf] %vm1179_vm2, %v1390_v25  ;;  %1188 = vst.msk [vmem:[%s2315_s6 + $0x20] sm:$0xf] %vm1179_vm2, %v1356_v26  ;;  %v770_v37 = vmul.f32 %v1493_v33, %v1918_v5  ;;  %v736_v38 = vmul.f32 %v1918_v5, %v510_v34  ;;  %v1359_v39 = vpack.c.bf16 %v870_v29, %v870_v29  ;;  %v902_v40 = vmax.f32 %v838_v30, 0.0  ;;  %v638_v42 = vpop.f32.mrf.mxu1  ;;  %v1462_v43 = vpop.f32.mrf.mxu0 }
  0xea   :  { %v868_v41 = vmax.f32 %v804_v31, 0.0  ;;  %v809_v4 = vadd.f32 %v1923_v44, %v738_v32  ;;  %1220 = vst.msk [vmem:[%s2315_s6 + $0xa0] sm:$0xf] %vm1179_vm2, %v1388_v35  ;;  %v900_v45 = vmax.f32 %v836_v36, 0.0  ;;  %v768_v48 = vmul.f32 %v1918_v5, %v638_v42 }
  0xeb   :  { %v841_v46 = vadd.f32 %v1923_v44, %v770_v37  ;;  %v807_v47 = vadd.f32 %v1923_v44, %v736_v38  ;;  %1191 = vst.msk [vmem:[%s2315_s6 + $0x2c] sm:$0xf] %vm1179_vm2, %v1359_v39  ;;  %v1391_v49 = vpack.c.bf16 %v902_v40, %v902_v40  ;;  %v739_v52 = vmul.f32 %v1462_v43, %v1918_v5  ;;  %v1494_v53 = vpop.f32.mrf.mxu1  ;;  %v513_v54 = vpop.f32.mrf.mxu0 }
  0xec   :  { %v1357_v50 = vpack.c.bf16 %v868_v41, %v868_v41  ;;  %v873_v51 = vmax.f32 %v809_v4, 0.0  ;;  %v1389_v55 = vpack.c.bf16 %v900_v45, %v900_v45  ;;  %v839_v58 = vadd.f32 %v1923_v44, %v768_v48 }
  0xed   :  { %v905_v56 = vmax.f32 %v841_v46, 0.0  ;;  %v871_v57 = vmax.f32 %v807_v47, 0.0  ;;  %1223 = vst.msk [vmem:[%s2315_s6 + $0xac] sm:$0xf] %vm1179_vm2, %v1391_v49  ;;  %v810_v60 = vadd.f32 %v1923_v44, %v739_v52  ;;  %v771_v61 = vmul.f32 %v1494_v53, %v1918_v5  ;;  %v641_v63 = vpop.f32.mrf.mxu1  ;;  %v1465_v0 = vpop.f32.mrf.mxu0 }
  0xee   :  { %1189 = vst.msk [vmem:[%s2315_s6 + $0x24] sm:$0xf] %vm1179_vm2, %v1357_v50  ;;  %v1362_v59 = vpack.c.bf16 %v873_v51, %v873_v51  ;;  %v737_v62 = vmul.f32 %v1918_v5, %v513_v54  ;;  %1221 = vst.msk [vmem:[%s2315_s6 + $0xa4] sm:$0xf] %vm1179_vm2, %v1389_v55  ;;  %v903_v3 = vmax.f32 %v839_v58, 0.0  ;;  %v769_v6 = vmul.f32 %v1918_v5, %v641_v63 }
  0xef   :  { %v1394_v1 = vpack.c.bf16 %v905_v56, %v905_v56  ;;  %v1360_v2 = vpack.c.bf16 %v871_v57, %v871_v57  ;;  %v874_v7 = vmax.f32 %v810_v60, 0.0  ;;  %v842_v8 = vadd.f32 %v1923_v44, %v771_v61  ;;  %v1497_v11 = vpop.f32.mrf.mxu1  ;;  %v526_v12 = vpop.f32.mrf.mxu0 }
  0xf0   :  { %1194 = vst.msk [vmem:[%s2315_s6 + $0x38] sm:$0xf] %vm1179_vm2, %v1362_v59  ;;  %v808_v9 = vadd.f32 %v1923_v44, %v737_v62  ;;  %v742_v10 = vmul.f32 %v1465_v0, %v1918_v5  ;;  %v1392_v13 = vpack.c.bf16 %v903_v3, %v903_v3  ;;  %v840_v14 = vadd.f32 %v1923_v44, %v769_v6 }
  0xf1   :  { %1226 = vst.msk [vmem:[%s2315_s6 + $0xb8] sm:$0xf] %vm1179_vm2, %v1394_v1  ;;  %1192 = vst.msk [vmem:[%s2315_s6 + $0x30] sm:$0xf] %vm1179_vm2, %v1360_v2  ;;  %v774_v15 = vmul.f32 %v1497_v11, %v1918_v5  ;;  %v740_v16 = vmul.f32 %v1918_v5, %v526_v12  ;;  %v1363_v17 = vpack.c.bf16 %v874_v7, %v874_v7  ;;  %v906_v18 = vmax.f32 %v842_v8, 0.0  ;;  %v654_v21 = vpop.f32.mrf.mxu1  ;;  %v1466_v22 = vpop.f32.mrf.mxu0 }
  0xf2   :  { %v872_v19 = vmax.f32 %v808_v9, 0.0  ;;  %v813_v20 = vadd.f32 %v1923_v44, %v742_v10  ;;  %1224 = vst.msk [vmem:[%s2315_s6 + $0xb0] sm:$0xf] %vm1179_vm2, %v1392_v13  ;;  %v904_v23 = vmax.f32 %v840_v14, 0.0  ;;  %v772_v26 = vmul.f32 %v1918_v5, %v654_v21 }
  0xf3   :  { %v845_v24 = vadd.f32 %v1923_v44, %v774_v15  ;;  %v811_v25 = vadd.f32 %v1923_v44, %v740_v16  ;;  %1195 = vst.msk [vmem:[%s2315_s6 + $0x3c] sm:$0xf] %vm1179_vm2, %v1363_v17  ;;  %v1395_v27 = vpack.c.bf16 %v906_v18, %v906_v18  ;;  %v743_v30 = vmul.f32 %v1466_v22, %v1918_v5  ;;  %v1498_v31 = vpop.f32.mrf.mxu1  ;;  %v529_v32 = vpop.f32.mrf.mxu0 }
  0xf4   :  { %v1361_v28 = vpack.c.bf16 %v872_v19, %v872_v19  ;;  %v877_v29 = vmax.f32 %v813_v20, 0.0  ;;  %v1393_v33 = vpack.c.bf16 %v904_v23, %v904_v23  ;;  %v843_v36 = vadd.f32 %v1923_v44, %v772_v26 }
  0xf5   :  { %v909_v34 = vmax.f32 %v845_v24, 0.0  ;;  %v875_v35 = vmax.f32 %v811_v25, 0.0  ;;  %1227 = vst.msk [vmem:[%s2315_s6 + $0xbc] sm:$0xf] %vm1179_vm2, %v1395_v27  ;;  %v814_v38 = vadd.f32 %v1923_v44, %v743_v30  ;;  %v775_v39 = vmul.f32 %v1498_v31, %v1918_v5  ;;  %v657_v41 = vpop.f32.mrf.mxu1  ;;  %v1469_v4 = vpop.f32.mrf.mxu0 }
  0xf6   :  { %1193 = vst.msk [vmem:[%s2315_s6 + $0x34] sm:$0xf] %vm1179_vm2, %v1361_v28  ;;  %v1366_v37 = vpack.c.bf16 %v877_v29, %v877_v29  ;;  %v741_v40 = vmul.f32 %v1918_v5, %v529_v32  ;;  %1225 = vst.msk [vmem:[%s2315_s6 + $0xb4] sm:$0xf] %vm1179_vm2, %v1393_v33  ;;  %v907_v45 = vmax.f32 %v843_v36, 0.0  ;;  %v773_v46 = vmul.f32 %v1918_v5, %v657_v41 }
  0xf7   :  { %v1398_v42 = vpack.c.bf16 %v909_v34, %v909_v34  ;;  %v1364_v43 = vpack.c.bf16 %v875_v35, %v875_v35  ;;  %v878_v47 = vmax.f32 %v814_v38, 0.0  ;;  %v846_v48 = vadd.f32 %v1923_v44, %v775_v39  ;;  %v1501_v51 = vpop.f32.mrf.mxu1  ;;  %v542_v52 = vpop.f32.mrf.mxu0 }
  0xf8   :  { %1198 = vst.msk [vmem:[%s2315_s6 + $0x48] sm:$0xf] %vm1179_vm2, %v1366_v37  ;;  %v812_v49 = vadd.f32 %v1923_v44, %v741_v40  ;;  %v746_v50 = vmul.f32 %v1469_v4, %v1918_v5  ;;  %v1396_v53 = vpack.c.bf16 %v907_v45, %v907_v45  ;;  %v844_v54 = vadd.f32 %v1923_v44, %v773_v46 }
  0xf9   :  { %1230 = vst.msk [vmem:[%s2315_s6 + $0xc8] sm:$0xf] %vm1179_vm2, %v1398_v42  ;;  %1196 = vst.msk [vmem:[%s2315_s6 + $0x40] sm:$0xf] %vm1179_vm2, %v1364_v43  ;;  %v778_v55 = vmul.f32 %v1501_v51, %v1918_v5  ;;  %v744_v56 = vmul.f32 %v1918_v5, %v542_v52  ;;  %v1367_v57 = vpack.c.bf16 %v878_v47, %v878_v47  ;;  %v910_v58 = vmax.f32 %v846_v48, 0.0  ;;  %v670_v61 = vpop.f32.mrf.mxu1  ;;  %v1470_v62 = vpop.f32.mrf.mxu0 }
  0xfa   :  { %v876_v59 = vmax.f32 %v812_v49, 0.0  ;;  %v817_v60 = vadd.f32 %v1923_v44, %v746_v50  ;;  %1228 = vst.msk [vmem:[%s2315_s6 + $0xc0] sm:$0xf] %vm1179_vm2, %v1396_v53  ;;  %v908_v63 = vmax.f32 %v844_v54, 0.0  ;;  %v776_v2 = vmul.f32 %v1918_v5, %v670_v61 }
  0xfb   :  { %v849_v0 = vadd.f32 %v1923_v44, %v778_v55  ;;  %v815_v1 = vadd.f32 %v1923_v44, %v744_v56  ;;  %1199 = vst.msk [vmem:[%s2315_s6 + $0x4c] sm:$0xf] %vm1179_vm2, %v1367_v57  ;;  %v1399_v3 = vpack.c.bf16 %v910_v58, %v910_v58  ;;  %v747_v8 = vmul.f32 %v1470_v62, %v1918_v5  ;;  %v1502_v9 = vpop.f32.mrf.mxu1  ;;  %v545_v10 = vpop.f32.mrf.mxu0 }
  0xfc   :  { %v1365_v6 = vpack.c.bf16 %v876_v59, %v876_v59  ;;  %v881_v7 = vmax.f32 %v817_v60, 0.0  ;;  %v1397_v11 = vpack.c.bf16 %v908_v63, %v908_v63  ;;  %v847_v14 = vadd.f32 %v1923_v44, %v776_v2 }
  0xfd   :  { %v913_v12 = vmax.f32 %v849_v0, 0.0  ;;  %v879_v13 = vmax.f32 %v815_v1, 0.0  ;;  %1231 = vst.msk [vmem:[%s2315_s6 + $0xcc] sm:$0xf] %vm1179_vm2, %v1399_v3  ;;  %v818_v16 = vadd.f32 %v1923_v44, %v747_v8  ;;  %v779_v17 = vmul.f32 %v1502_v9, %v1918_v5  ;;  %v673_v19 = vpop.f32.mrf.mxu1  ;;  %v1473_v20 = vpop.f32.mrf.mxu0 }
  0xfe   :  { %1197 = vst.msk [vmem:[%s2315_s6 + $0x44] sm:$0xf] %vm1179_vm2, %v1365_v6  ;;  %v1370_v15 = vpack.c.bf16 %v881_v7, %v881_v7  ;;  %v745_v18 = vmul.f32 %v1918_v5, %v545_v10  ;;  %1229 = vst.msk [vmem:[%s2315_s6 + $0xc4] sm:$0xf] %vm1179_vm2, %v1397_v11  ;;  %v911_v23 = vmax.f32 %v847_v14, 0.0  ;;  %v777_v24 = vmul.f32 %v1918_v5, %v673_v19 }
  0xff   :  { %v1402_v21 = vpack.c.bf16 %v913_v12, %v913_v12  ;;  %v1368_v22 = vpack.c.bf16 %v879_v13, %v879_v13  ;;  %v882_v25 = vmax.f32 %v818_v16, 0.0  ;;  %v850_v26 = vadd.f32 %v1923_v44, %v779_v17  ;;  %v1505_v29 = vpop.f32.mrf.mxu1  ;;  %v558_v30 = vpop.f32.mrf.mxu0 }
 0x100   :  { %1202 = vst.msk [vmem:[%s2315_s6 + $0x58] sm:$0xf] %vm1179_vm2, %v1370_v15  ;;  %v816_v27 = vadd.f32 %v1923_v44, %v745_v18  ;;  %v750_v28 = vmul.f32 %v1473_v20, %v1918_v5  ;;  %v1400_v31 = vpack.c.bf16 %v911_v23, %v911_v23  ;;  %v848_v32 = vadd.f32 %v1923_v44, %v777_v24 }
 0x101   :  { %1234 = vst.msk [vmem:[%s2315_s6 + $0xd8] sm:$0xf] %vm1179_vm2, %v1402_v21  ;;  %1200 = vst.msk [vmem:[%s2315_s6 + $0x50] sm:$0xf] %vm1179_vm2, %v1368_v22  ;;  %v782_v33 = vmul.f32 %v1505_v29, %v1918_v5  ;;  %v748_v34 = vmul.f32 %v1918_v5, %v558_v30  ;;  %v1371_v35 = vpack.c.bf16 %v882_v25, %v882_v25  ;;  %v914_v36 = vmax.f32 %v850_v26, 0.0  ;;  %v686_v39 = vpop.f32.mrf.mxu1  ;;  %v1474_v40 = vpop.f32.mrf.mxu0 }
 0x102   :  { %v880_v37 = vmax.f32 %v816_v27, 0.0  ;;  %v821_v38 = vadd.f32 %v1923_v44, %v750_v28  ;;  %1232 = vst.msk [vmem:[%s2315_s6 + $0xd0] sm:$0xf] %vm1179_vm2, %v1400_v31  ;;  %v912_v41 = vmax.f32 %v848_v32, 0.0  ;;  %v780_v43 = vmul.f32 %v1918_v5, %v686_v39 }
 0x103   :  { %v853_v4 = vadd.f32 %v1923_v44, %v782_v33  ;;  %v819_v42 = vadd.f32 %v1923_v44, %v748_v34  ;;  %1203 = vst.msk [vmem:[%s2315_s6 + $0x5c] sm:$0xf] %vm1179_vm2, %v1371_v35  ;;  %v1403_v45 = vpack.c.bf16 %v914_v36, %v914_v36  ;;  %v751_v48 = vmul.f32 %v1474_v40, %v1918_v5  ;;  %v1506_v49 = vpop.f32.mrf.mxu1  ;;  %v561_v50 = vpop.f32.mrf.mxu0 }
 0x104   :  { %v1369_v46 = vpack.c.bf16 %v880_v37, %v880_v37  ;;  %v885_v47 = vmax.f32 %v821_v38, 0.0  ;;  %v1401_v51 = vpack.c.bf16 %v912_v41, %v912_v41  ;;  %v851_v54 = vadd.f32 %v1923_v44, %v780_v43 }
 0x105   :  { %v917_v52 = vmax.f32 %v853_v4, 0.0  ;;  %v883_v53 = vmax.f32 %v819_v42, 0.0  ;;  %1235 = vst.msk [vmem:[%s2315_s6 + $0xdc] sm:$0xf] %vm1179_vm2, %v1403_v45  ;;  %v822_v56 = vadd.f32 %v1923_v44, %v751_v48  ;;  %v783_v57 = vmul.f32 %v1506_v49, %v1918_v5  ;;  %v689_v59 = vpop.f32.mrf.mxu1  ;;  %v1477_v60 = vpop.f32.mrf.mxu0 }
 0x106   :  { %1201 = vst.msk [vmem:[%s2315_s6 + $0x54] sm:$0xf] %vm1179_vm2, %v1369_v46  ;;  %v1374_v55 = vpack.c.bf16 %v885_v47, %v885_v47  ;;  %v749_v58 = vmul.f32 %v1918_v5, %v561_v50  ;;  %1233 = vst.msk [vmem:[%s2315_s6 + $0xd4] sm:$0xf] %vm1179_vm2, %v1401_v51  ;;  %v915_v63 = vmax.f32 %v851_v54, 0.0  ;;  %v781_v0 = vmul.f32 %v1918_v5, %v689_v59 }
 0x107   :  { %v1406_v61 = vpack.c.bf16 %v917_v52, %v917_v52  ;;  %v1372_v62 = vpack.c.bf16 %v883_v53, %v883_v53  ;;  %v886_v1 = vmax.f32 %v822_v56, 0.0  ;;  %v854_v2 = vadd.f32 %v1923_v44, %v783_v57  ;;  %v1509_v7 = vpop.f32.mrf.mxu1  ;;  %v574_v8 = vpop.f32.mrf.mxu0 }
 0x108   :  { %1206 = vst.msk [vmem:[%s2315_s6 + $0x68] sm:$0xf] %vm1179_vm2, %v1374_v55  ;;  %v820_v3 = vadd.f32 %v1923_v44, %v749_v58  ;;  %v754_v6 = vmul.f32 %v1477_v60, %v1918_v5  ;;  %v1404_v9 = vpack.c.bf16 %v915_v63, %v915_v63  ;;  %v852_v10 = vadd.f32 %v1923_v44, %v781_v0 }
 0x109   :  { %1238 = vst.msk [vmem:[%s2315_s6 + $0xe8] sm:$0xf] %vm1179_vm2, %v1406_v61  ;;  %1204 = vst.msk [vmem:[%s2315_s6 + $0x60] sm:$0xf] %vm1179_vm2, %v1372_v62  ;;  %v786_v11 = vmul.f32 %v1509_v7, %v1918_v5  ;;  %v752_v12 = vmul.f32 %v1918_v5, %v574_v8  ;;  %v1375_v13 = vpack.c.bf16 %v886_v1, %v886_v1  ;;  %v918_v14 = vmax.f32 %v854_v2, 0.0  ;;  %v702_v17 = vpop.f32.mrf.mxu1  ;;  %v1478_v18 = vpop.f32.mrf.mxu0 }
 0x10a   :  { %v884_v15 = vmax.f32 %v820_v3, 0.0  ;;  %v825_v16 = vadd.f32 %v1923_v44, %v754_v6  ;;  %1236 = vst.msk [vmem:[%s2315_s6 + $0xe0] sm:$0xf] %vm1179_vm2, %v1404_v9  ;;  %v916_v19 = vmax.f32 %v852_v10, 0.0  ;;  %v784_v22 = vmul.f32 %v1918_v5, %v702_v17 }
 0x10b   :  { %v857_v20 = vadd.f32 %v1923_v44, %v786_v11  ;;  %v823_v21 = vadd.f32 %v1923_v44, %v752_v12  ;;  %1207 = vst.msk [vmem:[%s2315_s6 + $0x6c] sm:$0xf] %vm1179_vm2, %v1375_v13  ;;  %v1407_v23 = vpack.c.bf16 %v918_v14, %v918_v14  ;;  %v755_v26 = vmul.f32 %v1478_v18, %v1918_v5  ;;  %v1510_v27 = vpop.f32.mrf.mxu1  ;;  %v577_v28 = vpop.f32.mrf.mxu0 }
 0x10c   :  { %v1373_v24 = vpack.c.bf16 %v884_v15, %v884_v15  ;;  %v889_v25 = vmax.f32 %v825_v16, 0.0  ;;  %v1405_v29 = vpack.c.bf16 %v916_v19, %v916_v19  ;;  %v855_v32 = vadd.f32 %v1923_v44, %v784_v22 }
 0x10d   :  { %v921_v30 = vmax.f32 %v857_v20, 0.0  ;;  %v887_v31 = vmax.f32 %v823_v21, 0.0  ;;  %1239 = vst.msk [vmem:[%s2315_s6 + $0xec] sm:$0xf] %vm1179_vm2, %v1407_v23  ;;  %v826_v34 = vadd.f32 %v1923_v44, %v755_v26  ;;  %v787_v35 = vmul.f32 %v1510_v27, %v1918_v5  ;;  %v705_v37 = vpop.f32.mrf.mxu1 }
 0x10e   :  { %1205 = vst.msk [vmem:[%s2315_s6 + $0x64] sm:$0xf] %vm1179_vm2, %v1373_v24  ;;  %v1378_v33 = vpack.c.bf16 %v889_v25, %v889_v25  ;;  %v753_v36 = vmul.f32 %v1918_v5, %v577_v28  ;;  %1237 = vst.msk [vmem:[%s2315_s6 + $0xe4] sm:$0xf] %vm1179_vm2, %v1405_v29  ;;  %v919_v40 = vmax.f32 %v855_v32, 0.0  ;;  %v785_v41 = vmul.f32 %v1918_v5, %v705_v37 }
 0x10f   :  { %v1410_v38 = vpack.c.bf16 %v921_v30, %v921_v30  ;;  %v1376_v39 = vpack.c.bf16 %v887_v31, %v887_v31  ;;  %v890_v4 = vmax.f32 %v826_v34, 0.0  ;;  %v858_v42 = vadd.f32 %v1923_v44, %v787_v35 }
 0x110   :  { %1210 = vst.msk [vmem:[%s2315_s6 + $0x78] sm:$0xf] %vm1179_vm2, %v1378_v33  ;;  %v824_v43 = vadd.f32 %v1923_v44, %v753_v36  ;;  %v1408_v5 = vpack.c.bf16 %v919_v40, %v919_v40  ;;  %v856_v45 = vadd.f32 %v1923_v44, %v785_v41 }
 0x111   :  { %1242 = vst.msk [vmem:[%s2315_s6 + $0xf8] sm:$0xf] %vm1179_vm2, %v1410_v38  ;;  %1208 = vst.msk [vmem:[%s2315_s6 + $0x70] sm:$0xf] %vm1179_vm2, %v1376_v39  ;;  %v1379_v46 = vpack.c.bf16 %v890_v4, %v890_v4  ;;  %v922_v47 = vmax.f32 %v858_v42, 0.0 }
 0x112   :  { %v888_v48 = vmax.f32 %v824_v43, 0.0  ;;  %1240 = vst.msk [vmem:[%s2315_s6 + $0xf0] sm:$0xf] %vm1179_vm2, %v1408_v5  ;;  %v920_v49 = vmax.f32 %v856_v45, 0.0 }
 0x113   :  { %1211 = vst.msk [vmem:[%s2315_s6 + $0x7c] sm:$0xf] %vm1179_vm2, %v1379_v46  ;;  %v1411_v50 = vpack.c.bf16 %v922_v47, %v922_v47 }
 0x114   :  { %v1377_v51 = vpack.c.bf16 %v888_v48, %v888_v48  ;;  %v1409_v52 = vpack.c.bf16 %v920_v49, %v920_v49 }
 0x115   :  { %1243 = vst.msk [vmem:[%s2315_s6 + $0xfc] sm:$0xf] %vm1179_vm2, %v1411_v50 }
 0x116   :  { %1209 = vst.msk [vmem:[%s2315_s6 + $0x74] sm:$0xf] %vm1179_vm2, %v1377_v51  ;;  %1241 = vst.msk [vmem:[%s2315_s6 + $0xf4] sm:$0xf] %vm1179_vm2, %v1409_v52 }

// kernel: preact_bottleneck_forward.5
= control target key start
LH: loop header
LB: loop body
LE: loop exit
PB: predicated region body
PF: predicated region fallthrough
CT: control target
= control target key end

     0   :  { %s6838_s21 = smov 0   ;;  %s9217_s0 = inlined_call_operand.vmem [shape: bf16[2,16,16,4], index: 0, kind: input, shape index: {}]   ;;  %s9218_s1 = inlined_call_operand.vmem [shape: bf16[3,3,4,4], index: 1, kind: input, shape index: {}]   ;;  %s9219_s2 = inlined_call_operand.vmem [shape: f32[1,4], index: 2, kind: input, shape index: {}]   ;;  %s9220_s3 = inlined_call_operand.vmem [shape: f32[1,4], index: 3, kind: input, shape index: {}]   ;;  %s9221_s4 = inlined_call_operand.vmem [shape: bf16[4,16], index: 4, kind: input, shape index: {}]   ;;  %s9222_s5 = inlined_call_operand.vmem [shape: f32[2,256,16], index: 5, kind: input, shape index: {}]   ;;  %s9223_s6 = inlined_call_operand.vmem [shape: f32[2,256,16], index: 6, kind: output, shape index: {}]  }
   0x1 LB: > { %s5831_s22 = sadd.s32 4294967295, %s6800_s21   ;;  %p5835_p0 = scmp.ge.s32.totalorder %s6800_s21, 1  ;;  %s6800_s21 = sphi %s6838_s21, %s16_s21  }
   0x2   : > { %p222_p1 = scmp.lt.s32.totalorder %s6800_s21, 3 }
   0x4   : > { %p223_p2 = pnand %p5835_p0, %p222_p1 }
   0x6   : > { %226 = sbr.rel (%p223_p2) target bundleno = 840 (0x348), region = 44 }
   0xb   : > { %v5842_v0 = vld [vmem:[%s9218_s1 + $0x2] sm:$0x3]  ;;  %vm1337_vm0 = vcmask 1041408   ;;  %v834_v1 = vld [vmem:[%s9218_s1] sm:$0x3]  ;;  %vm273_vm1 = vcmask 27648  }
   0xc   : > { %6719 = vmatprep.subr.msk.bf16.mxu0 %vm1337_vm0, %v5842_v0  ;;  %v1339_v2 = vsel %vm1337_vm0, %v5842_v0, 0  ;;  %6720 = vmatprep.subr.msk.bf16.mxu1 %vm1337_vm0, %v834_v1  ;;  %v1631_v3 = vsel %vm1337_vm0, %v834_v1, 0  ;;  %vm276_vm2 = vcmask 24576   ;;  %v6859_v4 = vld [vmem:[%s9218_s1 + $0x4] sm:$0x3]  ;;  %v6802_v5 = vmov 0  }
   0xd   : > { %6380 = vmatpush3.bf16.msra.mxu0 %v1339_v2  ;;  %6414 = vmatpush3.bf16.msra.mxu1 %v1631_v3  ;;  %274 = vst.msk [vmem:[#allocation2] sm:$0xf] %vm273_vm1, %v6802_v5  ;;  %275 = vst.msk [vmem:[#allocation2 + $0x4] sm:$0xf] %vm273_vm1, %v6802_v5  ;;  %p257_p3 = scmp.lt.s32.totalorder %s5831_s22, 1  ;;  %vm1288_vm5 = vcmask 31744  }
   0xe   : > { %277 = vst.msk [vmem:[#allocation2 + $0x8] sm:$0x1] %vm276_vm2, %v6802_v5  ;;  %280 = vst.msk [vmem:[#allocation2 + $0x14] sm:$0x1] %vm276_vm2, %v6802_v5  ;;  %6721 = vmatprep.subr.msk.bf16.mxu0 %vm1337_vm0, %v6859_v4  ;;  %vm851_vm3 = vsmask.f32 3328 }
   0xf   : > { %278 = vst.msk [vmem:[#allocation2 + $0xc] sm:$0xf] %vm273_vm1, %v6802_v5  ;;  %279 = vst.msk [vmem:[#allocation2 + $0x10] sm:$0xf] %vm273_vm1, %v6802_v5  ;;  %s9343_s22 = smov (!%p257_p3, %s5831_s22), 1  ;;  %v6933_v18 = vsel %vm1337_vm0, %v6859_v4, 0 }
  0x10   : > { %281 = vst.msk [vmem:[#allocation2 + $0x18] sm:$0xf] %vm273_vm1, %v6802_v5  ;;  %282 = vst.msk [vmem:[#allocation2 + $0x1c] sm:$0xf] %vm273_vm1, %v6802_v5  ;;  %s6206_s29 = sshll.u32 %s9343_s22, 7  ;;  %vm1842_vm13 = vcmask 1042432  }
  0x11   : > { %283 = vst.msk [vmem:[#allocation2 + $0x20] sm:$0x1] %vm276_vm2, %v6802_v5  ;;  %286 = vst.msk [vmem:[#allocation2 + $0x2c] sm:$0x1] %vm276_vm2, %v6802_v5  ;;  %vm852_vm4 = vsmask.f32 7440  ;;  %s6927_s8 = scalar_lea.vmem %s9217_s0, %s6206_s29 }
  0x12   : > { %284 = vst.msk [vmem:[#allocation2 + $0x24] sm:$0xf] %vm273_vm1, %v6802_v5  ;;  %285 = vst.msk [vmem:[#allocation2 + $0x28] sm:$0xf] %vm273_vm1, %v6802_v5  ;;  %vm361_vm6 = vsmask.f32 256 }
  0x13   : > { %287 = vst.msk [vmem:[#allocation2 + $0x30] sm:$0xf] %vm273_vm1, %v6802_v5  ;;  %288 = vst.msk [vmem:[#allocation2 + $0x34] sm:$0xf] %vm273_vm1, %v6802_v5  ;;  %v329_v6 = vld [vmem:[%s6927_s8] sm:$0xf] }
  0x14   : > { %289 = vst.msk [vmem:[#allocation2 + $0x38] sm:$0x1] %vm276_vm2, %v6802_v5  ;;  %292 = vst.msk [vmem:[#allocation2 + $0x44] sm:$0x1] %vm276_vm2, %v6802_v5  ;;  %vm362_vm7 = vsmask.f32 4368 }
  0x15   : > { %290 = vst.msk [vmem:[#allocation2 + $0x3c] sm:$0xf] %vm273_vm1, %v6802_v5  ;;  %291 = vst.msk [vmem:[#allocation2 + $0x40] sm:$0xf] %vm273_vm1, %v6802_v5  ;;  %vm686_vm8 = vsmask.f32 7938 }
  0x16   : > { %293 = vst.msk [vmem:[#allocation2 + $0x48] sm:$0xf] %vm273_vm1, %v6802_v5  ;;  %294 = vst.msk [vmem:[#allocation2 + $0x4c] sm:$0xf] %vm273_vm1, %v6802_v5  ;;  %v802_v7 = vld [vmem:[#allocation2] sm:$0xf] }
  0x17   : > { %295 = vst.msk [vmem:[#allocation2 + $0x50] sm:$0x1] %vm276_vm2, %v6802_v5  ;;  %298 = vst.msk [vmem:[#allocation2 + $0x5c] sm:$0x1] %vm276_vm2, %v6802_v5  ;;  %v803_v8 = vld [vmem:[#allocation2 + $0x4] sm:$0xf] }
  0x18   : > { %296 = vst.msk [vmem:[#allocation2 + $0x54] sm:$0xf] %vm273_vm1, %v6802_v5  ;;  %297 = vst.msk [vmem:[#allocation2 + $0x58] sm:$0xf] %vm273_vm1, %v6802_v5  ;;  %v835_v9 = vld [vmem:[#allocation2 + $0x8] sm:$0x1]  ;;  %v5875_v16 = vcombine.low %v802_v7, %v803_v8 }
  0x19   : > { %299 = vst.msk [vmem:[#allocation2 + $0x60] sm:$0xf] %vm273_vm1, %v6802_v5  ;;  %300 = vst.msk [vmem:[#allocation2 + $0x64] sm:$0xf] %vm273_vm1, %v6802_v5  ;;  %v855_v10 = vshrl.u32 %v802_v7, 16  ;;  %v858_v11 = vshll.u32 %v802_v7, 16 }
  0x1a   : > { %301 = vst.msk [vmem:[#allocation2 + $0x68] sm:$0x1] %vm276_vm2, %v6802_v5  ;;  %304 = vst.msk [vmem:[#allocation2 + $0x74] sm:$0x1] %vm276_vm2, %v6802_v5  ;;  %v864_v12 = vshll.u32 %v803_v8, 16  ;;  %v868_v13 = vshrl.u32 %v803_v8, 16  ;;  %6415 = vmatprep.mubr.msk.bf16.mxu1 %vm1288_vm5, %v5875_v16 }
  0x1b   : > { %302 = vst.msk [vmem:[#allocation2 + $0x6c] sm:$0xf] %vm273_vm1, %v6802_v5  ;;  %303 = vst.msk [vmem:[#allocation2 + $0x70] sm:$0xf] %vm273_vm1, %v6802_v5  ;;  %v330_v14 = vld [vmem:[%s6927_s8 + $0x4] sm:$0xf] }
  0x1c   : > { %305 = vst.msk [vmem:[#allocation2 + $0x78] sm:$0xf] %vm273_vm1, %v6802_v5  ;;  %306 = vst.msk [vmem:[#allocation2 + $0x7c] sm:$0xf] %vm273_vm1, %v6802_v5  ;;  %v874_v15 = vshll.u32 %v835_v9, 16  ;;  %v365_v17 = vshrl.u32 %v329_v6, 16 }
  0x1d   : > { %307 = vst.msk [vmem:[#allocation2 + $0x80] sm:$0x1] %vm276_vm2, %v6802_v5  ;;  %310 = vst.msk [vmem:[#allocation2 + $0x8c] sm:$0x1] %vm276_vm2, %v6802_v5  ;;  %v331_v19 = vld [vmem:[%s6927_s8 + $0x8] sm:$0xf] }
  0x1e   : > { %308 = vst.msk [vmem:[#allocation2 + $0x84] sm:$0xf] %vm273_vm1, %v6802_v5  ;;  %309 = vst.msk [vmem:[#allocation2 + $0x88] sm:$0xf] %vm273_vm1, %v6802_v5  ;;  %v857_v20 = vrot.slane %v855_v10, 4  ;;  %v860_v21 = vrot.slane %v858_v11, 5 }
  0x1f   : > { %311 = vst.msk [vmem:[#allocation2 + $0x90] sm:$0xf] %vm273_vm1, %v6802_v5  ;;  %312 = vst.msk [vmem:[#allocation2 + $0x94] sm:$0xf] %vm273_vm1, %v6802_v5  ;;  %v866_v22 = vrot.slane %v864_v12, 5  ;;  %v870_v23 = vrot.slane %v868_v13, 4 }
  0x20   : > { %313 = vst.msk [vmem:[#allocation2 + $0x98] sm:$0x1] %vm276_vm2, %v6802_v5  ;;  %316 = vst.msk [vmem:[#allocation2 + $0xa4] sm:$0x1] %vm276_vm2, %v6802_v5  ;;  %v876_v25 = vrot.slane %v874_v15, 5  ;;  %v367_v26 = vrot.slane %v365_v17, 7  ;;  %v861_v30 = vor.u32 %v860_v21, %v857_v20 }
  0x21   : > { %314 = vst.msk [vmem:[#allocation2 + $0x9c] sm:$0xf] %vm273_vm1, %v6802_v5  ;;  %315 = vst.msk [vmem:[#allocation2 + $0xa0] sm:$0xf] %vm273_vm1, %v6802_v5  ;;  %v368_v27 = vshll.u32 %v329_v6, 16  ;;  %v373_v28 = vshrl.u32 %v330_v14, 16  ;;  %v871_v31 = vor.u32 %v870_v23, %v866_v22 }
  0x22   : > { %317 = vst.msk [vmem:[#allocation2 + $0xa8] sm:$0xf] %vm273_vm1, %v6802_v5  ;;  %318 = vst.msk [vmem:[#allocation2 + $0xac] sm:$0xf] %vm273_vm1, %v6802_v5  ;;  %v332_v29 = vld [vmem:[%s6927_s8 + $0xc] sm:$0xf] }
  0x23   : > { %319 = vst.msk [vmem:[#allocation2 + $0xb0] sm:$0x1] %vm276_vm2, %v6802_v5  ;;  %322 = vst.msk [vmem:[#allocation2 + $0xbc] sm:$0x1] %vm276_vm2, %v6802_v5  ;;  %v376_v32 = vshll.u32 %v330_v14, 16  ;;  %v382_v35 = vshrl.u32 %v331_v19, 16  ;;  %v370_v37 = vor.u32 %v368_v27, %v367_v26 }
  0x24   : > { %320 = vst.msk [vmem:[#allocation2 + $0xb4] sm:$0xf] %vm273_vm1, %v6802_v5  ;;  %321 = vst.msk [vmem:[#allocation2 + $0xb8] sm:$0xf] %vm273_vm1, %v6802_v5  ;;  %v688_v34 = vld [vmem:[#allocation2 + $0xc] sm:$0xf] }
  0x25   : > { %323 = vst.msk [vmem:[#allocation2 + $0xc0] sm:$0xf] %vm273_vm1, %v6802_v5  ;;  %324 = vst.msk [vmem:[#allocation2 + $0xc4] sm:$0xf] %vm273_vm1, %v6802_v5  ;;  %v371_v38 = vrot.slane %v367_v26, 4  ;;  %v375_v39 = vrot.slane %v373_v28, 7 }
  0x26   : > { %325 = vst.msk [vmem:[#allocation2 + $0xc8] sm:$0x1] %vm276_vm2, %v6802_v5  ;;  %328 = vst.msk [vmem:[#allocation2 + $0xd4] sm:$0x1] %vm276_vm2, %v6802_v5  ;;  %v694_v40 = vld [vmem:[#allocation2 + $0x14] sm:$0x1] }
  0x27   : > { %326 = vst.msk [vmem:[#allocation2 + $0xcc] sm:$0xf] %vm273_vm1, %v6802_v5  ;;  %327 = vst.msk [vmem:[#allocation2 + $0xd0] sm:$0xf] %vm273_vm1, %v6802_v5  ;;  %v385_v41 = vshll.u32 %v331_v19, 16  ;;  %v862_v42 = vrot.slane %v861_v30, 4  ;;  %v378_v48 = vor.u32 %v376_v32, %v375_v39 }
  0x28   : > { %vm6938_vm9 = vmor %vm851_vm3, %vm852_vm4  ;;  %v872_v43 = vrot.slane %v871_v31, 4  ;;  %v384_v45 = vrot.slane %v382_v35, 7  ;;  %v390_v46 = vshrl.u32 %v332_v29, 16  ;;  %v697_v47 = vld [vmem:[#allocation2 + $0x18] sm:$0xf]  ;;  %v380_v49 = vrot.slane %v375_v39, 4 }
  0x29   : > { %vm6946_vm10 = vmand %vm273_vm1, %vm686_vm8  ;;  %v393_v51 = vshll.u32 %v332_v29, 16  ;;  %v333_v52 = vld [vmem:[%s6927_s8 + $0x10] sm:$0xf]  ;;  %v334_v53 = vld [vmem:[%s6927_s8 + $0x14] sm:$0xf]  ;;  %v867_v54 = vsel %vm6938_vm9, %v862_v42, %v866_v22  ;;  %vm1843_vm14 = vcmask 1046532  }
  0x2a   : > { %vm6952_vm11 = vmor %vm361_vm6, %vm362_vm7  ;;  %v689_v50 = vsel %vm6946_vm10, %v370_v37, %v688_v34  ;;  %v877_v55 = vsel %vm6938_vm9, %v872_v43, %v876_v25  ;;  %v387_v56 = vor.u32 %v385_v41, %v384_v45  ;;  %v388_v57 = vrot.slane %v384_v45, 4  ;;  %v335_v58 = vld [vmem:[%s6927_s8 + $0x18] sm:$0xf]  ;;  %v336_v63 = vld [vmem:[%s6927_s8 + $0x1c] sm:$0xf]  ;;  %s6207_s7 = sshll.u32 %s9343_s22, 8 }
  0x2b   : > { %vm6958_vm12 = vmand %vm276_vm2, %vm361_vm6  ;;  %690 = vst [vmem:[#allocation2 + $0xc] sm:$0xf] %v689_v50  ;;  %v5843_v59 = vcombine.low %v867_v54, %v877_v55  ;;  %v379_v60 = vsel %vm6952_vm11, %v371_v38, %v378_v48  ;;  %v392_v62 = vrot.slane %v390_v46, 7  ;;  %v701_v1 = vld [vmem:[#allocation2 + $0x20] sm:$0x1]  ;;  %v399_v2 = vshrl.u32 %v333_v52, 16  ;;  %s9111_s10 = scalar_lea.vmem %s9222_s5, %s6207_s7  ;;  %s9117_s13 = scalar_lea.vmem %s9223_s6, %s6207_s7 }
  0x2c   : > { %v695_v61 = vsel %vm6958_vm12, %v380_v49, %v694_v40  ;;  %691 = vst.msk [vmem:[#allocation2 + $0x10] sm:$0xf] %vm273_vm1, %v379_v60  ;;  %v698_v0 = vsel %vm6946_vm10, %v387_v56, %v697_v47  ;;  %v402_v3 = vshll.u32 %v333_v52, 16  ;;  %v407_v4 = vshrl.u32 %v334_v53, 16  ;;  %v6981_v13 = vld [vmem:[%s6927_s8 + $0x20] sm:$0xf]  ;;  %vm7289_vm15 = vmor %vm1842_vm13, %vm1843_vm14 }
  0x2d   : > { %696 = vst [vmem:[#allocation2 + $0x14] sm:$0x1] %v695_v61  ;;  %6381 = vmatprep.mubr.msk.bf16.mxu0 %vm1288_vm5, %v5843_v59  ;;  %v395_v5 = vor.u32 %v393_v51, %v392_v62  ;;  %v397_v6 = vrot.slane %v392_v62, 4  ;;  %699 = vst [vmem:[#allocation2 + $0x18] sm:$0xf] %v698_v0  ;;  %v410_v7 = vshll.u32 %v334_v53, 16 }
  0x2e   : > { %v416_v8 = vshrl.u32 %v335_v58, 16  ;;  %v401_v9 = vrot.slane %v399_v2, 7  ;;  %v409_v10 = vrot.slane %v407_v4, 7  ;;  %v419_v11 = vshll.u32 %v335_v58, 16  ;;  %v704_v16 = vld [vmem:[#allocation2 + $0x24] sm:$0xf] }
  0x2f   : > { %v424_v12 = vshrl.u32 %v336_v63, 16  ;;  %v396_v14 = vsel %vm6952_vm11, %v388_v57, %v395_v5  ;;  %v702_v15 = vsel %vm6958_vm12, %v397_v6, %v701_v1  ;;  %v427_v19 = vshll.u32 %v336_v63, 16  ;;  %v708_v25 = vld [vmem:[#allocation2 + $0x2c] sm:$0x1]  ;;  %v711_v26 = vld [vmem:[#allocation2 + $0x30] sm:$0xf] }
  0x30   : > { %v418_v17 = vrot.slane %v416_v8, 7  ;;  %700 = vst.msk [vmem:[#allocation2 + $0x1c] sm:$0xf] %vm273_vm1, %v396_v14  ;;  %703 = vst [vmem:[#allocation2 + $0x20] sm:$0x1] %v702_v15  ;;  %v404_v20 = vor.u32 %v402_v3, %v401_v9  ;;  %v405_v21 = vrot.slane %v401_v9, 4  ;;  %v412_v22 = vor.u32 %v410_v7, %v409_v10 }
  0x31   : > { %v414_v23 = vrot.slane %v409_v10, 4  ;;  %v426_v30 = vrot.slane %v424_v12, 7  ;;  %v433_v31 = vshrl.u32 %v6981_v13, 16  ;;  %v715_v38 = vld [vmem:[#allocation2 + $0x38] sm:$0x1] }
  0x32   : > { %v804_v27 = vld [vmem:[#allocation2 + $0xc] sm:$0xf]  ;;  %v421_v28 = vor.u32 %v419_v11, %v418_v17  ;;  %v422_v29 = vrot.slane %v418_v17, 4  ;;  %v413_v35 = vsel %vm6952_vm11, %v405_v21, %v412_v22  ;;  %v705_v37 = vsel %vm6946_vm10, %v404_v20, %v704_v16 }
  0x33   : > { %v879_v32 = vshrl.u32 %v804_v27, 16  ;;  %v882_v34 = vshll.u32 %v804_v27, 16  ;;  %v6993_v39 = vld [vmem:[#allocation2 + $0x10] sm:$0xf]  ;;  %706 = vst [vmem:[#allocation2 + $0x24] sm:$0xf] %v705_v37  ;;  %v709_v41 = vsel %vm6958_vm12, %v414_v23, %v708_v25  ;;  %v429_v42 = vor.u32 %v427_v19, %v426_v30 }
  0x34   : > { %v6995_v40 = vld [vmem:[#allocation2 + $0x14] sm:$0x1]  ;;  %707 = vst.msk [vmem:[#allocation2 + $0x28] sm:$0xf] %vm273_vm1, %v413_v35  ;;  %v431_v43 = vrot.slane %v426_v30, 4  ;;  %v712_v45 = vsel %vm6946_vm10, %v421_v28, %v711_v26  ;;  %v888_v48 = vshll.u32 %v6993_v39, 16  ;;  %v5876_v54 = vcombine.low %v804_v27, %v6993_v39 }
  0x35   : > { %v881_v46 = vrot.slane %v879_v32, 4  ;;  %v884_v47 = vrot.slane %v882_v34, 5  ;;  %v892_v49 = vshrl.u32 %v6993_v39, 16  ;;  %v806_v50 = vld [vmem:[#allocation2 + $0x18] sm:$0xf]  ;;  %v898_v51 = vshll.u32 %v6995_v40, 16 }
  0x36   : > { %710 = vst [vmem:[#allocation2 + $0x2c] sm:$0x1] %v709_v41  ;;  %713 = vst [vmem:[#allocation2 + $0x30] sm:$0xf] %v712_v45  ;;  %v1854_v52 = vrot.slane %v6993_v39, 5  ;;  %v1857_v53 = vrot.slane %v6995_v40, 5  ;;  %6416 = vmatmul.mubr.msk.bf16.vlgmr.msra.gmra.mxu1 %vm1288_vm5, %v5876_v54  ;;  %v430_v63 = vsel %vm6952_vm11, %v422_v29, %v429_v42  ;;  %v716_v0 = vsel %vm6958_vm12, %v431_v43, %v715_v38 }
  0x37   : > { %v885_v55 = vor.u32 %v884_v47, %v881_v46  ;;  %v890_v56 = vrot.slane %v888_v48, 5  ;;  %v894_v57 = vrot.slane %v892_v49, 4  ;;  %v903_v58 = vshrl.u32 %v806_v50, 16  ;;  %v807_v60 = vld [vmem:[#allocation2 + $0x1c] sm:$0xf] }
  0x38   : > { %v900_v59 = vrot.slane %v898_v51, 5  ;;  %v837_v61 = vld [vmem:[#allocation2 + $0x20] sm:$0x1]  ;;  %v906_v62 = vshll.u32 %v806_v50, 16  ;;  %v912_v4 = vshll.u32 %v807_v60, 16  ;;  %v916_v6 = vshrl.u32 %v807_v60, 16 }
  0x39   : > { %v886_v1 = vrot.slane %v885_v55, 4  ;;  %v895_v2 = vor.u32 %v894_v57, %v890_v56  ;;  %v905_v3 = vrot.slane %v903_v58, 4  ;;  %714 = vst.msk [vmem:[#allocation2 + $0x34] sm:$0xf] %vm273_vm1, %v430_v63  ;;  %717 = vst [vmem:[#allocation2 + $0x38] sm:$0x1] %v716_v0  ;;  %v5877_v8 = vcombine.low %v806_v50, %v807_v60 }
  0x3a   : > { %v908_v5 = vrot.slane %v906_v62, 5  ;;  %v922_v7 = vshll.u32 %v837_v61, 16  ;;  %v914_v11 = vrot.slane %v912_v4, 5  ;;  %v808_v12 = vld [vmem:[#allocation2 + $0x24] sm:$0xf]  ;;  %v918_v16 = vrot.slane %v916_v6, 4 }
  0x3b   : > { %v891_v9 = vsel %vm6938_vm9, %v886_v1, %v890_v56  ;;  %v896_v10 = vrot.slane %v895_v2, 4  ;;  %v809_v14 = vld [vmem:[#allocation2 + $0x28] sm:$0xf]  ;;  %6419 = vmatprep.mubr.msk.bf16.mxu1 %vm1288_vm5, %v5877_v8  ;;  %v927_v20 = vshrl.u32 %v808_v12, 16  ;;  %v930_v22 = vshll.u32 %v808_v12, 16 }
  0x3c   : > { %v909_v15 = vor.u32 %v908_v5, %v905_v3  ;;  %v924_v17 = vrot.slane %v922_v7, 5  ;;  %v936_v23 = vshll.u32 %v809_v14, 16  ;;  %v940_v25 = vshrl.u32 %v809_v14, 16  ;;  %v338_v0 = vld [vmem:[%s6927_s8 + $0x24] sm:$0xf] }
  0x3d   : > { %v838_v19 = vld [vmem:[#allocation2 + $0x2c] sm:$0x1]  ;;  %v901_v21 = vsel %vm6938_vm9, %v896_v10, %v900_v59  ;;  %v810_v26 = vld [vmem:[#allocation2 + $0x30] sm:$0xf]  ;;  %v919_v29 = vor.u32 %v918_v16, %v914_v11  ;;  %v929_v30 = vrot.slane %v927_v20, 4  ;;  %v932_v32 = vrot.slane %v930_v22, 5 }
  0x3e   : > { %v5844_v27 = vcombine.low %v891_v9, %v901_v21  ;;  %v910_v28 = vrot.slane %v909_v15, 4  ;;  %v938_v34 = vrot.slane %v936_v23, 5  ;;  %v942_v35 = vrot.slane %v940_v25, 4  ;;  %v339_v5 = vld [vmem:[%s6927_s8 + $0x28] sm:$0xf] }
  0x3f   : > { %v946_v37 = vshll.u32 %v838_v19, 16  ;;  %v920_v41 = vrot.slane %v919_v29, 4  ;;  %v5878_v42 = vcombine.low %v808_v12, %v809_v14  ;;  %v951_v45 = vshrl.u32 %v810_v26, 16  ;;  %v718_v10 = vld [vmem:[#allocation2 + $0x3c] sm:$0xf] }
  0x40   : > { %6382 = vmatmul.mubr.msk.bf16.vlgmr.msra.gmra.mxu0 %vm1288_vm5, %v5844_v27  ;;  %v915_v38 = vsel %vm6938_vm9, %v910_v28, %v914_v11  ;;  %v811_v43 = vld [vmem:[#allocation2 + $0x34] sm:$0xf]  ;;  %v933_v46 = vor.u32 %v932_v32, %v929_v30  ;;  %v943_v47 = vor.u32 %v942_v35, %v938_v34  ;;  %v839_v49 = vld [vmem:[#allocation2 + $0x38] sm:$0x1]  ;;  %v954_v50 = vshll.u32 %v810_v26, 16 }
  0x41   : > { %6448 = vmatpush3.bf16.msra.mxu0 %v6933_v18  ;;  %v948_v48 = vrot.slane %v946_v37, 5  ;;  %v925_v51 = vsel %vm6938_vm9, %v920_v41, %v924_v17  ;;  %6420 = vmatmul.mubr.msk.bf16.gmra.mxu1 %vm1288_vm5, %v5878_v42  ;;  %v953_v54 = vrot.slane %v951_v45, 4  ;;  %v960_v55 = vshll.u32 %v811_v43, 16  ;;  %v340_v11 = vld [vmem:[%s6927_s8 + $0x2c] sm:$0xf] }
  0x42   : > { %v964_v56 = vshrl.u32 %v811_v43, 16  ;;  %v5845_v57 = vcombine.low %v915_v38, %v925_v51  ;;  %v934_v58 = vrot.slane %v933_v46, 4  ;;  %v944_v59 = vrot.slane %v943_v47, 4  ;;  %v341_v17 = vld [vmem:[%s6927_s8 + $0x30] sm:$0xf] }
  0x43   : > { %v956_v60 = vrot.slane %v954_v50, 5  ;;  %v962_v18 = vrot.slane %v960_v55, 5  ;;  %v970_v62 = vshll.u32 %v839_v49, 16  ;;  %v5879_v63 = vcombine.low %v810_v26, %v811_v43  ;;  %v722_v28 = vld [vmem:[#allocation2 + $0x44] sm:$0x1] }
  0x44   : > { %v966_v61 = vrot.slane %v964_v56, 4  ;;  %6385 = vmatprep.mubr.msk.bf16.mxu0 %vm1288_vm5, %v5845_v57  ;;  %v939_v1 = vsel %vm6938_vm9, %v934_v58, %v938_v34  ;;  %v949_v2 = vsel %vm6938_vm9, %v944_v59, %v948_v48  ;;  %v435_v4 = vrot.slane %v433_v31, 7  ;;  %v725_v30 = vld [vmem:[#allocation2 + $0x48] sm:$0xf]  ;;  %v729_v41 = vld [vmem:[#allocation2 + $0x50] sm:$0x1] }
  0x45   : > { %v957_v3 = vor.u32 %v956_v60, %v953_v54  ;;  %v5846_v6 = vcombine.low %v939_v1, %v949_v2  ;;  %v972_v8 = vrot.slane %v970_v62, 5  ;;  %6423 = vmatprep.mubr.msk.bf16.mxu1 %vm1288_vm5, %v5879_v63  ;;  %v436_v9 = vshll.u32 %v6981_v13, 16  ;;  %v342_v42 = vld [vmem:[%s6927_s8 + $0x34] sm:$0xf]  ;;  %v343_v48 = vld [vmem:[%s6927_s8 + $0x38] sm:$0xf] }
  0x46   : > { %v967_v7 = vor.u32 %v966_v61, %v962_v18  ;;  %v439_v14 = vrot.slane %v435_v4, 4  ;;  %v441_v15 = vshrl.u32 %v338_v0, 16  ;;  %v444_v16 = vshll.u32 %v338_v0, 16  ;;  %v732_v55 = vld [vmem:[#allocation2 + $0x54] sm:$0xf] }
  0x47   : > { %v958_v12 = vrot.slane %v957_v3, 4  ;;  %v438_v20 = vor.u32 %v436_v9, %v435_v4  ;;  %v450_v31 = vshrl.u32 %v339_v5, 16  ;;  %v453_v21 = vshll.u32 %v339_v5, 16  ;;  %v344_v56 = vld [vmem:[%s6927_s8 + $0x3c] sm:$0xf] }
  0x48   : > { %6386 = vmatmul.mubr.msk.bf16.gmra.mxu0 %vm1288_vm5, %v5846_v6  ;;  %v968_v19 = vrot.slane %v967_v7, 4  ;;  %v443_v23 = vrot.slane %v441_v15, 7  ;;  %v458_v25 = vshrl.u32 %v340_v11, 16  ;;  %v461_v13 = vshll.u32 %v340_v11, 16  ;;  %v7065_v1 = vld [vmem:[%s6927_s8 + $0x44] sm:$0xf] }
  0x49   : > { %v963_v22 = vsel %vm6938_vm9, %v958_v12, %v962_v18  ;;  %v719_v27 = vsel %vm6946_vm10, %v438_v20, %v718_v10  ;;  %v452_v29 = vrot.slane %v450_v31, 7  ;;  %v467_v32 = vshrl.u32 %v341_v17, 16  ;;  %v7058_v18 = vld [vmem:[%s6927_s8 + $0x40] sm:$0xf]  ;;  %v736_v4 = vld [vmem:[#allocation2 + $0x5c] sm:$0x1] }
  0x4a   : > { %v973_v26 = vsel %vm6938_vm9, %v968_v19, %v972_v8  ;;  %v446_v35 = vor.u32 %v444_v16, %v443_v23  ;;  %v448_v37 = vrot.slane %v443_v23, 4  ;;  %720 = vst [vmem:[#allocation2 + $0x3c] sm:$0xf] %v719_v27  ;;  %v460_v38 = vrot.slane %v458_v25, 7  ;;  %v739_v9 = vld [vmem:[#allocation2 + $0x60] sm:$0xf] }
  0x4b   : > { %v5847_v34 = vcombine.low %v963_v22, %v973_v26  ;;  %v455_v43 = vor.u32 %v453_v21, %v452_v29  ;;  %v456_v45 = vrot.slane %v452_v29, 4  ;;  %v469_v46 = vrot.slane %v467_v32, 7  ;;  %v7080_v26 = vld [vmem:[%s9218_s1 + $0x6] sm:$0x3] }
  0x4c   : > { %v470_v47 = vshll.u32 %v341_v17, 16  ;;  %v447_v49 = vsel %vm6952_vm11, %v439_v14, %v446_v35  ;;  %v723_v50 = vsel %vm6958_vm12, %v448_v37, %v722_v28  ;;  %v463_v51 = vor.u32 %v461_v13, %v460_v38  ;;  %6722 = vmatprep.subr.msk.bf16.mxu1 %vm1337_vm0, %v7080_v26 }
  0x4d   : > { %6389 = vmatprep.mubr.msk.bf16.mxu0 %vm1288_vm5, %v5847_v34  ;;  %v465_v54 = vrot.slane %v460_v38, 4  ;;  %721 = vst.msk [vmem:[#allocation2 + $0x40] sm:$0xf] %vm273_vm1, %v447_v49  ;;  %724 = vst [vmem:[#allocation2 + $0x44] sm:$0x1] %v723_v50  ;;  %v726_v57 = vsel %vm6946_vm10, %v455_v43, %v725_v30  ;;  %v473_v59 = vrot.slane %v469_v46, 4 }
  0x4e   : > { %v472_v58 = vor.u32 %v470_v47, %v469_v46  ;;  %v475_v60 = vshrl.u32 %v342_v42, 16  ;;  %v464_v61 = vsel %vm6952_vm11, %v456_v45, %v463_v51  ;;  %727 = vst [vmem:[#allocation2 + $0x48] sm:$0xf] %v726_v57  ;;  %v478_v63 = vshll.u32 %v342_v42, 16 }
  0x4f   : > { %v730_v62 = vsel %vm6958_vm12, %v465_v54, %v729_v41  ;;  %v484_v0 = vshrl.u32 %v343_v48, 16  ;;  %728 = vst.msk [vmem:[#allocation2 + $0x4c] sm:$0xf] %vm273_vm1, %v464_v61  ;;  %v487_v5 = vshll.u32 %v343_v48, 16  ;;  %v492_v6 = vshrl.u32 %v344_v56, 16 }
  0x50   : > { %731 = vst [vmem:[#allocation2 + $0x50] sm:$0x1] %v730_v62  ;;  %v477_v2 = vrot.slane %v475_v60, 7  ;;  %v733_v3 = vsel %vm6946_vm10, %v472_v58, %v732_v55  ;;  %v495_v8 = vshll.u32 %v344_v56, 16  ;;  %v501_v10 = vshrl.u32 %v7058_v18, 16 }
  0x51   : > { %734 = vst [vmem:[#allocation2 + $0x54] sm:$0xf] %v733_v3  ;;  %v486_v7 = vrot.slane %v484_v0, 7  ;;  %v504_v11 = vshll.u32 %v7058_v18, 16  ;;  %v812_v12 = vld [vmem:[#allocation2 + $0x3c] sm:$0xf] }
  0x52   : > { %v480_v14 = vor.u32 %v478_v63, %v477_v2  ;;  %v482_v15 = vrot.slane %v477_v2, 4  ;;  %v494_v16 = vrot.slane %v492_v6, 7  ;;  %v509_v17 = vshrl.u32 %v7065_v1, 16  ;;  %v743_v60 = vld [vmem:[#allocation2 + $0x68] sm:$0x1] }
  0x53   : > { %v975_v19 = vshrl.u32 %v812_v12, 16  ;;  %v978_v20 = vshll.u32 %v812_v12, 16  ;;  %v489_v31 = vor.u32 %v487_v5, %v486_v7  ;;  %v490_v21 = vrot.slane %v486_v7, 4  ;;  %v7110_v2 = vld [vmem:[%s9218_s1 + $0x8] sm:$0x3] }
  0x54   : > { %v481_v22 = vsel %vm6952_vm11, %v473_v59, %v480_v14  ;;  %v737_v23 = vsel %vm6958_vm12, %v482_v15, %v736_v4  ;;  %v497_v25 = vor.u32 %v495_v8, %v494_v16  ;;  %v499_v13 = vrot.slane %v494_v16, 4  ;;  %v7082_v27 = vld [vmem:[#allocation2 + $0x40] sm:$0xf]  ;;  %v7084_v28 = vld [vmem:[#allocation2 + $0x44] sm:$0x1]  ;;  %6723 = vmatprep.subr.msk.bf16.mxu0 %vm1337_vm0, %v7110_v2 }
  0x55   : > { %v977_v29 = vrot.slane %v975_v19, 4  ;;  %v980_v30 = vrot.slane %v978_v20, 5  ;;  %735 = vst.msk [vmem:[#allocation2 + $0x58] sm:$0xf] %vm273_vm1, %v481_v22  ;;  %738 = vst [vmem:[#allocation2 + $0x5c] sm:$0x1] %v737_v23  ;;  %v740_v32 = vsel %vm6946_vm10, %v489_v31, %v739_v9  ;;  %v5880_v38 = vcombine.low %v812_v12, %v7082_v27 }
  0x56   : > { %v984_v34 = vshll.u32 %v7082_v27, 16  ;;  %v988_v35 = vshrl.u32 %v7082_v27, 16  ;;  %v994_v37 = vshll.u32 %v7084_v28, 16  ;;  %v814_v41 = vld [vmem:[#allocation2 + $0x48] sm:$0xf]  ;;  %v498_v48 = vsel %vm6952_vm11, %v490_v21, %v497_v25 }
  0x57   : > { %741 = vst [vmem:[#allocation2 + $0x60] sm:$0xf] %v740_v32  ;;  %v981_v42 = vor.u32 %v980_v30, %v977_v29  ;;  %v7095_v43 = vld [vmem:[#allocation2 + $0x4c] sm:$0xf]  ;;  %v7097_v45 = vld [vmem:[#allocation2 + $0x50] sm:$0x1]  ;;  %6424 = vmatmul.mubr.msk.bf16.gmra.mxu1 %vm1288_vm5, %v5880_v38  ;;  %v744_v14 = vsel %vm6958_vm12, %v499_v13, %v743_v60 }
  0x58   : > { %v999_v46 = vshrl.u32 %v814_v41, 16  ;;  %v1002_v47 = vshll.u32 %v814_v41, 16  ;;  %v986_v49 = vrot.slane %v984_v34, 5  ;;  %v990_v50 = vrot.slane %v988_v35, 4  ;;  %v816_v55 = vld [vmem:[#allocation2 + $0x54] sm:$0xf] }
  0x59   : > { %v996_v51 = vrot.slane %v994_v37, 5  ;;  %v1008_v54 = vshll.u32 %v7095_v43, 16  ;;  %742 = vst.msk [vmem:[#allocation2 + $0x64] sm:$0xf] %vm273_vm1, %v498_v48  ;;  %v982_v56 = vrot.slane %v981_v42, 4  ;;  %v1012_v59 = vshrl.u32 %v7095_v43, 16 }
  0x5a   : > { %v1001_v57 = vrot.slane %v999_v46, 4  ;;  %v1004_v58 = vrot.slane %v1002_v47, 5  ;;  %v991_v61 = vor.u32 %v990_v50, %v986_v49  ;;  %v1018_v63 = vshll.u32 %v7097_v45, 16  ;;  %745 = vst [vmem:[#allocation2 + $0x68] sm:$0x1] %v744_v14 }
  0x5b   : > { %v1010_v62 = vrot.slane %v1008_v54, 5  ;;  %v5881_v0 = vcombine.low %v814_v41, %v7095_v43  ;;  %v1014_v4 = vrot.slane %v1012_v59, 4  ;;  %v1023_v5 = vshrl.u32 %v816_v55, 16  ;;  %v746_v59 = vld [vmem:[#allocation2 + $0x6c] sm:$0xf] }
  0x5c   : > { %v1005_v3 = vor.u32 %v1004_v58, %v1001_v57  ;;  %v987_v6 = vsel %vm6938_vm9, %v982_v56, %v986_v49  ;;  %v992_v7 = vrot.slane %v991_v61, 4  ;;  %v1020_v8 = vrot.slane %v1018_v63, 5  ;;  %v7117_v9 = vld [vmem:[#allocation2 + $0x58] sm:$0xf]  ;;  %v7119_v12 = vld [vmem:[#allocation2 + $0x5c] sm:$0x1] }
  0x5d   : > { %6427 = vmatprep.mubr.msk.bf16.mxu1 %vm1288_vm5, %v5881_v0  ;;  %v1015_v16 = vor.u32 %v1014_v4, %v1010_v62  ;;  %v1025_v19 = vrot.slane %v1023_v5, 4  ;;  %v1026_v20 = vshll.u32 %v816_v55, 16  ;;  %v1032_v22 = vshll.u32 %v7117_v9, 16  ;;  %v348_v14 = vld [vmem:[%s6927_s8 + $0x4c] sm:$0xf] }
  0x5e   : > { %v1006_v15 = vrot.slane %v1005_v3, 4  ;;  %v818_v31 = vld [vmem:[#allocation2 + $0x60] sm:$0xf]  ;;  %v997_v21 = vsel %vm6938_vm9, %v992_v7, %v996_v51  ;;  %v1036_v23 = vshrl.u32 %v7117_v9, 16  ;;  %v1042_v25 = vshll.u32 %v7119_v12, 16 }
  0x5f   : > { %v5848_v29 = vcombine.low %v987_v6, %v997_v21  ;;  %v1016_v13 = vrot.slane %v1015_v16, 4  ;;  %v1028_v32 = vrot.slane %v1026_v20, 5  ;;  %v1034_v35 = vrot.slane %v1032_v22, 5  ;;  %v750_v7 = vld [vmem:[#allocation2 + $0x74] sm:$0x1] }
  0x60   : > { %v1011_v30 = vsel %vm6938_vm9, %v1006_v15, %v1010_v62  ;;  %v7130_v34 = vld [vmem:[#allocation2 + $0x64] sm:$0xf]  ;;  %v1038_v37 = vrot.slane %v1036_v23, 4  ;;  %v1044_v38 = vrot.slane %v1042_v25, 5  ;;  %v5882_v41 = vcombine.low %v816_v55, %v7117_v9  ;;  %v349_v20 = vld [vmem:[%s6927_s8 + $0x50] sm:$0xf] }
  0x61   : > { %6390 = vmatmul.mubr.msk.bf16.gmra.mxu0 %vm1288_vm5, %v5848_v29  ;;  %v1021_v42 = vsel %vm6938_vm9, %v1016_v13, %v1020_v8  ;;  %v1029_v46 = vor.u32 %v1028_v32, %v1025_v19  ;;  %v1047_v47 = vshrl.u32 %v818_v31, 16  ;;  %v1050_v48 = vshll.u32 %v818_v31, 16  ;;  %v7141_v61 = vld [vmem:[#allocation2 + $0x68] sm:$0x1] }
  0x62   : > { %v5849_v49 = vcombine.low %v1011_v30, %v1021_v42  ;;  %v1039_v50 = vor.u32 %v1038_v37, %v1034_v35  ;;  %6428 = vmatmul.mubr.msk.bf16.gmra.mxu1 %vm1288_vm5, %v5882_v41  ;;  %v1056_v51 = vshll.u32 %v7130_v34, 16  ;;  %v1060_v54 = vshrl.u32 %v7130_v34, 16  ;;  %v347_v8 = vld [vmem:[%s6927_s8 + $0x48] sm:$0xf]  ;;  %v350_v37 = vld [vmem:[%s6927_s8 + $0x54] sm:$0xf] }
  0x63   : > { %v1030_v56 = vrot.slane %v1029_v46, 4  ;;  %v1049_v57 = vrot.slane %v1047_v47, 4  ;;  %v1052_v55 = vrot.slane %v1050_v48, 5  ;;  %v5883_v58 = vcombine.low %v818_v31, %v7130_v34 }
  0x64   : > { %6393 = vmatprep.mubr.msk.bf16.mxu0 %vm1288_vm5, %v5849_v49  ;;  %v1040_v60 = vrot.slane %v1039_v50, 4  ;;  %v1058_v62 = vrot.slane %v1056_v51, 5  ;;  %v1062_v63 = vrot.slane %v1060_v54, 4  ;;  %v503_v0 = vrot.slane %v501_v10, 7 }
  0x65   : > { %v1035_v3 = vsel %vm6938_vm9, %v1030_v56, %v1034_v35  ;;  %v1053_v4 = vor.u32 %v1052_v55, %v1049_v57  ;;  %v1066_v5 = vshll.u32 %v7141_v61, 16  ;;  %6431 = vmatprep.mubr.msk.bf16.mxu1 %vm1288_vm5, %v5883_v58  ;;  %v511_v6 = vrot.slane %v509_v17, 7  ;;  %v753_v35 = vld [vmem:[#allocation2 + $0x78] sm:$0xf]  ;;  %v757_v56 = vld [vmem:[#allocation2 + $0x80] sm:$0x1] }
  0x66   : > { %v1045_v15 = vsel %vm6938_vm9, %v1040_v60, %v1044_v38  ;;  %v1063_v16 = vor.u32 %v1062_v63, %v1058_v62  ;;  %v506_v10 = vor.u32 %v504_v11, %v503_v0  ;;  %v507_v19 = vrot.slane %v503_v0, 4  ;;  %v351_v38 = vld [vmem:[%s6927_s8 + $0x58] sm:$0xf]  ;;  %v352_v63 = vld [vmem:[%s6927_s8 + $0x5c] sm:$0xf] }
  0x67   : > { %v5850_v31 = vcombine.low %v1035_v3, %v1045_v15  ;;  %v1054_v21 = vrot.slane %v1053_v4, 4  ;;  %v1068_v22 = vrot.slane %v1066_v5, 5  ;;  %v512_v23 = vshll.u32 %v7065_v1, 16  ;;  %v760_v4 = vld [vmem:[#allocation2 + $0x84] sm:$0xf] }
  0x68   : > { %v1064_v17 = vrot.slane %v1063_v16, 4  ;;  %v516_v25 = vrot.slane %v511_v6, 4  ;;  %v747_v29 = vsel %vm6946_vm10, %v506_v10, %v746_v59  ;;  %v518_v30 = vshrl.u32 %v347_v8, 16  ;;  %v764_v16 = vld [vmem:[#allocation2 + $0x8c] sm:$0x1] }
  0x69   : > { %6394 = vmatmul.mubr.msk.bf16.gmra.mxu0 %vm1288_vm5, %v5850_v31  ;;  %v1059_v18 = vsel %vm6938_vm9, %v1054_v21, %v1058_v62  ;;  %v514_v11 = vor.u32 %v512_v23, %v511_v6  ;;  %748 = vst [vmem:[#allocation2 + $0x6c] sm:$0xf] %v747_v29  ;;  %v521_v13 = vshll.u32 %v347_v8, 16  ;;  %v526_v32 = vshrl.u32 %v348_v14, 16  ;;  %v767_v10 = vld [vmem:[#allocation2 + $0x90] sm:$0xf] }
  0x6a   : > { %v1069_v1 = vsel %vm6938_vm9, %v1064_v17, %v1068_v22  ;;  %v751_v41 = vsel %vm6958_vm12, %v516_v25, %v750_v7  ;;  %v520_v42 = vrot.slane %v518_v30, 7  ;;  %v529_v46 = vshll.u32 %v348_v14, 16  ;;  %v7185_v30 = vld [vmem:[%s6927_s8 + $0x60] sm:$0xf] }
  0x6b   : > { %v5851_v47 = vcombine.low %v1059_v18, %v1069_v1  ;;  %v515_v48 = vsel %vm6952_vm11, %v507_v19, %v514_v11  ;;  %752 = vst [vmem:[#allocation2 + $0x74] sm:$0x1] %v751_v41  ;;  %v528_v49 = vrot.slane %v526_v32, 7  ;;  %v535_v50 = vshrl.u32 %v349_v20, 16 }
  0x6c   : > { %749 = vst.msk [vmem:[#allocation2 + $0x70] sm:$0xf] %vm273_vm1, %v515_v48  ;;  %v523_v51 = vor.u32 %v521_v13, %v520_v42  ;;  %v524_v54 = vrot.slane %v520_v42, 4  ;;  %v538_v57 = vshll.u32 %v349_v20, 16  ;;  %v543_v55 = vshrl.u32 %v350_v37, 16 }
  0x6d   : > { %6397 = vmatprep.mubr.msk.bf16.mxu0 %vm1288_vm5, %v5851_v47  ;;  %v531_v58 = vor.u32 %v529_v46, %v528_v49  ;;  %v533_v59 = vrot.slane %v528_v49, 4  ;;  %v537_v60 = vrot.slane %v535_v50, 7  ;;  %v546_v62 = vshll.u32 %v350_v37, 16  ;;  %v771_v50 = vld [vmem:[#allocation2 + $0x98] sm:$0x1] }
  0x6e   : > { %v754_v0 = vsel %vm6946_vm10, %v523_v51, %v753_v35  ;;  %v545_v3 = vrot.slane %v543_v55, 7  ;;  %v552_v5 = vshrl.u32 %v351_v38, 16  ;;  %v555_v6 = vshll.u32 %v351_v38, 16 }
  0x6f   : > { %v532_v7 = vsel %vm6952_vm11, %v524_v54, %v531_v58  ;;  %755 = vst [vmem:[#allocation2 + $0x78] sm:$0xf] %v754_v0  ;;  %v758_v8 = vsel %vm6958_vm12, %v533_v59, %v757_v56  ;;  %v540_v14 = vor.u32 %v538_v57, %v537_v60  ;;  %v541_v15 = vrot.slane %v537_v60, 4 }
  0x70   : > { %v820_v19 = vld [vmem:[#allocation2 + $0x6c] sm:$0xf]  ;;  %756 = vst.msk [vmem:[#allocation2 + $0x7c] sm:$0xf] %vm273_vm1, %v532_v7  ;;  %759 = vst [vmem:[#allocation2 + $0x80] sm:$0x1] %v758_v8  ;;  %v548_v20 = vor.u32 %v546_v62, %v545_v3 }
  0x71   : > { %v550_v31 = vrot.slane %v545_v3, 4  ;;  %v554_v21 = vrot.slane %v552_v5, 7  ;;  %v560_v22 = vshrl.u32 %v352_v63, 16  ;;  %v1071_v23 = vshrl.u32 %v820_v19, 16 }
  0x72   : > { %v1074_v17 = vshll.u32 %v820_v19, 16  ;;  %v761_v25 = vsel %vm6946_vm10, %v540_v14, %v760_v4  ;;  %v563_v29 = vshll.u32 %v352_v63, 16  ;;  %v7187_v18 = vld [vmem:[#allocation2 + $0x74] sm:$0x1]  ;;  %v549_v11 = vsel %vm6952_vm11, %v541_v15, %v548_v20 }
  0x73   : > { %762 = vst [vmem:[#allocation2 + $0x84] sm:$0xf] %v761_v25  ;;  %v765_v13 = vsel %vm6958_vm12, %v550_v31, %v764_v16  ;;  %v557_v32 = vor.u32 %v555_v6, %v554_v21  ;;  %v558_v35 = vrot.slane %v554_v21, 4  ;;  %v7193_v37 = vld [vmem:[#allocation2 + $0x70] sm:$0xf]  ;;  %v1073_v38 = vrot.slane %v1071_v23, 4 }
  0x74   : > { %v1076_v1 = vrot.slane %v1074_v17, 5  ;;  %v1090_v41 = vshll.u32 %v7187_v18, 16  ;;  %763 = vst.msk [vmem:[#allocation2 + $0x88] sm:$0xf] %vm273_vm1, %v549_v11  ;;  %766 = vst [vmem:[#allocation2 + $0x8c] sm:$0x1] %v765_v13  ;;  %v5884_v48 = vcombine.low %v820_v19, %v7193_v37 }
  0x75   : > { %v562_v42 = vrot.slane %v560_v22, 7  ;;  %v1080_v46 = vshll.u32 %v7193_v37, 16  ;;  %v1084_v47 = vshrl.u32 %v7193_v37, 16  ;;  %v768_v49 = vsel %vm6946_vm10, %v557_v32, %v767_v10 }
  0x76   : > { %v1077_v51 = vor.u32 %v1076_v1, %v1073_v38  ;;  %v1092_v54 = vrot.slane %v1090_v41, 5  ;;  %769 = vst [vmem:[#allocation2 + $0x90] sm:$0xf] %v768_v49  ;;  %6432 = vmatmul.mubr.msk.bf16.gmra.mxu1 %vm1288_vm5, %v5884_v48  ;;  %v822_v59 = vld [vmem:[#allocation2 + $0x78] sm:$0xf]  ;;  %v569_v60 = vshrl.u32 %v7185_v30, 16 }
  0x77   : > { %v565_v56 = vor.u32 %v563_v29, %v562_v42  ;;  %v567_v57 = vrot.slane %v562_v42, 4  ;;  %v1082_v55 = vrot.slane %v1080_v46, 5  ;;  %v1086_v58 = vrot.slane %v1084_v47, 4  ;;  %v7205_v0 = vld [vmem:[#allocation2 + $0x7c] sm:$0xf] }
  0x78   : > { %v572_v62 = vshll.u32 %v7185_v30, 16  ;;  %v1078_v63 = vrot.slane %v1077_v51, 4  ;;  %v7207_v3 = vld [vmem:[#allocation2 + $0x80] sm:$0x1]  ;;  %v1095_v4 = vshrl.u32 %v822_v59, 16  ;;  %v1098_v8 = vshll.u32 %v822_v59, 16 }
  0x79   : > { %v566_v5 = vsel %vm6952_vm11, %v558_v35, %v565_v56  ;;  %v772_v6 = vsel %vm6958_vm12, %v567_v57, %v771_v50  ;;  %v1087_v7 = vor.u32 %v1086_v58, %v1082_v55  ;;  %v1104_v14 = vshll.u32 %v7205_v0, 16 }
  0x7a   : > { %v1108_v15 = vshrl.u32 %v7205_v0, 16  ;;  %770 = vst.msk [vmem:[#allocation2 + $0x94] sm:$0xf] %vm273_vm1, %v566_v5  ;;  %773 = vst [vmem:[#allocation2 + $0x98] sm:$0x1] %v772_v6  ;;  %v1083_v16 = vsel %vm6938_vm9, %v1078_v63, %v1082_v55  ;;  %v1097_v10 = vrot.slane %v1095_v4, 4  ;;  %v5885_v20 = vcombine.low %v822_v59, %v7205_v0 }
  0x7b   : > { %v1114_v19 = vshll.u32 %v7207_v3, 16  ;;  %v824_v31 = vld [vmem:[#allocation2 + $0x84] sm:$0xf]  ;;  %v1088_v21 = vrot.slane %v1087_v7, 4  ;;  %v1100_v22 = vrot.slane %v1098_v8, 5  ;;  %v1106_v23 = vrot.slane %v1104_v14, 5 }
  0x7c   : > { %v1110_v17 = vrot.slane %v1108_v15, 4  ;;  %v7220_v25 = vld [vmem:[#allocation2 + $0x88] sm:$0xf]  ;;  %6435 = vmatprep.mubr.msk.bf16.mxu1 %vm1288_vm5, %v5885_v20  ;;  %v7223_v11 = vld [vmem:[#allocation2 + $0x8c] sm:$0x1]  ;;  %v1119_v13 = vshrl.u32 %v824_v31, 16 }
  0x7d   : > { %v1116_v29 = vrot.slane %v1114_v19, 5  ;;  %v1122_v32 = vshll.u32 %v824_v31, 16  ;;  %v1128_v35 = vshll.u32 %v7220_v25, 16  ;;  %v1093_v38 = vsel %vm6938_vm9, %v1088_v21, %v1092_v54  ;;  %v826_v46 = vld [vmem:[#allocation2 + $0x90] sm:$0xf] }
  0x7e   : > { %v1101_v1 = vor.u32 %v1100_v22, %v1097_v10  ;;  %v1111_v41 = vor.u32 %v1110_v17, %v1106_v23  ;;  %v1132_v42 = vshrl.u32 %v7220_v25, 16  ;;  %v5852_v47 = vcombine.low %v1083_v16, %v1093_v38  ;;  %v355_v38 = vld [vmem:[%s6927_s8 + $0x68] sm:$0xf] }
  0x7f   : > { %v1121_v48 = vrot.slane %v1119_v13, 4  ;;  %v1124_v49 = vrot.slane %v1122_v32, 5  ;;  %v1130_v50 = vrot.slane %v1128_v35, 5  ;;  %v1138_v55 = vshll.u32 %v7223_v11, 16  ;;  %v774_v35 = vld [vmem:[#allocation2 + $0x9c] sm:$0xf] }
  0x80   : > { %v1102_v51 = vrot.slane %v1101_v1, 4  ;;  %v1112_v56 = vrot.slane %v1111_v41, 4  ;;  %v1134_v57 = vrot.slane %v1132_v42, 4  ;;  %6398 = vmatmul.mubr.msk.bf16.gmra.mxu0 %vm1288_vm5, %v5852_v47  ;;  %v5886_v59 = vcombine.low %v824_v31, %v7220_v25 }
  0x81   : > { %v1125_v58 = vor.u32 %v1124_v49, %v1121_v48  ;;  %v7232_v54 = vld [vmem:[#allocation2 + $0x94] sm:$0xf]  ;;  %v7234_v63 = vld [vmem:[#allocation2 + $0x98] sm:$0x1]  ;;  %v1143_v4 = vshrl.u32 %v826_v46, 16  ;;  %v1146_v5 = vshll.u32 %v826_v46, 16 }
  0x82   : > { %v1107_v6 = vsel %vm6938_vm9, %v1102_v51, %v1106_v23  ;;  %v1117_v7 = vsel %vm6938_vm9, %v1112_v56, %v1116_v29  ;;  %v1135_v8 = vor.u32 %v1134_v57, %v1130_v50  ;;  %v1140_v14 = vrot.slane %v1138_v55, 5  ;;  %6436 = vmatmul.mubr.msk.bf16.gmra.mxu1 %vm1288_vm5, %v5886_v59  ;;  %v354_v23 = vld [vmem:[%s6927_s8 + $0x64] sm:$0xf]  ;;  %v356_v48 = vld [vmem:[%s6927_s8 + $0x6c] sm:$0xf] }
  0x83   : > { %v5853_v15 = vcombine.low %v1107_v6, %v1117_v7  ;;  %v1126_v16 = vrot.slane %v1125_v58, 4  ;;  %v1145_v10 = vrot.slane %v1143_v4, 4  ;;  %v1148_v19 = vrot.slane %v1146_v5, 5  ;;  %v357_v56 = vld [vmem:[%s6927_s8 + $0x70] sm:$0xf] }
  0x84   : > { %v1136_v20 = vrot.slane %v1135_v8, 4  ;;  %v1152_v31 = vshll.u32 %v7232_v54, 16  ;;  %v1156_v21 = vshrl.u32 %v7232_v54, 16  ;;  %v1162_v22 = vshll.u32 %v7234_v63, 16  ;;  %v358_v59 = vld [vmem:[%s6927_s8 + $0x74] sm:$0xf] }
  0x85   : > { %6401 = vmatprep.mubr.msk.bf16.mxu0 %vm1288_vm5, %v5853_v15  ;;  %v1131_v17 = vsel %vm6938_vm9, %v1126_v16, %v1130_v50  ;;  %v1149_v29 = vor.u32 %v1148_v19, %v1145_v10  ;;  %v5887_v13 = vcombine.low %v826_v46, %v7232_v54  ;;  %v571_v32 = vrot.slane %v569_v60, 7  ;;  %v781_v10 = vld [vmem:[#allocation2 + $0xa8] sm:$0xf] }
  0x86   : > { %v1141_v1 = vsel %vm6938_vm9, %v1136_v20, %v1140_v14  ;;  %v1154_v41 = vrot.slane %v1152_v31, 5  ;;  %v1158_v42 = vrot.slane %v1156_v21, 4  ;;  %v1164_v47 = vrot.slane %v1162_v22, 5 }
  0x87   : > { %v5854_v49 = vcombine.low %v1131_v17, %v1141_v1  ;;  %v1150_v51 = vrot.slane %v1149_v29, 4  ;;  %6439 = vmatprep.mubr.msk.bf16.mxu1 %vm1288_vm5, %v5887_v13  ;;  %v574_v46 = vor.u32 %v572_v62, %v571_v32  ;;  %v575_v50 = vrot.slane %v571_v32, 4  ;;  %v778_v62 = vld [vmem:[#allocation2 + $0xa4] sm:$0x1]  ;;  %v785_v29 = vld [vmem:[#allocation2 + $0xb0] sm:$0x1] }
  0x88   : > { %v1159_v60 = vor.u32 %v1158_v42, %v1154_v41  ;;  %v577_v57 = vshrl.u32 %v354_v23, 16  ;;  %v580_v55 = vshll.u32 %v354_v23, 16  ;;  %v586_v58 = vshrl.u32 %v355_v38, 16 }
  0x89   : > { %6402 = vmatmul.mubr.msk.bf16.gmra.mxu0 %vm1288_vm5, %v5854_v49  ;;  %v1155_v4 = vsel %vm6938_vm9, %v1150_v51, %v1154_v41  ;;  %v775_v5 = vsel %vm6946_vm10, %v574_v46, %v774_v35  ;;  %v589_v6 = vshll.u32 %v355_v38, 16  ;;  %v594_v7 = vshrl.u32 %v356_v48, 16  ;;  %v788_v49 = vld [vmem:[#allocation2 + $0xb4] sm:$0xf] }
  0x8a   : > { %v1160_v8 = vrot.slane %v1159_v60, 4  ;;  %v579_v30 = vrot.slane %v577_v57, 7  ;;  %776 = vst [vmem:[#allocation2 + $0x9c] sm:$0xf] %v775_v5  ;;  %v588_v14 = vrot.slane %v586_v58, 7  ;;  %v597_v15 = vshll.u32 %v356_v48, 16 }
  0x8b   : > { %v596_v16 = vrot.slane %v594_v7, 7  ;;  %v603_v19 = vshrl.u32 %v357_v56, 16  ;;  %v606_v20 = vshll.u32 %v357_v56, 16  ;;  %v611_v31 = vshrl.u32 %v358_v59, 16  ;;  %v792_v60 = vld [vmem:[#allocation2 + $0xbc] sm:$0x1] }
  0x8c   : > { %v1165_v21 = vsel %vm6938_vm9, %v1160_v8, %v1164_v47  ;;  %v582_v22 = vor.u32 %v580_v55, %v579_v30  ;;  %v584_v23 = vrot.slane %v579_v30, 4  ;;  %v591_v17 = vor.u32 %v589_v6, %v588_v14  ;;  %v1794_v47 = vld [vmem:[#allocation2] sm:$0xe]  ;;  %v7282_v57 = vld [vmem:[%s9218_s1 + $0xa] sm:$0x3] }
  0x8d   : > { %v5855_v13 = vcombine.low %v1155_v4, %v1165_v21  ;;  %v592_v32 = vrot.slane %v588_v14, 4  ;;  %v599_v35 = vor.u32 %v597_v15, %v596_v16  ;;  %v601_v38 = vrot.slane %v596_v16, 4  ;;  %v1795_v5 = vld [vmem:[#allocation2 + $0xc] sm:$0xe]  ;;  %v6785_v16 = vld [vmem:[#allocation2 + $0x4] sm:$0xf] }
  0x8e   : > { %v583_v1 = vsel %vm6952_vm11, %v575_v50, %v582_v22  ;;  %v779_v41 = vsel %vm6958_vm12, %v584_v23, %v778_v62  ;;  %v782_v42 = vsel %vm6946_vm10, %v591_v17, %v781_v10  ;;  %v605_v48 = vrot.slane %v603_v19, 7  ;;  %v7303_v22 = vld [vmem:[#allocation2 + $0x8] sm:$0x1] }
  0x8f   : > { %6405 = vmatprep.mubr.msk.bf16.mxu0 %vm1288_vm5, %v5855_v13  ;;  %777 = vst.msk [vmem:[#allocation2 + $0xa0] sm:$0xf] %vm273_vm1, %v583_v1  ;;  %780 = vst [vmem:[#allocation2 + $0xa4] sm:$0x1] %v779_v41  ;;  %v600_v51 = vsel %vm6952_vm11, %v592_v32, %v599_v35  ;;  %v786_v46 = vsel %vm6958_vm12, %v601_v38, %v785_v29  ;;  %v613_v50 = vrot.slane %v611_v31, 7  ;;  %v614_v56 = vshll.u32 %v358_v59, 16 }
  0x90   : > { %783 = vst [vmem:[#allocation2 + $0xa8] sm:$0xf] %v782_v42  ;;  %784 = vst.msk [vmem:[#allocation2 + $0xac] sm:$0xf] %vm273_vm1, %v600_v51  ;;  %v608_v55 = vor.u32 %v606_v20, %v605_v48  ;;  %v609_v58 = vrot.slane %v605_v48, 4  ;;  %v2414_v4 = vsel %vm1337_vm0, %v7080_v26, 0 }
  0x91   : > { %787 = vst [vmem:[#allocation2 + $0xb0] sm:$0x1] %v786_v46  ;;  %v828_v6 = vld [vmem:[#allocation2 + $0x9c] sm:$0xf]  ;;  %v616_v7 = vor.u32 %v614_v56, %v613_v50  ;;  %v618_v8 = vrot.slane %v613_v50, 4  ;;  %6482 = vmatpush3.bf16.msra.mxu1 %v2414_v4  ;;  %v5907_v59 = vrot.slane %v1794_v47, 9 }
  0x92   : > { %v1167_v30 = vshrl.u32 %v828_v6, 16  ;;  %v1170_v62 = vshll.u32 %v828_v6, 16  ;;  %v789_v14 = vsel %vm6946_vm10, %v608_v55, %v788_v49  ;;  %v1847_v10 = vrot.slane %v6785_v16, 5  ;;  %v7293_v26 = vld [vmem:[#allocation2 + $0x18] sm:$0xe]  ;;  %6724 = vmatprep.subr.msk.bf16.mxu1 %vm1337_vm0, %v7282_v57 }
  0x93   : > { %v617_v19 = vsel %vm6952_vm11, %v609_v58, %v616_v7  ;;  %790 = vst [vmem:[#allocation2 + $0xb4] sm:$0xf] %v789_v14  ;;  %v793_v20 = vsel %vm6958_vm12, %v618_v8, %v792_v60  ;;  %v5908_v31 = vrot.slane %v1795_v5, 9  ;;  %v1856_v21 = vrot.slane %v1854_v52, 4 }
  0x94   : > { %v1850_v23 = vrot.slane %v7303_v22, 5  ;;  %v1169_v17 = vrot.slane %v1167_v30, 4  ;;  %v1172_v29 = vrot.slane %v1170_v62, 5  ;;  %791 = vst.msk [vmem:[#allocation2 + $0xb8] sm:$0xf] %vm273_vm1, %v617_v19  ;;  %v1849_v13 = vrot.slane %v1847_v10, 4 }
  0x95   : > { %794 = vst [vmem:[#allocation2 + $0xbc] sm:$0x1] %v793_v20  ;;  %v7311_v32 = vsel %vm7289_vm15, %v5908_v31, %v1854_v52  ;;  %v7317_v35 = vsel %vm7289_vm15, %v1856_v21, %v1857_v53  ;;  %v7321_v38 = vsel %vm1337_vm0, %v7110_v2, 0  ;;  %v5909_v1 = vrot.slane %v7293_v26, 9  ;;  %v6792_v26 = vld [vmem:[#allocation2 + $0x38] sm:$0x1] }
  0x96   : > { %v7324_v41 = vld [vmem:[#allocation2 + $0xa0] sm:$0xf]  ;;  %v7326_v42 = vld [vmem:[#allocation2 + $0xa4] sm:$0x1]  ;;  %v1173_v39 = vor.u32 %v1172_v29, %v1169_v17  ;;  %v7330_v52 = vsel %vm7289_vm15, %v5907_v59, %v1847_v10  ;;  %v5925_v40 = vcombine.low %v7311_v32, %v7317_v35 }
  0x97   : > { %v830_v48 = vld [vmem:[#allocation2 + $0xa8] sm:$0xf]  ;;  %v1176_v53 = vshll.u32 %v7324_v41, 16  ;;  %v1180_v2 = vshrl.u32 %v7324_v41, 16  ;;  %v1186_v49 = vshll.u32 %v7326_v42, 16  ;;  %v5888_v47 = vcombine.low %v828_v6, %v7324_v41 }
  0x98   : > { %v7338_v51 = vld [vmem:[#allocation2 + $0xac] sm:$0xf]  ;;  %v1174_v46 = vrot.slane %v1173_v39, 4  ;;  %v7340_v50 = vld [vmem:[#allocation2 + $0xb0] sm:$0x1]  ;;  %v1191_v56 = vshrl.u32 %v830_v48, 16 }
  0x99   : > { %v1194_v60 = vshll.u32 %v830_v48, 16  ;;  %v1200_v55 = vshll.u32 %v7338_v51, 16  ;;  %v1178_v58 = vrot.slane %v1176_v53, 5  ;;  %v1182_v4 = vrot.slane %v1180_v2, 4  ;;  %6440 = vmatmul.mubr.msk.bf16.gmra.mxu1 %vm1288_vm5, %v5888_v47 }
  0x9a   : > { %v1188_v5 = vrot.slane %v1186_v49, 5  ;;  %v1204_v7 = vshrl.u32 %v7338_v51, 16  ;;  %v1193_v8 = vrot.slane %v1191_v56, 4  ;;  %v1210_v6 = vshll.u32 %v7340_v50, 16  ;;  %v832_v62 = vld [vmem:[#allocation2 + $0xb4] sm:$0xf] }
  0x9b   : > { %v1196_v59 = vrot.slane %v1194_v60, 5  ;;  %v1202_v30 = vrot.slane %v1200_v55, 5  ;;  %v1179_v14 = vsel %vm6938_vm9, %v1174_v46, %v1178_v58  ;;  %v1183_v16 = vor.u32 %v1182_v4, %v1178_v58  ;;  %v7349_v20 = vld [vmem:[#allocation2 + $0xb8] sm:$0xf] }
  0x9c   : > { %v1206_v10 = vrot.slane %v1204_v7, 4  ;;  %v5889_v19 = vcombine.low %v830_v48, %v7338_v51  ;;  %v7351_v31 = vld [vmem:[#allocation2 + $0xbc] sm:$0x1]  ;;  %v1212_v17 = vrot.slane %v1210_v6, 5  ;;  %v1215_v29 = vshrl.u32 %v832_v62, 16 }
  0x9d   : > { %v1197_v21 = vor.u32 %v1196_v59, %v1193_v8  ;;  %v1218_v39 = vshll.u32 %v832_v62, 16  ;;  %v1184_v53 = vrot.slane %v1183_v16, 4  ;;  %v1224_v49 = vshll.u32 %v7349_v20, 16  ;;  %v6753_v8 = vld [vmem:[#allocation2 + $0xc] sm:$0xff]  }
  0x9e   : > { %v1207_v2 = vor.u32 %v1206_v10, %v1202_v30  ;;  %6443 = vmatprep.mubr.msk.bf16.mxu1 %vm1288_vm5, %v5889_v19  ;;  %v1228_v47 = vshrl.u32 %v7349_v20, 16  ;;  %v1217_v56 = vrot.slane %v1215_v29, 4  ;;  %v1234_v48 = vshll.u32 %v7351_v31, 16  ;;  %v1797_v19 = vld [vmem:[#allocation2 + $0x24] sm:$0xe] }
  0x9f   : > { %v1198_v46 = vrot.slane %v1197_v21, 4  ;;  %v1220_v60 = vrot.slane %v1218_v39, 5  ;;  %v1189_v55 = vsel %vm6938_vm9, %v1184_v53, %v1188_v5  ;;  %v1226_v4 = vrot.slane %v1224_v49, 5  ;;  %v1798_v53 = vld [vmem:[#allocation2 + $0x30] sm:$0xe] }
  0xa0   : > { %v1208_v58 = vrot.slane %v1207_v2, 4  ;;  %v1230_v7 = vrot.slane %v1228_v47, 4  ;;  %v5856_v59 = vcombine.low %v1179_v14, %v1189_v55  ;;  %v1851_v10 = vsel %vm7289_vm15, %v1849_v13, %v1850_v23  ;;  %v6788_v47 = vld [vmem:[#allocation2 + $0x20] sm:$0x1]  ;;  %v6789_v13 = vld [vmem:[#allocation2 + $0x28] sm:$0xf] }
  0xa1   : > { %v1203_v6 = vsel %vm6938_vm9, %v1198_v46, %v1202_v30  ;;  %v1221_v16 = vor.u32 %v1220_v60, %v1217_v56  ;;  %v1236_v5 = vrot.slane %v1234_v48, 5  ;;  %v5890_v39 = vcombine.low %v832_v62, %v7349_v20  ;;  %v6787_v30 = vld [vmem:[#allocation2 + $0x1c] sm:$0xf] }
  0xa2   : > { %v1213_v21 = vsel %vm6938_vm9, %v1208_v58, %v1212_v17  ;;  %v1231_v29 = vor.u32 %v1230_v7, %v1226_v4  ;;  %6406 = vmatmul.mubr.msk.bf16.gmra.mxu0 %vm1288_vm5, %v5856_v59  ;;  %v1861_v49 = vrot.slane %v6787_v30, 5  ;;  %v1864_v22 = vrot.slane %v6788_v47, 5  ;;  %v6790_v17 = vld [vmem:[#allocation2 + $0x2c] sm:$0x1]  ;;  %v1799_v48 = vld [vmem:[#allocation2 + $0x3c] sm:$0xe] }
  0xa3   : > { %v5857_v14 = vcombine.low %v1203_v6, %v1213_v21  ;;  %v1222_v2 = vrot.slane %v1221_v16, 4  ;;  %6444 = vmatmul.mubr.msk.bf16.gmra.mxu1 %vm1288_vm5, %v5890_v39  ;;  %v5910_v23 = vrot.slane %v1797_v19, 9  ;;  %v1868_v56 = vrot.slane %v6789_v13, 5  ;;  %v6791_v19 = vld [vmem:[#allocation2 + $0x34] sm:$0xf]  ;;  %v6755_v30 = vld [vmem:[#allocation2 + $0x24] sm:$0xff]  }
  0xa4   : > { %v1232_v46 = vrot.slane %v1231_v29, 4  ;;  %v1871_v60 = vrot.slane %v6790_v17, 5  ;;  %6483 = vmatprep.mubr.msk.bf16.mxu1 %vm1288_vm5, %v6753_v8  ;;  %v7378_v55 = vsel %vm7289_vm15, %v5909_v1, %v1861_v49  ;;  %v1863_v58 = vrot.slane %v1861_v49, 4  ;;  %v1800_v29 = vld [vmem:[#allocation2 + $0x48] sm:$0xe] }
  0xa5   : > { %6409 = vmatprep.mubr.msk.bf16.mxu0 %vm1288_vm5, %v5857_v14  ;;  %v1227_v62 = vsel %vm6938_vm9, %v1222_v2, %v1226_v4  ;;  %v5911_v7 = vrot.slane %v1798_v53, 9  ;;  %v5924_v6 = vcombine.low %v7330_v52, %v1851_v10  ;;  %v1870_v16 = vrot.slane %v1868_v56, 4  ;;  %v1801_v14 = vld [vmem:[#allocation2 + $0x54] sm:$0xe]  ;;  %v6754_v2 = vld [vmem:[#allocation2 + $0x18] sm:$0xff]  }
  0xa6   : > { %v1237_v59 = vsel %vm6938_vm9, %v1232_v46, %v1236_v5  ;;  %v1875_v21 = vrot.slane %v6791_v19, 5  ;;  %v7385_v8 = vsel %vm7289_vm15, %v1863_v58, %v1864_v22  ;;  %v1878_v39 = vrot.slane %v6792_v26, 5  ;;  %v1802_v13 = vld [vmem:[#allocation2 + $0x60] sm:$0xe]  ;;  %v1803_v58 = vld [vmem:[#allocation2 + $0x6c] sm:$0xe] }
  0xa7   : > { %v5858_v4 = vcombine.low %v1227_v62, %v1237_v59  ;;  %v5912_v1 = vrot.slane %v1799_v48, 9  ;;  %v5926_v53 = vcombine.low %v7378_v55, %v7385_v8  ;;  %v7391_v52 = vsel %vm7289_vm15, %v5910_v23, %v1868_v56 }
  0xa8   : > { %v7395_v10 = vsel %vm7289_vm15, %v1870_v16, %v1871_v60  ;;  %v1877_v5 = vrot.slane %v1875_v21, 4  ;;  %v7399_v49 = vsel %vm7289_vm15, %v5911_v7, %v1875_v21  ;;  %v1882_v47 = vrot.slane %v7082_v27, 5  ;;  %v1804_v21 = vld [vmem:[#allocation2 + $0x78] sm:$0xe] }
  0xa9   : > { %v1885_v22 = vrot.slane %v7084_v28, 5  ;;  %v5913_v46 = vrot.slane %v1800_v29, 9  ;;  %v1889_v56 = vrot.slane %v7095_v43, 5  ;;  %v1892_v17 = vrot.slane %v7097_v45, 5 }
  0xaa   : > { %v7405_v23 = vsel %vm7289_vm15, %v1877_v5, %v1878_v39  ;;  %v5914_v60 = vrot.slane %v1801_v14, 9  ;;  %6410 = vmatmul.mubr.msk.bf16.gmra.mxu0 %vm1288_vm5, %v5858_v4  ;;  %v5927_v48 = vcombine.low %v7391_v52, %v7395_v10  ;;  %v7414_v27 = vsel %vm7289_vm15, %v5912_v1, %v1882_v47  ;;  %v1805_v39 = vld [vmem:[#allocation2 + $0x84] sm:$0xe] }
  0xab   : > { %v1884_v28 = vrot.slane %v1882_v47, 4  ;;  %v1896_v62 = vrot.slane %v7117_v9, 5  ;;  %6449 = vmatprep.mubr.msk.bf16.mxu0 %vm1288_vm5, %v5924_v6  ;;  %6484 = vmatmul.mubr.msk.bf16.vlgmr.msra.gmra.mxu1 %vm1288_vm5, %v6754_v2  ;;  %v7421_v43 = vsel %vm7289_vm15, %v5913_v46, %v1889_v56  ;;  %v1891_v45 = vrot.slane %v1889_v56, 4  ;;  %v6756_v46 = vld [vmem:[#allocation2 + $0x30] sm:$0xff]  }
  0xac   : > { %v1899_v7 = vrot.slane %v7119_v12, 5  ;;  %v5915_v59 = vrot.slane %v1802_v13, 9  ;;  %6487 = vmatprep.mubr.msk.bf16.mxu1 %vm1288_vm5, %v6755_v30  ;;  %v5928_v16 = vcombine.low %v7399_v49, %v7405_v23  ;;  %v1903_v19 = vrot.slane %v7130_v34, 5  ;;  %v6757_v13 = vld [vmem:[#allocation2 + $0x3c] sm:$0xff]  }
  0xad   : > { %v7429_v9 = vsel %vm7289_vm15, %v1884_v28, %v1885_v22  ;;  %v1898_v6 = vrot.slane %v1896_v62, 4  ;;  %v7434_v29 = vsel %vm7289_vm15, %v1891_v45, %v1892_v17  ;;  %v7438_v12 = vsel %vm7289_vm15, %v5914_v60, %v1896_v62  ;;  %v1806_v22 = vld [vmem:[#allocation2 + $0x90] sm:$0xe]  ;;  %v1807_v45 = vld [vmem:[#allocation2 + $0x9c] sm:$0xe] }
  0xae   : > { %v1906_v4 = vrot.slane %v7141_v61, 5  ;;  %v5916_v26 = vrot.slane %v1803_v58, 9  ;;  %v5929_v1 = vcombine.low %v7414_v27, %v7429_v9  ;;  %v5930_v14 = vcombine.low %v7421_v43, %v7434_v29 }
  0xaf   : > { %v7447_v34 = vsel %vm7289_vm15, %v1898_v6, %v1899_v7  ;;  %v1905_v2 = vrot.slane %v1903_v19, 4  ;;  %v7451_v5 = vsel %vm7289_vm15, %v5915_v59, %v1903_v19  ;;  %v1910_v30 = vrot.slane %v7193_v37, 5  ;;  %v7471_v7 = vld [vmem:[%s9218_s1 + $0xc] sm:$0x3]  ;;  %v1809_v19 = vld [vmem:[#allocation2 + $0xb4] sm:$0xe] }
  0xb0   : > { %v1913_v61 = vrot.slane %v7187_v18, 5  ;;  %v5917_v47 = vrot.slane %v1804_v21, 9  ;;  %v5931_v56 = vcombine.low %v7438_v12, %v7447_v34  ;;  %v1917_v17 = vrot.slane %v7205_v0, 5 }
  0xb1   : > { %v1920_v60 = vrot.slane %v7207_v3, 5  ;;  %v5918_v28 = vrot.slane %v1805_v39, 9  ;;  %v7461_v62 = vsel %vm7289_vm15, %v1905_v2, %v1906_v4  ;;  %v7465_v37 = vsel %vm7289_vm15, %v5916_v26, %v1910_v30 }
  0xb2   : > { %v1912_v18 = vrot.slane %v1910_v30, 4  ;;  %v1924_v58 = vrot.slane %v7220_v25, 5  ;;  %6450 = vmatmul.mubr.msk.bf16.vlgmr.msra.gmra.mxu0 %vm1288_vm5, %v5925_v40  ;;  %v7479_v0 = vsel %vm7289_vm15, %v5917_v47, %v1917_v17  ;;  %v1919_v3 = vrot.slane %v1917_v17, 4  ;;  %v6758_v47 = vld [vmem:[#allocation2 + $0x48] sm:$0xff]  }
  0xb3   : > { %v1927_v59 = vrot.slane %v7223_v11, 5  ;;  %v5919_v6 = vrot.slane %v1806_v22, 9  ;;  %6516 = vmatpush3.bf16.msra.mxu0 %v7321_v38  ;;  %6453 = vmatprep.mubr.msk.bf16.mxu0 %vm1288_vm5, %v5926_v53  ;;  %v1931_v40 = vrot.slane %v7232_v54, 5  ;;  %v1808_v11 = vld [vmem:[#allocation2 + $0xa8] sm:$0xe]  ;;  %v1934_v8 = vrot.slane %v7234_v63, 5 }
  0xb4   : > { %v7489_v25 = vsel %vm7289_vm15, %v1912_v18, %v1913_v61  ;;  %v7493_v32 = vsel %vm7289_vm15, %v5918_v28, %v1924_v58  ;;  %v1926_v35 = vrot.slane %v1924_v58, 4  ;;  %6488 = vmatmul.mubr.msk.bf16.gmra.mxu1 %vm1288_vm5, %v6756_v46  ;;  %v7501_v55 = vsel %vm7289_vm15, %v1919_v3, %v1920_v60  ;;  %6725 = vmatprep.subr.msk.bf16.mxu0 %vm1337_vm0, %v7471_v7  ;;  %v359_v61 = vld [vmem:[%s6927_s8 + $0x78] sm:$0xf]  ;;  %v360_v18 = vld [vmem:[%s6927_s8 + $0x7c] sm:$0xf] }
  0xb5   : > { %v5933_v38 = vcombine.low %v7465_v37, %v7489_v25  ;;  %v5920_v53 = vrot.slane %v1807_v45, 9  ;;  %6491 = vmatprep.mubr.msk.bf16.mxu1 %vm1288_vm5, %v6757_v13  ;;  %v5934_v54 = vcombine.low %v7479_v0, %v7501_v55  ;;  %v7515_v4 = vsel %vm7289_vm15, %v5919_v6, %v1931_v40  ;;  %v6759_v58 = vld [vmem:[#allocation2 + $0x54] sm:$0xff]   ;;  %v2622_v25 = vld [vmem:[#allocation2 + $0x40] sm:$0xf]  ;;  %v7702_v55 = vld [vmem:[#allocation2 + $0x44] sm:$0x1] }
  0xb6   : > { %v7511_v21 = vsel %vm7289_vm15, %v1926_v35, %v1927_v59  ;;  %v1933_v63 = vrot.slane %v1931_v40, 4  ;;  %v1938_v39 = vrot.slane %v7324_v41, 5  ;;  %v1941_v2 = vrot.slane %v7326_v42, 5  ;;  %v2609_v59 = vld [vmem:[#allocation2 + $0xc] sm:$0xf] }
  0xb7   : > { %v5935_v26 = vcombine.low %v7493_v32, %v7511_v21  ;;  %v5921_v30 = vrot.slane %v1808_v11, 9  ;;  %v1945_v46 = vrot.slane %v7338_v51, 5  ;;  %v1948_v13 = vrot.slane %v7340_v50, 5  ;;  %v7553_v11 = vld [vmem:[#allocation2 + $0x10] sm:$0xf] }
  0xb8   : > { %v7524_v22 = vsel %vm7289_vm15, %v1933_v63, %v1934_v8  ;;  %v5922_v17 = vrot.slane %v1809_v19, 9  ;;  %v7532_v41 = vsel %vm7289_vm15, %v5920_v53, %v1938_v39  ;;  %v1940_v42 = vrot.slane %v1938_v39, 4  ;;  %v6104_v8 = vld [vmem:[%s9218_s1 + $0xe] sm:$0x3]  ;;  %v795_v53 = vld [vmem:[#allocation2 + $0xc0] sm:$0xf] }
  0xb9   : > { %v5936_v60 = vcombine.low %v7515_v4, %v7524_v22  ;;  %v1952_v28 = vrot.slane %v7349_v20, 5  ;;  %v7538_v45 = vsel %vm7289_vm15, %v5921_v30, %v1945_v46  ;;  %v1947_v51 = vrot.slane %v1945_v46, 4  ;;  %v7577_v63 = vld [vmem:[#allocation2 + $0x14] sm:$0x1]  ;;  %v7584_v46 = vld [vmem:[#allocation2 + $0x1c] sm:$0xf] }
  0xba   : > { %v1955_v50 = vrot.slane %v7351_v31, 5  ;;  %v620_v3 = vshrl.u32 %v359_v61, 16  ;;  %6454 = vmatmul.mubr.msk.bf16.gmra.mxu0 %vm1288_vm5, %v5927_v48  ;;  %v7547_v6 = vsel %vm7289_vm15, %v1940_v42, %v1941_v2  ;;  %v623_v40 = vshll.u32 %v359_v61, 16 }
  0xbb   : > { %v7551_v20 = vsel %vm7289_vm15, %v5922_v17, %v1952_v28  ;;  %v1954_v35 = vrot.slane %v1952_v28, 4  ;;  %6457 = vmatprep.mubr.msk.bf16.mxu0 %vm1288_vm5, %v5928_v16  ;;  %v5937_v31 = vcombine.low %v7532_v41, %v7547_v6  ;;  %v7563_v52 = vsel %vm7289_vm15, %v1947_v51, %v1948_v13  ;;  %v7588_v28 = vld [vmem:[#allocation2 + $0x20] sm:$0x1] }
  0xbc   : > { %v622_v10 = vrot.slane %v620_v3, 7  ;;  %v628_v48 = vshrl.u32 %v360_v18, 16  ;;  %6492 = vmatmul.mubr.msk.bf16.gmra.mxu1 %vm1288_vm5, %v6758_v47  ;;  %v631_v16 = vshll.u32 %v360_v18, 16  ;;  %v3610_v19 = vsel %vm1337_vm0, %v7282_v57, 0  ;;  %v2612_v47 = vld [vmem:[#allocation2 + $0x18] sm:$0xf] }
  0xbd   : > { %v7573_v23 = vsel %vm7289_vm15, %v1954_v35, %v1955_v50  ;;  %6495 = vmatprep.mubr.msk.bf16.mxu1 %vm1288_vm5, %v6759_v58  ;;  %6550 = vmatpush3.bf16.msra.mxu1 %v3610_v19  ;;  %v2658_v13 = vshrl.u32 %v2609_v59, 16  ;;  %v2661_v17 = vshll.u32 %v2609_v59, 16  ;;  %v2667_v42 = vshll.u32 %v7553_v11, 16  ;;  %v6760_v18 = vld [vmem:[#allocation2 + $0x60] sm:$0xff]  }
  0xbe   : > { %v625_v2 = vor.u32 %v623_v40, %v622_v10  ;;  %v626_v30 = vrot.slane %v622_v10, 4  ;;  %v7582_v61 = vrot.slane %v628_v48, 7  ;;  %v2671_v57 = vshrl.u32 %v7553_v11, 16  ;;  %6726 = vmatprep.subr.msk.bf16.mxu1 %vm1337_vm0, %v6104_v8  ;;  %v6761_v48 = vld [vmem:[#allocation2 + $0x6c] sm:$0xff]  }
  0xbf   : > { %v5932_v58 = vcombine.low %v7451_v5, %v7461_v62  ;;  %v2677_v3 = vshll.u32 %v7577_v63, 16  ;;  %v2660_v59 = vrot.slane %v2658_v13, 4  ;;  %v2663_v35 = vrot.slane %v2661_v17, 5  ;;  %v3335_v13 = vld [vmem:[#allocation2 + $0xc] sm:$0xe] }
  0xc0   : > { %v633_v51 = vor.u32 %v631_v16, %v7582_v61  ;;  %v796_v50 = vsel %vm6946_vm10, %v625_v2, %v795_v53  ;;  %v2669_v40 = vrot.slane %v2667_v42, 5  ;;  %v2673_v10 = vrot.slane %v2671_v57, 4  ;;  %v3336_v57 = vld [vmem:[#allocation2 + $0x18] sm:$0xe] }
  0xc1   : > { %797 = vst [vmem:[#allocation2 + $0xc0] sm:$0xf] %v796_v50  ;;  %v635_v19 = vrot.slane %v7582_v61, 4  ;;  %v2682_v39 = vshrl.u32 %v2612_v47, 16  ;;  %v2685_v49 = vshll.u32 %v2612_v47, 16  ;;  %v2664_v33 = vor.u32 %v2663_v35, %v2660_v59 }
  0xc2   : > { %v634_v8 = vsel %vm6952_vm11, %v626_v30, %v633_v51  ;;  %6458 = vmatmul.mubr.msk.bf16.gmra.mxu0 %vm1288_vm5, %v5929_v1  ;;  %v2674_v16 = vor.u32 %v2673_v10, %v2669_v40  ;;  %v2691_v53 = vshll.u32 %v7584_v46, 16  ;;  %v2695_v2 = vshrl.u32 %v7584_v46, 16  ;;  %v7622_v35 = vld [vmem:[#allocation2 + $0x28] sm:$0xf] }
  0xc3   : > { %798 = vst.msk [vmem:[#allocation2 + $0xc4] sm:$0xf] %vm273_vm1, %v634_v8  ;;  %6461 = vmatprep.mubr.msk.bf16.mxu0 %vm1288_vm5, %v5930_v14  ;;  %v2679_v36 = vrot.slane %v2677_v3, 5  ;;  %v2684_v30 = vrot.slane %v2682_v39, 4  ;;  %v2687_v47 = vrot.slane %v2685_v49, 5  ;;  %v2701_v27 = vshll.u32 %v7588_v28, 16 }
  0xc4   : > { %6496 = vmatmul.mubr.msk.bf16.gmra.mxu1 %vm1288_vm5, %v6760_v18  ;;  %v2665_v9 = vrot.slane %v2664_v33, 4  ;;  %v2675_v1 = vrot.slane %v2674_v16, 4  ;;  %v2693_v17 = vrot.slane %v2691_v53, 5  ;;  %v2697_v42 = vrot.slane %v2695_v2, 4  ;;  %v2615_v49 = vld [vmem:[#allocation2 + $0x24] sm:$0xf] }
  0xc5   : > { %6499 = vmatprep.mubr.msk.bf16.mxu1 %vm1288_vm5, %v6761_v48  ;;  %v2688_v51 = vor.u32 %v2687_v47, %v2684_v30  ;;  %v7616_v43 = vsel %vm1337_vm0, %v7471_v7, 0  ;;  %v6022_v29 = vrot.slane %v3335_v13, 9  ;;  %v3401_v14 = vrot.slane %v7553_v11, 5  ;;  %v6762_v39 = vld [vmem:[#allocation2 + $0x78] sm:$0xff]   ;;  %v6763_v10 = vld [vmem:[#allocation2 + $0x84] sm:$0xff]  }
  0xc6   : > { %v2670_v18 = vsel %vm6938_vm9, %v2665_v9, %v2669_v40  ;;  %v2698_v50 = vor.u32 %v2697_v42, %v2693_v17  ;;  %v2703_v3 = vrot.slane %v2701_v27, 5  ;;  %v3404_v59 = vrot.slane %v7577_v63, 5  ;;  %v7630_v33 = vld [vmem:[#allocation2 + $0x2c] sm:$0x1]  ;;  %v2618_v2 = vld [vmem:[#allocation2 + $0x30] sm:$0xf] }
  0xc7   : > { %v2680_v48 = vsel %vm6938_vm9, %v2675_v1, %v2679_v36  ;;  %v2689_v7 = vrot.slane %v2688_v51, 4  ;;  %v7628_v8 = vsel %vm7289_vm15, %v6022_v29, %v3401_v14  ;;  %v3403_v11 = vrot.slane %v3401_v14, 4  ;;  %v7640_v27 = vld [vmem:[#allocation2 + $0x34] sm:$0xf] }
  0xc8   : > { %v2699_v16 = vrot.slane %v2698_v50, 4  ;;  %v6023_v40 = vrot.slane %v3336_v57, 9  ;;  %v3408_v53 = vrot.slane %v7584_v46, 5  ;;  %v3411_v63 = vrot.slane %v7588_v28, 5 }
  0xc9   : > { %v2694_v13 = vsel %vm6938_vm9, %v2689_v7, %v2693_v17  ;;  %v7638_v36 = vsel %vm7289_vm15, %v3403_v11, %v3404_v59  ;;  %v2706_v30 = vshrl.u32 %v2615_v49, 16  ;;  %v2709_v47 = vshll.u32 %v2615_v49, 16  ;;  %v7652_v17 = vld [vmem:[#allocation2 + $0x38] sm:$0x1] }
  0xca   : > { %6462 = vmatmul.mubr.msk.bf16.gmra.mxu0 %vm1288_vm5, %v5931_v56  ;;  %v7646_v46 = vcombine.low %v2670_v18, %v2680_v48  ;;  %v2704_v28 = vsel %vm6938_vm9, %v2699_v16, %v2703_v3  ;;  %v6039_v9 = vcombine.low %v7628_v8, %v7638_v36  ;;  %v3410_v1 = vrot.slane %v3408_v53, 4  ;;  %v3337_v18 = vld [vmem:[#allocation2 + $0x24] sm:$0xe] }
  0xcb   : > { %6465 = vmatprep.mubr.msk.bf16.mxu0 %vm1288_vm5, %v5932_v58  ;;  %v7660_v12 = vsel %vm7289_vm15, %v6023_v40, %v3408_v53  ;;  %v2708_v34 = vrot.slane %v2706_v30, 4  ;;  %v2711_v56 = vrot.slane %v2709_v47, 5  ;;  %v2715_v42 = vshll.u32 %v7622_v35, 16  ;;  %v3338_v30 = vld [vmem:[#allocation2 + $0x30] sm:$0xe] }
  0xcc   : > { %6500 = vmatmul.mubr.msk.bf16.gmra.mxu1 %vm1288_vm5, %v6762_v39  ;;  %v7664_v57 = vcombine.low %v2694_v13, %v2704_v28  ;;  %v2719_v51 = vshrl.u32 %v7622_v35, 16  ;;  %v2725_v29 = vshll.u32 %v7630_v33, 16  ;;  %v2730_v14 = vshrl.u32 %v2618_v2, 16 }
  0xcd   : > { %6503 = vmatprep.mubr.msk.bf16.mxu1 %vm1288_vm5, %v6763_v10  ;;  %v7671_v5 = vsel %vm7289_vm15, %v3410_v1, %v3411_v63  ;;  %v2712_v62 = vor.u32 %v2711_v56, %v2708_v34  ;;  %v2717_v58 = vrot.slane %v2715_v42, 5  ;;  %v2733_v49 = vshll.u32 %v2618_v2, 16  ;;  %v6764_v10 = vld [vmem:[#allocation2 + $0x90] sm:$0xff]   ;;  %v6765_v2 = vld [vmem:[#allocation2 + $0x9c] sm:$0xff]  }
  0xce   : > { %v2721_v50 = vrot.slane %v2719_v51, 4  ;;  %v2727_v3 = vrot.slane %v2725_v29, 5  ;;  %v2732_v39 = vrot.slane %v2730_v14, 4  ;;  %v2739_v59 = vshll.u32 %v7640_v27, 16  ;;  %v2621_v56 = vld [vmem:[#allocation2 + $0x3c] sm:$0xf] }
  0xcf   : > { %v2713_v48 = vrot.slane %v2712_v62, 4  ;;  %v2735_v7 = vrot.slane %v2733_v49, 5  ;;  %v2743_v11 = vshrl.u32 %v7640_v27, 16  ;;  %v2749_v16 = vshll.u32 %v7652_v17, 16 }
  0xd0   : > { %v2722_v40 = vor.u32 %v2721_v50, %v2717_v58  ;;  %v2741_v53 = vrot.slane %v2739_v59, 5  ;;  %v6024_v63 = vrot.slane %v3337_v18, 9  ;;  %v3415_v13 = vrot.slane %v7622_v35, 5 }
  0xd1   : > { %v6040_v47 = vcombine.low %v7660_v12, %v7671_v5  ;;  %v2718_v28 = vsel %vm6938_vm9, %v2713_v48, %v2717_v58  ;;  %v2736_v1 = vor.u32 %v2735_v7, %v2732_v39  ;;  %v2745_v34 = vrot.slane %v2743_v11, 4  ;;  %v2624_v39 = vld [vmem:[#allocation2 + $0x48] sm:$0xf] }
  0xd2   : > { %6466 = vmatmul.mubr.msk.bf16.gmra.mxu0 %vm1288_vm5, %v5933_v38  ;;  %v2723_v42 = vrot.slane %v2722_v40, 4  ;;  %v2751_v51 = vrot.slane %v2749_v16, 5  ;;  %v3417_v29 = vrot.slane %v3415_v13, 4  ;;  %v3418_v35 = vrot.slane %v7630_v33, 5  ;;  %v7714_v16 = vld [vmem:[#allocation2 + $0x50] sm:$0x1] }
  0xd3   : > { %6469 = vmatprep.mubr.msk.bf16.mxu0 %vm1288_vm5, %v5934_v54  ;;  %v2737_v14 = vrot.slane %v2736_v1, 4  ;;  %v2746_v62 = vor.u32 %v2745_v34, %v2741_v53  ;;  %v7692_v58 = vsel %vm7289_vm15, %v6024_v63, %v3415_v13  ;;  %v3422_v37 = vrot.slane %v7640_v27, 5  ;;  %v3339_v13 = vld [vmem:[#allocation2 + $0x3c] sm:$0xe]  ;;  %v6767_v34 = vld [vmem:[#allocation2 + $0xb4] sm:$0xff]  }
  0xd4   : > { %6504 = vmatmul.mubr.msk.bf16.gmra.mxu1 %vm1288_vm5, %v6764_v10  ;;  %v2728_v38 = vsel %vm6938_vm9, %v2723_v42, %v2727_v3  ;;  %v7700_v33 = vsel %vm7289_vm15, %v3417_v29, %v3418_v35  ;;  %v6025_v0 = vrot.slane %v3338_v30, 9  ;;  %v2754_v54 = vshrl.u32 %v2621_v56, 16  ;;  %v7710_v3 = vld [vmem:[#allocation2 + $0x4c] sm:$0xf] }
  0xd5   : > { %6507 = vmatprep.mubr.msk.bf16.mxu1 %vm1288_vm5, %v6765_v2  ;;  %v7705_v49 = vcombine.low %v2718_v28, %v2728_v38  ;;  %v2742_v27 = vsel %vm6938_vm9, %v2737_v14, %v2741_v53  ;;  %v2747_v18 = vrot.slane %v2746_v62, 4  ;;  %v3425_v50 = vrot.slane %v7652_v17, 5  ;;  %v6766_v17 = vld [vmem:[#allocation2 + $0xa8] sm:$0xff]  }
  0xd6   : > { %v6041_v59 = vcombine.low %v7692_v58, %v7700_v33  ;;  %v3424_v48 = vrot.slane %v3422_v37, 4  ;;  %v2756_v7 = vrot.slane %v2754_v54, 4  ;;  %v2757_v11 = vshll.u32 %v2621_v56, 16 }
  0xd7   : > { %v2752_v10 = vsel %vm6938_vm9, %v2747_v18, %v2751_v51  ;;  %v2763_v40 = vshll.u32 %v2622_v25, 16  ;;  %v2767_v63 = vshrl.u32 %v2622_v25, 16  ;;  %v2773_v53 = vshll.u32 %v7702_v55, 16 }
  0xd8   : > { %v7719_v30 = vcombine.low %v2742_v27, %v2752_v10  ;;  %v7723_v2 = vsel %vm7289_vm15, %v6025_v0, %v3422_v37  ;;  %v2759_v28 = vrot.slane %v2757_v11, 5  ;;  %v2778_v1 = vshrl.u32 %v2624_v39, 16 }
  0xd9   : > { %v7727_v56 = vsel %vm7289_vm15, %v3424_v48, %v3425_v50  ;;  %v2765_v42 = vrot.slane %v2763_v40, 5  ;;  %v2769_v51 = vrot.slane %v2767_v63, 4  ;;  %v2775_v29 = vrot.slane %v2773_v53, 5  ;;  %v3340_v50 = vld [vmem:[#allocation2 + $0x48] sm:$0xe] }
  0xda   : > { %6470 = vmatmul.mubr.msk.bf16.gmra.mxu0 %vm1288_vm5, %v5935_v26  ;;  %v2760_v35 = vor.u32 %v2759_v28, %v2756_v7  ;;  %v2780_v14 = vrot.slane %v2778_v1, 4  ;;  %v2781_v62 = vshll.u32 %v2624_v39, 16  ;;  %v2787_v37 = vshll.u32 %v7710_v3, 16  ;;  %v2627_v40 = vld [vmem:[#allocation2 + $0x54] sm:$0xf] }
  0xdb   : > { %6473 = vmatprep.mubr.msk.bf16.mxu0 %vm1288_vm5, %v5936_v60  ;;  %v2770_v38 = vor.u32 %v2769_v51, %v2765_v42  ;;  %v2791_v0 = vshrl.u32 %v7710_v3, 16  ;;  %v2797_v54 = vshll.u32 %v7714_v16, 16  ;;  %v6026_v27 = vrot.slane %v3339_v13, 9  ;;  %v7749_v63 = vld [vmem:[#allocation2 + $0x58] sm:$0xf] }
  0xdc   : > { %6508 = vmatmul.mubr.msk.bf16.gmra.mxu1 %vm1288_vm5, %v6766_v17  ;;  %v2761_v32 = vrot.slane %v2760_v35, 4  ;;  %v2783_v21 = vrot.slane %v2781_v62, 5  ;;  %v2789_v26 = vrot.slane %v2787_v37, 5  ;;  %v3429_v18 = vrot.slane %v2622_v25, 5  ;;  %v6768_v25 = vld [vmem:[#allocation2 + $0xc0] sm:$0xff]  }
  0xdd   : > { %6511 = vmatprep.mubr.msk.bf16.mxu1 %vm1288_vm5, %v6767_v34  ;;  %v2771_v39 = vrot.slane %v2770_v38, 4  ;;  %v2793_v48 = vrot.slane %v2791_v0, 4  ;;  %v2799_v4 = vrot.slane %v2797_v54, 5  ;;  %v3432_v22 = vrot.slane %v7702_v55, 5  ;;  %v7754_v28 = vld [vmem:[#allocation2 + $0x5c] sm:$0x1] }
  0xde   : > { %v2766_v60 = vsel %vm6938_vm9, %v2761_v32, %v2765_v42  ;;  %v2784_v7 = vor.u32 %v2783_v21, %v2780_v14  ;;  %v7747_v11 = vsel %vm7289_vm15, %v6026_v27, %v3429_v18  ;;  %v3431_v10 = vrot.slane %v3429_v18, 4  ;;  %v2631_v32 = vld [vmem:[#allocation2 + $0x64] sm:$0xf]  ;;  %v2632_v18 = vld [vmem:[#allocation2 + $0x68] sm:$0x1] }
  0xdf   : > { %v2776_v53 = vsel %vm6938_vm9, %v2771_v39, %v2775_v29  ;;  %v2794_v13 = vor.u32 %v2793_v48, %v2789_v26  ;;  %v6027_v17 = vrot.slane %v3340_v50, 9  ;;  %v3436_v55 = vrot.slane %v7710_v3, 5  ;;  %v3341_v50 = vld [vmem:[#allocation2 + $0x54] sm:$0xe] }
  0xe0   : > { %v6042_v1 = vcombine.low %v7723_v2, %v7727_v56  ;;  %v2785_v34 = vrot.slane %v2784_v7, 4  ;;  %v7760_v42 = vsel %vm7289_vm15, %v3431_v10, %v3432_v22  ;;  %v3439_v51 = vrot.slane %v7714_v16, 5  ;;  %v2630_v16 = vld [vmem:[#allocation2 + $0x60] sm:$0xf]  ;;  %v2639_v56 = vld [vmem:[#allocation2 + $0x84] sm:$0xf] }
  0xe1   : > { %v7763_v35 = vcombine.low %v2766_v60, %v2776_v53  ;;  %v2795_v14 = vrot.slane %v2794_v13, 4  ;;  %v6043_v29 = vcombine.low %v7747_v11, %v7760_v42  ;;  %v3438_v62 = vrot.slane %v3436_v55, 4  ;;  %v3342_v60 = vld [vmem:[#allocation2 + $0x60] sm:$0xe] }
  0xe2   : > { %6474 = vmatmul.mubr.msk.bf16.gmra.mxu0 %vm1288_vm5, %v5937_v31  ;;  %v2790_v3 = vsel %vm6938_vm9, %v2785_v34, %v2789_v26  ;;  %v2802_v37 = vshrl.u32 %v2627_v40, 16  ;;  %v2805_v38 = vshll.u32 %v2627_v40, 16  ;;  %v2811_v0 = vshll.u32 %v7749_v63, 16 }
  0xe3   : > { %v9243_v54 = vcombine.low %v7538_v45, %v7563_v52  ;;  %v2800_v27 = vsel %vm6938_vm9, %v2795_v14, %v2799_v4  ;;  %v7782_v41 = vsel %vm7289_vm15, %v6027_v17, %v3436_v55  ;;  %v2815_v6 = vshrl.u32 %v7749_v63, 16 }
  0xe4   : > { %v2821_v31 = vshll.u32 %v7754_v28, 16  ;;  %6512 = vmatmul.mubr.msk.bf16.gmra.mxu1 %vm1288_vm5, %v6768_v25  ;;  %v7787_v21 = vcombine.low %v2790_v3, %v2800_v27  ;;  %v7791_v45 = vsel %vm7289_vm15, %v3438_v62, %v3439_v51  ;;  %v2804_v52 = vrot.slane %v2802_v37, 4  ;;  %v2633_v27 = vld [vmem:[#allocation2 + $0x6c] sm:$0xf] }
  0xe5   : > { %6477 = vmatprep.mubr.msk.bf16.mxu0 %vm1288_vm5, %v9243_v54  ;;  %v2807_v26 = vrot.slane %v2805_v38, 5  ;;  %6551 = vmatprep.mubr.msk.bf16.mxu1 %vm1288_vm5, %v6039_v9  ;;  %v2813_v39 = vrot.slane %v2811_v0, 5  ;;  %v2817_v48 = vrot.slane %v2815_v6, 4  ;;  %v2826_v22 = vshrl.u32 %v2630_v16, 16 }
  0xe6   : > { %v2823_v4 = vrot.slane %v2821_v31, 5  ;;  %v2829_v10 = vshll.u32 %v2630_v16, 16  ;;  %v2835_v40 = vshll.u32 %v2631_v32, 16  ;;  %v2839_v25 = vshrl.u32 %v2631_v32, 16  ;;  %v7813_v31 = vld [vmem:[#allocation2 + $0x74] sm:$0x1] }
  0xe7   : > { %v2808_v7 = vor.u32 %v2807_v26, %v2804_v52  ;;  %v2818_v53 = vor.u32 %v2817_v48, %v2813_v39  ;;  %v2828_v13 = vrot.slane %v2826_v22, 4  ;;  %v2845_v17 = vshll.u32 %v2632_v18, 16  ;;  %v7833_v48 = vld [vmem:[#allocation2 + $0x7c] sm:$0xf] }
  0xe8   : > { %v6028_v55 = vrot.slane %v3341_v50, 9  ;;  %v2831_v51 = vrot.slane %v2829_v10, 5  ;;  %v2837_v14 = vrot.slane %v2835_v40, 5  ;;  %v2841_v62 = vrot.slane %v2839_v25, 4  ;;  %v7848_v10 = vld [vmem:[#allocation2 + $0x80] sm:$0x1] }
  0xe9   : > { %v2809_v34 = vrot.slane %v2808_v7, 4  ;;  %v2819_v8 = vrot.slane %v2818_v53, 4  ;;  %v2847_v36 = vrot.slane %v2845_v17, 5  ;;  %v3443_v9 = vrot.slane %v7749_v63, 5  ;;  %v3343_v17 = vld [vmem:[#allocation2 + $0x6c] sm:$0xe] }
  0xea   : > { %v3446_v3 = vrot.slane %v7754_v28, 5  ;;  %v9244_v37 = vcombine.low %v7551_v20, %v7573_v23  ;;  %v2832_v0 = vor.u32 %v2831_v51, %v2828_v13  ;;  %v2842_v16 = vor.u32 %v2841_v62, %v2837_v14  ;;  %v7811_v23 = vld [vmem:[#allocation2 + $0x70] sm:$0xf] }
  0xeb   : > { %v2814_v38 = vsel %vm6938_vm9, %v2809_v34, %v2813_v39  ;;  %v6029_v54 = vrot.slane %v3342_v60, 9  ;;  %v6044_v63 = vcombine.low %v7782_v41, %v7791_v45  ;;  %v2824_v28 = vsel %vm6938_vm9, %v2819_v8, %v2823_v4  ;;  %v2636_v39 = vld [vmem:[#allocation2 + $0x78] sm:$0xf]  ;;  %v7860_v62 = vld [vmem:[%s9218_s1 + $0x10] sm:$0x3] }
  0xec   : > { %6478 = vmatmul.mubr.msk.bf16.gmra.mxu0 %vm1288_vm5, %v9244_v37  ;;  %v3445_v6 = vrot.slane %v3443_v9, 4  ;;  %v3450_v20 = vrot.slane %v2631_v32, 5  ;;  %6552 = vmatmul.mubr.msk.bf16.vlgmr.msra.gmra.mxu1 %vm1288_vm5, %v6040_v47  ;;  %v2833_v52 = vrot.slane %v2832_v0, 4  ;;  %v2843_v26 = vrot.slane %v2842_v16, 4 }
  0xed   : > { %6517 = vmatprep.mubr.msk.bf16.mxu0 %vm1288_vm5, %v7646_v46  ;;  %v7821_v46 = vsel %vm7289_vm15, %v6028_v55, %v3443_v9  ;;  %v3453_v50 = vrot.slane %v2632_v18, 5  ;;  %6555 = vmatprep.mubr.msk.bf16.mxu1 %vm1288_vm5, %v6041_v59  ;;  %v7827_v32 = vcombine.low %v2814_v38, %v2824_v28  ;;  %v2850_v47 = vshrl.u32 %v2633_v27, 16 }
  0xee   : > { %v7831_v12 = vsel %vm7289_vm15, %v3445_v6, %v3446_v3  ;;  %v3452_v5 = vrot.slane %v3450_v20, 4  ;;  %v2838_v4 = vsel %vm6938_vm9, %v2833_v52, %v2837_v14  ;;  %v2848_v18 = vsel %vm6938_vm9, %v2843_v26, %v2847_v36 }
  0xef   : > { %v7841_v58 = vsel %vm7289_vm15, %v6029_v54, %v3450_v20  ;;  %v2853_v33 = vshll.u32 %v2633_v27, 16  ;;  %v7843_v59 = vcombine.low %v2838_v4, %v2848_v18  ;;  %v6045_v22 = vcombine.low %v7821_v46, %v7831_v12  ;;  %v3344_v54 = vld [vmem:[#allocation2 + $0x78] sm:$0xe] }
  0xf0   : > { %v2852_v60 = vrot.slane %v2850_v47, 4  ;;  %v2859_v7 = vshll.u32 %v7811_v23, 16  ;;  %v7852_v40 = vsel %vm7289_vm15, %v3452_v5, %v3453_v50  ;;  %v2863_v53 = vshrl.u32 %v7811_v23, 16  ;;  %v7892_v47 = vld [vmem:[#allocation2 + $0x88] sm:$0xf] }
  0xf1   : > { %v2855_v25 = vrot.slane %v2853_v33, 5  ;;  %v2869_v13 = vshll.u32 %v7813_v31, 16  ;;  %v2874_v34 = vshrl.u32 %v2636_v39, 16  ;;  %v2877_v51 = vshll.u32 %v2636_v39, 16 }
  0xf2   : > { %v2861_v55 = vrot.slane %v2859_v7, 5  ;;  %v2883_v14 = vshll.u32 %v7833_v48, 16  ;;  %v2865_v36 = vrot.slane %v2863_v53, 4  ;;  %v2887_v3 = vshrl.u32 %v7833_v48, 16  ;;  %v2641_v7 = vld [vmem:[#allocation2 + $0x8c] sm:$0x1] }
  0xf3   : > { %v2856_v8 = vor.u32 %v2855_v25, %v2852_v60  ;;  %v2871_v9 = vrot.slane %v2869_v13, 5  ;;  %v2876_v37 = vrot.slane %v2874_v34, 4  ;;  %v2879_v38 = vrot.slane %v2877_v51, 5  ;;  %v2642_v25 = vld [vmem:[#allocation2 + $0x90] sm:$0xf] }
  0xf4   : > { %6518 = vmatmul.mubr.msk.bf16.vlgmr.msra.gmra.mxu0 %vm1288_vm5, %v7664_v57  ;;  %v2885_v0 = vrot.slane %v2883_v14, 5  ;;  %v2893_v16 = vshll.u32 %v7848_v10, 16  ;;  %6556 = vmatmul.mubr.msk.bf16.gmra.mxu1 %vm1288_vm5, %v6042_v1  ;;  %v2866_v27 = vor.u32 %v2865_v36, %v2861_v55  ;;  %v2889_v28 = vrot.slane %v2887_v3, 4  ;;  %v7927_v3 = vld [vmem:[#allocation2 + $0x98] sm:$0x1] }
  0xf5   : > { %6584 = vmatpush3.bf16.msra.mxu0 %v7616_v43  ;;  %6521 = vmatprep.mubr.msk.bf16.mxu0 %vm1288_vm5, %v7705_v49  ;;  %v2857_v57 = vrot.slane %v2856_v8, 4  ;;  %v6030_v6 = vrot.slane %v3343_v17, 9  ;;  %v2880_v43 = vor.u32 %v2879_v38, %v2876_v37  ;;  %v3457_v20 = vrot.slane %v7811_v23, 5  ;;  %v7919_v8 = vld [vmem:[#allocation2 + $0x94] sm:$0xf] }
  0xf6   : > { %6727 = vmatprep.subr.msk.bf16.mxu0 %vm1337_vm0, %v7860_v62  ;;  %6559 = vmatprep.mubr.msk.bf16.mxu1 %vm1288_vm5, %v6043_v29  ;;  %v2895_v49 = vrot.slane %v2893_v16, 5  ;;  %v3460_v2 = vrot.slane %v7813_v31, 5  ;;  %v2867_v52 = vrot.slane %v2866_v27, 4  ;;  %v2890_v26 = vor.u32 %v2889_v28, %v2885_v0  ;;  %v7913_v34 = vpop.f32.mrf.mxu1 }
  0xf7   : > { %v2862_v1 = vsel %vm6938_vm9, %v2857_v57, %v2861_v55  ;;  %v6031_v50 = vrot.slane %v3344_v54, 9  ;;  %v2881_v39 = vrot.slane %v2880_v43, 4  ;;  %v7885_v5 = vsel %vm7289_vm15, %v6030_v6, %v3457_v20 }
  0xf8   : > { %v3459_v11 = vrot.slane %v3457_v20, 4  ;;  %v3464_v42 = vrot.slane %v7833_v48, 5  ;;  %v6046_v29 = vcombine.low %v7841_v58, %v7852_v40  ;;  %v2872_v23 = vsel %vm6938_vm9, %v2867_v52, %v2871_v9  ;;  %v7938_v28 = vpop.f32.mrf.mxu1 }
  0xf9   : > { %v2891_v31 = vrot.slane %v2890_v26, 4  ;;  %v2898_v4 = vshrl.u32 %v2639_v56, 16  ;;  %v7894_v18 = vcombine.low %v2862_v1, %v2872_v23  ;;  %v2886_v33 = vsel %vm6938_vm9, %v2881_v39, %v2885_v0  ;;  %v2645_v23 = vld [vmem:[#allocation2 + $0x9c] sm:$0xf] }
  0xfa   : > { %v7900_v60 = vsel %vm7289_vm15, %v3459_v11, %v3460_v2  ;;  %v3467_v48 = vrot.slane %v7848_v10, 5  ;;  %v7911_v17 = vsel %vm7289_vm15, %v6031_v50, %v3464_v42  ;;  %v3466_v55 = vrot.slane %v3464_v42, 4  ;;  %v3346_v50 = vld [vmem:[#allocation2 + $0x90] sm:$0xe] }
  0xfb   : > { %v2896_v53 = vsel %vm6938_vm9, %v2891_v31, %v2895_v49  ;;  %v6047_v13 = vcombine.low %v7885_v5, %v7900_v60  ;;  %v2900_v10 = vrot.slane %v2898_v4, 4  ;;  %v2901_v51 = vshll.u32 %v2639_v56, 16  ;;  %v7947_v31 = vpop.f32.mrf.mxu1  ;;  %v7957_v60 = vld [vmem:[#allocation2 + $0xa0] sm:$0xf] }
  0xfc   : > { %6522 = vmatmul.mubr.msk.bf16.gmra.mxu0 %vm1288_vm5, %v7719_v30  ;;  %v2907_v30 = vshll.u32 %v7892_v47, 16  ;;  %v2911_v14 = vshrl.u32 %v7892_v47, 16  ;;  %6560 = vmatmul.mubr.msk.bf16.gmra.mxu1 %vm1288_vm5, %v6044_v63  ;;  %v7925_v36 = vcombine.low %v2886_v33, %v2896_v53  ;;  %v2917_v9 = vshll.u32 %v2641_v7, 16  ;;  %v3345_v63 = vld [vmem:[#allocation2 + $0x84] sm:$0xe] }
  0xfd   : > { %6525 = vmatprep.mubr.msk.bf16.mxu0 %vm1288_vm5, %v7763_v35  ;;  %v2922_v37 = vshrl.u32 %v2642_v25, 16  ;;  %v2925_v35 = vshll.u32 %v2642_v25, 16  ;;  %6563 = vmatprep.mubr.msk.bf16.mxu1 %vm1288_vm5, %v6045_v22  ;;  %v7935_v38 = vsel %vm7289_vm15, %v3466_v55, %v3467_v48  ;;  %v2903_v0 = vrot.slane %v2901_v51, 5  ;;  %v7970_v55 = vld [vmem:[#allocation2 + $0xa4] sm:$0x1] }
  0xfe   : > { %v2909_v41 = vrot.slane %v2907_v30, 5  ;;  %v2913_v45 = vrot.slane %v2911_v14, 4  ;;  %v2919_v16 = vrot.slane %v2917_v9, 5  ;;  %v2931_v27 = vshll.u32 %v7919_v8, 16 }
  0xff   : > { %v2924_v54 = vrot.slane %v2922_v37, 4  ;;  %v2927_v57 = vrot.slane %v2925_v35, 5  ;;  %v2904_v6 = vor.u32 %v2903_v0, %v2900_v10  ;;  %v2935_v46 = vshrl.u32 %v7919_v8, 16  ;;  %v2648_v37 = vld [vmem:[#allocation2 + $0xa8] sm:$0xf]  ;;  %v7977_v35 = vpop.f32.mrf.mxu1 }
 0x100   : > { %v2914_v43 = vor.u32 %v2913_v45, %v2909_v41  ;;  %v2941_v12 = vshll.u32 %v7927_v3, 16  ;;  %v2933_v49 = vrot.slane %v2931_v27, 5  ;;  %v6032_v20 = vrot.slane %v3345_v63, 9  ;;  %v7959_v48 = vpop.f32.mrf.mxu0  ;;  %9245 = vst [vmem:[#allocation3_spill] sm:$0xff] %v7977_v35  ;;  %v2649_v45 = vld [vmem:[#allocation2 + $0xac] sm:$0xf] }
 0x101   : > { %v2928_v22 = vor.u32 %v2927_v57, %v2924_v54  ;;  %v3471_v2 = vrot.slane %v7892_v47, 5  ;;  %v6048_v56 = vcombine.low %v7911_v17, %v7935_v38  ;;  %v2905_v1 = vrot.slane %v2904_v6, 4  ;;  %v2650_v27 = vld [vmem:[#allocation2 + $0xb0] sm:$0x1]  ;;  %v3347_v6 = vld [vmem:[#allocation2 + $0x9c] sm:$0xe] }
 0x102   : > { %v2915_v52 = vrot.slane %v2914_v43, 4  ;;  %v2937_v26 = vrot.slane %v2935_v46, 4  ;;  %v2943_v5 = vrot.slane %v2941_v12, 5  ;;  %v3474_v42 = vrot.slane %v2641_v7, 5  ;;  %v7983_v63 = vpop.f32.mrf.mxu0 }
 0x103   : > { %v2929_v39 = vrot.slane %v2928_v22, 4  ;;  %v3473_v11 = vrot.slane %v3471_v2, 4  ;;  %v2910_v47 = vsel %vm6938_vm9, %v2905_v1, %v2909_v41  ;;  %v6033_v25 = vrot.slane %v3346_v50, 9 }
 0x104   : > { %6526 = vmatmul.mubr.msk.bf16.gmra.mxu0 %vm1288_vm5, %v7787_v21  ;;  %v2920_v4 = vsel %vm6938_vm9, %v2915_v52, %v2919_v16  ;;  %v2938_v33 = vor.u32 %v2937_v26, %v2933_v49  ;;  %v3472_v21 = vsel %vm7289_vm15, %v6032_v20, %v3471_v2  ;;  %6564 = vmatmul.mubr.msk.bf16.gmra.mxu1 %vm1288_vm5, %v6046_v29  ;;  %v3478_v53 = vrot.slane %v7919_v8, 5  ;;  %v7997_v52 = vpop.f32.mrf.mxu1 }
 0x105   : > { %6529 = vmatprep.mubr.msk.bf16.mxu0 %vm1288_vm5, %v7827_v32  ;;  %v7965_v32 = vcombine.low %v2910_v47, %v2920_v4  ;;  %v3475_v7 = vsel %vm7289_vm15, %v3473_v11, %v3474_v42  ;;  %6567 = vmatprep.mubr.msk.bf16.mxu1 %vm1288_vm5, %v6047_v13  ;;  %v2934_v10 = vsel %vm6938_vm9, %v2929_v39, %v2933_v49  ;;  %v3481_v58 = vrot.slane %v7927_v3, 5  ;;  %v3348_v11 = vld [vmem:[#allocation2 + $0xa8] sm:$0xe]  ;;  %v8001_v42 = vpop.f32.mrf.mxu0 }
 0x106   : > { %v2939_v51 = vrot.slane %v2938_v33, 4  ;;  %v2946_v40 = vshrl.u32 %v2645_v23, 16  ;;  %v6049_v29 = vcombine.low %v3472_v21, %v3475_v7  ;;  %v3480_v30 = vrot.slane %v3478_v53, 4 }
 0x107   : > { %v2949_v14 = vshll.u32 %v2645_v23, 16  ;;  %v2955_v9 = vshll.u32 %v7957_v60, 16  ;;  %v2959_v13 = vshrl.u32 %v7957_v60, 16  ;;  %v2965_v41 = vshll.u32 %v7970_v55, 16 }
 0x108   : > { %v2944_v8 = vsel %vm6938_vm9, %v2939_v51, %v2943_v5  ;;  %v2948_v0 = vrot.slane %v2946_v40, 4  ;;  %v7989_v16 = vsel %vm7289_vm15, %v6033_v25, %v3478_v53  ;;  %v7993_v43 = vsel %vm7289_vm15, %v3480_v30, %v3481_v58  ;;  %v2651_v53 = vld [vmem:[#allocation2 + $0xb4] sm:$0xf] }
 0x109   : > { %v7985_v3 = vcombine.low %v2934_v10, %v2944_v8  ;;  %v2951_v54 = vrot.slane %v2949_v14, 5  ;;  %v2957_v57 = vrot.slane %v2955_v9, 5  ;;  %v2961_v46 = vrot.slane %v2959_v13, 4  ;;  %v8017_v10 = vpop.f32.mrf.mxu1 }
 0x10a   : > { %v2967_v12 = vrot.slane %v2965_v41, 5  ;;  %v2970_v22 = vshrl.u32 %v2648_v37, 16  ;;  %v2973_v20 = vshll.u32 %v2648_v37, 16  ;;  %v2979_v2 = vshll.u32 %v2649_v45, 16  ;;  %v2652_v37 = vld [vmem:[#allocation2 + $0xb8] sm:$0xf] }
 0x10b   : > { %v2952_v49 = vor.u32 %v2951_v54, %v2948_v0  ;;  %v2983_v1 = vshrl.u32 %v2649_v45, 16  ;;  %v2962_v26 = vor.u32 %v2961_v46, %v2957_v57  ;;  %v2989_v39 = vshll.u32 %v2650_v27, 16  ;;  %v8037_v41 = vld [vmem:[#allocation2 + $0xbc] sm:$0x1]  ;;  %v8045_v46 = vpop.f32.mrf.mxu1 }
 0x10c   : > { %6530 = vmatmul.mubr.msk.bf16.gmra.mxu0 %vm1288_vm5, %v7843_v59  ;;  %v2972_v50 = vrot.slane %v2970_v22, 4  ;;  %v6034_v5 = vrot.slane %v3347_v6, 9  ;;  %6568 = vmatmul.mubr.msk.bf16.gmra.mxu1 %vm1288_vm5, %v6048_v56  ;;  %v2975_v23 = vrot.slane %v2973_v20, 5  ;;  %v8007_v47 = vrot.slane %v2979_v2, 5  ;;  %v799_v6 = vld [vmem:[#allocation2 + $0xc8] sm:$0x1] }
 0x10d   : > { %6533 = vmatprep.mubr.msk.bf16.mxu0 %vm1288_vm5, %v7894_v18  ;;  %v2953_v59 = vrot.slane %v2952_v49, 4  ;;  %v2985_v4 = vrot.slane %v2983_v1, 4  ;;  %6571 = vmatprep.mubr.msk.bf16.mxu1 %vm1288_vm5, %v6049_v29  ;;  %v2963_v18 = vrot.slane %v2962_v26, 4  ;;  %v8010_v33 = vrot.slane %v2989_v39, 5  ;;  %v8023_v29 = vpop.f32.mrf.mxu0  ;;  %v8055_v20 = vld [vmem:[#allocation2 + $0xc4] sm:$0xf] }
 0x10e   : > { %v3485_v21 = vrot.slane %v7957_v60, 5  ;;  %v3488_v7 = vrot.slane %v7970_v55, 5  ;;  %v2976_v17 = vor.u32 %v2975_v23, %v2972_v50  ;;  %v6035_v56 = vrot.slane %v3348_v11, 9  ;;  %9246 = vst [vmem:[#allocation4_spill] sm:$0xff] %v8023_v29  ;;  %v3349_v39 = vld [vmem:[#allocation2 + $0xb4] sm:$0xe] }
 0x10f   : > { %v2958_v25 = vsel %vm6938_vm9, %v2953_v59, %v2957_v57  ;;  %v2986_v38 = vor.u32 %v2985_v4, %v8007_v47  ;;  %v2968_v51 = vsel %vm6938_vm9, %v2963_v18, %v2967_v12  ;;  %v3492_v60 = vrot.slane %v2649_v45, 5  ;;  %v8057_v2 = vpop.f32.mrf.mxu0 }
 0x110   : > { %v3486_v58 = vsel %vm7289_vm15, %v6034_v5, %v3485_v21  ;;  %v3487_v40 = vrot.slane %v3485_v21, 4  ;;  %v6050_v55 = vcombine.low %v7989_v16, %v7993_v43  ;;  %v8027_v30 = vrot.slane %v2976_v17, 4  ;;  %v2654_v43 = vld [vmem:[#allocation2 + $0xc0] sm:$0xf] }
 0x111   : > { %v8029_v14 = vrot.slane %v2986_v38, 4  ;;  %v3495_v9 = vrot.slane %v2650_v27, 5  ;;  %v8035_v0 = vsel %vm7289_vm15, %v6035_v56, %v3492_v60  ;;  %v3494_v13 = vrot.slane %v3492_v60, 4  ;;  %v3350_v21 = vld [vmem:[#allocation2 + $0xc0] sm:$0xe]  ;;  %v8071_v61 = vpop.f32.mrf.mxu0 }
 0x112   : > { %v3489_v8 = vsel %vm7289_vm15, %v3487_v40, %v3488_v7  ;;  %v2994_v45 = vshrl.u32 %v2651_v53, 16  ;;  %v6002_v16 = vcombine.low %v2958_v25, %v2968_v51  ;;  %v2982_v54 = vsel %vm6938_vm9, %v8027_v30, %v8007_v47  ;;  %v8068_v7 = vpop.f32.mrf.mxu1 }
 0x113   : > { %v6051_v57 = vcombine.low %v3486_v58, %v3489_v8  ;;  %v2997_v27 = vshll.u32 %v2651_v53, 16  ;;  %v3496_v12 = vsel %vm7289_vm15, %v3494_v13, %v3495_v9  ;;  %v3003_v49 = vshll.u32 %v2652_v37, 16 }
 0x114   : > { %6534 = vmatmul.mubr.msk.bf16.gmra.mxu0 %vm1288_vm5, %v7925_v36  ;;  %v2992_v36 = vsel %vm6938_vm9, %v8029_v14, %v8010_v33  ;;  %v2996_v22 = vrot.slane %v2994_v45, 4  ;;  %6572 = vmatmul.mubr.msk.bf16.gmra.mxu1 %vm1288_vm5, %v6050_v55  ;;  %v6052_v1 = vcombine.low %v8035_v0, %v3496_v12  ;;  %v3013_v50 = vshll.u32 %v8037_v41, 16  ;;  %v8091_v45 = vpop.f32.mrf.mxu0  ;;  %v8102_v12 = vld [vmem:[#allocation2 + $0x1c] sm:$0xf] }
 0x115   : > { %6537 = vmatprep.mubr.msk.bf16.mxu0 %vm1288_vm5, %v7965_v32  ;;  %v2999_v26 = vrot.slane %v2997_v27, 5  ;;  %v3007_v32 = vshrl.u32 %v2652_v37, 16  ;;  %6575 = vmatprep.mubr.msk.bf16.mxu1 %vm1288_vm5, %v6051_v57  ;;  %v3005_v5 = vrot.slane %v3003_v49, 5  ;;  %v800_v11 = vsel %vm6958_vm12, %v635_v19, %v799_v6 }
 0x116   : > { %v3018_v59 = vshrl.u32 %v2654_v43, 16  ;;  %v3021_v23 = vshll.u32 %v2654_v43, 16  ;;  %v3015_v18 = vrot.slane %v3013_v50, 5  ;;  %801 = vst [vmem:[#allocation2 + $0xc8] sm:$0x1] %v800_v11  ;;  %v3027_v33 = vshll.u32 %v8055_v20, 16 }
 0x117   : > { %v3000_v47 = vor.u32 %v2999_v26, %v2996_v22  ;;  %v3009_v4 = vrot.slane %v3007_v32, 4  ;;  %v3031_v38 = vshrl.u32 %v8055_v20, 16  ;;  %v6036_v56 = vrot.slane %v3349_v39, 9  ;;  %v8082_v0 = vpop.f32.mrf.mxu1  ;;  %v4164_v43 = vld [vmem:[#allocation2 + $0x18] sm:$0xf] }
 0x118   : > { %v3020_v25 = vrot.slane %v3018_v59, 4  ;;  %v3023_v17 = vrot.slane %v3021_v23, 5  ;;  %v8073_v53 = vrot.slane %v3027_v33, 5  ;;  %v3499_v51 = vrot.slane %v2652_v37, 5  ;;  %v4167_v23 = vld [vmem:[#allocation2 + $0x24] sm:$0xf] }
 0x119   : > { %v3001_v44 = vrot.slane %v3000_v47, 4  ;;  %v3010_v19 = vor.u32 %v3009_v4, %v3005_v5  ;;  %v3033_v40 = vrot.slane %v3031_v38, 4  ;;  %v3502_v60 = vrot.slane %v8037_v41, 5  ;;  %v8113_v47 = vpop.f32.mrf.mxu0 }
 0x11a   : > { %v3024_v58 = vor.u32 %v3023_v17, %v3020_v25  ;;  %v6037_v55 = vrot.slane %v3350_v21, 9  ;;  %v3500_v9 = vsel %vm7289_vm15, %v6036_v56, %v3499_v51  ;;  %v3501_v8 = vrot.slane %v3499_v51, 4  ;;  %v8122_v25 = vld [vmem:[#allocation2 + $0x28] sm:$0xf] }
 0x11b   : > { %v3006_v30 = vsel %vm6938_vm9, %v3001_v44, %v3005_v5  ;;  %v3011_v14 = vrot.slane %v3010_v19, 4  ;;  %v3034_v37 = vor.u32 %v3033_v40, %v8073_v53  ;;  %v3506_v13 = vrot.slane %v8055_v20, 5  ;;  %v8124_v19 = vld [vmem:[#allocation2 + $0x2c] sm:$0x1] }
 0x11c   : > { %6538 = vmatmul.mubr.msk.bf16.gmra.mxu0 %vm1288_vm5, %v7985_v3  ;;  %v6793_v3 = vld [vmem:[%s9218_s1 + $0xe] sm:$0x3]  ;;  %v6003_v57 = vcombine.low %v2982_v54, %v2992_v36  ;;  %6576 = vmatmul.mubr.msk.bf16.gmra.mxu1 %vm1288_vm5, %v6052_v1  ;;  %v8100_v6 = vadd.f32 %v7913_v34, %v7959_v48  ;;  %v3025_v20 = vrot.slane %v3024_v58, 4  ;;  %v8104_v36 = vld [vmem:[#allocation2 + $0x20] sm:$0x1]  ;;  %v8106_v1 = vpop.f32.mrf.mxu1  ;;  %v4213_v48 = vshrl.u32 %v4164_v43, 16 }
 0x11d   : > { %6541 = vmatprep.mubr.msk.bf16.mxu0 %vm1288_vm5, %v6002_v16  ;;  %v4695_v41 = vsel %vm1337_vm0, %v6793_v3, 0  ;;  %v3016_v27 = vsel %vm6938_vm9, %v3011_v14, %v3015_v18  ;;  %v3503_v16 = vsel %vm7289_vm15, %v3501_v8, %v3502_v60  ;;  %v2656_v49 = vld [vmem:[#allocation2 + $0xc8] sm:$0x1]  ;;  %v3035_v26 = vrot.slane %v3034_v37, 4 }
 0x11e   : > { %v6004_v22 = vcombine.low %v3006_v30, %v3016_v27  ;;  %v6053_v54 = vcombine.low %v3500_v9, %v3503_v16  ;;  %6618 = vmatpush3.bf16.msra.mxu1 %v4695_v41  ;;  %v3037_v32 = vshll.u32 %v2656_v49, 16  ;;  %v3507_v50 = vsel %vm7289_vm15, %v6037_v55, %v3506_v13  ;;  %v8126_v51 = vpop.f32.mrf.mxu1  ;;  %v4170_v27 = vld [vmem:[#allocation2 + $0x30] sm:$0xf] }
 0x11f   : > { %v3508_v39 = vrot.slane %v3506_v13, 4  ;;  %v3509_v34 = vrot.slane %v2656_v49, 5  ;;  %v4216_v5 = vshll.u32 %v4164_v43, 16  ;;  %v4222_v11 = vshll.u32 %v8102_v12, 16 }
 0x120   : > { %6579 = vmatprep.mubr.msk.bf16.mxu1 %vm1288_vm5, %v6053_v54  ;;  %v4226_v59 = vshrl.u32 %v8102_v12, 16  ;;  %v3039_v4 = vrot.slane %v3037_v32, 5  ;;  %v4232_v33 = vshll.u32 %v8104_v36, 16  ;;  %v8120_v21 = vadd.f32 %v7938_v28, %v7983_v63  ;;  %v8143_v43 = vpop.f32.mrf.mxu1  ;;  %v6769_v54 = vld [vmem:[#allocation2 + $0x18] sm:$0xff]  }
 0x121   : > { %v3510_v18 = vsel %vm7289_vm15, %v3508_v39, %v3509_v34  ;;  %v4215_v38 = vrot.slane %v4213_v48, 4  ;;  %v4218_v56 = vrot.slane %v4216_v5, 5  ;;  %v4224_v44 = vrot.slane %v4222_v11, 5  ;;  %v8136_v9 = vpop.f32.mrf.mxu0  ;;  %9247 = vst [vmem:[#allocation5_spill] sm:$0xff] %v8143_v43  ;;  %v8153_v48 = vld [vmem:[#allocation2 + $0x38] sm:$0x1] }
 0x122   : > { %v6054_v17 = vcombine.low %v3507_v50, %v3510_v18  ;;  %v3030_v58 = vsel %vm6938_vm9, %v3025_v20, %v8073_v53  ;;  %v3040_v28 = vsel %vm6938_vm9, %v3035_v26, %v3039_v4  ;;  %v4228_v63 = vrot.slane %v4226_v59, 4  ;;  %v8145_v26 = vld [vmem:[#allocation2 + $0x34] sm:$0xf] }
 0x123   : > { %v4237_v40 = vshrl.u32 %v4167_v23, 16  ;;  %v4219_v60 = vor.u32 %v4218_v56, %v4215_v38  ;;  %v4234_v55 = vrot.slane %v4232_v33, 5  ;;  %v4240_v30 = vshll.u32 %v4167_v23, 16  ;;  %v8141_v16 = vpop.f32.mrf.mxu0  ;;  %v4173_v38 = vld [vmem:[#allocation2 + $0x3c] sm:$0xf] }
 0x124   : > { %6542 = vmatmul.mubr.msk.bf16.gmra.mxu0 %vm1288_vm5, %v6003_v57  ;;  %v4246_v14 = vshll.u32 %v8122_v25, 16  ;;  %6580 = vmatmul.mubr.msk.bf16.gmra.mxu1 %vm1288_vm5, %v6054_v17  ;;  %v4229_v8 = vor.u32 %v4228_v63, %v4224_v44  ;;  %v4250_v53 = vshrl.u32 %v8122_v25, 16  ;;  %v4256_v13 = vshll.u32 %v8124_v19, 16 }
 0x125   : > { %6545 = vmatprep.mubr.msk.bf16.mxu0 %vm1288_vm5, %v6004_v22  ;;  %v4239_v37 = vrot.slane %v4237_v40, 4  ;;  %v4220_v3 = vrot.slane %v4219_v60, 4  ;;  %v4242_v41 = vrot.slane %v4240_v30, 5  ;;  %v6005_v22 = vcombine.low %v3030_v58, %v3040_v28  ;;  %v8162_v56 = vpop.f32.mrf.mxu0 }
 0x126   : > { %v4248_v57 = vrot.slane %v4246_v14, 5  ;;  %v4230_v49 = vrot.slane %v4229_v8, 4  ;;  %v4252_v20 = vrot.slane %v4250_v53, 4  ;;  %v4258_v39 = vrot.slane %v4256_v13, 5 }
 0x127   : > { %v4225_v32 = vsel %vm6938_vm9, %v4220_v3, %v4224_v44  ;;  %v4243_v50 = vor.u32 %v4242_v41, %v4239_v37  ;;  %v8151_v34 = vadd.f32 %v7947_v31, %v8001_v42  ;;  %v8159_v59 = vadd.f32 %v7997_v52, %v8057_v2  ;;  %v8164_v31 = vpop.f32.mrf.mxu1  ;;  %v8169_v2 = vld [vmem:[#allocation2 + $0x40] sm:$0xf] }
 0x128   : > { %v4235_v5 = vsel %vm6938_vm9, %v4230_v49, %v4234_v55  ;;  %v4253_v11 = vor.u32 %v4252_v20, %v4248_v57  ;;  %v4261_v23 = vshrl.u32 %v4170_v27, 16  ;;  %v4264_v33 = vshll.u32 %v4170_v27, 16  ;;  %v8179_v55 = vld [vmem:[#allocation2 + $0x44] sm:$0x1] }
 0x129   : > { %v6105_v4 = vcombine.low %v4225_v32, %v4235_v5  ;;  %v4244_v18 = vrot.slane %v4243_v50, 4  ;;  %v4270_v17 = vshll.u32 %v8145_v26, 16  ;;  %v4274_v58 = vshrl.u32 %v8145_v26, 16  ;;  %v8186_v27 = vpop.f32.mrf.mxu1  ;;  %v4176_v5 = vld [vmem:[#allocation2 + $0x48] sm:$0xf] }
 0x12a   : > { %v4254_v42 = vrot.slane %v4253_v11, 4  ;;  %v4263_v44 = vrot.slane %v4261_v23, 4  ;;  %v4280_v52 = vshll.u32 %v8153_v48, 16  ;;  %v4266_v63 = vrot.slane %v4264_v33, 5  ;;  %v8197_v33 = vld [vmem:[#allocation2 + $0x4c] sm:$0xf] }
 0x12b   : > { %6619 = vmatprep.mubr.msk.bf16.mxu1 %vm1288_vm5, %v6105_v4  ;;  %v4249_v28 = vsel %vm6938_vm9, %v4244_v18, %v4248_v57  ;;  %v4272_v40 = vrot.slane %v4270_v17, 5  ;;  %v8177_v60 = vadd.f32 %v8017_v10, %v8071_v61  ;;  %v4276_v14 = vrot.slane %v4274_v58, 4  ;;  %v8184_v57 = vpop.f32.mrf.mxu0  ;;  %v8205_v58 = vld [vmem:[#allocation2 + $0x50] sm:$0x1] }
 0x12c   : > { %6546 = vmatmul.mubr.msk.bf16.gmra.mxu0 %vm1288_vm5, %v6005_v22  ;;  %v4259_v30 = vsel %vm6938_vm9, %v4254_v42, %v4258_v39  ;;  %v4282_v8 = vrot.slane %v4280_v52, 5  ;;  %v4285_v37 = vshrl.u32 %v4173_v38, 16  ;;  %v4267_v13 = vor.u32 %v4266_v63, %v4263_v44  ;;  %v6770_v22 = vld [vmem:[#allocation2 + $0x24] sm:$0xff]   ;;  %v8207_v52 = vpop.f32.mrf.mxu1 }
 0x12d   : > { %6585 = vmatprep.mubr.msk.bf16.mxu0 %vm1288_vm5, %v6769_v54  ;;  %v6106_v53 = vcombine.low %v4249_v28, %v4259_v30  ;;  %v4288_v3 = vshll.u32 %v4173_v38, 16  ;;  %v4294_v41 = vshll.u32 %v8169_v2, 16  ;;  %v4277_v10 = vor.u32 %v4276_v14, %v4272_v40  ;;  %v6771_v54 = vld [vmem:[#allocation2 + $0x30] sm:$0xff]  }
 0x12e   : > { %v4287_v61 = vrot.slane %v4285_v37, 4  ;;  %v4298_v49 = vshrl.u32 %v8169_v2, 16  ;;  %v4304_v20 = vshll.u32 %v8179_v55, 16  ;;  %v4268_v32 = vrot.slane %v4267_v13, 4  ;;  %v4179_v14 = vld [vmem:[#allocation2 + $0x54] sm:$0xf] }
 0x12f   : > { %6620 = vmatmul.mubr.msk.bf16.vlgmr.msra.gmra.mxu1 %vm1288_vm5, %v6106_v53  ;;  %v4290_v50 = vrot.slane %v4288_v3, 5  ;;  %v4296_v39 = vrot.slane %v4294_v41, 5  ;;  %v5165_v11 = vsel %vm1337_vm0, %v7860_v62, 0  ;;  %v4278_v23 = vrot.slane %v4277_v10, 4  ;;  %v6395_v62 = vpop.f32.mrf.mxu0  ;;  %v8216_v41 = vld [vmem:[#allocation2 + $0x58] sm:$0xf] }
 0x130   : > { %v4300_v4 = vrot.slane %v4298_v49, 4  ;;  %v8195_v18 = vadd.f32 %v8045_v46, %v8091_v45  ;;  %v4273_v17 = vsel %vm6938_vm9, %v4268_v32, %v4272_v40  ;;  %v4306_v42 = vrot.slane %v4304_v20, 5  ;;  %v8225_v49 = vld [vmem:[#allocation2 + $0x5c] sm:$0x1] }
 0x131   : > { %v4291_v38 = vor.u32 %v4290_v50, %v4287_v61  ;;  %v8203_v44 = vadd.f32 %v8082_v0, %v8136_v9  ;;  %v4283_v46 = vsel %vm6938_vm9, %v4278_v23, %v4282_v8  ;;  %v4309_v28 = vshrl.u32 %v4176_v5, 16  ;;  %v1423_v20 = vpop.f32.mrf.mxu0  ;;  %v6772_v32 = vld [vmem:[#allocation2 + $0x3c] sm:$0xff]  }
 0x132   : > { %v4301_v45 = vor.u32 %v4300_v4, %v4296_v39  ;;  %v4312_v63 = vshll.u32 %v4176_v5, 16  ;;  %v6107_v40 = vcombine.low %v4273_v17, %v4283_v46  ;;  %v4318_v0 = vshll.u32 %v8197_v33, 16 }
 0x133   : > { %v4292_v30 = vrot.slane %v4291_v38, 4  ;;  %v4322_v9 = vshrl.u32 %v8197_v33, 16  ;;  %v4311_v53 = vrot.slane %v4309_v28, 4  ;;  %v4328_v3 = vshll.u32 %v8205_v58, 16 }
 0x134   : > { %6586 = vmatmul.mubr.msk.bf16.vlgmr.msra.gmra.mxu0 %vm1288_vm5, %v6770_v22  ;;  %v4302_v37 = vrot.slane %v4301_v45, 4  ;;  %v4314_v13 = vrot.slane %v4312_v63, 5  ;;  %6623 = vmatprep.mubr.msk.bf16.mxu1 %vm1288_vm5, %v6107_v40  ;;  %v4320_v22 = vrot.slane %v4318_v0, 5  ;;  %v8223_v61 = vadd.f32 %v8106_v1, %v8141_v16  ;;  %v8235_v0 = vpop.f32.mrf.mxu0 }
 0x135   : > { %6652 = vmatpush3.bf16.msra.mxu0 %v5165_v11  ;;  %6589 = vmatprep.mubr.msk.bf16.mxu0 %vm1288_vm5, %v6771_v54  ;;  %v4297_v8 = vsel %vm6938_vm9, %v4292_v30, %v4296_v39  ;;  %v4324_v10 = vrot.slane %v4322_v9, 4  ;;  %v8227_v54 = vpop.f32.mrf.mxu1  ;;  %v4330_v11 = vrot.slane %v4328_v3, 5  ;;  %v4333_v23 = vshrl.u32 %v4179_v14, 16  ;;  %v6773_v39 = vld [vmem:[#allocation2 + $0x48] sm:$0xff]   ;;  %v4182_v30 = vld [vmem:[#allocation2 + $0x60] sm:$0xf] }
 0x136   : > { %v4307_v50 = vsel %vm6938_vm9, %v4302_v37, %v4306_v42  ;;  %v4315_v5 = vor.u32 %v4314_v13, %v4311_v53  ;;  %v4336_v38 = vshll.u32 %v4179_v14, 16  ;;  %v4342_v46 = vshll.u32 %v8216_v41, 16  ;;  %v8246_v13 = vld [vmem:[#allocation2 + $0x64] sm:$0xf]  ;;  %v8248_v3 = vld [vmem:[#allocation2 + $0x68] sm:$0x1] }
 0x137   : > { %v6108_v4 = vcombine.low %v4297_v8, %v4307_v50  ;;  %v4325_v17 = vor.u32 %v4324_v10, %v4320_v22  ;;  %v4335_v16 = vrot.slane %v4333_v23, 4  ;;  %v4346_v45 = vshrl.u32 %v8216_v41, 16  ;;  %v8237_v9 = vpop.f32.mrf.mxu1 }
 0x138   : > { %v4316_v1 = vrot.slane %v4315_v5, 4  ;;  %v4352_v28 = vshll.u32 %v8225_v49, 16  ;;  %v4338_v40 = vrot.slane %v4336_v38, 5  ;;  %v4344_v42 = vrot.slane %v4342_v46, 5  ;;  %v1426_v46 = vpop.f32.mrf.mxu0 }
 0x139   : > { %6624 = vmatmul.mubr.msk.bf16.gmra.mxu1 %vm1288_vm5, %v6108_v4  ;;  %v4326_v63 = vrot.slane %v4325_v17, 4  ;;  %v4348_v37 = vrot.slane %v4346_v45, 4  ;;  %v8244_v53 = vadd.f32 %v8126_v51, %v8162_v56  ;;  %v4357_v23 = vshrl.u32 %v4182_v30, 16 }
 0x13a   : > { %v4321_v14 = vsel %vm6938_vm9, %v4316_v1, %v4320_v22  ;;  %v4339_v10 = vor.u32 %v4338_v40, %v4335_v16  ;;  %v4354_v50 = vrot.slane %v4352_v28, 5  ;;  %v4360_v4 = vshll.u32 %v4182_v30, 16  ;;  %v8259_v1 = vpop.f32.mrf.mxu1  ;;  %v8265_v28 = vld [vmem:[#allocation2 + $0x70] sm:$0xf]  ;;  %v6775_v40 = vld [vmem:[#allocation2 + $0x60] sm:$0xff]  }
 0x13b   : > { %9248 = vst [vmem:[#allocation6_spill] sm:$0xff] %v8244_v53  ;;  %v4331_v8 = vsel %vm6938_vm9, %v4326_v63, %v4330_v11  ;;  %v4349_v5 = vor.u32 %v4348_v37, %v4344_v42  ;;  %v4366_v56 = vshll.u32 %v8246_v13, 16  ;;  %v4370_v17 = vshrl.u32 %v8246_v13, 16  ;;  %v6774_v11 = vld [vmem:[#allocation2 + $0x54] sm:$0xff]  }
 0x13c   : > { %6590 = vmatmul.mubr.msk.bf16.gmra.mxu0 %vm1288_vm5, %v6772_v32  ;;  %v8254_v32 = vadd.f32 %v8164_v31, %v6395_v62  ;;  %v6109_v22 = vcombine.low %v4321_v14, %v4331_v8  ;;  %v4340_v51 = vrot.slane %v4339_v10, 4  ;;  %v4376_v38 = vshll.u32 %v8248_v3, 16  ;;  %v8269_v8 = vld [vmem:[#allocation2 + $0x74] sm:$0x1] }
 0x13d   : > { %6593 = vmatprep.mubr.msk.bf16.mxu0 %vm1288_vm5, %v6773_v39  ;;  %v4185_v39 = vld [vmem:[#allocation2 + $0x6c] sm:$0xf]  ;;  %v4350_v31 = vrot.slane %v4349_v5, 4  ;;  %v4359_v62 = vrot.slane %v4357_v23, 4  ;;  %v4362_v16 = vrot.slane %v4360_v4, 5  ;;  %v8263_v45 = vadd.f32 %v8186_v27, %v1423_v20 }
 0x13e   : > { %9249 = vst [vmem:[#allocation7_spill] sm:$0xff] %v8254_v32  ;;  %6627 = vmatprep.mubr.msk.bf16.mxu1 %vm1288_vm5, %v6109_v22  ;;  %v4345_v63 = vsel %vm6938_vm9, %v4340_v51, %v4344_v42  ;;  %v4368_v30 = vrot.slane %v4366_v56, 5  ;;  %v4372_v14 = vrot.slane %v4370_v17, 4  ;;  %v4378_v37 = vrot.slane %v4376_v38, 5  ;;  %v8275_v42 = vpop.f32.mrf.mxu1 }
 0x13f   : > { %9250 = vst [vmem:[#allocation8_spill] sm:$0xff] %v8263_v45  ;;  %v4355_v10 = vsel %vm6938_vm9, %v4350_v31, %v4354_v50  ;;  %v4363_v22 = vor.u32 %v4362_v16, %v4359_v62  ;;  %v4381_v5 = vshrl.u32 %v4185_v39, 16  ;;  %v4384_v23 = vshll.u32 %v4185_v39, 16  ;;  %v4188_v16 = vld [vmem:[#allocation2 + $0x78] sm:$0xf] }
 0x140   : > { %v6110_v4 = vcombine.low %v4345_v63, %v4355_v10  ;;  %v4373_v27 = vor.u32 %v4372_v14, %v4368_v30  ;;  %v4390_v20 = vshll.u32 %v8265_v28, 16  ;;  %v4394_v35 = vshrl.u32 %v8265_v28, 16  ;;  %v6399_v29 = vpop.f32.mrf.mxu0 }
 0x141   : > { %v4364_v51 = vrot.slane %v4363_v22, 4  ;;  %v4383_v56 = vrot.slane %v4381_v5, 4  ;;  %v4386_v17 = vrot.slane %v4384_v23, 5  ;;  %v4400_v38 = vshll.u32 %v8269_v8, 16  ;;  %v8288_v5 = vld [vmem:[#allocation2 + $0x7c] sm:$0xf] }
 0x142   : > { %6628 = vmatmul.mubr.msk.bf16.gmra.mxu1 %vm1288_vm5, %v6110_v4  ;;  %v4374_v39 = vrot.slane %v4373_v27, 4  ;;  %v4392_v31 = vrot.slane %v4390_v20, 5  ;;  %v4396_v62 = vrot.slane %v4394_v35, 4  ;;  %v1439_v63 = vpop.f32.mrf.mxu0  ;;  %v8286_v22 = vadd.f32 %v8207_v52, %v8235_v0  ;;  %v8290_v23 = vld [vmem:[#allocation2 + $0x80] sm:$0x1]  ;;  %v8300_v20 = vpop.f32.mrf.mxu1 }
 0x143   : > { %v4369_v14 = vsel %vm6938_vm9, %v4364_v51, %v4368_v30  ;;  %v4402_v10 = vrot.slane %v4400_v38, 5  ;;  %v8295_v35 = vadd.f32 %v8227_v54, %v1426_v46  ;;  %v8298_v27 = vadd.f32 %v8237_v9, %v6399_v29  ;;  %9254 = vst [vmem:[#allocation12_spill] sm:$0xff] %v8300_v20  ;;  %v6776_v51 = vld [vmem:[#allocation2 + $0x6c] sm:$0xff]   ;;  %v4191_v46 = vld [vmem:[#allocation2 + $0x84] sm:$0xf] }
 0x144   : > { %6594 = vmatmul.mubr.msk.bf16.gmra.mxu0 %vm1288_vm5, %v6774_v11  ;;  %v4387_v11 = vor.u32 %v4386_v17, %v4383_v56  ;;  %9251 = vst [vmem:[#allocation9_spill] sm:$0xff] %v8286_v22  ;;  %v4397_v4 = vor.u32 %v4396_v62, %v4392_v31  ;;  %v6400_v30 = vpop.f32.mrf.mxu0  ;;  %v6777_v56 = vld [vmem:[#allocation2 + $0x78] sm:$0xff]   ;;  %v4405_v17 = vshrl.u32 %v4188_v16, 16  ;;  %v4408_v38 = vshll.u32 %v4188_v16, 16  ;;  %v8313_v16 = vld [vmem:[#allocation2 + $0x88] sm:$0xf] }
 0x145   : > { %6597 = vmatprep.mubr.msk.bf16.mxu0 %vm1288_vm5, %v6775_v40  ;;  %v4379_v40 = vsel %vm6938_vm9, %v4374_v39, %v4378_v37  ;;  %9252 = vst [vmem:[#allocation10_spill] sm:$0xff] %v8295_v35  ;;  %9253 = vst [vmem:[#allocation11_spill] sm:$0xff] %v8298_v27  ;;  %v4414_v22 = vshll.u32 %v8288_v5, 16  ;;  %v4418_v37 = vshrl.u32 %v8288_v5, 16  ;;  %v4424_v54 = vshll.u32 %v8290_v23, 16  ;;  %v6437_v27 = vpop.f32.mrf.mxu1 }
 0x146   : > { %v6111_v52 = vcombine.low %v4369_v14, %v4379_v40  ;;  %v4388_v0 = vrot.slane %v4387_v11, 4  ;;  %v4398_v50 = vrot.slane %v4397_v4, 4  ;;  %v8305_v39 = vpop.f32.mrf.mxu0  ;;  %v4407_v9 = vrot.slane %v4405_v17, 4  ;;  %v8315_v11 = vld [vmem:[#allocation2 + $0x8c] sm:$0x1] }
 0x147   : > { %9255 = vst [vmem:[#allocation13_spill] sm:$0xff] %v8305_v39  ;;  %v4410_v62 = vrot.slane %v4408_v38, 5  ;;  %v8311_v14 = vadd.f32 %v8259_v1, %v1439_v63  ;;  %9257 = vst [vmem:[#allocation15_spill] sm:$0xff] %v8315_v11  ;;  %v4416_v4 = vrot.slane %v4414_v22, 5  ;;  %v4420_v20 = vrot.slane %v4418_v37, 4 }
 0x148   : > { %6631 = vmatprep.mubr.msk.bf16.mxu1 %vm1288_vm5, %v6111_v52  ;;  %v4393_v29 = vsel %vm6938_vm9, %v4388_v0, %v4392_v31  ;;  %v4403_v40 = vsel %vm6938_vm9, %v4398_v50, %v4402_v10  ;;  %v4426_v39 = vrot.slane %v4424_v54, 5  ;;  %v4429_v0 = vshrl.u32 %v4191_v46, 16  ;;  %v4194_v54 = vld [vmem:[#allocation2 + $0x90] sm:$0xf] }
 0x149   : > { %9256 = vst [vmem:[#allocation14_spill] sm:$0xff] %v8311_v14  ;;  %v6112_v52 = vcombine.low %v4393_v29, %v4403_v40  ;;  %v4411_v31 = vor.u32 %v4410_v62, %v4407_v9  ;;  %v4432_v17 = vshll.u32 %v4191_v46, 16  ;;  %v4421_v1 = vor.u32 %v4420_v20, %v4416_v4  ;;  %v6403_v50 = vpop.f32.mrf.mxu0  ;;  %v8329_v9 = vld [vmem:[#allocation2 + $0x94] sm:$0xf]  ;;  %v1747_v62 = vpop.f32.mrf.mxu1  ;;  %v6778_v40 = vld [vmem:[#allocation2 + $0x84] sm:$0xff]  }
 0x14a   : > { %v4438_v63 = vshll.u32 %v8313_v16, 16  ;;  %v4442_v38 = vshrl.u32 %v8313_v16, 16  ;;  %v4448_v14 = vshll.u32 %v8315_v11, 16  ;;  %v4431_v22 = vrot.slane %v4429_v0, 4 }
 0x14b   : > { %6632 = vmatmul.mubr.msk.bf16.gmra.mxu1 %vm1288_vm5, %v6112_v52  ;;  %v4412_v10 = vrot.slane %v4411_v31, 4  ;;  %v4434_v37 = vrot.slane %v4432_v17, 5  ;;  %v8333_v0 = vadd.f32 %v6437_v27, %v6403_v50  ;;  %v8335_v17 = vld [vmem:[#allocation2 + $0x98] sm:$0x1]  ;;  %v1455_v46 = vpop.f32.mrf.mxu0  ;;  %v4462_v32 = vshll.u32 %v8329_v9, 16 }
 0x14c   : > { %6598 = vmatmul.mubr.msk.bf16.gmra.mxu0 %vm1288_vm5, %v6776_v51  ;;  %v8326_v51 = vadd.f32 %v8275_v42, %v6400_v30  ;;  %v4440_v20 = vrot.slane %v4438_v63, 5  ;;  %v4444_v29 = vrot.slane %v4442_v38, 4  ;;  %v4450_v31 = vrot.slane %v4448_v14, 5  ;;  %9260 = vst [vmem:[#allocation18_spill] sm:$0xff] %v8335_v17 }
 0x14d   : > { %6601 = vmatprep.mubr.msk.bf16.mxu0 %vm1288_vm5, %v6777_v56  ;;  %v4422_v56 = vrot.slane %v4421_v1, 4  ;;  %v4417_v35 = vsel %vm6938_vm9, %v4412_v10, %v4416_v4  ;;  %v4435_v52 = vor.u32 %v4434_v37, %v4431_v22  ;;  %9259 = vst [vmem:[#allocation17_spill] sm:$0xff] %v8333_v0  ;;  %v6779_v1 = vld [vmem:[#allocation2 + $0x90] sm:$0xff]   ;;  %v4453_v63 = vshrl.u32 %v4194_v54, 16  ;;  %v4197_v10 = vld [vmem:[#allocation2 + $0x9c] sm:$0xf] }
 0x14e   : > { %9258 = vst [vmem:[#allocation16_spill] sm:$0xff] %v8326_v51  ;;  %v4445_v30 = vor.u32 %v4444_v29, %v4440_v20  ;;  %v4456_v38 = vshll.u32 %v4194_v54, 16  ;;  %v4466_v4 = vshrl.u32 %v8329_v9, 16  ;;  %v4472_v22 = vshll.u32 %v8335_v17, 16  ;;  %v8342_v37 = vld [vmem:[#allocation2 + $0xa0] sm:$0xf] }
 0x14f   : > { %v4427_v42 = vsel %vm6938_vm9, %v4422_v56, %v4426_v39  ;;  %v4436_v45 = vrot.slane %v4435_v52, 4  ;;  %v4455_v27 = vrot.slane %v4453_v63, 4  ;;  %9261 = vst [vmem:[#allocation19_spill] sm:$0xff] %v8342_v37  ;;  %v6438_v39 = vpop.f32.mrf.mxu1  ;;  %v4464_v54 = vrot.slane %v4462_v32, 5  ;;  %v8350_v52 = vld [vmem:[#allocation2 + $0xa4] sm:$0x1] }
 0x150   : > { %v6113_v51 = vcombine.low %v4417_v35, %v4427_v42  ;;  %v4446_v14 = vrot.slane %v4445_v30, 4  ;;  %v4458_v50 = vrot.slane %v4456_v38, 5  ;;  %v4468_v56 = vrot.slane %v4466_v4, 4  ;;  %9263 = vst [vmem:[#allocation21_spill] sm:$0xff] %v8350_v52 }
 0x151   : > { %v4441_v35 = vsel %vm6938_vm9, %v4436_v45, %v4440_v20  ;;  %v8348_v29 = vadd.f32 %v1747_v62, %v1455_v46  ;;  %v4474_v63 = vrot.slane %v4472_v22, 5  ;;  %v4477_v38 = vshrl.u32 %v4197_v10, 16  ;;  %v8358_v4 = vpop.f32.mrf.mxu1 }
 0x152   : > { %6635 = vmatprep.mubr.msk.bf16.mxu1 %vm1288_vm5, %v6113_v51  ;;  %v4451_v42 = vsel %vm6938_vm9, %v4446_v14, %v4450_v31  ;;  %v4459_v30 = vor.u32 %v4458_v50, %v4455_v27  ;;  %v4469_v51 = vor.u32 %v4468_v56, %v4464_v54  ;;  %v4480_v17 = vshll.u32 %v4197_v10, 16  ;;  %9264 = vst [vmem:[#allocation22_spill] sm:$0xff] %v8358_v4  ;;  %v4200_v31 = vld [vmem:[#allocation2 + $0xa8] sm:$0xf]  ;;  %v8363_v10 = vld [vmem:[#allocation2 + $0xac] sm:$0xf] }
 0x153   : > { %9262 = vst [vmem:[#allocation20_spill] sm:$0xff] %v8348_v29  ;;  %v6114_v0 = vcombine.low %v4441_v35, %v4451_v42  ;;  %v4486_v45 = vshll.u32 %v8342_v37, 16  ;;  %v4479_v20 = vrot.slane %v4477_v38, 4  ;;  %v4490_v46 = vshrl.u32 %v8342_v37, 16  ;;  %9266 = vst [vmem:[#allocation24_spill] sm:$0xff] %v8363_v10  ;;  %v6781_v38 = vld [vmem:[#allocation2 + $0xa8] sm:$0xff]  }
 0x154   : > { %6602 = vmatmul.mubr.msk.bf16.gmra.mxu0 %vm1288_vm5, %v6778_v40  ;;  %v6404_v40 = vpop.f32.mrf.mxu0  ;;  %v4460_v32 = vrot.slane %v4459_v30, 4  ;;  %v4496_v62 = vshll.u32 %v8350_v52, 16  ;;  %v4470_v14 = vrot.slane %v4469_v51, 4  ;;  %v4482_v27 = vrot.slane %v4480_v17, 5  ;;  %v8368_v4 = vld [vmem:[#allocation2 + $0xb0] sm:$0x1] }
 0x155   : > { %6605 = vmatprep.mubr.msk.bf16.mxu0 %vm1288_vm5, %v6779_v1  ;;  %6636 = vmatmul.mubr.msk.bf16.gmra.mxu1 %vm1288_vm5, %v6114_v0  ;;  %v6780_v1 = vld [vmem:[#allocation2 + $0x9c] sm:$0xff]   ;;  %v4488_v50 = vrot.slane %v4486_v45, 5  ;;  %v8361_v22 = vadd.f32 %v6438_v39, %v6404_v40  ;;  %v4492_v42 = vrot.slane %v4490_v46, 4  ;;  %9267 = vst [vmem:[#allocation25_spill] sm:$0xff] %v8368_v4  ;;  %v4501_v17 = vshrl.u32 %v4200_v31, 16 }
 0x156   : > { %v4465_v56 = vsel %vm6938_vm9, %v4460_v32, %v4464_v54  ;;  %v4498_v30 = vrot.slane %v4496_v62, 5  ;;  %v4475_v0 = vsel %vm6938_vm9, %v4470_v14, %v4474_v63  ;;  %v4483_v51 = vor.u32 %v4482_v27, %v4479_v20  ;;  %v4203_v39 = vld [vmem:[#allocation2 + $0xb4] sm:$0xf]  ;;  %v8376_v37 = vld [vmem:[#allocation2 + $0xb8] sm:$0xf] }
 0x157   : > { %9265 = vst [vmem:[#allocation23_spill] sm:$0xff] %v8361_v22  ;;  %v4504_v45 = vshll.u32 %v4200_v31, 16  ;;  %v6115_v40 = vcombine.low %v4465_v56, %v4475_v0  ;;  %v4493_v22 = vor.u32 %v4492_v42, %v4488_v50  ;;  %v4510_v35 = vshll.u32 %v8363_v10, 16  ;;  %9268 = vst [vmem:[#allocation26_spill] sm:$0xff] %v8376_v37  ;;  %v8382_v0 = vld [vmem:[#allocation2 + $0xbc] sm:$0x1] }
 0x158   : > { %v4514_v52 = vshrl.u32 %v8363_v10, 16  ;;  %v4484_v54 = vrot.slane %v4483_v51, 4  ;;  %v4503_v32 = vrot.slane %v4501_v17, 4  ;;  %v4520_v62 = vshll.u32 %v8368_v4, 16  ;;  %9269 = vst [vmem:[#allocation27_spill] sm:$0xff] %v8382_v0  ;;  %v8387_v4 = vpop.f32.mrf.mxu0  ;;  %v6782_v10 = vld [vmem:[#allocation2 + $0xb4] sm:$0xff]  }
 0x159   : > { %v6441_v29 = vpop.f32.mrf.mxu1  ;;  %v4506_v46 = vrot.slane %v4504_v45, 5  ;;  %6639 = vmatprep.mubr.msk.bf16.mxu1 %vm1288_vm5, %v6115_v40  ;;  %v4494_v63 = vrot.slane %v4493_v22, 4  ;;  %v4512_v20 = vrot.slane %v4510_v35, 5  ;;  %v4525_v27 = vshrl.u32 %v4203_v39, 16  ;;  %v4206_v17 = vld [vmem:[#allocation2 + $0xc0] sm:$0xf] }
 0x15a   : > { %v4516_v31 = vrot.slane %v4514_v52, 4  ;;  %v4489_v56 = vsel %vm6938_vm9, %v4484_v54, %v4488_v50  ;;  %v4522_v42 = vrot.slane %v4520_v62, 5  ;;  %v4528_v51 = vshll.u32 %v4203_v39, 16  ;;  %9270 = vst [vmem:[#allocation28_spill] sm:$0xff] %v8387_v4 }
 0x15b   : > { %v1763_v14 = vpop.f32.mrf.mxu1  ;;  %v4499_v45 = vsel %vm6938_vm9, %v4494_v63, %v4498_v30  ;;  %v4527_v22 = vrot.slane %v4525_v27, 4  ;;  %v4538_v54 = vshrl.u32 %v8376_v37, 16  ;;  %v4544_v62 = vshll.u32 %v8382_v0, 16  ;;  %v6783_v63 = vld [vmem:[#allocation2 + $0xc0] sm:$0xff]  }
 0x15c   : > { %6606 = vmatmul.mubr.msk.bf16.gmra.mxu0 %vm1288_vm5, %v6780_v1  ;;  %v4507_v1 = vor.u32 %v4506_v46, %v4503_v32  ;;  %v4517_v40 = vor.u32 %v4516_v31, %v4512_v20  ;;  %v6116_v52 = vcombine.low %v4489_v56, %v4499_v45  ;;  %v4530_v50 = vrot.slane %v4528_v51, 5  ;;  %v8390_v32 = vld [vmem:[#allocation2 + $0xc4] sm:$0xf]  ;;  %v8398_v51 = vld [vmem:[#allocation2 + $0xc8] sm:$0x1] }
 0x15d   : > { %6609 = vmatprep.mubr.msk.bf16.mxu0 %vm1288_vm5, %v6781_v38  ;;  %v4534_v38 = vshll.u32 %v8376_v37, 16  ;;  %v6442_v35 = vpop.f32.mrf.mxu1  ;;  %v4549_v31 = vshrl.u32 %v4206_v17, 16  ;;  %9272 = vst [vmem:[#allocation30_spill] sm:$0xff] %v8398_v51  ;;  %v4552_v45 = vshll.u32 %v4206_v17, 16  ;;  %v4558_v0 = vshll.u32 %v8390_v32, 16 }
 0x15e   : > { %v4508_v11 = vrot.slane %v4507_v1, 4  ;;  %v4518_v39 = vrot.slane %v4517_v40, 4  ;;  %6640 = vmatmul.mubr.msk.bf16.gmra.mxu1 %vm1288_vm5, %v6116_v52  ;;  %v4531_v56 = vor.u32 %v4530_v50, %v4527_v22  ;;  %v4540_v1 = vrot.slane %v4538_v54, 4  ;;  %v8409_v54 = vld [vmem:[#allocation2 + $0xd0] sm:$0xf] }
 0x15f   : > { %v4536_v46 = vrot.slane %v4534_v38, 5  ;;  %v8393_v30 = vpop.f32.mrf.mxu1  ;;  %v4546_v38 = vrot.slane %v4544_v62, 5  ;;  %v4551_v4 = vrot.slane %v4549_v31, 4  ;;  %v4560_v22 = vrot.slane %v4558_v0, 5 }
 0x160   : > { %9271 = vst [vmem:[#allocation29_spill] sm:$0xff] %v8393_v30  ;;  %v4513_v27 = vsel %vm6938_vm9, %v4508_v11, %v4512_v20  ;;  %v4523_v40 = vsel %vm6938_vm9, %v4518_v39, %v4522_v42  ;;  %v4209_v30 = vld [vmem:[#allocation2 + $0xcc] sm:$0xf]  ;;  %v4532_v53 = vrot.slane %v4531_v56, 4  ;;  %v4554_v11 = vrot.slane %v4552_v45, 5 }
 0x161   : > { %v6117_v52 = vcombine.low %v4513_v27, %v4523_v40  ;;  %v4541_v43 = vor.u32 %v4540_v1, %v4536_v46  ;;  %v4562_v42 = vshrl.u32 %v8390_v32, 16  ;;  %v4568_v50 = vshll.u32 %v8398_v51, 16  ;;  %v8416_v56 = vld [vmem:[#allocation2 + $0xd4] sm:$0x1] }
 0x162   : > { %v6407_v37 = vpop.f32.mrf.mxu0  ;;  %v4555_v31 = vor.u32 %v4554_v11, %v4551_v4  ;;  %v4576_v1 = vshll.u32 %v4209_v30, 16 }
 0x163   : > { %v8404_v20 = vadd.f32 %v6441_v29, %v6407_v37  ;;  %v6445_v17 = vpop.f32.mrf.mxu1  ;;  %6643 = vmatprep.mubr.msk.bf16.mxu1 %vm1288_vm5, %v6117_v52  ;;  %v4542_v62 = vrot.slane %v4541_v43, 4  ;;  %v4573_v37 = vshrl.u32 %v4209_v30, 16  ;;  %v4570_v27 = vrot.slane %v4568_v50, 5  ;;  %v6784_v52 = vld [vmem:[#allocation2 + $0xcc] sm:$0xff]   ;;  %v4890_v43 = vld [vmem:[#allocation2 + $0x18] sm:$0xe] }
 0x164   : > { %6610 = vmatmul.mubr.msk.bf16.gmra.mxu0 %vm1288_vm5, %v6782_v10  ;;  %v1471_v39 = vpop.f32.mrf.mxu0  ;;  %v4537_v10 = vsel %vm6938_vm9, %v4532_v53, %v4536_v46  ;;  %v4582_v53 = vshll.u32 %v8409_v54, 16  ;;  %v4578_v11 = vrot.slane %v4576_v1, 5  ;;  %v6137_v1 = vrot.slane %v4890_v43, 9 }
 0x165   : > { %9273 = vst [vmem:[#allocation31_spill] sm:$0xff] %v8404_v20  ;;  %6613 = vmatprep.mubr.msk.bf16.mxu0 %vm1288_vm5, %v6783_v63  ;;  %v8414_v29 = vadd.f32 %v1763_v14, %v1471_v39  ;;  %v4564_v63 = vrot.slane %v4562_v42, 4  ;;  %v1779_v0 = vpop.f32.mrf.mxu1  ;;  %v4547_v45 = vsel %vm6938_vm9, %v4542_v62, %v4546_v38  ;;  %v4556_v20 = vrot.slane %v4555_v31, 4  ;;  %v4891_v31 = vld [vmem:[#allocation2 + $0x24] sm:$0xe] }
 0x166   : > { %v6408_v40 = vpop.f32.mrf.mxu0  ;;  %v4575_v51 = vrot.slane %v4573_v37, 4  ;;  %v6118_v4 = vcombine.low %v4537_v10, %v4547_v45  ;;  %v4584_v30 = vrot.slane %v4582_v53, 5  ;;  %v4586_v38 = vshrl.u32 %v8409_v54, 16 }
 0x167   : > { %v8421_v46 = vadd.f32 %v6442_v35, %v6408_v40  ;;  %v4565_v14 = vor.u32 %v4564_v63, %v4560_v22  ;;  %v6446_v42 = vpop.f32.mrf.mxu1  ;;  %v4592_v62 = vshll.u32 %v8416_v56, 16  ;;  %v4561_v10 = vsel %vm6938_vm9, %v4556_v20, %v4560_v22 }
 0x168   : > { %v8424_v39 = vpop.f32.mrf.mxu0  ;;  %6644 = vmatmul.mubr.msk.bf16.gmra.mxu1 %vm1288_vm5, %v6118_v4  ;;  %v4579_v37 = vor.u32 %v4578_v11, %v4575_v51  ;;  %v4588_v40 = vrot.slane %v4586_v38, 4  ;;  %v4956_v50 = vrot.slane %v8102_v12, 5  ;;  %v6138_v22 = vrot.slane %v4891_v31, 9 }
 0x169   : > { %9274 = vst [vmem:[#allocation32_spill] sm:$0xff] %v8421_v46  ;;  %9275 = vst [vmem:[#allocation33_spill] sm:$0xff] %v8424_v39  ;;  %v4566_v35 = vrot.slane %v4565_v14, 4  ;;  %v8431_v63 = vpop.f32.mrf.mxu1  ;;  %v4594_v53 = vrot.slane %v4592_v62, 5  ;;  %v4959_v46 = vrot.slane %v8104_v36, 5  ;;  %v9277_v36 = vrot.slane %v8122_v25, 5 }
 0x16a   : > { %9276 = vst [vmem:[#allocation34_spill] sm:$0xff] %v8431_v63  ;;  %v6411_v45 = vpop.f32.mrf.mxu0  ;;  %v4580_v20 = vrot.slane %v4579_v37, 4  ;;  %v4892_v14 = vld [vmem:[#allocation2 + $0x30] sm:$0xe]  ;;  %v4589_v63 = vor.u32 %v4588_v40, %v4584_v30  ;;  %v4958_v38 = vrot.slane %v4956_v50, 4 }
 0x16b   : > { %v8436_v39 = vadd.f32 %v6445_v17, %v6411_v45  ;;  %v4571_v4 = vsel %vm6938_vm9, %v4566_v35, %v4570_v27  ;;  %v6485_v51 = vpop.f32.mrf.mxu1  ;;  %v4964_v17 = vsel %vm7289_vm15, %v6138_v22, %v9277_v36  ;;  %v9278_v27 = vmov %v9277_v36  ;;  %v4895_v36 = vld [vmem:[#allocation2 + $0x54] sm:$0xe] }
 0x16c   : > { %6614 = vmatmul.mubr.msk.bf16.gmra.mxu0 %vm1288_vm5, %v6784_v52  ;;  %v6119_v11 = vcombine.low %v4561_v10, %v4571_v4  ;;  %v1487_v43 = vpop.f32.mrf.mxu0  ;;  %v4957_v52 = vsel %vm7289_vm15, %v6137_v1, %v4956_v50  ;;  %v4585_v12 = vsel %vm6938_vm9, %v4580_v20, %v4584_v30  ;;  %v4965_v31 = vrot.slane %v9278_v27, 4  ;;  %v4893_v30 = vld [vmem:[#allocation2 + $0x3c] sm:$0xe] }
 0x16d   : > { %v8442_v62 = vadd.f32 %v1779_v0, %v1487_v43  ;;  %v2450_v10 = vpop.f32.mrf.mxu1  ;;  %v4590_v35 = vrot.slane %v4589_v63, 4  ;;  %v4960_v0 = vsel %vm7289_vm15, %v4958_v38, %v4959_v46  ;;  %v6139_v50 = vrot.slane %v4892_v14, 9  ;;  %v4894_v63 = vld [vmem:[#allocation2 + $0x48] sm:$0xe] }
 0x16e   : > { %6647 = vmatprep.mubr.msk.bf16.mxu1 %vm1288_vm5, %v6119_v11  ;;  %v6412_v37 = vpop.f32.mrf.mxu0  ;;  %v4970_v1 = vrot.slane %v8145_v26, 5  ;;  %v6154_v40 = vcombine.low %v4957_v52, %v4960_v0  ;;  %v9279_v4 = vrot.slane %v8124_v19, 5  ;;  %v4973_v22 = vrot.slane %v8153_v48, 5 }
 0x16f   : > { %v8456_v45 = vadd.f32 %v6446_v42, %v6412_v37  ;;  %v6486_v20 = vpop.f32.mrf.mxu1  ;;  %v4595_v11 = vsel %vm6938_vm9, %v4590_v35, %v4594_v53  ;;  %v5008_v43 = vrot.slane %v8269_v8, 5  ;;  %v6140_v38 = vrot.slane %v4893_v30, 9 }
 0x170   : > { %v4967_v25 = vsel %vm7289_vm15, %v4965_v31, %v9279_v4  ;;  %v8465_v46 = vpop.f32.mrf.mxu0  ;;  %v4971_v26 = vsel %vm7289_vm15, %v6139_v50, %v4970_v1  ;;  %v4972_v42 = vrot.slane %v4970_v1, 4  ;;  %v6120_v19 = vcombine.low %v4585_v12, %v4595_v11  ;;  %6653 = vmatprep.mubr.msk.bf16.mxu0 %vm1288_vm5, %v6154_v40  ;;  %v4896_v12 = vld [vmem:[#allocation2 + $0x60] sm:$0xe] }
 0x171   : > { %v6155_v14 = vcombine.low %v4964_v17, %v4967_v25  ;;  %v8471_v52 = vpop.f32.mrf.mxu1  ;;  %v4977_v48 = vrot.slane %v8169_v2, 5  ;;  %v6141_v17 = vrot.slane %v4894_v63, 9  ;;  %v4984_v27 = vrot.slane %v8197_v33, 5  ;;  %v4897_v63 = vld [vmem:[#allocation2 + $0x6c] sm:$0xe] }
 0x172   : > { %v6451_v24 = vpop.f32.mrf.mxu0  ;;  %v4974_v53 = vsel %vm7289_vm15, %v4972_v42, %v4973_v22  ;;  %v4987_v8 = vrot.slane %v8205_v58, 5  ;;  %6648 = vmatmul.mubr.msk.bf16.gmra.mxu1 %vm1288_vm5, %v6120_v19  ;;  %v6142_v40 = vrot.slane %v4895_v36, 9  ;;  %v4991_v33 = vrot.slane %v8216_v41, 5 }
 0x173   : > { %v2221_v31 = vadd.f32 %v6451_v24, %v8100_v6  ;;  %v6156_v35 = vcombine.low %v4971_v26, %v4974_v53  ;;  %v4978_v2 = vsel %vm7289_vm15, %v6140_v38, %v4977_v48  ;;  %v4979_v37 = vrot.slane %v4977_v48, 4 }
 0x174   : > { %6654 = vmatmul.mubr.msk.bf16.vlgmr.msra.gmra.mxu0 %vm1288_vm5, %v6155_v14  ;;  %v2092_v0 = vpop.f32.mrf.mxu0  ;;  %v6489_v50 = vpop.f32.mrf.mxu1  ;;  %v4985_v1 = vsel %vm7289_vm15, %v6141_v17, %v4984_v27  ;;  %v4986_v30 = vrot.slane %v4984_v27, 4  ;;  %v9280_v6 = vrot.slane %v8179_v55, 5  ;;  %v6143_v22 = vrot.slane %v4896_v12, 9 }
 0x175   : > { %v2219_v58 = vadd.f32 %v2092_v0, %v8120_v21  ;;  %v8487_v4 = vadd.f32 %v6485_v51, %v2221_v31  ;;  %6657 = vmatprep.mubr.msk.bf16.mxu0 %vm1288_vm5, %v6156_v35  ;;  %v4992_v21 = vsel %vm7289_vm15, %v6142_v40, %v4991_v33  ;;  %v4993_v41 = vrot.slane %v4991_v33, 4  ;;  %v4898_v33 = vld [vmem:[#allocation2 + $0x78] sm:$0xe] }
 0x176   : > { %v4981_v25 = vsel %vm7289_vm15, %v4979_v37, %v9280_v6  ;;  %v6452_v11 = vpop.f32.mrf.mxu0  ;;  %v2466_v26 = vpop.f32.mrf.mxu1  ;;  %v4988_v42 = vsel %vm7289_vm15, %v4986_v30, %v4987_v8  ;;  %v4998_v38 = vrot.slane %v8246_v13, 5  ;;  %v9281_v24 = vrot.slane %v8225_v49, 5 }
 0x177   : > { %v6157_v14 = vcombine.low %v4978_v2, %v4981_v25  ;;  %v2222_v51 = vadd.f32 %v6452_v11, %v8151_v34  ;;  %v8499_v19 = vadd.f32 %v2450_v10, %v2219_v58  ;;  %v6158_v55 = vcombine.low %v4985_v1, %v4988_v42 }
 0x178   : > { %v8502_v48 = vpop.f32.mrf.mxu0  ;;  %v6490_v36 = vpop.f32.mrf.mxu1  ;;  %v4995_v53 = vsel %vm7289_vm15, %v4993_v41, %v9281_v24  ;;  %v5001_v17 = vrot.slane %v8248_v3, 5  ;;  %v6144_v27 = vrot.slane %v4897_v63, 9  ;;  %v5005_v8 = vrot.slane %v8265_v28, 5 }
 0x179   : > { %v8510_v12 = vadd.f32 %v6486_v20, %v2222_v51  ;;  %v6159_v34 = vcombine.low %v4992_v21, %v4995_v53  ;;  %v5000_v31 = vrot.slane %v4998_v38, 4  ;;  %v4999_v28 = vsel %vm7289_vm15, %v6143_v22, %v4998_v38  ;;  %v4900_v53 = vld [vmem:[#allocation2 + $0x90] sm:$0xe] }
 0x17a   : > { %v6455_v10 = vpop.f32.mrf.mxu0  ;;  %v8513_v13 = vpop.f32.mrf.mxu1  ;;  %v5006_v49 = vsel %vm7289_vm15, %v6144_v27, %v5005_v8  ;;  %v5007_v35 = vrot.slane %v5005_v8, 4  ;;  %v5012_v1 = vrot.slane %v8288_v5, 5  ;;  %v1687_v25 = vadd.f32 %v8068_v7, %v8113_v47 }
 0x17b   : > { %v2225_v2 = vadd.f32 %v6455_v10, %v8159_v59  ;;  %v5002_v20 = vsel %vm7289_vm15, %v5000_v31, %v5001_v17  ;;  %v6145_v42 = vrot.slane %v4898_v33, 9  ;;  %v5019_v7 = vrot.slane %v8313_v16, 5  ;;  %v9282_v17 = vld [vmem:[#allocation5_spill] sm:$0xff] }
 0x17c   : > { %6658 = vmatmul.mubr.msk.bf16.gmra.mxu0 %vm1288_vm5, %v6157_v14  ;;  %v2108_v3 = vpop.f32.mrf.mxu0  ;;  %v6493_v37 = vpop.f32.mrf.mxu1  ;;  %v5009_v0 = vsel %vm7289_vm15, %v5007_v35, %v5008_v43  ;;  %v6160_v11 = vcombine.low %v4999_v28, %v5002_v20  ;;  %v5014_v5 = vrot.slane %v5012_v1, 4  ;;  %v5026_v24 = vrot.slane %v8329_v9, 5  ;;  %v9284_v9 = vld [vmem:[#allocation15_spill] sm:$0xff] }
 0x17d   : > { %6661 = vmatprep.mubr.msk.bf16.mxu0 %vm1288_vm5, %v6158_v55  ;;  %v2223_v30 = vadd.f32 %v2108_v3, %v8177_v60  ;;  %v8527_v40 = vadd.f32 %v6489_v50, %v2225_v2  ;;  %v6161_v59 = vcombine.low %v5006_v49, %v5009_v0  ;;  %v5015_v60 = vrot.slane %v8290_v23, 5  ;;  %v5486_v23 = vld [vmem:[%s9221_s4] sm:$0x3]  ;;  %v9283_v49 = vld [vmem:[#allocation6_spill] sm:$0xff] }
 0x17e   : > { %v6456_v58 = vpop.f32.mrf.mxu0  ;;  %v2482_v6 = vpop.f32.mrf.mxu1  ;;  %v5013_v38 = vsel %vm7289_vm15, %v6145_v42, %v5012_v1  ;;  %6728 = vmatprep.subr.msk.bf16.mxu1 %vm1337_vm0, %v5486_v23  ;;  %v1703_v27 = vadd.f32 %v9282_v17, %v8184_v57  ;;  %v5021_v31 = vrot.slane %v5019_v7, 4  ;;  %v5022_v28 = vrot.slane %v9284_v9, 5  ;;  %v9285_v1 = vld [vmem:[#allocation18_spill] sm:$0xff]  ;;  %v4901_v42 = vld [vmem:[#allocation2 + $0x9c] sm:$0xe] }
 0x17f   : > { %v2226_v22 = vadd.f32 %v6456_v58, %v8195_v18  ;;  %v8532_v63 = vadd.f32 %v2466_v26, %v2223_v30  ;;  %v4899_v18 = vld [vmem:[#allocation2 + $0x84] sm:$0xe]  ;;  %v5029_v30 = vrot.slane %v9285_v1, 5 }
 0x180   : > { %v2111_v14 = vpop.f32.mrf.mxu0  ;;  %v6494_v43 = vpop.f32.mrf.mxu1  ;;  %v6146_v10 = vrot.slane %v4899_v18, 9  ;;  %v9288_v18 = vld [vmem:[#allocation24_spill] sm:$0xff] }
 0x181   : > { %v8535_v50 = vadd.f32 %v2111_v14, %v1687_v25  ;;  %v8537_v21 = vadd.f32 %v6490_v36, %v2226_v22  ;;  %v5016_v36 = vsel %vm7289_vm15, %v5014_v5, %v5015_v60  ;;  %v5023_v14 = vsel %vm7289_vm15, %v5021_v31, %v5022_v28  ;;  %v9287_v5 = vld [vmem:[#allocation19_spill] sm:$0xff]  ;;  %v9290_v31 = vld [vmem:[#allocation21_spill] sm:$0xff] }
 0x182   : > { %v6459_v41 = vpop.f32.mrf.mxu0  ;;  %v8540_v51 = vpop.f32.mrf.mxu1  ;;  %v6162_v3 = vcombine.low %v5013_v38, %v5016_v36  ;;  %v5033_v60 = vrot.slane %v9287_v5, 5  ;;  %v5568_v38 = vsel %vm1337_vm0, %v5486_v23, 0  ;;  %v9289_v36 = vld [vmem:[#allocation8_spill] sm:$0xff]  ;;  %vm5731_vm0 = vcmask 130048  }
 0x183   : > { %v2229_v47 = vadd.f32 %v6459_v41, %v8203_v44  ;;  %6686 = vmatpush3.bf16.msra.mxu1 %v5568_v38 }
 0x184   : > { %6662 = vmatmul.mubr.msk.bf16.gmra.mxu0 %vm1288_vm5, %v6159_v34  ;;  %v2124_v26 = vpop.f32.mrf.mxu0  ;;  %v6497_v55 = vpop.f32.mrf.mxu1  ;;  %v5035_v28 = vrot.slane %v5033_v60, 4 }
 0x185   : > { %6665 = vmatprep.mubr.msk.bf16.mxu0 %vm1288_vm5, %v6160_v11  ;;  %v2227_v44 = vadd.f32 %v2124_v26, %v8223_v61  ;;  %v8555_v16 = vadd.f32 %v6493_v37, %v2229_v47  ;;  %v6147_v61 = vrot.slane %v4900_v53, 9  ;;  %v5028_v37 = vrot.slane %v5026_v24, 4  ;;  %v4902_v53 = vld [vmem:[#allocation2 + $0xa8] sm:$0xe] }
 0x186   : > { %v6460_v8 = vpop.f32.mrf.mxu0  ;;  %v2498_v34 = vpop.f32.mrf.mxu1  ;;  %v5020_v11 = vsel %vm7289_vm15, %v6146_v10, %v5019_v7  ;;  %v5040_v26 = vrot.slane %v9288_v18, 5  ;;  %v6148_v10 = vrot.slane %v4901_v42, 9 }
 0x187   : > { %v2230_v35 = vadd.f32 %v6460_v8, %v9283_v49  ;;  %v8560_v2 = vadd.f32 %v2482_v6, %v2227_v44  ;;  %v9286_v6 = vld [vmem:[#allocation7_spill] sm:$0xff]  ;;  %v5030_v47 = vsel %vm7289_vm15, %v5028_v37, %v5029_v30  ;;  %v5036_v49 = vrot.slane %v9290_v31, 5  ;;  %v9293_v30 = vld [vmem:[#allocation10_spill] sm:$0xff]  ;;  %v9298_v31 = vld [vmem:[#allocation12_spill] sm:$0xff] }
 0x188   : > { %v2127_v20 = vpop.f32.mrf.mxu0  ;;  %v6498_v0 = vpop.f32.mrf.mxu1  ;;  %v5042_v37 = vrot.slane %v5040_v26, 4  ;;  %v5034_v42 = vsel %vm7289_vm15, %v6148_v10, %v5033_v60  ;;  %v4904_v60 = vld [vmem:[#allocation2 + $0xc0] sm:$0xe]  ;;  %v9297_v10 = vld [vmem:[#allocation13_spill] sm:$0xff] }
 0x189   : > { %v8564_v33 = vadd.f32 %v2127_v20, %v1703_v27  ;;  %v8566_v57 = vadd.f32 %v6494_v43, %v2230_v35  ;;  %v6163_v27 = vcombine.low %v5020_v11, %v5023_v14  ;;  %v9294_v14 = vld [vmem:[#allocation11_spill] sm:$0xff]  ;;  %v5037_v5 = vsel %vm7289_vm15, %v5035_v28, %v5036_v49 }
 0x18a   : > { %v6463_v58 = vpop.f32.mrf.mxu0  ;;  %v8569_v25 = vpop.f32.mrf.mxu1  ;;  %v1735_v49 = vadd.f32 %v9298_v31, %v9297_v10 }
 0x18b   : > { %v2233_v22 = vadd.f32 %v6463_v58, %v9286_v6 }
 0x18c   : > { %6666 = vmatmul.mubr.msk.bf16.gmra.mxu0 %vm1288_vm5, %v6161_v59  ;;  %v2140_v43 = vpop.f32.mrf.mxu0  ;;  %v6501_v41 = vpop.f32.mrf.mxu1  ;;  %v5027_v59 = vsel %vm7289_vm15, %v6147_v61, %v5026_v24  ;;  %v9291_v24 = vld [vmem:[#allocation9_spill] sm:$0xff]  ;;  %v6149_v61 = vrot.slane %v4902_v53, 9  ;;  %v9296_v53 = vld [vmem:[#allocation14_spill] sm:$0xff] }
 0x18d   : > { %6669 = vmatprep.mubr.msk.bf16.mxu0 %vm1288_vm5, %v6162_v3  ;;  %v2231_v7 = vadd.f32 %v2140_v43, %v9289_v36  ;;  %v8585_v44 = vadd.f32 %v6497_v55, %v2233_v22  ;;  %v6164_v9 = vcombine.low %v5027_v59, %v5030_v47  ;;  %v9292_v55 = vld [vmem:[#allocation25_spill] sm:$0xff]  ;;  %v4903_v43 = vld [vmem:[#allocation2 + $0xb4] sm:$0xe] }
 0x18e   : > { %v6464_v17 = vpop.f32.mrf.mxu0  ;;  %v2514_v8 = vpop.f32.mrf.mxu1  ;;  %v5043_v1 = vrot.slane %v9292_v55, 5  ;;  %v9295_v59 = vld [vmem:[#allocation26_spill] sm:$0xff]  ;;  %v5041_v38 = vsel %vm7289_vm15, %v6149_v61, %v5040_v26  ;;  %v6150_v28 = vrot.slane %v4903_v43, 9  ;;  %v9300_v26 = vld [vmem:[#allocation16_spill] sm:$0xff] }
 0x18f   : > { %v2234_v35 = vadd.f32 %v6464_v17, %v9291_v24  ;;  %v8589_v3 = vadd.f32 %v2498_v34, %v2231_v7  ;;  %v5047_v47 = vrot.slane %v9295_v59, 5  ;;  %v5054_v7 = vrot.slane %v8390_v32, 5 }
 0x190   : > { %v2143_v20 = vpop.f32.mrf.mxu0  ;;  %v6502_v23 = vpop.f32.mrf.mxu1  ;;  %v5044_v36 = vsel %vm7289_vm15, %v5042_v37, %v5043_v1 }
 0x191   : > { %v8593_v58 = vadd.f32 %v2143_v20, %v9293_v30  ;;  %v8595_v6 = vadd.f32 %v6498_v0, %v2234_v35  ;;  %v6165_v35 = vcombine.low %v5034_v42, %v5037_v5  ;;  %v9299_v20 = vld [vmem:[#allocation27_spill] sm:$0xff]  ;;  %v6166_v37 = vcombine.low %v5041_v38, %v5044_v36 }
 0x192   : > { %v6467_v22 = vpop.f32.mrf.mxu0  ;;  %v2517_v11 = vpop.f32.mrf.mxu1  ;;  %v5050_v55 = vrot.slane %v9299_v20, 5  ;;  %v5049_v32 = vrot.slane %v5047_v47, 4  ;;  %v5048_v43 = vsel %vm7289_vm15, %v6150_v28, %v5047_v47  ;;  %v9304_v28 = vld [vmem:[#allocation28_spill] sm:$0xff]  ;;  %v9305_v20 = vld [vmem:[#allocation22_spill] sm:$0xff] }
 0x193   : > { %v2237_v34 = vadd.f32 %v6467_v22, %v9294_v14  ;;  %v5056_v14 = vrot.slane %v5054_v7, 4 }
 0x194   : > { %6670 = vmatmul.mubr.msk.bf16.gmra.mxu0 %vm1288_vm5, %v6163_v27  ;;  %v2156_v18 = vpop.f32.mrf.mxu0  ;;  %v6505_v0 = vpop.f32.mrf.mxu1  ;;  %v5051_v36 = vsel %vm7289_vm15, %v5049_v32, %v5050_v55 }
 0x195   : > { %6673 = vmatprep.mubr.msk.bf16.mxu0 %vm1288_vm5, %v6164_v9  ;;  %v2235_v17 = vadd.f32 %v2156_v18, %v9296_v53  ;;  %v8611_v27 = vadd.f32 %v6501_v41, %v2237_v34  ;;  %v6151_v41 = vrot.slane %v4904_v60, 9  ;;  %v9301_v34 = vld [vmem:[#allocation30_spill] sm:$0xff]  ;;  %v4905_v60 = vld [vmem:[#allocation2 + $0xcc] sm:$0xe]  ;;  %v6167_v55 = vcombine.low %v5048_v43, %v5051_v36  ;;  %v9307_v43 = vld [vmem:[#allocation31_spill] sm:$0xff] }
 0x196   : > { %v6468_v24 = vpop.f32.mrf.mxu0  ;;  %v2530_v9 = vpop.f32.mrf.mxu1  ;;  %v5057_v59 = vrot.slane %v9301_v34, 5  ;;  %v6152_v32 = vrot.slane %v4905_v60, 9 }
 0x197   : > { %v2238_v61 = vadd.f32 %v6468_v24, %v9300_v26  ;;  %v8617_v30 = vadd.f32 %v2514_v8, %v2235_v17  ;;  %v9302_v8 = vld [vmem:[#allocation17_spill] sm:$0xff]  ;;  %v9303_v24 = vld [vmem:[#allocation20_spill] sm:$0xff]  ;;  %v1751_v26 = vadd.f32 %v9305_v20, %v9304_v28 }
 0x198   : > { %v2159_v1 = vpop.f32.mrf.mxu0  ;;  %v6506_v22 = vpop.f32.mrf.mxu1  ;;  %v5058_v47 = vsel %vm7289_vm15, %v5056_v14, %v5057_v59  ;;  %v9308_v20 = vld [vmem:[#allocation33_spill] sm:$0xff] }
 0x199   : > { %v2236_v18 = vadd.f32 %v2159_v1, %v1735_v49  ;;  %v8620_v53 = vadd.f32 %v6502_v23, %v2238_v61  ;;  %v5061_v23 = vrot.slane %v8409_v54, 5  ;;  %v5055_v49 = vsel %vm7289_vm15, %v6151_v41, %v5054_v7  ;;  %v9306_v1 = vld [vmem:[#allocation23_spill] sm:$0xff] }
 0x19a   : > { %v6471_v42 = vpop.f32.mrf.mxu0  ;;  %v2533_v5 = vpop.f32.mrf.mxu1  ;;  %v5064_v54 = vrot.slane %v8416_v56, 5  ;;  %v6168_v7 = vcombine.low %v5055_v49, %v5058_v47 }
 0x19b   : > { %v2241_v17 = vadd.f32 %v6471_v42, %v9302_v8  ;;  %v8626_v38 = vadd.f32 %v2517_v11, %v2236_v18  ;;  %v5063_v41 = vrot.slane %v5061_v23, 4  ;;  %v5062_v56 = vsel %vm7289_vm15, %v6152_v32, %v5061_v23 }
 0x19c   : > { %6674 = vmatmul.mubr.msk.bf16.gmra.mxu0 %vm1288_vm5, %v6165_v35  ;;  %v2172_v10 = vpop.f32.mrf.mxu0  ;;  %v6509_v31 = vpop.f32.mrf.mxu1 }
 0x19d   : > { %6677 = vmatprep.mubr.msk.bf16.mxu0 %vm1288_vm5, %v6166_v37  ;;  %v2239_v35 = vadd.f32 %v2172_v10, %v9303_v24  ;;  %v8637_v11 = vadd.f32 %v6505_v0, %v2241_v17 }
 0x19e   : > { %v6472_v61 = vpop.f32.mrf.mxu0  ;;  %v2546_v37 = vpop.f32.mrf.mxu1 }
 0x19f   : > { %v2242_v34 = vadd.f32 %v6472_v61, %v9306_v1  ;;  %v8643_v18 = vadd.f32 %v2530_v9, %v2239_v35  ;;  %v5065_v9 = vsel %vm7289_vm15, %v5063_v41, %v5064_v54  ;;  %v9310_v61 = vld [vmem:[#allocation32_spill] sm:$0xff] }
 0x1a0   : > { %v2175_v14 = vpop.f32.mrf.mxu0  ;;  %v6510_v59 = vpop.f32.mrf.mxu1  ;;  %v6169_v35 = vcombine.low %v5062_v56, %v5065_v9 }
 0x1a1   : > { %v2240_v42 = vadd.f32 %v2175_v14, %v1751_v26  ;;  %v8645_v0 = vadd.f32 %v6506_v22, %v2242_v34 }
 0x1a2   : > { %v6475_v8 = vpop.f32.mrf.mxu0  ;;  %v2549_v17 = vpop.f32.mrf.mxu1 }
 0x1a3   : > { %v2245_v36 = vadd.f32 %v6475_v8, %v9307_v43  ;;  %v8649_v60 = vadd.f32 %v2533_v5, %v2240_v42  ;;  %v9309_v5 = vld [vmem:[#allocation29_spill] sm:$0xff] }
 0x1a4   : > { %6678 = vmatmul.mubr.msk.bf16.gmra.mxu0 %vm1288_vm5, %v6167_v55  ;;  %v2188_v10 = vpop.f32.mrf.mxu0  ;;  %v6513_v49 = vpop.f32.mrf.mxu1  ;;  %v1767_v26 = vadd.f32 %v9309_v5, %v9308_v20 }
 0x1a5   : > { %6681 = vmatprep.mubr.msk.bf16.mxu0 %vm1288_vm5, %v6168_v7  ;;  %v2243_v22 = vadd.f32 %v2188_v10, %v8414_v29  ;;  %v8657_v47 = vadd.f32 %v6509_v31, %v2245_v36  ;;  %v9311_v36 = vld [vmem:[#allocation34_spill] sm:$0xff] }
 0x1a6   : > { %v6476_v24 = vpop.f32.mrf.mxu0  ;;  %v2562_v28 = vpop.f32.mrf.mxu1 }
 0x1a7   : > { %v2246_v55 = vadd.f32 %v6476_v24, %v9310_v61  ;;  %v8662_v1 = vadd.f32 %v2546_v37, %v2243_v22 }
 0x1a8   : > { %v2191_v23 = vpop.f32.mrf.mxu0  ;;  %v6514_v32 = vpop.f32.mrf.mxu1 }
 0x1a9   : > { %v2244_v15 = vadd.f32 %v2191_v23, %v1767_v26  ;;  %v8664_v54 = vadd.f32 %v6510_v59, %v2246_v55  ;;  %v1783_v59 = vadd.f32 %v9311_v36, %v8465_v46 }
 0x1aa   : > { %v2565_v29 = vpop.f32.mrf.mxu1 }
 0x1ab   : > { %v8668_v7 = vadd.f32 %v2549_v17, %v2244_v15  ;;  %v9313_v17 = vld [vmem:[#allocation3_spill] sm:$0xff] }
 0x1ac   : > { %v6479_v34 = vpop.f32.mrf.mxu0  ;;  %6682 = vmatmul.mubr.msk.bf16.gmra.mxu0 %vm1288_vm5, %v6169_v35  ;;  %v6553_v14 = vpop.f32.mrf.mxu1 }
 0x1ad   : > { %v2249_v31 = vadd.f32 %v6479_v34, %v8436_v39  ;;  %v9312_v39 = vld [vmem:[#allocation4_spill] sm:$0xff] }
 0x1ae   : > { %v2204_v41 = vpop.f32.mrf.mxu0  ;;  %v3646_v43 = vpop.f32.mrf.mxu1  ;;  %v1671_v24 = vadd.f32 %v9313_v17, %v9312_v39 }
 0x1af   : > { %v2247_v42 = vadd.f32 %v2204_v41, %v8442_v62  ;;  %v8671_v8 = vadd.f32 %v6513_v49, %v2249_v31 }
 0x1b0   : > { %v6480_v37 = vpop.f32.mrf.mxu0  ;;  %v8678_v22 = vpop.f32.mrf.mxu1  ;;  %v2220_v5 = vadd.f32 %v8502_v48, %v1671_v24 }
 0x1b1   : > { %v2250_v56 = vadd.f32 %v6480_v37, %v8456_v45  ;;  %v8676_v9 = vadd.f32 %v2562_v28, %v2247_v42 }
 0x1b2   : > { %v2207_v10 = vpop.f32.mrf.mxu0  ;;  %v8684_v49 = vpop.f32.mrf.mxu1 }
 0x1b3   : > { %v2248_v35 = vadd.f32 %v2207_v10, %v1783_v59  ;;  %v8682_v20 = vadd.f32 %v6514_v32, %v2250_v56  ;;  %v2578_v32 = vadd.f32 %v8471_v52, %v2220_v5 }
 0x1b4   : > { %v6519_v62 = vpop.f32.mrf.mxu0  ;;  %v6557_v28 = vpop.f32.mrf.mxu1 }
 0x1b5   : > { %v8687_v26 = vadd.f32 %v2565_v29, %v2248_v35  ;;  %v3305_v45 = vadd.f32 %v6519_v62, %v8487_v4 }
 0x1b6   : > { %v3176_v46 = vpop.f32.mrf.mxu0  ;;  %v3662_v15 = vpop.f32.mrf.mxu1 }
 0x1b7   : > { %v3303_v61 = vadd.f32 %v3176_v46, %v8499_v19  ;;  %v8691_v55 = vadd.f32 %v6553_v14, %v3305_v45 }
 0x1b8   : > { %v6520_v23 = vpop.f32.mrf.mxu0  ;;  %v8699_v29 = vpop.f32.mrf.mxu1 }
 0x1b9   : > { %v8695_v34 = vadd.f32 %v6520_v23, %v8510_v12  ;;  %v8697_v31 = vadd.f32 %v3646_v43, %v3303_v61  ;;  %v2582_v43 = vadd.f32 %v8513_v13, %v8535_v50 }
 0x1ba   : > { %v3179_v48 = vpop.f32.mrf.mxu0  ;;  %v8703_v42 = vpop.f32.mrf.mxu1 }
 0x1bb   : > { %v8701_v41 = vadd.f32 %v3179_v48, %v2578_v32 }
 0x1bc   : > { %v6523_v4 = vpop.f32.mrf.mxu0  ;;  %v6561_v37 = vpop.f32.mrf.mxu1 }
 0x1bd   : > { %v3309_v19 = vadd.f32 %v6523_v4, %v8527_v40 }
 0x1be   : > { %v3192_v14 = vpop.f32.mrf.mxu0  ;;  %v3678_v59 = vpop.f32.mrf.mxu1 }
 0x1bf   : > { %v3307_v36 = vadd.f32 %v3192_v14, %v8532_v63  ;;  %v8707_v52 = vadd.f32 %v6557_v28, %v3309_v19 }
 0x1c0   : > { %v6524_v12 = vpop.f32.mrf.mxu0  ;;  %v6562_v17 = vpop.f32.mrf.mxu1 }
 0x1c1   : > { %v8712_v56 = vadd.f32 %v6524_v12, %v8537_v21  ;;  %v8714_v10 = vadd.f32 %v3662_v15, %v3307_v36  ;;  %v2586_v21 = vadd.f32 %v8540_v51, %v8564_v33  ;;  %v2590_v36 = vadd.f32 %v8569_v25, %v8593_v58 }
 0x1c2   : > { %v3195_v39 = vpop.f32.mrf.mxu0  ;;  %v8718_v35 = vpop.f32.mrf.mxu1 }
 0x1c3   : > { %v8716_v24 = vadd.f32 %v3195_v39, %v2582_v43 }
 0x1c4   : > { %v6527_v40 = vpop.f32.mrf.mxu0  ;;  %v6565_v5 = vpop.f32.mrf.mxu1 }
 0x1c5   : > { %v3313_v63 = vadd.f32 %v6527_v40, %v8555_v16 }
 0x1c6   : > { %v3208_v62 = vpop.f32.mrf.mxu0  ;;  %v3694_v50 = vpop.f32.mrf.mxu1 }
 0x1c7   : > { %v3311_v45 = vadd.f32 %v3208_v62, %v8560_v2  ;;  %v8722_v46 = vadd.f32 %v6561_v37, %v3313_v63 }
 0x1c8   : > { %v6528_v13 = vpop.f32.mrf.mxu0  ;;  %v6566_v15 = vpop.f32.mrf.mxu1 }
 0x1c9   : > { %v3314_v28 = vadd.f32 %v6528_v13, %v8566_v57  ;;  %v8727_v61 = vadd.f32 %v3678_v59, %v3311_v45 }
 0x1ca   : > { %v3211_v23 = vpop.f32.mrf.mxu0  ;;  %v8733_v4 = vpop.f32.mrf.mxu1 }
 0x1cb   : > { %v8729_v32 = vadd.f32 %v3211_v23, %v2586_v21  ;;  %v8731_v16 = vadd.f32 %v6562_v17, %v3314_v28 }
 0x1cc   : > { %v6531_v48 = vpop.f32.mrf.mxu0  ;;  %v6569_v14 = vpop.f32.mrf.mxu1 }
 0x1cd   : > { %v3317_v2 = vadd.f32 %v6531_v48, %v8585_v44 }
 0x1ce   : > { %v3224_v19 = vpop.f32.mrf.mxu0  ;;  %v3710_v57 = vpop.f32.mrf.mxu1 }
 0x1cf   : > { %v3315_v37 = vadd.f32 %v3224_v19, %v8589_v3  ;;  %v8737_v51 = vadd.f32 %v6565_v5, %v3317_v2 }
 0x1d0   : > { %v6532_v33 = vpop.f32.mrf.mxu0  ;;  %v6570_v39 = vpop.f32.mrf.mxu1 }
 0x1d1   : > { %v3318_v12 = vadd.f32 %v6532_v33, %v8595_v6  ;;  %v8742_v59 = vadd.f32 %v3694_v50, %v3315_v37 }
 0x1d2   : > { %v3227_v43 = vpop.f32.mrf.mxu0  ;;  %v8748_v63 = vpop.f32.mrf.mxu1 }
 0x1d3   : > { %v8744_v17 = vadd.f32 %v3227_v43, %v2590_v36  ;;  %v8746_v44 = vadd.f32 %v6566_v15, %v3318_v12 }
 0x1d4   : > { %v6535_v40 = vpop.f32.mrf.mxu0  ;;  %v6573_v5 = vpop.f32.mrf.mxu1 }
 0x1d5   : > { %v3321_v3 = vadd.f32 %v6535_v40, %v8611_v27 }
 0x1d6   : > { %v3240_v62 = vpop.f32.mrf.mxu0  ;;  %v3726_v6 = vpop.f32.mrf.mxu1 }
 0x1d7   : > { %v3319_v45 = vadd.f32 %v3240_v62, %v8617_v30  ;;  %v8752_v25 = vadd.f32 %v6569_v14, %v3321_v3 }
 0x1d8   : > { %v6536_v58 = vpop.f32.mrf.mxu0  ;;  %v6574_v28 = vpop.f32.mrf.mxu1 }
 0x1d9   : > { %v3322_v13 = vadd.f32 %v6536_v58, %v8620_v53  ;;  %v8755_v50 = vadd.f32 %v3710_v57, %v3319_v45 }
 0x1da   : > { %v3243_v21 = vpop.f32.mrf.mxu0  ;;  %v8762_v48 = vpop.f32.mrf.mxu1 }
 0x1db   : > { %v8758_v23 = vadd.f32 %v3243_v21, %v8626_v38  ;;  %v8760_v15 = vadd.f32 %v6570_v39, %v3322_v13  ;;  %9314 = vst [vmem:[#allocation5_spill] sm:$0xff] %v8762_v48 }
 0x1dc   : > { %v6539_v27 = vpop.f32.mrf.mxu0  ;;  %v6577_v19 = vpop.f32.mrf.mxu1 }
 0x1dd   : > { %v3325_v30 = vadd.f32 %v6539_v27, %v8637_v11 }
 0x1de   : > { %v3256_v2 = vpop.f32.mrf.mxu0  ;;  %v3742_v33 = vpop.f32.mrf.mxu1 }
 0x1df   : > { %v3323_v14 = vadd.f32 %v3256_v2, %v8643_v18  ;;  %v8766_v37 = vadd.f32 %v6573_v5, %v3325_v30 }
 0x1e0   : > { %v6540_v53 = vpop.f32.mrf.mxu0  ;;  %v6578_v12 = vpop.f32.mrf.mxu1 }
 0x1e1   : > { %v3326_v57 = vadd.f32 %v6540_v53, %v8645_v0  ;;  %v8769_v36 = vadd.f32 %v3726_v6, %v3323_v14 }
 0x1e2   : > { %v3259_v38 = vpop.f32.mrf.mxu0  ;;  %v8776_v40 = vpop.f32.mrf.mxu1 }
 0x1e3   : > { %v8772_v43 = vadd.f32 %v3259_v38, %v8649_v60  ;;  %v8774_v39 = vadd.f32 %v6574_v28, %v3326_v57  ;;  %9316 = vst [vmem:[#allocation15_spill] sm:$0xff] %v8776_v40 }
 0x1e4   : > { %v6543_v11 = vpop.f32.mrf.mxu0  ;;  %v6581_v62 = vpop.f32.mrf.mxu1 }
 0x1e5   : > { %9315 = vst [vmem:[#allocation6_spill] sm:$0xff] %v8772_v43  ;;  %v3329_v18 = vadd.f32 %v6543_v11, %v8657_v47 }
 0x1e6   : > { %v3272_v3 = vpop.f32.mrf.mxu0  ;;  %v3758_v58 = vpop.f32.mrf.mxu1 }
 0x1e7   : > { %v3327_v5 = vadd.f32 %v3272_v3, %v8662_v1  ;;  %v8780_v45 = vadd.f32 %v6577_v19, %v3329_v18 }
 0x1e8   : > { %v6544_v0 = vpop.f32.mrf.mxu0  ;;  %v6582_v21 = vpop.f32.mrf.mxu1 }
 0x1e9   : > { %v3330_v6 = vadd.f32 %v6544_v0, %v8664_v54  ;;  %v8783_v13 = vadd.f32 %v3742_v33, %v3327_v5 }
 0x1ea   : > { %v3275_v60 = vpop.f32.mrf.mxu0  ;;  %v8791_v2 = vpop.f32.mrf.mxu1 }
 0x1eb   : > { %v8786_v28 = vadd.f32 %v3275_v60, %v8668_v7  ;;  %v8788_v27 = vadd.f32 %v6578_v12, %v3330_v6  ;;  %9318 = vst [vmem:[#allocation7_spill] sm:$0xff] %v8791_v2 }
 0x1ec   : > { %v6547_v47 = vpop.f32.mrf.mxu0 }
 0x1ed   : > { %9317 = vst [vmem:[#allocation18_spill] sm:$0xff] %v8786_v28  ;;  %v3333_v30 = vadd.f32 %v6547_v47, %v8671_v8 }
 0x1ee   : > { %v3288_v1 = vpop.f32.mrf.mxu0 }
 0x1ef   : > { %v3331_v19 = vadd.f32 %v3288_v1, %v8676_v9  ;;  %v8794_v14 = vadd.f32 %v6581_v62, %v3333_v30  ;;  %v8799_v57 = vpop.f32.mrf.mxu1 }
 0x1f0   : > { %v6548_v54 = vpop.f32.mrf.mxu0 }
 0x1f1   : > { %v3334_v53 = vadd.f32 %v6548_v54, %v8682_v20  ;;  %v8797_v33 = vadd.f32 %v3758_v58, %v3331_v19  ;;  %v8809_v9 = vpop.f32.mrf.mxu1 }
 0x1f2   : > { %v3291_v7 = vpop.f32.mrf.mxu0 }
 0x1f3   : > { %v8802_v38 = vadd.f32 %v3291_v7, %v8687_v26  ;;  %v8804_v12 = vadd.f32 %v6582_v21, %v3334_v53  ;;  %v8816_v62 = vpop.f32.mrf.mxu1 }
 0x1f4   : > { %v6587_v8 = vpop.f32.mrf.mxu0 }
 0x1f5   : > { %9319 = vst [vmem:[#allocation19_spill] sm:$0xff] %v8802_v38  ;;  %v8807_v11 = vadd.f32 %v6587_v8, %v8691_v55  ;;  %v8823_v58 = vpop.f32.mrf.mxu1 }
 0x1f6   : > { %v4005_v18 = vpop.f32.mrf.mxu0 }
 0x1f7   : > { %v8812_v3 = vadd.f32 %v4005_v18, %v8697_v31 }
 0x1f8   : > { %v8814_v20 = vpop.f32.mrf.mxu0 }
 0x1f9   : > { %v8830_v31 = vpop.f32.mrf.mxu1 }
 0x1fa   : > { %v8818_v5 = vpop.f32.mrf.mxu0 }
 0x1fb   : > { %v8834_v30 = vpop.f32.mrf.mxu1 }
 0x1fc   : > { %v6591_v26 = vpop.f32.mrf.mxu0 }
 0x1fd   : > { %v8821_v0 = vadd.f32 %v6591_v26, %v8707_v52  ;;  %v8842_v53 = vpop.f32.mrf.mxu1 }
 0x1fe   : > { %v4021_v55 = vpop.f32.mrf.mxu0 }
 0x1ff   : > { %v8826_v6 = vadd.f32 %v4021_v55, %v8714_v10  ;;  %v8849_v18 = vpop.f32.mrf.mxu1 }
 0x200   : > { %v8828_v60 = vpop.f32.mrf.mxu0 }
 0x202   : > { %v8832_v21 = vpop.f32.mrf.mxu0 }
 0x204   : > { %v6595_v47 = vpop.f32.mrf.mxu0 }
 0x205   : > { %v8837_v1 = vadd.f32 %v6595_v47, %v8722_v46  ;;  %v8857_v47 = vpop.f32.mrf.mxu1 }
 0x206   : > { %v4037_v52 = vpop.f32.mrf.mxu0 }
 0x207   : > { %v8840_v19 = vadd.f32 %v4037_v52, %v8727_v61  ;;  %v8864_v2 = vpop.f32.mrf.mxu1 }
 0x208   : > { %v6596_v54 = vpop.f32.mrf.mxu0 }
 0x209   : > { %v8845_v10 = vadd.f32 %v6596_v54, %v8731_v16 }
 0x20a   : > { %v8847_v7 = vpop.f32.mrf.mxu0 }
 0x20c   : > { %v6599_v8 = vpop.f32.mrf.mxu0 }
 0x20d   : > { %v8852_v26 = vadd.f32 %v6599_v8, %v8737_v51 }
 0x20e   : > { %v4053_v46 = vpop.f32.mrf.mxu0 }
 0x20f   : > { %v8855_v55 = vadd.f32 %v4053_v46, %v8742_v59  ;;  %v8872_v46 = vpop.f32.mrf.mxu1 }
 0x210   : > { %v6600_v61 = vpop.f32.mrf.mxu0 }
 0x211   : > { %v8860_v52 = vadd.f32 %v6600_v61, %v8746_v44  ;;  %v8879_v28 = vpop.f32.mrf.mxu1 }
 0x212   : > { %v8862_v16 = vpop.f32.mrf.mxu0 }
 0x214   : > { %v6603_v54 = vpop.f32.mrf.mxu0 }
 0x215   : > { %v8867_v38 = vadd.f32 %v6603_v54, %v8752_v25 }
 0x216   : > { %v4069_v51 = vpop.f32.mrf.mxu0 }
 0x217   : > { %v8870_v8 = vadd.f32 %v4069_v51, %v8755_v50  ;;  %v8887_v51 = vpop.f32.mrf.mxu1 }
 0x218   : > { %v6604_v59 = vpop.f32.mrf.mxu0 }
 0x219   : > { %v8875_v40 = vadd.f32 %v6604_v59, %v8760_v15 }
 0x21a   : > { %v8877_v44 = vpop.f32.mrf.mxu0 }
 0x21b   : > { %9320 = vst [vmem:[#allocation24_spill] sm:$0xff] %v8875_v40  ;;  %9321 = vst [vmem:[#allocation8_spill] sm:$0xff] %v8877_v44  ;;  %v8894_v40 = vpop.f32.mrf.mxu1 }
 0x21c   : > { %v6607_v61 = vpop.f32.mrf.mxu0 }
 0x21d   : > { %v8882_v48 = vadd.f32 %v6607_v61, %v8766_v37 }
 0x21e   : > { %v4085_v25 = vpop.f32.mrf.mxu0 }
 0x21f   : > { %v8885_v54 = vadd.f32 %v4085_v25, %v8769_v36  ;;  %v8902_v25 = vpop.f32.mrf.mxu1 }
 0x220   : > { %v6608_v50 = vpop.f32.mrf.mxu0 }
 0x221   : > { %9322 = vst [vmem:[#allocation21_spill] sm:$0xff] %v8885_v54  ;;  %v8890_v43 = vadd.f32 %v6608_v50, %v8774_v39 }
 0x222   : > { %v8892_v15 = vpop.f32.mrf.mxu0 }
 0x223   : > { %9323 = vst [vmem:[#allocation9_spill] sm:$0xff] %v8890_v43  ;;  %9324 = vst [vmem:[#allocation25_spill] sm:$0xff] %v8892_v15  ;;  %v8909_v43 = vpop.f32.mrf.mxu1 }
 0x224   : > { %v6611_v59 = vpop.f32.mrf.mxu0 }
 0x225   : > { %v8897_v44 = vadd.f32 %v6611_v59, %v8780_v45 }
 0x226   : > { %v4101_v37 = vpop.f32.mrf.mxu0 }
 0x227   : > { %v8900_v61 = vadd.f32 %v4101_v37, %v8783_v13  ;;  %v3776_v37 = vadd.f32 %v8678_v22, %v8695_v34  ;;  %v8934_v22 = vld [vmem:[%s9219_s2] ss:$0 sm:$0xff]  ;;  %v4858_v34 = vadd.f32 %v8809_v9, %v8812_v3 }
 0x228   : > { %v6612_v36 = vpop.f32.mrf.mxu0 }
 0x229   : > { %9325 = vst [vmem:[#allocation10_spill] sm:$0xff] %v8900_v61  ;;  %v8905_v54 = vadd.f32 %v6612_v36, %v8788_v27  ;;  %v8919_v61 = vpop.f32.mrf.mxu1 }
 0x22a   : > { %v8907_v39 = vpop.f32.mrf.mxu0 }
 0x22b   : > { %9326 = vst [vmem:[#allocation11_spill] sm:$0xff] %v8905_v54  ;;  %v3774_v54 = vadd.f32 %v8684_v49, %v8701_v41 }
 0x22c   : > { %v6615_v50 = vpop.f32.mrf.mxu0 }
 0x22d   : > { %v8912_v15 = vadd.f32 %v6615_v50, %v8794_v14  ;;  %v4860_v14 = vadd.f32 %v8799_v57, %v8807_v11 }
 0x22e   : > { %v4117_v45 = vpop.f32.mrf.mxu0 }
 0x22f   : > { %v8915_v59 = vadd.f32 %v4117_v45, %v8797_v33  ;;  %v4135_v33 = vadd.f32 %v8814_v20, %v3776_v37  ;;  %v8939_v45 = vpop.f32.mrf.mxu1  ;;  %v8946_v20 = vld [vmem:[%s9220_s3] ss:$0 sm:$0xff] }
 0x230   : > { %v6616_v13 = vpop.f32.mrf.mxu0 }
 0x231   : > { %v8922_v27 = vadd.f32 %v6616_v13, %v8804_v12  ;;  %v4133_v12 = vadd.f32 %v8818_v5, %v3774_v54  ;;  %v4861_v41 = vadd.f32 %v8816_v62, %v4135_v33  ;;  %v8949_v9 = vpop.f32.mrf.mxu1  ;;  %v3780_v54 = vadd.f32 %v8699_v29, %v8712_v56 }
 0x232   : > { %v8924_v36 = vpop.f32.mrf.mxu0  ;;  %v3778_v62 = vadd.f32 %v8703_v42, %v8716_v24  ;;  %v4864_v33 = vadd.f32 %v8830_v31, %v8821_v0 }
 0x233   : > { %9327 = vst [vmem:[#allocation26_spill] sm:$0xff] %v8922_v27  ;;  %v4859_v27 = vadd.f32 %v8823_v58, %v4133_v12  ;;  %v4139_v12 = vadd.f32 %v8828_v60, %v3780_v54  ;;  %v8964_v56 = vpop.f32.mrf.mxu1 }
 0x234   : > { %v6655_v50 = vpop.f32.mrf.mxu0 }
 0x235   : > { %v5330_v13 = vadd.f32 %v6655_v50, %v4860_v14 }
 0x236   : > { %v5201_v49 = vpop.f32.mrf.mxu0 }
 0x237   : > { %v5369_v57 = vmul.f32 %v8934_v22, %v5330_v13  ;;  %v5328_v11 = vadd.f32 %v5201_v49, %v4858_v34  ;;  %v4862_v13 = vadd.f32 %v8834_v30, %v8826_v6  ;;  %v4137_v49 = vadd.f32 %v8832_v21, %v3778_v62 }
 0x238   : > { %v6656_v37 = vpop.f32.mrf.mxu0  ;;  %v4865_v6 = vadd.f32 %v8842_v53, %v4139_v12  ;;  %v3782_v53 = vadd.f32 %v8718_v35, %v8729_v32 }
 0x239   : > { %v5367_v3 = vmul.f32 %v8934_v22, %v5328_v11  ;;  %v5331_v5 = vadd.f32 %v6656_v37, %v4861_v41  ;;  %v5408_v50 = vadd.f32 %v8946_v20, %v5369_v57  ;;  %v4863_v21 = vadd.f32 %v8849_v18, %v4137_v49 }
 0x23a   : > { %v5204_v14 = vpop.f32.mrf.mxu0 }
 0x23b   : > { %v5370_v34 = vmul.f32 %v8934_v22, %v5331_v5  ;;  %v5329_v58 = vadd.f32 %v5204_v14, %v4859_v27  ;;  %v5406_v42 = vadd.f32 %v8946_v20, %v5367_v3  ;;  %v5440_v57 = vmax.f32 %v5408_v50, 0.0  ;;  %v8973_v5 = vpop.f32.mrf.mxu1 }
 0x23c   : > { %v6659_v29 = vpop.f32.mrf.mxu0 }
 0x23d   : > { %v5409_v24 = vadd.f32 %v8946_v20, %v5370_v34  ;;  %v5368_v0 = vmul.f32 %v8934_v22, %v5329_v58  ;;  %v5334_v31 = vadd.f32 %v6659_v29, %v4864_v33  ;;  %v5438_v3 = vmax.f32 %v5406_v42, 0.0  ;;  %v8984_v42 = vpop.f32.mrf.mxu1 }
 0x23e   : > { %v5217_v41 = vpop.f32.mrf.mxu0  ;;  %v4868_v34 = vadd.f32 %v8857_v47, %v8837_v1  ;;  %v4866_v29 = vadd.f32 %v8864_v2, %v8840_v19  ;;  %v4141_v47 = vadd.f32 %v8847_v7, %v3782_v53 }
 0x23f   : > { %v5441_v27 = vmax.f32 %v5409_v24, 0.0  ;;  %v5407_v60 = vadd.f32 %v8946_v20, %v5368_v0  ;;  %v5332_v11 = vadd.f32 %v5217_v41, %v4862_v13  ;;  %v5373_v30 = vmul.f32 %v8934_v22, %v5334_v31 }
 0x240   : > { %v6660_v37 = vpop.f32.mrf.mxu0  ;;  %v4869_v31 = vadd.f32 %v8872_v46, %v8845_v10 }
 0x241   : > { %v5471_v54 = vpack.c.bf16 %v5441_v27, %v5440_v57  ;;  %v5439_v62 = vmax.f32 %v5407_v60, 0.0  ;;  %v5371_v14 = vmul.f32 %v8934_v22, %v5332_v11  ;;  %v5335_v33 = vadd.f32 %v6660_v37, %v4865_v6  ;;  %v8996_v11 = vpop.f32.mrf.mxu1 }
 0x242   : > { %v5220_v50 = vpop.f32.mrf.mxu0  ;;  %v5412_v18 = vadd.f32 %v8946_v20, %v5373_v30  ;;  %v3786_v30 = vadd.f32 %v8733_v4, %v8744_v17  ;;  %v4867_v37 = vadd.f32 %v8879_v28, %v4141_v47  ;;  %v3790_v47 = vadd.f32 %v8748_v63, %v8758_v23 }
 0x243   : > { %v5470_v58 = vpack.c.bf16 %v5439_v62, %v5438_v3  ;;  %v5333_v13 = vadd.f32 %v5220_v50, %v4863_v21  ;;  %v5374_v12 = vmul.f32 %v8934_v22, %v5335_v33  ;;  %v5410_v24 = vadd.f32 %v8946_v20, %v5371_v14  ;;  %v9009_v17 = vpop.f32.mrf.mxu1 }
 0x244   : > { %v6663_v49 = vpop.f32.mrf.mxu0  ;;  %v5444_v57 = vmax.f32 %v5412_v18, 0.0  ;;  %v4145_v4 = vadd.f32 %v8862_v16, %v3786_v30 }
 0x245   : > { %v5372_v0 = vmul.f32 %v8934_v22, %v5333_v13  ;;  %v5338_v1 = vadd.f32 %v6663_v49, %v4868_v34  ;;  %6687 = vmatprep.mubr.msk.bf16.mxu1 %vm1288_vm5, %v5470_v58  ;;  %v5413_v35 = vadd.f32 %v8946_v20, %v5374_v12  ;;  %v5442_v6 = vmax.f32 %v5410_v24, 0.0 }
 0x246   : > { %v5233_v32 = vpop.f32.mrf.mxu0  ;;  %6688 = vmatmul.mubr.msk.bf16.vlgmr.msra.gmra.mxu1 %vm1288_vm5, %v5471_v54  ;;  %v4872_v54 = vadd.f32 %v8887_v51, %v8852_v26  ;;  %v4870_v58 = vadd.f32 %v8894_v40, %v8855_v55  ;;  %v4873_v26 = vadd.f32 %v8902_v25, %v8860_v52  ;;  %v4871_v24 = vadd.f32 %v8909_v43, %v4145_v4 }
 0x247   : > { %v5411_v2 = vadd.f32 %v8946_v20, %v5372_v0  ;;  %v5377_v19 = vmul.f32 %v8934_v22, %v5338_v1  ;;  %v5336_v41 = vadd.f32 %v5233_v32, %v4866_v29  ;;  %v5445_v27 = vmax.f32 %v5413_v35, 0.0  ;;  %v9021_v0 = vpop.f32.mrf.mxu1 }
 0x248   : > { %v6664_v60 = vpop.f32.mrf.mxu0 }
 0x249   : > { %v5443_v7 = vmax.f32 %v5411_v2, 0.0  ;;  %v5339_v21 = vadd.f32 %v6664_v60, %v4869_v31  ;;  %v5473_v3 = vpack.c.bf16 %v5445_v27, %v5444_v57  ;;  %v5375_v10 = vmul.f32 %v8934_v22, %v5336_v41  ;;  %v9328_v27 = vld [vmem:[#allocation8_spill] sm:$0xff] }
 0x24a   : > { %v5236_v46 = vpop.f32.mrf.mxu0  ;;  %v5416_v14 = vadd.f32 %v8946_v20, %v5377_v19  ;;  %v4876_v2 = vadd.f32 %v8919_v61, %v8867_v38  ;;  %v4874_v57 = vadd.f32 %v8939_v45, %v8870_v8  ;;  %v4149_v60 = vadd.f32 %v9328_v27, %v3790_v47  ;;  %v9329_v45 = vld [vmem:[#allocation24_spill] sm:$0xff] }
 0x24b   : > { %v5472_v62 = vpack.c.bf16 %v5443_v7, %v5442_v6  ;;  %v5378_v33 = vmul.f32 %v8934_v22, %v5339_v21  ;;  %v5337_v50 = vadd.f32 %v5236_v46, %v4867_v37  ;;  %v5414_v51 = vadd.f32 %v8946_v20, %v5375_v10  ;;  %v4827_v21 = vpop.f32.mrf.mxu1 }
 0x24c   : > { %v6667_v34 = vpop.f32.mrf.mxu0  ;;  %v5448_v40 = vmax.f32 %v5416_v14, 0.0  ;;  %v4877_v46 = vadd.f32 %v8949_v9, %v9329_v45  ;;  %v9331_v9 = vld [vmem:[#allocation5_spill] sm:$0xff] }
 0x24d   : > { %v5417_v28 = vadd.f32 %v8946_v20, %v5378_v33  ;;  %v5342_v13 = vadd.f32 %v6667_v34, %v4872_v54  ;;  %6691 = vmatprep.mubr.msk.bf16.mxu1 %vm1288_vm5, %v5472_v62  ;;  %v5376_v53 = vmul.f32 %v8934_v22, %v5337_v50  ;;  %v5446_v35 = vmax.f32 %v5414_v51, 0.0  ;;  %v6646_v33 = vpop.f32.mrf.mxu1 }
 0x24e   : > { %v5249_v18 = vpop.f32.mrf.mxu0  ;;  %6692 = vmatmul.mubr.msk.bf16.gmra.mxu1 %vm1288_vm5, %v5473_v3  ;;  %v4875_v54 = vadd.f32 %v8964_v56, %v4149_v60 }
 0x24f   : > { %v5449_v55 = vmax.f32 %v5417_v28, 0.0  ;;  %v5381_v16 = vmul.f32 %v8934_v22, %v5342_v13  ;;  %v5340_v12 = vadd.f32 %v5249_v18, %v4870_v58  ;;  %v5415_v49 = vadd.f32 %v8946_v20, %v5376_v53  ;;  %v9330_v18 = vld [vmem:[#allocation6_spill] sm:$0xff] }
 0x250   : > { %v6668_v29 = vpop.f32.mrf.mxu0 }
 0x251   : > { %v5475_v52 = vpack.c.bf16 %v5449_v55, %v5448_v40  ;;  %v5379_v25 = vmul.f32 %v8934_v22, %v5340_v12  ;;  %v5343_v1 = vadd.f32 %v6668_v29, %v4873_v26  ;;  %v5447_v32 = vmax.f32 %v5415_v49, 0.0  ;;  %v9332_v12 = vld [vmem:[#allocation21_spill] sm:$0xff]  ;;  %v4830_v29 = vpop.f32.mrf.mxu1 }
 0x252   : > { %v5252_v31 = vpop.f32.mrf.mxu0  ;;  %v5420_v19 = vadd.f32 %v8946_v20, %v5381_v16  ;;  %v4880_v26 = vadd.f32 %v8973_v5, %v8882_v48  ;;  %v3794_v40 = vadd.f32 %v9331_v9, %v9330_v18  ;;  %v4878_v49 = vadd.f32 %v8984_v42, %v9332_v12  ;;  %v9333_v48 = vld [vmem:[#allocation25_spill] sm:$0xff] }
 0x253   : > { %v5382_v41 = vmul.f32 %v8934_v22, %v5343_v1  ;;  %v5341_v43 = vadd.f32 %v5252_v31, %v4871_v24  ;;  %v5474_v6 = vpack.c.bf16 %v5447_v32, %v5446_v35  ;;  %v5418_v63 = vadd.f32 %v8946_v20, %v5379_v25  ;;  %v9334_v35 = vld [vmem:[#allocation9_spill] sm:$0xff] }
 0x254   : > { %v6671_v7 = vpop.f32.mrf.mxu0  ;;  %v5452_v37 = vmax.f32 %v5420_v19, 0.0  ;;  %v4153_v5 = vadd.f32 %v9333_v48, %v3794_v40  ;;  %v4881_v32 = vadd.f32 %v8996_v11, %v9334_v35 }
 0x255   : > { %v5421_v23 = vadd.f32 %v8946_v20, %v5382_v41  ;;  %v5380_v30 = vmul.f32 %v8934_v22, %v5341_v43  ;;  %v5346_v38 = vadd.f32 %v6671_v7, %v4876_v2  ;;  %6695 = vmatprep.mubr.msk.bf16.mxu1 %vm1288_vm5, %v5474_v6  ;;  %v5450_v50 = vmax.f32 %v5418_v63, 0.0  ;;  %v9335_v7 = vld [vmem:[#allocation18_spill] sm:$0xff]  ;;  %v9336_v63 = vld [vmem:[#allocation15_spill] sm:$0xff] }
 0x256   : > { %v5265_v61 = vpop.f32.mrf.mxu0  ;;  %6696 = vmatmul.mubr.msk.bf16.gmra.mxu1 %vm1288_vm5, %v5475_v52 }
 0x257   : > { %v5453_v3 = vmax.f32 %v5421_v23, 0.0  ;;  %v5419_v10 = vadd.f32 %v8946_v20, %v5380_v30  ;;  %v5344_v8 = vadd.f32 %v5265_v61, %v4874_v57  ;;  %v5385_v62 = vmul.f32 %v8934_v22, %v5346_v38  ;;  %v6649_v57 = vpop.f32.mrf.mxu1 }
 0x258   : > { %v6672_v14 = vpop.f32.mrf.mxu0  ;;  %v3798_v23 = vadd.f32 %v9336_v63, %v9335_v7  ;;  %v4879_v30 = vadd.f32 %v9009_v17, %v4153_v5 }
 0x259   : > { %v5477_v34 = vpack.c.bf16 %v5453_v3, %v5452_v37  ;;  %v5451_v58 = vmax.f32 %v5419_v10, 0.0  ;;  %v5383_v4 = vmul.f32 %v8934_v22, %v5344_v8  ;;  %v5347_v28 = vadd.f32 %v6672_v14, %v4877_v46 }
 0x25a   : > { %v5268_v13 = vpop.f32.mrf.mxu0  ;;  %v5424_v56 = vadd.f32 %v8946_v20, %v5385_v62  ;;  %v4884_v37 = vadd.f32 %v9021_v0, %v8897_v44  ;;  %v4157_v14 = vadd.f32 %v8907_v39, %v3798_v23 }
 0x25b   : > { %v5476_v51 = vpack.c.bf16 %v5451_v58, %v5450_v50  ;;  %v5345_v53 = vadd.f32 %v5268_v13, %v4875_v54  ;;  %v5386_v55 = vmul.f32 %v8934_v22, %v5347_v28  ;;  %v5422_v24 = vadd.f32 %v8946_v20, %v5383_v4  ;;  %v9337_v54 = vld [vmem:[#allocation10_spill] sm:$0xff]  ;;  %v4843_v50 = vpop.f32.mrf.mxu1  ;;  %v9338_v58 = vld [vmem:[#allocation11_spill] sm:$0xff] }
 0x25c   : > { %v6675_v16 = vpop.f32.mrf.mxu0  ;;  %v5456_v19 = vmax.f32 %v5424_v56, 0.0  ;;  %v4882_v62 = vadd.f32 %v4827_v21, %v9337_v54  ;;  %v4885_v4 = vadd.f32 %v6646_v33, %v9338_v58  ;;  %v4883_v18 = vadd.f32 %v4830_v29, %v4157_v14 }
 0x25d   : > { %v5384_v52 = vmul.f32 %v8934_v22, %v5345_v53  ;;  %v5350_v25 = vadd.f32 %v6675_v16, %v4880_v26  ;;  %6699 = vmatprep.mubr.msk.bf16.mxu1 %vm1288_vm5, %v5476_v51  ;;  %v5425_v1 = vadd.f32 %v8946_v20, %v5386_v55  ;;  %v5454_v27 = vmax.f32 %v5422_v24, 0.0  ;;  %v6650_v9 = vpop.f32.mrf.mxu1  ;;  %v9339_v55 = vld [vmem:[#allocation19_spill] sm:$0xff] }
 0x25e   : > { %v5281_v47 = vpop.f32.mrf.mxu0  ;;  %6700 = vmatmul.mubr.msk.bf16.gmra.mxu1 %vm1288_vm5, %v5477_v34  ;;  %v9340_v16 = vld [vmem:[#allocation7_spill] sm:$0xff]  ;;  %v4886_v29 = vadd.f32 %v4843_v50, %v8915_v59 }
 0x25f   : > { %v5423_v31 = vadd.f32 %v8946_v20, %v5384_v52  ;;  %v5389_v42 = vmul.f32 %v8934_v22, %v5350_v25  ;;  %v5348_v2 = vadd.f32 %v5281_v47, %v4878_v49  ;;  %v5457_v41 = vmax.f32 %v5425_v1, 0.0 }
 0x260   : > { %v6676_v43 = vpop.f32.mrf.mxu0  ;;  %v3802_v12 = vadd.f32 %v9340_v16, %v9339_v55  ;;  %v4888_v25 = vadd.f32 %v6649_v57, %v8912_v15 }
 0x261   : > { %v5455_v60 = vmax.f32 %v5423_v31, 0.0  ;;  %v5351_v6 = vadd.f32 %v6676_v43, %v4881_v32  ;;  %v5479_v11 = vpack.c.bf16 %v5457_v41, %v5456_v19  ;;  %v5387_v38 = vmul.f32 %v8934_v22, %v5348_v2  ;;  %v4846_v31 = vpop.f32.mrf.mxu1 }
 0x262   : > { %v5284_v61 = vpop.f32.mrf.mxu0  ;;  %v5428_v10 = vadd.f32 %v8946_v20, %v5389_v42  ;;  %v4161_v47 = vadd.f32 %v8924_v36, %v3802_v12  ;;  %v9341_v36 = vld [vmem:[#allocation26_spill] sm:$0xff]  ;;  %v5494_v12 = vld [vmem:[%s9111_s10 + $0x38] sm:$0xff] }
 0x263   : > { %v5478_v3 = vpack.c.bf16 %v5455_v60, %v5454_v27  ;;  %v5390_v8 = vmul.f32 %v8934_v22, %v5351_v6  ;;  %v5349_v45 = vadd.f32 %v5284_v61, %v4879_v30  ;;  %v5426_v44 = vadd.f32 %v8946_v20, %v5387_v38 }
 0x264   : > { %v6679_v46 = vpop.f32.mrf.mxu0  ;;  %v5460_v13 = vmax.f32 %v5428_v10, 0.0  ;;  %v4889_v60 = vadd.f32 %v6650_v9, %v9341_v36  ;;  %v4887_v6 = vadd.f32 %v4846_v31, %v4161_v47  ;;  %v5493_v9 = vld [vmem:[%s9111_s10 + $0x30] sm:$0xff]  ;;  %v5495_v47 = vld [vmem:[%s9111_s10 + $0x40] sm:$0xff]  ;;  %v5498_v31 = vld [vmem:[%s9111_s10 + $0x58] sm:$0xff] }
 0x265   : > { %v5429_v17 = vadd.f32 %v8946_v20, %v5390_v8  ;;  %v5354_v34 = vadd.f32 %v6679_v46, %v4884_v37  ;;  %6703 = vmatprep.mubr.msk.bf16.mxu1 %vm1288_vm5, %v5478_v3  ;;  %v5388_v0 = vmul.f32 %v8934_v22, %v5349_v45  ;;  %v5458_v49 = vmax.f32 %v5426_v44, 0.0 }
 0x266   : > { %v5297_v28 = vpop.f32.mrf.mxu0  ;;  %6704 = vmatmul.mubr.msk.bf16.gmra.mxu1 %vm1288_vm5, %v5479_v11 }
 0x267   : > { %v5461_v26 = vmax.f32 %v5429_v17, 0.0  ;;  %v5393_v51 = vmul.f32 %v8934_v22, %v5354_v34  ;;  %v5352_v21 = vadd.f32 %v5297_v28, %v4882_v62  ;;  %v5427_v39 = vadd.f32 %v8946_v20, %v5388_v0  ;;  %v5487_v0 = vld [vmem:[%s9111_s10] sm:$0xff] }
 0x268   : > { %v6680_v53 = vpop.f32.mrf.mxu0 }
 0x269   : > { %v5481_v40 = vpack.c.bf16 %v5461_v26, %v5460_v13  ;;  %v5391_v33 = vmul.f32 %v8934_v22, %v5352_v21  ;;  %v5355_v56 = vadd.f32 %v6680_v53, %v4885_v4  ;;  %v5459_v24 = vmax.f32 %v5427_v39, 0.0  ;;  %v5490_v26 = vld [vmem:[%s9111_s10 + $0x18] sm:$0xff]  ;;  %v5488_v39 = vld [vmem:[%s9111_s10 + $0x8] sm:$0xff] }
 0x26a   : > { %v5300_v52 = vpop.f32.mrf.mxu0  ;;  %v5432_v48 = vadd.f32 %v8946_v20, %v5393_v51 }
 0x26b   : > { %v5394_v5 = vmul.f32 %v8934_v22, %v5355_v56  ;;  %v5353_v1 = vadd.f32 %v5300_v52, %v4883_v18  ;;  %v5480_v35 = vpack.c.bf16 %v5459_v24, %v5458_v49  ;;  %v5430_v42 = vadd.f32 %v8946_v20, %v5391_v33  ;;  %v5491_v56 = vld [vmem:[%s9111_s10 + $0x20] sm:$0xff]  ;;  %v5492_v52 = vld [vmem:[%s9111_s10 + $0x28] sm:$0xff] }
 0x26c   : > { %v6683_v32 = vpop.f32.mrf.mxu0  ;;  %v5464_v43 = vmax.f32 %v5432_v48, 0.0 }
 0x26d   : > { %v5433_v2 = vadd.f32 %v8946_v20, %v5394_v5  ;;  %v5392_v19 = vmul.f32 %v8934_v22, %v5353_v1  ;;  %v5358_v41 = vadd.f32 %v6683_v32, %v4888_v25  ;;  %6707 = vmatprep.mubr.msk.bf16.mxu1 %vm1288_vm5, %v5480_v35  ;;  %v5462_v23 = vmax.f32 %v5430_v42, 0.0  ;;  %v5497_v1 = vld [vmem:[%s9111_s10 + $0x50] sm:$0xff] }
 0x26e   : > { %v5313_v15 = vpop.f32.mrf.mxu0  ;;  %6708 = vmatmul.mubr.msk.bf16.gmra.mxu1 %vm1288_vm5, %v5481_v40 }
 0x26f   : > { %v5465_v57 = vmax.f32 %v5433_v2, 0.0  ;;  %v5431_v27 = vadd.f32 %v8946_v20, %v5392_v19  ;;  %v5356_v59 = vadd.f32 %v5313_v15, %v4886_v29  ;;  %v5397_v7 = vmul.f32 %v8934_v22, %v5358_v41  ;;  %v5496_v19 = vld [vmem:[%s9111_s10 + $0x48] sm:$0xff] }
 0x270   : > { %v6684_v63 = vpop.f32.mrf.mxu0 }
 0x271   : > { %v5483_v30 = vpack.c.bf16 %v5465_v57, %v5464_v43  ;;  %v5463_v11 = vmax.f32 %v5431_v27, 0.0  ;;  %v5395_v38 = vmul.f32 %v8934_v22, %v5356_v59  ;;  %v5359_v61 = vadd.f32 %v6684_v63, %v4889_v60  ;;  %v5501_v43 = vld [vmem:[%s9111_s10 + $0x70] sm:$0xff]  ;;  %v5499_v59 = vld [vmem:[%s9111_s10 + $0x60] sm:$0xff] }
 0x272   : > { %v5316_v37 = vpop.f32.mrf.mxu0  ;;  %v5436_v8 = vadd.f32 %v8946_v20, %v5397_v7 }
 0x273   : > { %v5482_v3 = vpack.c.bf16 %v5463_v11, %v5462_v23  ;;  %v5357_v10 = vadd.f32 %v5316_v37, %v4887_v6  ;;  %v5398_v45 = vmul.f32 %v8934_v22, %v5359_v61  ;;  %v5434_v46 = vadd.f32 %v8946_v20, %v5395_v38  ;;  %v5502_v6 = vld [vmem:[%s9111_s10 + $0x78] sm:$0xff]  ;;  %v5500_v23 = vld [vmem:[%s9111_s10 + $0x68] sm:$0xff]  ;;  %v5505_v38 = vld [vmem:[%s9111_s10 + $0x90] sm:$0xff] }
 0x274   : > { %v5468_v50 = vmax.f32 %v5436_v8, 0.0 }
 0x275   : > { %v5396_v54 = vmul.f32 %v8934_v22, %v5357_v10  ;;  %6711 = vmatprep.mubr.msk.bf16.mxu1 %vm1288_vm5, %v5482_v3  ;;  %v5437_v62 = vadd.f32 %v8946_v20, %v5398_v45  ;;  %v5466_v34 = vmax.f32 %v5434_v46, 0.0  ;;  %v5489_v22 = vld [vmem:[%s9111_s10 + $0x10] sm:$0xff]  ;;  %v5503_v3 = vld [vmem:[%s9111_s10 + $0x80] sm:$0xff]  ;;  %v5506_v45 = vld [vmem:[%s9111_s10 + $0x98] sm:$0xff] }
 0x276   : > { %6712 = vmatmul.mubr.msk.bf16.gmra.mxu1 %vm1288_vm5, %v5483_v30 }
 0x277   : > { %v5435_v14 = vadd.f32 %v8946_v20, %v5396_v54  ;;  %v5469_v17 = vmax.f32 %v5437_v62, 0.0  ;;  %v5504_v62 = vld [vmem:[%s9111_s10 + $0x88] sm:$0xff] }
 0x279   : > { %v5467_v58 = vmax.f32 %v5435_v14, 0.0  ;;  %v5485_v4 = vpack.c.bf16 %v5469_v17, %v5468_v50  ;;  %v5509_v17 = vld [vmem:[%s9111_s10 + $0xb0] sm:$0xff] }
 0x27b   : > { %v5484_v44 = vpack.c.bf16 %v5467_v58, %v5466_v34 }
 0x27d   : > { %6715 = vmatprep.mubr.msk.bf16.mxu1 %vm1288_vm5, %v5484_v44 }
 0x27e   : > { %6716 = vmatmul.mubr.msk.bf16.gmra.mxu1 %vm1288_vm5, %v5485_v4  ;;  %v5507_v4 = vld [vmem:[%s9111_s10 + $0xa0] sm:$0xff] }
 0x306   : > { %v6689_v20 = vpop.f32.mrf.mxu1 }
 0x307   : > { %v5613_v28 = vadd.f32 %v6689_v20, %v5489_v22  ;;  %v5510_v20 = vld [vmem:[%s9111_s10 + $0xb8] sm:$0xff] }
 0x308   : > { %v5604_v13 = vpop.f32.mrf.mxu1 }
 0x309   : > { %5734 = vst.msk [vmem:[%s9117_s13 + $0x10] sm:$0xff] %vm5731_vm0, %v5613_v28  ;;  %v5605_v51 = vadd.f32 %v5604_v13, %v5487_v0  ;;  %v5508_v13 = vld [vmem:[%s9111_s10 + $0xa8] sm:$0xff] }
 0x30a   : > { %v6690_v21 = vpop.f32.mrf.mxu1 }
 0x30b   : > { %5732 = vst.msk [vmem:[%s9117_s13] sm:$0xff] %vm5731_vm0, %v5605_v51  ;;  %v5616_v53 = vadd.f32 %v6690_v21, %v5490_v26  ;;  %v5513_v21 = vld [vmem:[%s9111_s10 + $0xd0] sm:$0xff] }
 0x30c   : > { %v5607_v18 = vpop.f32.mrf.mxu1 }
 0x30d   : > { %5735 = vst.msk [vmem:[%s9117_s13 + $0x18] sm:$0xff] %vm5731_vm0, %v5616_v53  ;;  %v5608_v40 = vadd.f32 %v5607_v18, %v5488_v39  ;;  %v5511_v18 = vld [vmem:[%s9111_s10 + $0xc0] sm:$0xff] }
 0x30e   : > { %v6693_v33 = vpop.f32.mrf.mxu1 }
 0x30f   : > { %5733 = vst.msk [vmem:[%s9117_s13 + $0x8] sm:$0xff] %vm5731_vm0, %v5608_v40  ;;  %v5629_v55 = vadd.f32 %v6693_v33, %v5493_v9  ;;  %v5514_v33 = vld [vmem:[%s9111_s10 + $0xd8] sm:$0xff] }
 0x310   : > { %v5620_v16 = vpop.f32.mrf.mxu1 }
 0x311   : > { %5738 = vst.msk [vmem:[%s9117_s13 + $0x30] sm:$0xff] %vm5731_vm0, %v5629_v55  ;;  %v5621_v49 = vadd.f32 %v5620_v16, %v5491_v56  ;;  %v5512_v16 = vld [vmem:[%s9111_s10 + $0xc8] sm:$0xff] }
 0x312   : > { %v6694_v24 = vpop.f32.mrf.mxu1 }
 0x313   : > { %5736 = vst.msk [vmem:[%s9117_s13 + $0x20] sm:$0xff] %vm5731_vm0, %v5621_v49  ;;  %v5632_v25 = vadd.f32 %v6694_v24, %v5494_v12  ;;  %v5517_v24 = vld [vmem:[%s9111_s10 + $0xf0] sm:$0xff] }
 0x314   : > { %v5623_v48 = vpop.f32.mrf.mxu1 }
 0x315   : > { %5739 = vst.msk [vmem:[%s9117_s13 + $0x38] sm:$0xff] %vm5731_vm0, %v5632_v25  ;;  %v5624_v5 = vadd.f32 %v5623_v48, %v5492_v52  ;;  %v5515_v48 = vld [vmem:[%s9111_s10 + $0xe0] sm:$0xff] }
 0x316   : > { %v6697_v29 = vpop.f32.mrf.mxu1 }
 0x317   : > { %5737 = vst.msk [vmem:[%s9117_s13 + $0x28] sm:$0xff] %vm5731_vm0, %v5624_v5  ;;  %v5645_v35 = vadd.f32 %v6697_v29, %v5497_v1  ;;  %v5518_v29 = vld [vmem:[%s9111_s10 + $0xf8] sm:$0xff] }
 0x318   : > { %v5636_v32 = vpop.f32.mrf.mxu1 }
 0x319   : > { %5742 = vst.msk [vmem:[%s9117_s13 + $0x50] sm:$0xff] %vm5731_vm0, %v5645_v35  ;;  %v5637_v42 = vadd.f32 %v5636_v32, %v5495_v47  ;;  %v5516_v32 = vld [vmem:[%s9111_s10 + $0xe8] sm:$0xff] }
 0x31a   : > { %v6698_v2 = vpop.f32.mrf.mxu1 }
 0x31b   : > { %5740 = vst.msk [vmem:[%s9117_s13 + $0x40] sm:$0xff] %vm5731_vm0, %v5637_v42  ;;  %v5648_v41 = vadd.f32 %v6698_v2, %v5498_v31 }
 0x31c   : > { %v5639_v15 = vpop.f32.mrf.mxu1 }
 0x31d   : > { %5743 = vst.msk [vmem:[%s9117_s13 + $0x58] sm:$0xff] %vm5731_vm0, %v5648_v41  ;;  %v5640_v57 = vadd.f32 %v5639_v15, %v5496_v19 }
 0x31e   : > { %v6701_v27 = vpop.f32.mrf.mxu1 }
 0x31f   : > { %5741 = vst.msk [vmem:[%s9117_s13 + $0x48] sm:$0xff] %vm5731_vm0, %v5640_v57  ;;  %v5661_v36 = vadd.f32 %v6701_v27, %v5501_v43 }
 0x320   : > { %v5652_v60 = vpop.f32.mrf.mxu1 }
 0x321   : > { %5746 = vst.msk [vmem:[%s9117_s13 + $0x70] sm:$0xff] %vm5731_vm0, %v5661_v36  ;;  %v5653_v7 = vadd.f32 %v5652_v60, %v5499_v59 }
 0x322   : > { %v6702_v63 = vpop.f32.mrf.mxu1 }
 0x323   : > { %5744 = vst.msk [vmem:[%s9117_s13 + $0x60] sm:$0xff] %vm5731_vm0, %v5653_v7  ;;  %v5664_v30 = vadd.f32 %v6702_v63, %v5502_v6 }
 0x324   : > { %v5655_v11 = vpop.f32.mrf.mxu1 }
 0x325   : > { %5747 = vst.msk [vmem:[%s9117_s13 + $0x78] sm:$0xff] %vm5731_vm0, %v5664_v30  ;;  %v5656_v61 = vadd.f32 %v5655_v11, %v5500_v23 }
 0x326   : > { %v6705_v37 = vpop.f32.mrf.mxu1 }
 0x327   : > { %5745 = vst.msk [vmem:[%s9117_s13 + $0x68] sm:$0xff] %vm5731_vm0, %v5656_v61  ;;  %v5677_v10 = vadd.f32 %v6705_v37, %v5505_v38 }
 0x328   : > { %v5668_v8 = vpop.f32.mrf.mxu1 }
 0x329   : > { %5750 = vst.msk [vmem:[%s9117_s13 + $0x90] sm:$0xff] %vm5731_vm0, %v5677_v10  ;;  %v5669_v46 = vadd.f32 %v5668_v8, %v5503_v3 }
 0x32a   : > { %v6706_v54 = vpop.f32.mrf.mxu1 }
 0x32b   : > { %5748 = vst.msk [vmem:[%s9117_s13 + $0x80] sm:$0xff] %vm5731_vm0, %v5669_v46  ;;  %v5680_v14 = vadd.f32 %v6706_v54, %v5506_v45 }
 0x32c   : > { %v5671_v50 = vpop.f32.mrf.mxu1 }
 0x32d   : > { %5751 = vst.msk [vmem:[%s9117_s13 + $0x98] sm:$0xff] %vm5731_vm0, %v5680_v14  ;;  %v5672_v34 = vadd.f32 %v5671_v50, %v5504_v62 }
 0x32e   : > { %v6709_v58 = vpop.f32.mrf.mxu1 }
 0x32f   : > { %5749 = vst.msk [vmem:[%s9117_s13 + $0x88] sm:$0xff] %vm5731_vm0, %v5672_v34  ;;  %v5693_v44 = vadd.f32 %v6709_v58, %v5509_v17 }
 0x330   : > { %v5684_v22 = vpop.f32.mrf.mxu1 }
 0x331   : > { %5754 = vst.msk [vmem:[%s9117_s13 + $0xb0] sm:$0xff] %vm5731_vm0, %v5693_v44  ;;  %v5685_v0 = vadd.f32 %v5684_v22, %v5507_v4 }
 0x332   : > { %v6710_v28 = vpop.f32.mrf.mxu1 }
 0x333   : > { %5752 = vst.msk [vmem:[%s9117_s13 + $0xa0] sm:$0xff] %vm5731_vm0, %v5685_v0  ;;  %v5696_v26 = vadd.f32 %v6710_v28, %v5510_v20 }
 0x334   : > { %v5687_v51 = vpop.f32.mrf.mxu1 }
 0x335   : > { %5755 = vst.msk [vmem:[%s9117_s13 + $0xb8] sm:$0xff] %vm5731_vm0, %v5696_v26  ;;  %v5688_v39 = vadd.f32 %v5687_v51, %v5508_v13 }
 0x336   : > { %v6713_v53 = vpop.f32.mrf.mxu1 }
 0x337   : > { %5753 = vst.msk [vmem:[%s9117_s13 + $0xa8] sm:$0xff] %vm5731_vm0, %v5688_v39  ;;  %v5709_v9 = vadd.f32 %v6713_v53, %v5513_v21 }
 0x338   : > { %v5700_v40 = vpop.f32.mrf.mxu1 }
 0x339   : > { %5758 = vst.msk [vmem:[%s9117_s13 + $0xd0] sm:$0xff] %vm5731_vm0, %v5709_v9  ;;  %v5701_v56 = vadd.f32 %v5700_v40, %v5511_v18 }
 0x33a   : > { %v6714_v55 = vpop.f32.mrf.mxu1 }
 0x33b   : > { %5756 = vst.msk [vmem:[%s9117_s13 + $0xc0] sm:$0xff] %vm5731_vm0, %v5701_v56  ;;  %v5712_v12 = vadd.f32 %v6714_v55, %v5514_v33 }
 0x33c   : > { %v5703_v49 = vpop.f32.mrf.mxu1 }
 0x33d   : > { %5759 = vst.msk [vmem:[%s9117_s13 + $0xd8] sm:$0xff] %vm5731_vm0, %v5712_v12  ;;  %v5704_v52 = vadd.f32 %v5703_v49, %v5512_v16 }
 0x33e   : > { %v6717_v25 = vpop.f32.mrf.mxu1 }
 0x33f   : > { %5757 = vst.msk [vmem:[%s9117_s13 + $0xc8] sm:$0xff] %vm5731_vm0, %v5704_v52  ;;  %v5725_v5 = vadd.f32 %v6717_v25, %v5517_v24 }
 0x340   : > { %v5716_v1 = vpop.f32.mrf.mxu1 }
 0x341   : > { %5762 = vst.msk [vmem:[%s9117_s13 + $0xf0] sm:$0xff] %vm5731_vm0, %v5725_v5  ;;  %v5717_v47 = vadd.f32 %v5716_v1, %v5515_v48 }
 0x342   : > { %v6718_v35 = vpop.f32.mrf.mxu1 }
 0x343   : > { %5760 = vst.msk [vmem:[%s9117_s13 + $0xe0] sm:$0xff] %vm5731_vm0, %v5717_v47  ;;  %v5728_v31 = vadd.f32 %v6718_v35, %v5518_v29 }
 0x344   : > { %v5719_v42 = vpop.f32.mrf.mxu1 }
 0x345   : > { %5763 = vst.msk [vmem:[%s9117_s13 + $0xf8] sm:$0xff] %vm5731_vm0, %v5728_v31  ;;  %v5720_v2 = vadd.f32 %v5719_v42, %v5516_v32 }
 0x347   : > { %5761 = vst.msk [vmem:[%s9117_s13 + $0xe8] sm:$0xff] %vm5731_vm0, %v5720_v2 }
 0x348 PF: > { %s16_s21 = sadd.s32 1, %s6800_s21  }
 0x349   : > { %p13_p4 = scmp.ge.s32.totalorder %s16_s21, 4  }
 0x34b   :  { %15 = sbr.rel (!%p13_p4) target bundleno = 1 (0x1), region = 87 }

</bundles_post_ra>
